<compile_context>
chip_gen: v5e
topology: v5e:2x2
jax: 0.10.0
libtpu: 0.0.40
codegen_flags: <defaults>
</compile_context>

<pallas_src>
import functools
import math

import jax
import jax.numpy as jnp
from jax import lax
from jax.experimental import pallas as pl
from jax.experimental.pallas import tpu as pltpu

_INV_SQRT2 = 0.7071067811865476
_LN_EPS = 1e-5


def _residual_cnn_kernel(x_ref, w1_ref, b1_ref, w2_ref, b2_ref,
                         g1_ref, be1_ref, g2_ref, be2_ref, o_ref,
                         *, C, F, T, K):
    P = K // 2

    x = x_ref[0].astype(jnp.float32)                     # (F, C, T)

    g1, be1 = g1_ref[...], be1_ref[...]                  # (F, 1, 1) f32
    g2, be2 = g2_ref[...], be2_ref[...]
    b1 = b1_ref[...]                                     # (1, C, 1) f32
    b2 = b2_ref[...]

    # Zero-pad blocks, built once and reused by both convs (bf16: they only
    # ever feed the MXU operands).
    if P > 0:
        z_lane = jnp.zeros((F, C, P), jnp.bfloat16)          # T ('same') pad
        z_row = jnp.zeros((P, C, T + 2 * P), jnp.bfloat16)   # F ('same') pad

    def layer_norm(h, g, be):
        # CNNLayerNorm == LayerNorm over n_feats, i.e. axis 0 of (F, C, T).
        mu = jnp.mean(h, axis=0, keepdims=True)
        var = jnp.mean(jnp.square(h - mu), axis=0, keepdims=True)
        return (h - mu) * lax.rsqrt(var + _LN_EPS) * g + be

    def gelu(h):
        # exact erf GELU (matches torch.nn.functional.gelu default)
        return 0.5 * h * (1.0 + lax.erf(h * _INV_SQRT2))

    def conv_mxu(h, w_taps_ref, b):
        # KxK 'same' conv, stride 1: K*K accumulated MXU matmuls, batched over
        # F, contracting over C_in.  bf16 operands, f32 accumulation.
        hb = h.astype(jnp.bfloat16)                          # (F, C, T)
        if P > 0:
            hb = jnp.concatenate([z_lane, hb, z_lane], axis=2)   # (F, C, T+2P)
            hb = jnp.concatenate([z_row, hb, z_row], axis=0)     # (F+2P, C, T+2P)
        # One lane window per kw tap, sliced once and reused across kh taps.
        h_kw = [hb[:, :, kw:kw + T] for kw in range(K)]          # (F+2P, C, T)
        acc = jnp.zeros((F, C, T), jnp.float32)
        for kh in range(K):
            for kw in range(K):
                rhs = h_kw[kw][kh:kh + F]                        # (F, C_in, T)
                lhs = w_taps_ref[kh * K + kw]                    # (F, C_out, C_in)
                acc = acc + jnp.einsum(
                    'foc,fct->fot', lhs, rhs,
                    preferred_element_type=jnp.float32)
        return acc + b                                           # (F, C_out, T)

    h = gelu(layer_norm(x, g1, be1))
    # dropout1: identity (inference)
    h = conv_mxu(h, w1_ref, b1)
    h = gelu(layer_norm(h, g2, be2))
    # dropout2: identity (inference)
    h = conv_mxu(h, w2_ref, b2)
    # fused residual add + single full-block store
    o_ref[0] = (h + x).astype(o_ref.dtype)


def residual_cnn_forward(x, w1, b1, w2, b2, g1, be1, g2, be2, *, kernel):
    B, C, F, T = x.shape
    K = kernel
    assert K % 2 == 1, "ResidualCNN 'same' conv requires an odd kernel size"
    assert w1.shape == (C, C, K, K) and w2.shape == (C, C, K, K)

    # Layout plumbing (plain XLA, outside the kernel): NCHW -> (B, F, C, T) so
    # LayerNorm over n_feats is a leading-axis reduction and T stays lane-dense.
    xt = jnp.transpose(x, (0, 2, 1, 3))

    def prep_w(w):
        # (C_out, C_in, K, K) -> (K*K, F, C_out, C_in) bf16: tap-major and
        # pre-broadcast over F for the F-batched MXU contraction.
        wt = jnp.transpose(w, (2, 3, 0, 1)).reshape(K * K, C, C)
        return jnp.broadcast_to(
            wt[:, None, :, :], (K * K, F, C, C)).astype(jnp.bfloat16)

    w1p = prep_w(w1)
    w2p = prep_w(w2)
    b1p = b1.reshape(1, C, 1).astype(jnp.float32)
    b2p = b2.reshape(1, C, 1).astype(jnp.float32)
    g1p = g1.reshape(F, 1, 1).astype(jnp.float32)
    be1p = be1.reshape(F, 1, 1).astype(jnp.float32)
    g2p = g2.reshape(F, 1, 1).astype(jnp.float32)
    be2p = be2.reshape(F, 1, 1).astype(jnp.float32)

    body = functools.partial(_residual_cnn_kernel, C=C, F=F, T=T, K=K)
    batch_map = lambda b: (b, 0, 0, 0)
    fixed3 = lambda b: (0, 0, 0)
    fixed4 = lambda b: (0, 0, 0, 0)

    out_t = pl.pallas_call(
        body,
        out_shape=jax.ShapeDtypeStruct((B, F, C, T), x.dtype),
        grid=(B,),
        in_specs=[
            pl.BlockSpec((1, F, C, T), batch_map),    # x (one batch element)
            pl.BlockSpec((K * K, F, C, C), fixed4),   # conv1 tap weights (bf16)
            pl.BlockSpec((1, C, 1), fixed3),          # conv1 bias
            pl.BlockSpec((K * K, F, C, C), fixed4),   # conv2 tap weights (bf16)
            pl.BlockSpec((1, C, 1), fixed3),          # conv2 bias
            pl.BlockSpec((F, 1, 1), fixed3),          # ln1 gamma
            pl.BlockSpec((F, 1, 1), fixed3),          # ln1 beta
            pl.BlockSpec((F, 1, 1), fixed3),          # ln2 gamma
            pl.BlockSpec((F, 1, 1), fixed3),          # ln2 beta
        ],
        out_specs=pl.BlockSpec((1, F, C, T), batch_map),
        compiler_params=pltpu.CompilerParams(
            dimension_semantics=("parallel",),
            vmem_limit_bytes=32 * 1024 * 1024),
    )(xt, w1p, b1p, w2p, b2p, g1p, be1p, g2p, be2p)

    return jnp.transpose(out_t, (0, 2, 1, 3))


def reference_forward(x, w1, b1, w2, b2, g1, be1, g2, be2, *, kernel):
    """Pure-JAX reference replicating the PyTorch forward (eval mode)."""
    K = kernel
    pad = K // 2

    def ln(h, g, be):
        mu = h.mean(axis=2, keepdims=True)
        var = ((h - mu) ** 2).mean(axis=2, keepdims=True)
        return (h - mu) / jnp.sqrt(var + _LN_EPS) * g[None, None, :, None] \
            + be[None, None, :, None]

    def gelu(h):
        return 0.5 * h * (1.0 + lax.erf(h * _INV_SQRT2))

    def conv(h, w, b):
        out = lax.conv_general_dilated(
            h, w, window_strides=(1, 1), padding=[(pad, pad), (pad, pad)],
            dimension_numbers=("NCHW", "OIHW", "NCHW"))
        return out + b[None, :, None, None]

    residual = x
    h = gelu(ln(x, g1, be1))
    h = conv(h, w1, b1)
    h = gelu(ln(h, g2, be2))
    h = conv(h, w2, b2)
    return h + residual


if __name__ == "__main__":
    B, C, F, T, K = 2, 4, 16, 16, 3   # in_channels == out_channels, stride=1

    key = jax.random.PRNGKey(0)
    kx, k1, k2, k3, k4, k5, k6 = jax.random.split(key, 7)

    x = jax.random.normal(kx, (B, C, F, T), jnp.float32)

    fan_in = C * K * K
    bound = 1.0 / math.sqrt(fan_in)
    w1 = jax.random.uniform(k1, (C, C, K, K), jnp.float32, -bound, bound)
    b1 = jax.random.uniform(k2, (C,), jnp.float32, -bound, bound)
    w2 = jax.random.uniform(k3, (C, C, K, K), jnp.float32, -bound, bound)
    b2 = jax.random.uniform(k4, (C,), jnp.float32, -bound, bound)
    # LayerNorm affine params (PyTorch inits ones/zeros; perturb to exercise path)
    g1 = 1.0 + 0.1 * jax.random.normal(k5, (F,), jnp.float32)
    be1 = 0.1 * jax.random.normal(k6, (F,), jnp.float32)
    g2 = jnp.ones((F,), jnp.float32)
    be2 = jnp.zeros((F,), jnp.float32)

    out = residual_cnn_forward(x, w1, b1, w2, b2, g1, be1, g2, be2, kernel=K)
    out = jax.block_until_ready(out)

    ref = reference_forward(x, w1, b1, w2, b2, g1, be1, g2, be2, kernel=K)
    assert out.shape == ref.shape == (B, C, F, T)
    # bf16 MXU operands (f32 accumulation) -> slightly looser tolerance than
    # the all-f32 variant.
    assert jnp.allclose(out, ref, rtol=3e-2, atol=3e-2), \
        f"max abs err = {jnp.max(jnp.abs(out - ref))}"

    print("KERNEL_OK")
</pallas_src>

<mosaic_0001>
module attributes {stable_mosaic.version = 11 : i64} {
  func.func @_residual_cnn_kernel(%arg0: i32, %arg1: memref<1x16x4x16xf32, #tpu.memory_space<vmem>>, %arg2: memref<9x16x4x4xbf16, #tpu.memory_space<vmem>>, %arg3: memref<1x4x1xf32, #tpu.memory_space<vmem>>, %arg4: memref<9x16x4x4xbf16, #tpu.memory_space<vmem>>, %arg5: memref<1x4x1xf32, #tpu.memory_space<vmem>>, %arg6: memref<16x1x1xf32, #tpu.memory_space<vmem>>, %arg7: memref<16x1x1xf32, #tpu.memory_space<vmem>>, %arg8: memref<16x1x1xf32, #tpu.memory_space<vmem>>, %arg9: memref<16x1x1xf32, #tpu.memory_space<vmem>>, %arg10: memref<1x16x4x16xf32, #tpu.memory_space<vmem>>) attributes {dimension_semantics = [#tpu.dimension_semantics<parallel>], iteration_bounds = array<i64: 2>, scalar_prefetch = 0 : i64, scratch_operands = 0 : i64, tpu.core_type = #tpu.core_type<tc>, window_params = [{transform_indices = @transform_0, window_bounds = array<i64: 1, 16, 4, 16>}, {pipeline_mode = #tpu.pipeline_mode<synchronous>, transform_indices = @transform_1, window_bounds = array<i64: 9, 16, 4, 4>}, {pipeline_mode = #tpu.pipeline_mode<synchronous>, transform_indices = @transform_2, window_bounds = array<i64: 1, 4, 1>}, {pipeline_mode = #tpu.pipeline_mode<synchronous>, transform_indices = @transform_3, window_bounds = array<i64: 9, 16, 4, 4>}, {pipeline_mode = #tpu.pipeline_mode<synchronous>, transform_indices = @transform_4, window_bounds = array<i64: 1, 4, 1>}, {pipeline_mode = #tpu.pipeline_mode<synchronous>, transform_indices = @transform_5, window_bounds = array<i64: 16, 1, 1>}, {pipeline_mode = #tpu.pipeline_mode<synchronous>, transform_indices = @transform_6, window_bounds = array<i64: 16, 1, 1>}, {pipeline_mode = #tpu.pipeline_mode<synchronous>, transform_indices = @transform_7, window_bounds = array<i64: 16, 1, 1>}, {pipeline_mode = #tpu.pipeline_mode<synchronous>, transform_indices = @transform_8, window_bounds = array<i64: 16, 1, 1>}, {transform_indices = @transform_9, window_bounds = array<i64: 1, 16, 4, 16>}]} {
    %c0 = arith.constant 0 : index
    %c0_0 = arith.constant 0 : index
    %c0_1 = arith.constant 0 : index
    %c0_2 = arith.constant 0 : index
    %0 = vector.load %arg1[%c0, %c0_0, %c0_1, %c0_2] : memref<1x16x4x16xf32, #tpu.memory_space<vmem>>, vector<1x16x4x16xf32>
    %1 = vector.shape_cast %0 : vector<1x16x4x16xf32> to vector<16x4x16xf32>
    %c0_3 = arith.constant 0 : index
    %c0_4 = arith.constant 0 : index
    %c0_5 = arith.constant 0 : index
    %2 = vector.load %arg6[%c0_3, %c0_4, %c0_5] : memref<16x1x1xf32, #tpu.memory_space<vmem>>, vector<16x1x1xf32>
    %c0_6 = arith.constant 0 : index
    %c0_7 = arith.constant 0 : index
    %c0_8 = arith.constant 0 : index
    %3 = vector.load %arg7[%c0_6, %c0_7, %c0_8] : memref<16x1x1xf32, #tpu.memory_space<vmem>>, vector<16x1x1xf32>
    %c0_9 = arith.constant 0 : index
    %c0_10 = arith.constant 0 : index
    %c0_11 = arith.constant 0 : index
    %4 = vector.load %arg8[%c0_9, %c0_10, %c0_11] : memref<16x1x1xf32, #tpu.memory_space<vmem>>, vector<16x1x1xf32>
    %c0_12 = arith.constant 0 : index
    %c0_13 = arith.constant 0 : index
    %c0_14 = arith.constant 0 : index
    %5 = vector.load %arg9[%c0_12, %c0_13, %c0_14] : memref<16x1x1xf32, #tpu.memory_space<vmem>>, vector<16x1x1xf32>
    %c0_15 = arith.constant 0 : index
    %c0_16 = arith.constant 0 : index
    %c0_17 = arith.constant 0 : index
    %6 = vector.load %arg3[%c0_15, %c0_16, %c0_17] : memref<1x4x1xf32, #tpu.memory_space<vmem>>, vector<1x4x1xf32>
    %c0_18 = arith.constant 0 : index
    %c0_19 = arith.constant 0 : index
    %c0_20 = arith.constant 0 : index
    %7 = vector.load %arg5[%c0_18, %c0_19, %c0_20] : memref<1x4x1xf32, #tpu.memory_space<vmem>>, vector<1x4x1xf32>
    %cst = arith.constant 0.000000e+00 : bf16
    %8 = vector.broadcast %cst : bf16 to vector<16x4x1xbf16>
    %cst_21 = arith.constant 0.000000e+00 : bf16
    %9 = vector.broadcast %cst_21 : bf16 to vector<1x4x18xbf16>
    %cst_22 = arith.constant dense<0.000000e+00> : vector<4x16xf32>
    %10 = vector.multi_reduction <add>, %1, %cst_22 [0] : vector<16x4x16xf32> to vector<4x16xf32>
    %11 = vector.shape_cast %10 : vector<4x16xf32> to vector<1x4x16xf32>
    %cst_23 = arith.constant 1.600000e+01 : f32
    %12 = vector.broadcast %cst_23 : f32 to vector<1x4x16xf32>
    %13 = arith.divf %11, %12 : vector<1x4x16xf32>
    %14 = vector.broadcast %13 : vector<1x4x16xf32> to vector<16x4x16xf32>
    %15 = arith.subf %1, %14 : vector<16x4x16xf32>
    %16 = arith.mulf %15, %15 : vector<16x4x16xf32>
    %cst_24 = arith.constant dense<0.000000e+00> : vector<4x16xf32>
    %17 = vector.multi_reduction <add>, %16, %cst_24 [0] : vector<16x4x16xf32> to vector<4x16xf32>
    %18 = vector.shape_cast %17 : vector<4x16xf32> to vector<1x4x16xf32>
    %cst_25 = arith.constant 1.600000e+01 : f32
    %19 = vector.broadcast %cst_25 : f32 to vector<1x4x16xf32>
    %20 = arith.divf %18, %19 : vector<1x4x16xf32>
    %21 = vector.broadcast %13 : vector<1x4x16xf32> to vector<16x4x16xf32>
    %22 = arith.subf %1, %21 : vector<16x4x16xf32>
    %cst_26 = arith.constant 9.99999974E-6 : f32
    %23 = vector.broadcast %cst_26 : f32 to vector<1x4x16xf32>
    %24 = arith.addf %20, %23 : vector<1x4x16xf32>
    %25 = math.rsqrt %24 : vector<1x4x16xf32>
    %26 = vector.broadcast %25 : vector<1x4x16xf32> to vector<16x4x16xf32>
    %27 = arith.mulf %22, %26 : vector<16x4x16xf32>
    %28 = vector.broadcast %2 : vector<16x1x1xf32> to vector<16x4x16xf32>
    %29 = arith.mulf %27, %28 : vector<16x4x16xf32>
    %30 = vector.broadcast %3 : vector<16x1x1xf32> to vector<16x4x16xf32>
    %31 = arith.addf %29, %30 : vector<16x4x16xf32>
    %cst_27 = arith.constant 5.000000e-01 : f32
    %32 = vector.broadcast %cst_27 : f32 to vector<16x4x16xf32>
    %33 = arith.mulf %32, %31 : vector<16x4x16xf32>
    %cst_28 = arith.constant 0.707106769 : f32
    %34 = vector.broadcast %cst_28 : f32 to vector<16x4x16xf32>
    %35 = arith.mulf %31, %34 : vector<16x4x16xf32>
    %36 = math.erf %35 : vector<16x4x16xf32>
    %cst_29 = arith.constant 1.000000e+00 : f32
    %37 = vector.broadcast %cst_29 : f32 to vector<16x4x16xf32>
    %38 = arith.addf %37, %36 : vector<16x4x16xf32>
    %39 = arith.mulf %33, %38 : vector<16x4x16xf32>
    %40 = arith.truncf %39 : vector<16x4x16xf32> to vector<16x4x16xbf16>
    %41 = tpu.concatenate %8, %40, %8 in 2 : vector<16x4x1xbf16>, vector<16x4x16xbf16>, vector<16x4x1xbf16> -> vector<16x4x18xbf16>
    %42 = tpu.concatenate %9, %41, %9 in 0 : vector<1x4x18xbf16>, vector<16x4x18xbf16>, vector<1x4x18xbf16> -> vector<18x4x18xbf16>
    %43 = vector.extract_strided_slice %42 {offsets = [0, 0, 0], sizes = [18, 4, 16], strides = [1, 1, 1]} : vector<18x4x18xbf16> to vector<18x4x16xbf16>
    %44 = vector.extract_strided_slice %42 {offsets = [0, 0, 1], sizes = [18, 4, 16], strides = [1, 1, 1]} : vector<18x4x18xbf16> to vector<18x4x16xbf16>
    %45 = vector.extract_strided_slice %42 {offsets = [0, 0, 2], sizes = [18, 4, 16], strides = [1, 1, 1]} : vector<18x4x18xbf16> to vector<18x4x16xbf16>
    %cst_30 = arith.constant 0.000000e+00 : f32
    %46 = vector.broadcast %cst_30 : f32 to vector<16x4x16xf32>
    %47 = vector.extract_strided_slice %43 {offsets = [0, 0, 0], sizes = [16, 4, 16], strides = [1, 1, 1]} : vector<18x4x16xbf16> to vector<16x4x16xbf16>
    %c0_31 = arith.constant 0 : index
    %c0_32 = arith.constant 0 : index
    %c0_33 = arith.constant 0 : index
    %c0_34 = arith.constant 0 : index
    %48 = vector.load %arg2[%c0_31, %c0_32, %c0_33, %c0_34] : memref<9x16x4x4xbf16, #tpu.memory_space<vmem>>, vector<1x16x4x4xbf16>
    %49 = vector.shape_cast %48 : vector<1x16x4x4xbf16> to vector<16x4x4xbf16>
    "tpu.trace_start"() <{level = 10 : i32, message = "foc,fct->fot"}> : () -> ()
    %cst_35 = arith.constant dense<0.000000e+00> : vector<16x4x16xf32>
    %50 = tpu.matmul %49, %47, %cst_35 {dimension_numbers = #tpu.dot_dimension_numbers<[2], [1], [1], [2], [0, 0, 0, 1, 1, 2], [0], [0]>} : vector<16x4x4xbf16>, vector<16x4x16xbf16>, vector<16x4x16xf32> -> vector<16x4x16xf32>
    "tpu.trace_stop"() : () -> ()
    %51 = arith.addf %46, %50 : vector<16x4x16xf32>
    %52 = vector.extract_strided_slice %44 {offsets = [0, 0, 0], sizes = [16, 4, 16], strides = [1, 1, 1]} : vector<18x4x16xbf16> to vector<16x4x16xbf16>
    %c1 = arith.constant 1 : index
    %c0_36 = arith.constant 0 : index
    %c0_37 = arith.constant 0 : index
    %c0_38 = arith.constant 0 : index
    %53 = vector.load %arg2[%c1, %c0_36, %c0_37, %c0_38] : memref<9x16x4x4xbf16, #tpu.memory_space<vmem>>, vector<1x16x4x4xbf16>
    %54 = vector.shape_cast %53 : vector<1x16x4x4xbf16> to vector<16x4x4xbf16>
    "tpu.trace_start"() <{level = 10 : i32, message = "foc,fct->fot"}> : () -> ()
    %cst_39 = arith.constant dense<0.000000e+00> : vector<16x4x16xf32>
    %55 = tpu.matmul %54, %52, %cst_39 {dimension_numbers = #tpu.dot_dimension_numbers<[2], [1], [1], [2], [0, 0, 0, 1, 1, 2], [0], [0]>} : vector<16x4x4xbf16>, vector<16x4x16xbf16>, vector<16x4x16xf32> -> vector<16x4x16xf32>
    "tpu.trace_stop"() : () -> ()
    %56 = arith.addf %51, %55 : vector<16x4x16xf32>
    %57 = vector.extract_strided_slice %45 {offsets = [0, 0, 0], sizes = [16, 4, 16], strides = [1, 1, 1]} : vector<18x4x16xbf16> to vector<16x4x16xbf16>
    %c2 = arith.constant 2 : index
    %c0_40 = arith.constant 0 : index
    %c0_41 = arith.constant 0 : index
    %c0_42 = arith.constant 0 : index
    %58 = vector.load %arg2[%c2, %c0_40, %c0_41, %c0_42] : memref<9x16x4x4xbf16, #tpu.memory_space<vmem>>, vector<1x16x4x4xbf16>
    %59 = vector.shape_cast %58 : vector<1x16x4x4xbf16> to vector<16x4x4xbf16>
    "tpu.trace_start"() <{level = 10 : i32, message = "foc,fct->fot"}> : () -> ()
    %cst_43 = arith.constant dense<0.000000e+00> : vector<16x4x16xf32>
    %60 = tpu.matmul %59, %57, %cst_43 {dimension_numbers = #tpu.dot_dimension_numbers<[2], [1], [1], [2], [0, 0, 0, 1, 1, 2], [0], [0]>} : vector<16x4x4xbf16>, vector<16x4x16xbf16>, vector<16x4x16xf32> -> vector<16x4x16xf32>
    "tpu.trace_stop"() : () -> ()
    %61 = arith.addf %56, %60 : vector<16x4x16xf32>
    %62 = vector.extract_strided_slice %43 {offsets = [1, 0, 0], sizes = [16, 4, 16], strides = [1, 1, 1]} : vector<18x4x16xbf16> to vector<16x4x16xbf16>
    %c3 = arith.constant 3 : index
    %c0_44 = arith.constant 0 : index
    %c0_45 = arith.constant 0 : index
    %c0_46 = arith.constant 0 : index
    %63 = vector.load %arg2[%c3, %c0_44, %c0_45, %c0_46] : memref<9x16x4x4xbf16, #tpu.memory_space<vmem>>, vector<1x16x4x4xbf16>
    %64 = vector.shape_cast %63 : vector<1x16x4x4xbf16> to vector<16x4x4xbf16>
    "tpu.trace_start"() <{level = 10 : i32, message = "foc,fct->fot"}> : () -> ()
    %cst_47 = arith.constant dense<0.000000e+00> : vector<16x4x16xf32>
    %65 = tpu.matmul %64, %62, %cst_47 {dimension_numbers = #tpu.dot_dimension_numbers<[2], [1], [1], [2], [0, 0, 0, 1, 1, 2], [0], [0]>} : vector<16x4x4xbf16>, vector<16x4x16xbf16>, vector<16x4x16xf32> -> vector<16x4x16xf32>
    "tpu.trace_stop"() : () -> ()
    %66 = arith.addf %61, %65 : vector<16x4x16xf32>
    %67 = vector.extract_strided_slice %44 {offsets = [1, 0, 0], sizes = [16, 4, 16], strides = [1, 1, 1]} : vector<18x4x16xbf16> to vector<16x4x16xbf16>
    %c4 = arith.constant 4 : index
    %c0_48 = arith.constant 0 : index
    %c0_49 = arith.constant 0 : index
    %c0_50 = arith.constant 0 : index
    %68 = vector.load %arg2[%c4, %c0_48, %c0_49, %c0_50] : memref<9x16x4x4xbf16, #tpu.memory_space<vmem>>, vector<1x16x4x4xbf16>
    %69 = vector.shape_cast %68 : vector<1x16x4x4xbf16> to vector<16x4x4xbf16>
    "tpu.trace_start"() <{level = 10 : i32, message = "foc,fct->fot"}> : () -> ()
    %cst_51 = arith.constant dense<0.000000e+00> : vector<16x4x16xf32>
    %70 = tpu.matmul %69, %67, %cst_51 {dimension_numbers = #tpu.dot_dimension_numbers<[2], [1], [1], [2], [0, 0, 0, 1, 1, 2], [0], [0]>} : vector<16x4x4xbf16>, vector<16x4x16xbf16>, vector<16x4x16xf32> -> vector<16x4x16xf32>
    "tpu.trace_stop"() : () -> ()
    %71 = arith.addf %66, %70 : vector<16x4x16xf32>
    %72 = vector.extract_strided_slice %45 {offsets = [1, 0, 0], sizes = [16, 4, 16], strides = [1, 1, 1]} : vector<18x4x16xbf16> to vector<16x4x16xbf16>
    %c5 = arith.constant 5 : index
    %c0_52 = arith.constant 0 : index
    %c0_53 = arith.constant 0 : index
    %c0_54 = arith.constant 0 : index
    %73 = vector.load %arg2[%c5, %c0_52, %c0_53, %c0_54] : memref<9x16x4x4xbf16, #tpu.memory_space<vmem>>, vector<1x16x4x4xbf16>
    %74 = vector.shape_cast %73 : vector<1x16x4x4xbf16> to vector<16x4x4xbf16>
    "tpu.trace_start"() <{level = 10 : i32, message = "foc,fct->fot"}> : () -> ()
    %cst_55 = arith.constant dense<0.000000e+00> : vector<16x4x16xf32>
    %75 = tpu.matmul %74, %72, %cst_55 {dimension_numbers = #tpu.dot_dimension_numbers<[2], [1], [1], [2], [0, 0, 0, 1, 1, 2], [0], [0]>} : vector<16x4x4xbf16>, vector<16x4x16xbf16>, vector<16x4x16xf32> -> vector<16x4x16xf32>
    "tpu.trace_stop"() : () -> ()
    %76 = arith.addf %71, %75 : vector<16x4x16xf32>
    %77 = vector.extract_strided_slice %43 {offsets = [2, 0, 0], sizes = [16, 4, 16], strides = [1, 1, 1]} : vector<18x4x16xbf16> to vector<16x4x16xbf16>
    %c6 = arith.constant 6 : index
    %c0_56 = arith.constant 0 : index
    %c0_57 = arith.constant 0 : index
    %c0_58 = arith.constant 0 : index
    %78 = vector.load %arg2[%c6, %c0_56, %c0_57, %c0_58] : memref<9x16x4x4xbf16, #tpu.memory_space<vmem>>, vector<1x16x4x4xbf16>
    %79 = vector.shape_cast %78 : vector<1x16x4x4xbf16> to vector<16x4x4xbf16>
    "tpu.trace_start"() <{level = 10 : i32, message = "foc,fct->fot"}> : () -> ()
    %cst_59 = arith.constant dense<0.000000e+00> : vector<16x4x16xf32>
    %80 = tpu.matmul %79, %77, %cst_59 {dimension_numbers = #tpu.dot_dimension_numbers<[2], [1], [1], [2], [0, 0, 0, 1, 1, 2], [0], [0]>} : vector<16x4x4xbf16>, vector<16x4x16xbf16>, vector<16x4x16xf32> -> vector<16x4x16xf32>
    "tpu.trace_stop"() : () -> ()
    %81 = arith.addf %76, %80 : vector<16x4x16xf32>
    %82 = vector.extract_strided_slice %44 {offsets = [2, 0, 0], sizes = [16, 4, 16], strides = [1, 1, 1]} : vector<18x4x16xbf16> to vector<16x4x16xbf16>
    %c7 = arith.constant 7 : index
    %c0_60 = arith.constant 0 : index
    %c0_61 = arith.constant 0 : index
    %c0_62 = arith.constant 0 : index
    %83 = vector.load %arg2[%c7, %c0_60, %c0_61, %c0_62] : memref<9x16x4x4xbf16, #tpu.memory_space<vmem>>, vector<1x16x4x4xbf16>
    %84 = vector.shape_cast %83 : vector<1x16x4x4xbf16> to vector<16x4x4xbf16>
    "tpu.trace_start"() <{level = 10 : i32, message = "foc,fct->fot"}> : () -> ()
    %cst_63 = arith.constant dense<0.000000e+00> : vector<16x4x16xf32>
    %85 = tpu.matmul %84, %82, %cst_63 {dimension_numbers = #tpu.dot_dimension_numbers<[2], [1], [1], [2], [0, 0, 0, 1, 1, 2], [0], [0]>} : vector<16x4x4xbf16>, vector<16x4x16xbf16>, vector<16x4x16xf32> -> vector<16x4x16xf32>
    "tpu.trace_stop"() : () -> ()
    %86 = arith.addf %81, %85 : vector<16x4x16xf32>
    %87 = vector.extract_strided_slice %45 {offsets = [2, 0, 0], sizes = [16, 4, 16], strides = [1, 1, 1]} : vector<18x4x16xbf16> to vector<16x4x16xbf16>
    %c8 = arith.constant 8 : index
    %c0_64 = arith.constant 0 : index
    %c0_65 = arith.constant 0 : index
    %c0_66 = arith.constant 0 : index
    %88 = vector.load %arg2[%c8, %c0_64, %c0_65, %c0_66] : memref<9x16x4x4xbf16, #tpu.memory_space<vmem>>, vector<1x16x4x4xbf16>
    %89 = vector.shape_cast %88 : vector<1x16x4x4xbf16> to vector<16x4x4xbf16>
    "tpu.trace_start"() <{level = 10 : i32, message = "foc,fct->fot"}> : () -> ()
    %cst_67 = arith.constant dense<0.000000e+00> : vector<16x4x16xf32>
    %90 = tpu.matmul %89, %87, %cst_67 {dimension_numbers = #tpu.dot_dimension_numbers<[2], [1], [1], [2], [0, 0, 0, 1, 1, 2], [0], [0]>} : vector<16x4x4xbf16>, vector<16x4x16xbf16>, vector<16x4x16xf32> -> vector<16x4x16xf32>
    "tpu.trace_stop"() : () -> ()
    %91 = arith.addf %86, %90 : vector<16x4x16xf32>
    %92 = vector.broadcast %6 : vector<1x4x1xf32> to vector<16x4x16xf32>
    %93 = arith.addf %91, %92 : vector<16x4x16xf32>
    %cst_68 = arith.constant dense<0.000000e+00> : vector<4x16xf32>
    %94 = vector.multi_reduction <add>, %93, %cst_68 [0] : vector<16x4x16xf32> to vector<4x16xf32>
    %95 = vector.shape_cast %94 : vector<4x16xf32> to vector<1x4x16xf32>
    %cst_69 = arith.constant 1.600000e+01 : f32
    %96 = vector.broadcast %cst_69 : f32 to vector<1x4x16xf32>
    %97 = arith.divf %95, %96 : vector<1x4x16xf32>
    %98 = vector.broadcast %97 : vector<1x4x16xf32> to vector<16x4x16xf32>
    %99 = arith.subf %93, %98 : vector<16x4x16xf32>
    %100 = arith.mulf %99, %99 : vector<16x4x16xf32>
    %cst_70 = arith.constant dense<0.000000e+00> : vector<4x16xf32>
    %101 = vector.multi_reduction <add>, %100, %cst_70 [0] : vector<16x4x16xf32> to vector<4x16xf32>
    %102 = vector.shape_cast %101 : vector<4x16xf32> to vector<1x4x16xf32>
    %cst_71 = arith.constant 1.600000e+01 : f32
    %103 = vector.broadcast %cst_71 : f32 to vector<1x4x16xf32>
    %104 = arith.divf %102, %103 : vector<1x4x16xf32>
    %105 = vector.broadcast %97 : vector<1x4x16xf32> to vector<16x4x16xf32>
    %106 = arith.subf %93, %105 : vector<16x4x16xf32>
    %cst_72 = arith.constant 9.99999974E-6 : f32
    %107 = vector.broadcast %cst_72 : f32 to vector<1x4x16xf32>
    %108 = arith.addf %104, %107 : vector<1x4x16xf32>
    %109 = math.rsqrt %108 : vector<1x4x16xf32>
    %110 = vector.broadcast %109 : vector<1x4x16xf32> to vector<16x4x16xf32>
    %111 = arith.mulf %106, %110 : vector<16x4x16xf32>
    %112 = vector.broadcast %4 : vector<16x1x1xf32> to vector<16x4x16xf32>
    %113 = arith.mulf %111, %112 : vector<16x4x16xf32>
    %114 = vector.broadcast %5 : vector<16x1x1xf32> to vector<16x4x16xf32>
    %115 = arith.addf %113, %114 : vector<16x4x16xf32>
    %cst_73 = arith.constant 5.000000e-01 : f32
    %116 = vector.broadcast %cst_73 : f32 to vector<16x4x16xf32>
    %117 = arith.mulf %116, %115 : vector<16x4x16xf32>
    %cst_74 = arith.constant 0.707106769 : f32
    %118 = vector.broadcast %cst_74 : f32 to vector<16x4x16xf32>
    %119 = arith.mulf %115, %118 : vector<16x4x16xf32>
    %120 = math.erf %119 : vector<16x4x16xf32>
    %cst_75 = arith.constant 1.000000e+00 : f32
    %121 = vector.broadcast %cst_75 : f32 to vector<16x4x16xf32>
    %122 = arith.addf %121, %120 : vector<16x4x16xf32>
    %123 = arith.mulf %117, %122 : vector<16x4x16xf32>
    %124 = arith.truncf %123 : vector<16x4x16xf32> to vector<16x4x16xbf16>
    %125 = tpu.concatenate %8, %124, %8 in 2 : vector<16x4x1xbf16>, vector<16x4x16xbf16>, vector<16x4x1xbf16> -> vector<16x4x18xbf16>
    %126 = tpu.concatenate %9, %125, %9 in 0 : vector<1x4x18xbf16>, vector<16x4x18xbf16>, vector<1x4x18xbf16> -> vector<18x4x18xbf16>
    %127 = vector.extract_strided_slice %126 {offsets = [0, 0, 0], sizes = [18, 4, 16], strides = [1, 1, 1]} : vector<18x4x18xbf16> to vector<18x4x16xbf16>
    %128 = vector.extract_strided_slice %126 {offsets = [0, 0, 1], sizes = [18, 4, 16], strides = [1, 1, 1]} : vector<18x4x18xbf16> to vector<18x4x16xbf16>
    %129 = vector.extract_strided_slice %126 {offsets = [0, 0, 2], sizes = [18, 4, 16], strides = [1, 1, 1]} : vector<18x4x18xbf16> to vector<18x4x16xbf16>
    %cst_76 = arith.constant 0.000000e+00 : f32
    %130 = vector.broadcast %cst_76 : f32 to vector<16x4x16xf32>
    %131 = vector.extract_strided_slice %127 {offsets = [0, 0, 0], sizes = [16, 4, 16], strides = [1, 1, 1]} : vector<18x4x16xbf16> to vector<16x4x16xbf16>
    %c0_77 = arith.constant 0 : index
    %c0_78 = arith.constant 0 : index
    %c0_79 = arith.constant 0 : index
    %c0_80 = arith.constant 0 : index
    %132 = vector.load %arg4[%c0_77, %c0_78, %c0_79, %c0_80] : memref<9x16x4x4xbf16, #tpu.memory_space<vmem>>, vector<1x16x4x4xbf16>
    %133 = vector.shape_cast %132 : vector<1x16x4x4xbf16> to vector<16x4x4xbf16>
    "tpu.trace_start"() <{level = 10 : i32, message = "foc,fct->fot"}> : () -> ()
    %cst_81 = arith.constant dense<0.000000e+00> : vector<16x4x16xf32>
    %134 = tpu.matmul %133, %131, %cst_81 {dimension_numbers = #tpu.dot_dimension_numbers<[2], [1], [1], [2], [0, 0, 0, 1, 1, 2], [0], [0]>} : vector<16x4x4xbf16>, vector<16x4x16xbf16>, vector<16x4x16xf32> -> vector<16x4x16xf32>
    "tpu.trace_stop"() : () -> ()
    %135 = arith.addf %130, %134 : vector<16x4x16xf32>
    %136 = vector.extract_strided_slice %128 {offsets = [0, 0, 0], sizes = [16, 4, 16], strides = [1, 1, 1]} : vector<18x4x16xbf16> to vector<16x4x16xbf16>
    %c1_82 = arith.constant 1 : index
    %c0_83 = arith.constant 0 : index
    %c0_84 = arith.constant 0 : index
    %c0_85 = arith.constant 0 : index
    %137 = vector.load %arg4[%c1_82, %c0_83, %c0_84, %c0_85] : memref<9x16x4x4xbf16, #tpu.memory_space<vmem>>, vector<1x16x4x4xbf16>
    %138 = vector.shape_cast %137 : vector<1x16x4x4xbf16> to vector<16x4x4xbf16>
    "tpu.trace_start"() <{level = 10 : i32, message = "foc,fct->fot"}> : () -> ()
    %cst_86 = arith.constant dense<0.000000e+00> : vector<16x4x16xf32>
    %139 = tpu.matmul %138, %136, %cst_86 {dimension_numbers = #tpu.dot_dimension_numbers<[2], [1], [1], [2], [0, 0, 0, 1, 1, 2], [0], [0]>} : vector<16x4x4xbf16>, vector<16x4x16xbf16>, vector<16x4x16xf32> -> vector<16x4x16xf32>
    "tpu.trace_stop"() : () -> ()
    %140 = arith.addf %135, %139 : vector<16x4x16xf32>
    %141 = vector.extract_strided_slice %129 {offsets = [0, 0, 0], sizes = [16, 4, 16], strides = [1, 1, 1]} : vector<18x4x16xbf16> to vector<16x4x16xbf16>
    %c2_87 = arith.constant 2 : index
    %c0_88 = arith.constant 0 : index
    %c0_89 = arith.constant 0 : index
    %c0_90 = arith.constant 0 : index
    %142 = vector.load %arg4[%c2_87, %c0_88, %c0_89, %c0_90] : memref<9x16x4x4xbf16, #tpu.memory_space<vmem>>, vector<1x16x4x4xbf16>
    %143 = vector.shape_cast %142 : vector<1x16x4x4xbf16> to vector<16x4x4xbf16>
    "tpu.trace_start"() <{level = 10 : i32, message = "foc,fct->fot"}> : () -> ()
    %cst_91 = arith.constant dense<0.000000e+00> : vector<16x4x16xf32>
    %144 = tpu.matmul %143, %141, %cst_91 {dimension_numbers = #tpu.dot_dimension_numbers<[2], [1], [1], [2], [0, 0, 0, 1, 1, 2], [0], [0]>} : vector<16x4x4xbf16>, vector<16x4x16xbf16>, vector<16x4x16xf32> -> vector<16x4x16xf32>
    "tpu.trace_stop"() : () -> ()
    %145 = arith.addf %140, %144 : vector<16x4x16xf32>
    %146 = vector.extract_strided_slice %127 {offsets = [1, 0, 0], sizes = [16, 4, 16], strides = [1, 1, 1]} : vector<18x4x16xbf16> to vector<16x4x16xbf16>
    %c3_92 = arith.constant 3 : index
    %c0_93 = arith.constant 0 : index
    %c0_94 = arith.constant 0 : index
    %c0_95 = arith.constant 0 : index
    %147 = vector.load %arg4[%c3_92, %c0_93, %c0_94, %c0_95] : memref<9x16x4x4xbf16, #tpu.memory_space<vmem>>, vector<1x16x4x4xbf16>
    %148 = vector.shape_cast %147 : vector<1x16x4x4xbf16> to vector<16x4x4xbf16>
    "tpu.trace_start"() <{level = 10 : i32, message = "foc,fct->fot"}> : () -> ()
    %cst_96 = arith.constant dense<0.000000e+00> : vector<16x4x16xf32>
    %149 = tpu.matmul %148, %146, %cst_96 {dimension_numbers = #tpu.dot_dimension_numbers<[2], [1], [1], [2], [0, 0, 0, 1, 1, 2], [0], [0]>} : vector<16x4x4xbf16>, vector<16x4x16xbf16>, vector<16x4x16xf32> -> vector<16x4x16xf32>
    "tpu.trace_stop"() : () -> ()
    %150 = arith.addf %145, %149 : vector<16x4x16xf32>
    %151 = vector.extract_strided_slice %128 {offsets = [1, 0, 0], sizes = [16, 4, 16], strides = [1, 1, 1]} : vector<18x4x16xbf16> to vector<16x4x16xbf16>
    %c4_97 = arith.constant 4 : index
    %c0_98 = arith.constant 0 : index
    %c0_99 = arith.constant 0 : index
    %c0_100 = arith.constant 0 : index
    %152 = vector.load %arg4[%c4_97, %c0_98, %c0_99, %c0_100] : memref<9x16x4x4xbf16, #tpu.memory_space<vmem>>, vector<1x16x4x4xbf16>
    %153 = vector.shape_cast %152 : vector<1x16x4x4xbf16> to vector<16x4x4xbf16>
    "tpu.trace_start"() <{level = 10 : i32, message = "foc,fct->fot"}> : () -> ()
    %cst_101 = arith.constant dense<0.000000e+00> : vector<16x4x16xf32>
    %154 = tpu.matmul %153, %151, %cst_101 {dimension_numbers = #tpu.dot_dimension_numbers<[2], [1], [1], [2], [0, 0, 0, 1, 1, 2], [0], [0]>} : vector<16x4x4xbf16>, vector<16x4x16xbf16>, vector<16x4x16xf32> -> vector<16x4x16xf32>
    "tpu.trace_stop"() : () -> ()
    %155 = arith.addf %150, %154 : vector<16x4x16xf32>
    %156 = vector.extract_strided_slice %129 {offsets = [1, 0, 0], sizes = [16, 4, 16], strides = [1, 1, 1]} : vector<18x4x16xbf16> to vector<16x4x16xbf16>
    %c5_102 = arith.constant 5 : index
    %c0_103 = arith.constant 0 : index
    %c0_104 = arith.constant 0 : index
    %c0_105 = arith.constant 0 : index
    %157 = vector.load %arg4[%c5_102, %c0_103, %c0_104, %c0_105] : memref<9x16x4x4xbf16, #tpu.memory_space<vmem>>, vector<1x16x4x4xbf16>
    %158 = vector.shape_cast %157 : vector<1x16x4x4xbf16> to vector<16x4x4xbf16>
    "tpu.trace_start"() <{level = 10 : i32, message = "foc,fct->fot"}> : () -> ()
    %cst_106 = arith.constant dense<0.000000e+00> : vector<16x4x16xf32>
    %159 = tpu.matmul %158, %156, %cst_106 {dimension_numbers = #tpu.dot_dimension_numbers<[2], [1], [1], [2], [0, 0, 0, 1, 1, 2], [0], [0]>} : vector<16x4x4xbf16>, vector<16x4x16xbf16>, vector<16x4x16xf32> -> vector<16x4x16xf32>
    "tpu.trace_stop"() : () -> ()
    %160 = arith.addf %155, %159 : vector<16x4x16xf32>
    %161 = vector.extract_strided_slice %127 {offsets = [2, 0, 0], sizes = [16, 4, 16], strides = [1, 1, 1]} : vector<18x4x16xbf16> to vector<16x4x16xbf16>
    %c6_107 = arith.constant 6 : index
    %c0_108 = arith.constant 0 : index
    %c0_109 = arith.constant 0 : index
    %c0_110 = arith.constant 0 : index
    %162 = vector.load %arg4[%c6_107, %c0_108, %c0_109, %c0_110] : memref<9x16x4x4xbf16, #tpu.memory_space<vmem>>, vector<1x16x4x4xbf16>
    %163 = vector.shape_cast %162 : vector<1x16x4x4xbf16> to vector<16x4x4xbf16>
    "tpu.trace_start"() <{level = 10 : i32, message = "foc,fct->fot"}> : () -> ()
    %cst_111 = arith.constant dense<0.000000e+00> : vector<16x4x16xf32>
    %164 = tpu.matmul %163, %161, %cst_111 {dimension_numbers = #tpu.dot_dimension_numbers<[2], [1], [1], [2], [0, 0, 0, 1, 1, 2], [0], [0]>} : vector<16x4x4xbf16>, vector<16x4x16xbf16>, vector<16x4x16xf32> -> vector<16x4x16xf32>
    "tpu.trace_stop"() : () -> ()
    %165 = arith.addf %160, %164 : vector<16x4x16xf32>
    %166 = vector.extract_strided_slice %128 {offsets = [2, 0, 0], sizes = [16, 4, 16], strides = [1, 1, 1]} : vector<18x4x16xbf16> to vector<16x4x16xbf16>
    %c7_112 = arith.constant 7 : index
    %c0_113 = arith.constant 0 : index
    %c0_114 = arith.constant 0 : index
    %c0_115 = arith.constant 0 : index
    %167 = vector.load %arg4[%c7_112, %c0_113, %c0_114, %c0_115] : memref<9x16x4x4xbf16, #tpu.memory_space<vmem>>, vector<1x16x4x4xbf16>
    %168 = vector.shape_cast %167 : vector<1x16x4x4xbf16> to vector<16x4x4xbf16>
    "tpu.trace_start"() <{level = 10 : i32, message = "foc,fct->fot"}> : () -> ()
    %cst_116 = arith.constant dense<0.000000e+00> : vector<16x4x16xf32>
    %169 = tpu.matmul %168, %166, %cst_116 {dimension_numbers = #tpu.dot_dimension_numbers<[2], [1], [1], [2], [0, 0, 0, 1, 1, 2], [0], [0]>} : vector<16x4x4xbf16>, vector<16x4x16xbf16>, vector<16x4x16xf32> -> vector<16x4x16xf32>
    "tpu.trace_stop"() : () -> ()
    %170 = arith.addf %165, %169 : vector<16x4x16xf32>
    %171 = vector.extract_strided_slice %129 {offsets = [2, 0, 0], sizes = [16, 4, 16], strides = [1, 1, 1]} : vector<18x4x16xbf16> to vector<16x4x16xbf16>
    %c8_117 = arith.constant 8 : index
    %c0_118 = arith.constant 0 : index
    %c0_119 = arith.constant 0 : index
    %c0_120 = arith.constant 0 : index
    %172 = vector.load %arg4[%c8_117, %c0_118, %c0_119, %c0_120] : memref<9x16x4x4xbf16, #tpu.memory_space<vmem>>, vector<1x16x4x4xbf16>
    %173 = vector.shape_cast %172 : vector<1x16x4x4xbf16> to vector<16x4x4xbf16>
    "tpu.trace_start"() <{level = 10 : i32, message = "foc,fct->fot"}> : () -> ()
    %cst_121 = arith.constant dense<0.000000e+00> : vector<16x4x16xf32>
    %174 = tpu.matmul %173, %171, %cst_121 {dimension_numbers = #tpu.dot_dimension_numbers<[2], [1], [1], [2], [0, 0, 0, 1, 1, 2], [0], [0]>} : vector<16x4x4xbf16>, vector<16x4x16xbf16>, vector<16x4x16xf32> -> vector<16x4x16xf32>
    "tpu.trace_stop"() : () -> ()
    %175 = arith.addf %170, %174 : vector<16x4x16xf32>
    %176 = vector.broadcast %7 : vector<1x4x1xf32> to vector<16x4x16xf32>
    %177 = arith.addf %175, %176 : vector<16x4x16xf32>
    %178 = arith.addf %177, %1 : vector<16x4x16xf32>
    %c0_122 = arith.constant 0 : index
    %c0_123 = arith.constant 0 : index
    %c0_124 = arith.constant 0 : index
    %c0_125 = arith.constant 0 : index
    %179 = vector.load %arg10[%c0_122, %c0_123, %c0_124, %c0_125] : memref<1x16x4x16xf32, #tpu.memory_space<vmem>>, vector<1x16x4x16xf32>
    %180 = vector.shape_cast %179 : vector<1x16x4x16xf32> to vector<16x4x16xf32>
    %181 = vector.shape_cast %178 : vector<16x4x16xf32> to vector<1x16x4x16xf32>
    tpu.vector_store %arg10[%c0_122, %c0_123, %c0_124, %c0_125], %181 {strides = array<i32>} : memref<1x16x4x16xf32, #tpu.memory_space<vmem>>, vector<1x16x4x16xf32>,
    return
  }
  func.func @transform_0(%arg0: i32) -> (i32, i32, i32, i32) {
    %c0_i32 = arith.constant 0 : i32
    %c0_i32_0 = arith.constant 0 : i32
    %c0_i32_1 = arith.constant 0 : i32
    %c0_i32_2 = arith.constant 0 : i32
    return %arg0, %c0_i32, %c0_i32_0, %c0_i32_1 : i32, i32, i32, i32
  }
  func.func @transform_1(%arg0: i32) -> (i32, i32, i32, i32) {
    %c0_i32 = arith.constant 0 : i32
    %c0_i32_0 = arith.constant 0 : i32
    %c0_i32_1 = arith.constant 0 : i32
    %c0_i32_2 = arith.constant 0 : i32
    %c0_i32_3 = arith.constant 0 : i32
    return %c0_i32, %c0_i32_0, %c0_i32_1, %c0_i32_2 : i32, i32, i32, i32
  }
  func.func @transform_2(%arg0: i32) -> (i32, i32, i32) {
    %c0_i32 = arith.constant 0 : i32
    %c0_i32_0 = arith.constant 0 : i32
    %c0_i32_1 = arith.constant 0 : i32
    %c0_i32_2 = arith.constant 0 : i32
    return %c0_i32, %c0_i32_0, %c0_i32_1 : i32, i32, i32
  }
  func.func @transform_3(%arg0: i32) -> (i32, i32, i32, i32) {
    %c0_i32 = arith.constant 0 : i32
    %c0_i32_0 = arith.constant 0 : i32
    %c0_i32_1 = arith.constant 0 : i32
    %c0_i32_2 = arith.constant 0 : i32
    %c0_i32_3 = arith.constant 0 : i32
    return %c0_i32, %c0_i32_0, %c0_i32_1, %c0_i32_2 : i32, i32, i32, i32
  }
  func.func @transform_4(%arg0: i32) -> (i32, i32, i32) {
    %c0_i32 = arith.constant 0 : i32
    %c0_i32_0 = arith.constant 0 : i32
    %c0_i32_1 = arith.constant 0 : i32
    %c0_i32_2 = arith.constant 0 : i32
    return %c0_i32, %c0_i32_0, %c0_i32_1 : i32, i32, i32
  }
  func.func @transform_5(%arg0: i32) -> (i32, i32, i32) {
    %c0_i32 = arith.constant 0 : i32
    %c0_i32_0 = arith.constant 0 : i32
    %c0_i32_1 = arith.constant 0 : i32
    %c0_i32_2 = arith.constant 0 : i32
    return %c0_i32, %c0_i32_0, %c0_i32_1 : i32, i32, i32
  }
  func.func @transform_6(%arg0: i32) -> (i32, i32, i32) {
    %c0_i32 = arith.constant 0 : i32
    %c0_i32_0 = arith.constant 0 : i32
    %c0_i32_1 = arith.constant 0 : i32
    %c0_i32_2 = arith.constant 0 : i32
    return %c0_i32, %c0_i32_0, %c0_i32_1 : i32, i32, i32
  }
  func.func @transform_7(%arg0: i32) -> (i32, i32, i32) {
    %c0_i32 = arith.constant 0 : i32
    %c0_i32_0 = arith.constant 0 : i32
    %c0_i32_1 = arith.constant 0 : i32
    %c0_i32_2 = arith.constant 0 : i32
    return %c0_i32, %c0_i32_0, %c0_i32_1 : i32, i32, i32
  }
  func.func @transform_8(%arg0: i32) -> (i32, i32, i32) {
    %c0_i32 = arith.constant 0 : i32
    %c0_i32_0 = arith.constant 0 : i32
    %c0_i32_1 = arith.constant 0 : i32
    %c0_i32_2 = arith.constant 0 : i32
    return %c0_i32, %c0_i32_0, %c0_i32_1 : i32, i32, i32
  }
  func.func @transform_9(%arg0: i32) -> (i32, i32, i32, i32) {
    %c0_i32 = arith.constant 0 : i32
    %c0_i32_0 = arith.constant 0 : i32
    %c0_i32_1 = arith.constant 0 : i32
    %c0_i32_2 = arith.constant 0 : i32
    return %arg0, %c0_i32, %c0_i32_0, %c0_i32_1 : i32, i32, i32, i32
  }
}

</mosaic_0001>

<bundles_post_ra>
// kernel: tpu_custom_call.1
= control target key start
LH: loop header
LB: loop body
LE: loop exit
PB: predicated region body
PF: predicated region fallthrough
CT: control target
= control target key end

     0   :  { %14 = vsyncpa [#allocation3], 0  ;;  %s14158_s0 = inlined_call_operand.vmem [shape: f32[2,16,4,16], index: 0, kind: input, shape index: {}]   ;;  %s14159_s1 = inlined_call_operand.vmem [shape: bf16[9,16,4,4], index: 1, kind: input, shape index: {}]   ;;  %s14160_s2 = inlined_call_operand.vmem [shape: f32[1,4,1], index: 2, kind: input, shape index: {}]   ;;  %s14161_s3 = inlined_call_operand.vmem [shape: bf16[9,16,4,4], index: 3, kind: input, shape index: {}]   ;;  %s14162_s4 = inlined_call_operand.vmem [shape: f32[1,4,1], index: 4, kind: input, shape index: {}]   ;;  %s14163_s5 = inlined_call_operand.vmem [shape: f32[16,1,1], index: 5, kind: input, shape index: {}]   ;;  %s14164_s6 = inlined_call_operand.vmem [shape: f32[16,1,1], index: 6, kind: input, shape index: {}]   ;;  %s14165_s7 = inlined_call_operand.vmem [shape: f32[16,1,1], index: 7, kind: input, shape index: {}]   ;;  %s14166_s8 = inlined_call_operand.vmem [shape: f32[16,1,1], index: 8, kind: input, shape index: {}]   ;;  %s14167_s9 = inlined_call_operand.hbm [shape: f32[2,16,4,16], index: 9, kind: output, shape index: {}]  }
   0x1   :  { %16 = vsyncpa [#allocation3 + $0x1], 0  ;;  %s9444_s30 = smov 0   ;;  %s9446_s10 = smov 0  }
   0x2   :  { %s9448_s11 = smov 0   ;;  %s9450_s12 = smov 0  }
   0x3 LB: > { %s9465_s13 = sadd.s32 4294967295, %s9385_s12   ;;  %s8534_s14 = sadd.s32 4294967294, %s9385_s12   ;;  %s9385_s12 = sphi %s9450_s12, %s14348_s12   ;;  %s9381_s11 = sphi %s9448_s11, %s14347_s11   ;;  %s9377_s10 = sphi %s9446_s10, %s14346_s10   ;;  %s9373_s30 = sphi %s9444_s30, %s14345_s30  }
   0x4   : > { %s9469_s15 = sadd.s32 1, %s9385_s12   ;;  %s223_s16 = sadd.s32 1, %s9381_s11 }
   0x5   : > { %s220_s17 = ssub.s32 %s9385_s12, %s9469_s15  ;;  %p233_p0 = scmp.ne.s32.totalorder %s9381_s11, %s9377_s10 }
   0x6   : > { %p221_p1 = scmp.eq.s32.totalorder %s220_s17, 0  ;;  %p234_p2 = scmp.eq.s32.totalorder %s9465_s13, 1 }
   0x7   : > { %p239_p3 = scmp.ne.s32.totalorder %s9377_s10, %s9373_s30  ;;  %p240_p4 = scmp.eq.s32.totalorder %s8534_s14, 1 }
   0x8   : > { %s9480_s18 = scalar_select %p221_p1, %s9381_s11, %s223_s16  }
   0x9   : > { %p9482_p5 = por %p234_p2, %p233_p0  ;;  %p9486_p6 = por %p240_p4, %p239_p3 }
   0xa   : > { %p8537_p7 = scmp.ge.s32.totalorder %s9385_s12, 1  ;;  %p290_p8 = scmp.lt.s32.totalorder %s9385_s12, 3 }
   0xc   : > { %p291_p9 = pnand %p8537_p7, %p290_p8 }
   0xe   : > { %294 = sbr.rel (%p291_p9) target bundleno = 2470 (0x9a6), region = 56 }
  0x13   : > { %v9173_v0 = vld [vmem:[%s14164_s6 + $0x2] ss:$0 sm:$0xff]  ;;  %v14168_v1 = vmov 0   ;;  %v9174_v2 = vld [vmem:[%s14164_s6 + $0x1] ss:$0 sm:$0xff]  ;;  %p326_p10 = scmp.lt.s32.totalorder %s9465_s13, 1 }
  0x14   : > { %9172 = vset.pattern.permute.xlu2 %v14168_v1  ;;  %9171 = vset.pattern.permute.xlu1 %v14168_v1  ;;  %v9175_v3 = vld [vmem:[%s14163_s5 + $0x1] ss:$0 sm:$0xff]  ;;  %v9176_v4 = vld [vmem:[%s14164_s6] ss:$0 sm:$0xff]  ;;  %v9177_v6 = vld [vmem:[%s14163_s5 + $0x2] ss:$0 sm:$0xff] }
  0x15   : > { %9170 = vset.pattern.permute.xlu0 %v14168_v1  ;;  %698 = vperm.xlu2 %9172, %v9173_v0   ;;  %v9178_v5 = vld [vmem:[%s14163_s5] ss:$0 sm:$0xff]  ;;  %v9179_v7 = vld [vmem:[%s14163_s5 + $0x6] ss:$0 sm:$0xff]  ;;  %v9181_v8 = vld [vmem:[%s14163_s5 + $0x3] ss:$0 sm:$0xff] }
  0x16   : > { %694 = vperm.xlu1 %9171, %v9174_v2   ;;  %582 = vperm.xlu0 %9170, %v9175_v3   ;;  %v9180_v9 = vld [vmem:[%s14163_s5 + $0x5] ss:$0 sm:$0xff]  ;;  %s327_s27 = scalar_select %p326_p10, %s9465_s13, 1  ;;  %vm414_vm0 = vcmask 125952   ;;  %v9182_v10 = vld [vmem:[%s14164_s6 + $0x3] ss:$0 sm:$0xff] }
  0x17   : > { %v9184_v12 = vld [vmem:[%s14163_s5 + $0x4] ss:$0 sm:$0xff]  ;;  %v9183_v14 = vld [vmem:[%s14164_s6 + $0x5] ss:$0 sm:$0xff]  ;;  %v9388_v16 = vmov 16.0   ;;  %s9389_s29 = smov 1  }
  0x18   : > { %s9122_s28 = sshll.u32 %s327_s27, 6  ;;  %9237 = vrcp.f32 %v9388_v16  ;;  %v9185_v21 = vld [vmem:[%s14163_s5 + $0x9] ss:$0 sm:$0xff]  ;;  %v9187_v23 = vld [vmem:[%s14164_s6 + $0x4] ss:$0 sm:$0xff]  ;;  %s9390_s14 = smov 127  }
  0x19   : > { %s9527_s16 = scalar_lea.vmem %s14158_s0, %s9122_s28  ;;  %v9186_v27 = vld [vmem:[%s14164_s6 + $0x6] ss:$0 sm:$0xff]  ;;  %v9188_v39 = vld [vmem:[%s14164_s6 + $0x9] ss:$0 sm:$0xff]  ;;  %v9190_v44 = vld [vmem:[%s14163_s5 + $0xa] ss:$0 sm:$0xff] }
  0x1a   : > { %v9533_v11 = vld [vmem:[%s9527_s16] sm:$0xf]  ;;  %v9539_v13 = vld [vmem:[%s9527_s16 + $0x4] sm:$0xf]  ;;  %v9547_v17 = vld [vmem:[%s9527_s16 + $0x8] sm:$0xf] }
  0x1b   : > { %v415_v15 = vsel %vm414_vm0, %v9533_v11, 0.0  ;;  %v9550_v18 = vld [vmem:[%s9527_s16 + $0xc] sm:$0xf]  ;;  %v416_v19 = vsel %vm414_vm0, %v9539_v13, 0.0  ;;  %v9558_v22 = vld [vmem:[%s9527_s16 + $0x10] sm:$0xf] }
  0x1c   : > { %v417_v20 = vadd.f32 %v416_v19, %v415_v15  ;;  %v9564_v24 = vld [vmem:[%s9527_s16 + $0x14] sm:$0xf]  ;;  %v418_v25 = vsel %vm414_vm0, %v9547_v17, 0.0  ;;  %v420_v26 = vsel %vm414_vm0, %v9550_v18, 0.0  ;;  %v9574_v28 = vld [vmem:[%s9527_s16 + $0x18] sm:$0xf] }
  0x1d   : > { %690 = vperm.xlu2 %9172, %v9176_v4   ;;  %v9577_v31 = vld [vmem:[%s9527_s16 + $0x1c] sm:$0xf]  ;;  %v422_v32 = vsel %vm414_vm0, %v9558_v22, 0.0  ;;  %v9582_v33 = vld [vmem:[%s9527_s16 + $0x20] sm:$0xf]  ;;  %v424_v35 = vsel %vm414_vm0, %v9564_v24, 0.0 }
  0x1e   : > { %578 = vperm.xlu1 %9171, %v9178_v5   ;;  %586 = vperm.xlu0 %9170, %v9177_v6   ;;  %v419_v29 = vadd.f32 %v418_v25, %v417_v20  ;;  %v9238_v30 = vpop.eup %9237  ;;  %v426_v38 = vsel %vm414_vm0, %v9574_v28, 0.0  ;;  %v9592_v40 = vld [vmem:[%s9527_s16 + $0x24] sm:$0xf]  ;;  %v428_v42 = vsel %vm414_vm0, %v9577_v31, 0.0  ;;  %v430_v43 = vsel %vm414_vm0, %v9582_v33, 0.0  ;;  %s9391_s17 = smov 126  }
  0x1f   : > { %v447_v36 = vmul.f32 16.0, %v9238_v30  ;;  %v9189_v46 = vld [vmem:[%s14163_s5 + $0x7] ss:$0 sm:$0xff]  ;;  %v9605_v47 = vld [vmem:[%s9527_s16 + $0x28] sm:$0xf]  ;;  %v432_v49 = vsel %vm414_vm0, %v9592_v40, 0.0  ;;  %vm451_vm1 = vweird.f32 %v9238_v30 }
  0x20   : > { %v421_v34 = vadd.f32 %v420_v26, %v419_v29  ;;  %v9610_v50 = vld [vmem:[%s9527_s16 + $0x2c] sm:$0xf]  ;;  %v434_v53 = vsel %vm414_vm0, %v9605_v47, 0.0  ;;  %v9615_v54 = vld [vmem:[%s9527_s16 + $0x30] sm:$0xf]  ;;  %s323_s26 = sand.u32 1, %s9377_s10  }
  0x21   : > { %v448_v52 = vsub.f32 1.0, %v447_v36  ;;  %v436_v56 = vsel %vm414_vm0, %v9610_v50, 0.0  ;;  %v9191_v57 = vld [vmem:[%s14164_s6 + $0xa] ss:$0 sm:$0xff]  ;;  %v9623_v58 = vld [vmem:[%s9527_s16 + $0x34] sm:$0xf] }
  0x22   : > { %v423_v37 = vadd.f32 %v422_v32, %v421_v34  ;;  %v9193_v60 = vld [vmem:[%s14164_s6 + $0x7] ss:$0 sm:$0xff]  ;;  %v438_v62 = vsel %vm414_vm0, %v9615_v54, 0.0  ;;  %v9192_v63 = vld [vmem:[%s14163_s5 + $0x8] ss:$0 sm:$0xff]  ;;  %v440_v3 = vsel %vm414_vm0, %v9623_v58, 0.0 }
  0x23   : > { %v449_v61 = vmul.f32 %v9238_v30, %v448_v52  ;;  %v9634_v0 = vld [vmem:[%s9527_s16 + $0x38] sm:$0xf]  ;;  %v9639_v4 = vld [vmem:[%s9527_s16 + $0x3c] sm:$0xf]  ;;  %v9195_v16 = vld [vmem:[%s14164_s6 + $0x8] ss:$0 sm:$0xff] }
  0x24   : > { %v425_v41 = vadd.f32 %v424_v35, %v423_v37  ;;  %v9197_v26 = vld [vmem:[%s14163_s5 + $0xc] ss:$0 sm:$0xff]  ;;  %s9123_s27 = sshll.u32 %s9465_s13, 6  ;;  %s8457_s13 = scalar_lea.sflag [#allocation3], %s323_s26 }
  0x25   : > { %602 = vperm.xlu2 %9172, %v9179_v7   ;;  %v450_v6 = vadd.f32 %v9238_v30, %v449_v61  ;;  %v442_v7 = vsel %vm414_vm0, %v9634_v0, 0.0  ;;  %s8468_s21 = scalar_lea.hbm %s14167_s9, %s9123_s27  ;;  %s9343_s28 = scalar_lea.hbm %s14167_s9, 128 }
  0x26   : > { %590 = vperm.xlu1 %9171, %v9181_v8   ;;  %598 = vperm.xlu0 %9170, %v9180_v9   ;;  %v427_v45 = vadd.f32 %v426_v38, %v425_v41  ;;  %v444_v9 = vsel %vm414_vm0, %v9639_v4, 0.0  ;;  %s8471_s23 = sshll.u32 %s8468_s21, 4  ;;  %s8472_s23 = int_to_ptr.hbm [resolvable:$true] %s8471_s23 }
  0x27   : > { %v9651_v15 = vsel %vm451_vm1, %v9238_v30, %v450_v6  ;;  %s9337_s24 = sshra.s32 %s8472_s23, 4  ;;  %s9338_s24 = int_to_ptr.hbm [resolvable:$true] %s9337_s24 }
  0x28   : > { %v429_v48 = vadd.f32 %v428_v42, %v427_v45  ;;  %14225 = vst [vmem:[#allocation5_spill] sm:$0xff] %v9651_v15  ;;  %v9201_v45 = vld [vmem:[%s14164_s6 + $0xb] ss:$0 sm:$0xff]  ;;  %s9339_s25 = scalar_lea.hbm %s9338_s24, 64  ;;  %p9344_p0 = scmp.lt.s32.totalorder %s9338_s24, %s14167_s9 }
  0x29   : > { %p9340_p11 = scmp.ne.s32.totalorder %s9338_s24, %s9339_s25  ;;  %p9345_p1 = scmp.lt.s32.totalorder %s9343_s28, %s9339_s25 }
  0x2a   : > { %v431_v51 = vadd.f32 %v430_v43, %v429_v48  ;;  %v9202_v43 = vld [vmem:[%s14164_s6 + $0xe] ss:$0 sm:$0xff] }
  0x2b   : > { %p9341_p12 = pnand %p9340_p11, %p9482_p5  ;;  %p9346_p2 = por %p9345_p1, %p9344_p0 }
  0x2c   : > { %v433_v55 = vadd.f32 %v432_v49, %v431_v51 }
  0x2d   : > { %702 = vperm.xlu2 %9172, %v9182_v10   ;;  %v9194_v10 = vld [vmem:[%s14163_s5 + $0xb] ss:$0 sm:$0xff]  ;;  %p9342_p13 = pneg %p9341_p12 }
  0x2e   : > { %594 = vperm.xlu1 %9171, %v9184_v12   ;;  %710 = vperm.xlu0 %9170, %v9183_v14   ;;  %v435_v59 = vadd.f32 %v434_v53, %v433_v55  ;;  %v9196_v14 = vld [vmem:[%s14163_s5 + $0xd] ss:$0 sm:$0xff] }
  0x2f   : > { %p9347_p3 = pnand %p9346_p2, %p9342_p13 }
  0x30   : > { %v437_v2 = vadd.f32 %v436_v56, %v435_v59 }
  0x32   : > { %v439_v5 = vadd.f32 %v438_v62, %v437_v2 }
  0x34   : > { %v441_v8 = vadd.f32 %v440_v3, %v439_v5 }
  0x35   : > { %614 = vperm.xlu2 %9172, %v9185_v21  }
  0x36   : > { %706 = vperm.xlu1 %9171, %v9187_v23   ;;  %714 = vperm.xlu0 %9170, %v9186_v27   ;;  %v443_v12 = vadd.f32 %v442_v7, %v441_v8 }
  0x38   : > { %v445_v19 = vadd.f32 %v444_v9, %v443_v12 }
  0x3a   : > { %v9657_v20 = vmul.f32 %v9651_v15, %v445_v19 }
  0x3c   : > { %v9661_v21 = vsub.f32 %v9533_v11, %v9657_v20  ;;  %v9665_v23 = vsub.f32 %v9539_v13, %v9657_v20  ;;  %v9669_v25 = vsub.f32 %v9547_v17, %v9657_v20  ;;  %v9676_v27 = vsub.f32 %v9550_v18, %v9657_v20  ;;  %v9199_v11 = vld [vmem:[%s14164_s6 + $0xd] ss:$0 sm:$0xff]  ;;  %v9198_v13 = vld [vmem:[%s14163_s5 + $0xe] ss:$0 sm:$0xff] }
  0x3d   : > { %726 = vperm.xlu2 %9172, %v9188_v39   ;;  %v9686_v17 = vsub.f32 %v9558_v22, %v9657_v20  ;;  %v9696_v32 = vsub.f32 %v9564_v24, %v9657_v20  ;;  %v9702_v22 = vsub.f32 %v9574_v28, %v9657_v20  ;;  %v9200_v39 = vld [vmem:[%s14164_s6 + $0xc] ss:$0 sm:$0xff]  ;;  %v9714_v41 = vsub.f32 %v9577_v31, %v9657_v20 }
  0x3e   : > { %618 = vperm.xlu1 %9171, %v9190_v44   ;;  %606 = vperm.xlu0 %9170, %v9189_v46   ;;  %v470_v29 = vmul.f32 %v9661_v21, %v9661_v21  ;;  %v471_v30 = vmul.f32 %v9665_v23, %v9665_v23  ;;  %v472_v18 = vmul.f32 %v9669_v25, %v9669_v25 }
  0x3f   : > { %v473_v34 = vmul.f32 %v9676_v27, %v9676_v27  ;;  %v474_v35 = vmul.f32 %v9686_v17, %v9686_v17  ;;  %v475_v28 = vmul.f32 %v9696_v32, %v9696_v32  ;;  %v9727_v46 = vsub.f32 %v9582_v33, %v9657_v20 }
  0x40   : > { %v486_v36 = vsel %vm414_vm0, %v470_v29, 0.0  ;;  %v487_v37 = vsel %vm414_vm0, %v471_v30, 0.0  ;;  %v489_v38 = vsel %vm414_vm0, %v472_v18, 0.0  ;;  %v476_v31 = vmul.f32 %v9702_v22, %v9702_v22 }
  0x41   : > { %v488_v24 = vadd.f32 %v487_v37, %v486_v36  ;;  %v491_v42 = vsel %vm414_vm0, %v473_v34, 0.0  ;;  %v493_v48 = vsel %vm414_vm0, %v474_v35, 0.0  ;;  %v463_v51 = vsub.f32 %v9592_v40, %v9657_v20 }
  0x42   : > { %v477_v52 = vmul.f32 %v9714_v41, %v9714_v41  ;;  %v495_v53 = vsel %vm414_vm0, %v475_v28, 0.0  ;;  %v9739_v33 = vsub.f32 %v9605_v47, %v9657_v20  ;;  %v478_v56 = vmul.f32 %v9727_v46, %v9727_v46 }
  0x43   : > { %v490_v44 = vadd.f32 %v489_v38, %v488_v24  ;;  %v9746_v40 = vsub.f32 %v9610_v50, %v9657_v20  ;;  %v9758_v5 = vsub.f32 %v9623_v58, %v9657_v20  ;;  %v9772_v58 = vsub.f32 %v9639_v4, %v9657_v20 }
  0x44   : > { %v499_v61 = vsel %vm414_vm0, %v477_v52, 0.0  ;;  %v480_v47 = vmul.f32 %v9739_v33, %v9739_v33  ;;  %v501_v2 = vsel %vm414_vm0, %v478_v56, 0.0 }
  0x45   : > { %730 = vperm.xlu2 %9172, %v9191_v57   ;;  %v492_v49 = vadd.f32 %v491_v42, %v490_v44  ;;  %v497_v57 = vsel %vm414_vm0, %v476_v31, 0.0  ;;  %v481_v50 = vmul.f32 %v9746_v40, %v9746_v40  ;;  %14226 = vst [vmem:[#allocation6_spill] sm:$0xff] %v9772_v58  ;;  %v483_v12 = vmul.f32 %v9758_v5, %v9758_v5 }
  0x46   : > { %718 = vperm.xlu1 %9171, %v9193_v60   ;;  %610 = vperm.xlu0 %9170, %v9192_v63   ;;  %v479_v60 = vmul.f32 %v463_v51, %v463_v51  ;;  %v9751_v63 = vsub.f32 %v9615_v54, %v9657_v20  ;;  %v9765_v54 = vsub.f32 %v9634_v0, %v9657_v20  ;;  %v505_v9 = vsel %vm414_vm0, %v480_v47, 0.0 }
  0x47   : > { %v494_v55 = vadd.f32 %v493_v48, %v492_v49 }
  0x48   : > { %v503_v6 = vsel %vm414_vm0, %v479_v60, 0.0  ;;  %v482_v8 = vmul.f32 %v9751_v63, %v9751_v63  ;;  %v484_v0 = vmul.f32 %v9765_v54, %v9765_v54 }
  0x49   : > { %v496_v59 = vadd.f32 %v495_v53, %v494_v55 }
  0x4a   : > { %v509_v19 = vsel %vm414_vm0, %v482_v8, 0.0  ;;  %v513_v20 = vsel %vm414_vm0, %v484_v0, 0.0 }
  0x4b   : > { %v498_v62 = vadd.f32 %v497_v57, %v496_v59 }
  0x4d   : > { %622 = vperm.xlu2 %9172, %v9194_v10   ;;  %v500_v3 = vadd.f32 %v499_v61, %v498_v62 }
  0x4e   : > { %630 = vperm.xlu1 %9171, %v9196_v14   ;;  %722 = vperm.xlu0 %9170, %v9195_v16   ;;  %v507_v14 = vsel %vm414_vm0, %v481_v50, 0.0 }
  0x4f   : > { %v502_v7 = vadd.f32 %v501_v2, %v500_v3 }
  0x51   : > { %v504_v10 = vadd.f32 %v503_v6, %v502_v7 }
  0x53   : > { %v506_v16 = vadd.f32 %v505_v9, %v504_v10 }
  0x55   : > { %626 = vperm.xlu2 %9172, %v9197_v26   ;;  %v508_v26 = vadd.f32 %v507_v14, %v506_v16 }
  0x56   : > { %742 = vperm.xlu1 %9171, %v9199_v11   ;;  %634 = vperm.xlu0 %9170, %v9198_v13   ;;  %v485_v11 = vmul.f32 %v9772_v58, %v9772_v58  ;;  %v511_v13 = vsel %vm414_vm0, %v483_v12, 0.0 }
  0x57   : > { %v510_v29 = vadd.f32 %v509_v19, %v508_v26 }
  0x58   : > { %v515_v18 = vsel %vm414_vm0, %v485_v11, 0.0 }
  0x59   : > { %v512_v30 = vadd.f32 %v511_v13, %v510_v29 }
  0x5b   : > { %v514_v34 = vadd.f32 %v513_v20, %v512_v30 }
  0x5d   : > { %738 = vperm.xlu2 %9172, %v9200_v39   ;;  %v516_v35 = vadd.f32 %v515_v18, %v514_v34 }
  0x5e   : > { %746 = vperm.xlu1 %9171, %v9202_v43   ;;  %734 = vperm.xlu0 %9170, %v9201_v45  }
  0x5f   : > { %v517_v36 = vmul.f32 %v516_v35, %v9651_v15 }
  0x61   : > { %v518_v38 = vadd.f32 1e-05, %v517_v36 }
  0x63   : > { %9239 = vrsqrt.f32 %v518_v38  ;;  %vm525_vm2 = vweird.f32 %v518_v38 }
  0x69   : > { %v9240_v39 = vpop.eup %9239 }
  0x6a   : > { %v520_v28 = vmul.f32 %v9240_v39, %v518_v38  ;;  %vm526_vm3 = vweird.f32 %v9240_v39 }
  0x6b   : > { %vm527_vm4 = vmor %vm525_vm2, %vm526_vm3 }
  0x6c   : > { %v521_v42 = vmul.f32 %v9240_v39, %v520_v28 }
  0x6e   : > { %v522_v43 = vmul.f32 0.5, %v521_v42 }
  0x6f   : > { %v699_v4 = vpop.permute.xlu2 %698 }
  0x70   : > { %v523_v45 = vsub.f32 1.5, %v522_v43 }
  0x72   : > { %v524_v48 = vmul.f32 %v9240_v39, %v523_v45 }
  0x74   : > { %v9788_v52 = vsel %vm527_vm4, %v9240_v39, %v524_v48 }
  0x75   : > { %v538_v56 = vmul.f32 %v9788_v52, %v463_v51  ;;  %v530_v61 = vmul.f32 %v9788_v52, %v9665_v23  ;;  %v531_v47 = vmul.f32 %v9788_v52, %v9669_v25  ;;  %v529_v2 = vmul.f32 %v9788_v52, %v9661_v21 }
  0x76   : > { %v534_v10 = vmul.f32 %v9788_v52, %v9696_v32 }
  0x77   : > { %v691_v37 = vpop.permute.xlu2 %690 }
  0x7f   : > { %v9786_v24 = vpop.permute.xlu2 %602 }
  0x87   : > { %v703_v44 = vpop.permute.xlu2 %702 }
  0x88   : > { %v583_v31 = vpop.permute.xlu0 %582  ;;  %v695_v55 = vpop.permute.xlu1 %694 }
  0x89   : > { %v642_v6 = vmul.f32 %v583_v31, %v530_v61 }
  0x8b   : > { %v9806_v23 = vadd.f32 %v695_v55, %v642_v6 }
  0x8d   : > { %v9816_v16 = vmul.f32 0.70710677, %v9806_v23 }
  0x8f   : > { %v615_v49 = vpop.permute.xlu2 %614  ;;  %v841_v29 = vmul.f32 %v9816_v16, %v9816_v16 }
  0x90   : > { %v587_v53 = vpop.permute.xlu0 %586  ;;  %v650_v57 = vmul.f32 %v615_v49, %v538_v56  ;;  %v579_v50 = vpop.permute.xlu1 %578 }
  0x91   : > { %v643_v7 = vmul.f32 %v587_v53, %v531_v47  ;;  %v641_v8 = vmul.f32 %v579_v50, %v529_v2  ;;  %v9838_v35 = vmin.f32 %v841_v29, 16.0  ;;  %v533_v2 = vmul.f32 %v9788_v52, %v9686_v17 }
  0x93   : > { %v9810_v12 = vadd.f32 %v699_v4, %v643_v7  ;;  %v9812_v25 = vadd.f32 %v691_v37, %v641_v8  ;;  %v532_v4 = vmul.f32 %v9788_v52, %v9676_v27  ;;  %v843_v42 = vmul.f32 2.1237322e-06, %v9838_v35 }
  0x95   : > { %v9819_v19 = vmul.f32 0.70710677, %v9810_v12  ;;  %v9822_v26 = vmul.f32 0.70710677, %v9812_v25  ;;  %v844_v53 = vadd.f32 0.00028619796, %v843_v42 }
  0x97   : > { %v727_v59 = vpop.permute.xlu2 %726  ;;  %v881_v20 = vmul.f32 %v9819_v19, %v9819_v19  ;;  %v801_v30 = vmul.f32 %v9822_v26, %v9822_v26 }
  0x98   : > { %v9791_v60 = vadd.f32 %v727_v59, %v650_v57  ;;  %v599_v3 = vpop.permute.xlu0 %598  ;;  %v591_v13 = vpop.permute.xlu1 %590  ;;  %v535_v57 = vmul.f32 %v9788_v52, %v9702_v22 }
  0x99   : > { %v646_v0 = vmul.f32 %v599_v3, %v534_v10  ;;  %v644_v36 = vmul.f32 %v591_v13, %v532_v4  ;;  %v9840_v37 = vmin.f32 %v881_v20, 16.0  ;;  %v9842_v38 = vmin.f32 %v801_v30, 16.0 }
  0x9a   : > { %v9796_v62 = vmul.f32 0.70710677, %v9791_v60  ;;  %v845_v3 = vmul.f32 %v844_v53, %v9838_v35 }
  0x9b   : > { %v9847_v43 = vadd.f32 %v703_v44, %v644_v36  ;;  %v883_v45 = vmul.f32 2.1237322e-06, %v9840_v37  ;;  %v803_v31 = vmul.f32 2.1237322e-06, %v9842_v38 }
  0x9c   : > { %v1161_v51 = vmul.f32 %v9796_v62, %v9796_v62  ;;  %v846_v17 = vadd.f32 0.0036580483, %v845_v3 }
  0x9d   : > { %v9855_v55 = vmul.f32 0.70710677, %v9847_v43  ;;  %v884_v59 = vadd.f32 0.00028619796, %v883_v45  ;;  %v804_v61 = vadd.f32 0.00028619796, %v803_v31 }
  0x9e   : > { %v9804_v9 = vmin.f32 %v1161_v51, 16.0  ;;  %v647_v51 = vmul.f32 %v9786_v24, %v535_v57 }
  0x9f   : > { %v921_v50 = vmul.f32 %v9855_v55, %v9855_v55  ;;  %v885_v6 = vmul.f32 %v884_v59, %v9840_v37  ;;  %v805_v7 = vmul.f32 %v804_v61, %v9842_v38  ;;  %v9893_v61 = vpop.permute.xlu2 %730 }
  0xa0   : > { %v1174_v21 = vmul.f32 3.8918573e-05, %v9804_v9  ;;  %v711_v14 = vpop.permute.xlu0 %710  ;;  %v595_v28 = vpop.permute.xlu1 %594 }
  0xa1   : > { %v9824_v32 = vadd.f32 %v711_v14, %v646_v0  ;;  %v1163_v14 = vmul.f32 2.1237322e-06, %v9804_v9  ;;  %v886_v29 = vadd.f32 0.0036580483, %v885_v6  ;;  %v806_v24 = vadd.f32 0.0036580483, %v805_v7 }
  0xa2   : > { %v1175_v11 = vadd.f32 0.001143296, %v1174_v21  ;;  %v645_v21 = vmul.f32 %v595_v28, %v533_v2 }
  0xa3   : > { %v9836_v34 = vmul.f32 0.70710677, %v9824_v32  ;;  %v887_v42 = vmul.f32 %v886_v29, %v9840_v37  ;;  %v807_v45 = vmul.f32 %v806_v24, %v9842_v38 }
  0xa4   : > { %v1176_v18 = vmul.f32 %v1175_v11, %v9804_v9  ;;  %v9872_v11 = vmin.f32 %v921_v50, 16.0 }
  0xa5   : > { %v1001_v27 = vmul.f32 %v9836_v34, %v9836_v34  ;;  %v888_v2 = vadd.f32 0.05243302, %v887_v42  ;;  %v808_v3 = vadd.f32 0.05243302, %v807_v45  ;;  %v9920_v42 = vmul.f32 0.5, %v9810_v12 }
  0xa6   : > { %v1177_v39 = vadd.f32 0.014752088, %v1176_v18  ;;  %v1164_v18 = vadd.f32 0.00028619796, %v1163_v14  ;;  %v9923_v45 = vmul.f32 0.5, %v9791_v60 }
  0xa7   : > { %v9852_v49 = vmin.f32 %v1001_v27, 16.0  ;;  %v923_v27 = vmul.f32 2.1237322e-06, %v9872_v11  ;;  %v889_v24 = vmul.f32 %v888_v2, %v9840_v37  ;;  %v623_v2 = vpop.permute.xlu2 %622 }
  0xa8   : > { %v1178_v48 = vmul.f32 %v1177_v39, %v9804_v9  ;;  %v715_v56 = vpop.permute.xlu0 %714  ;;  %v707_v8 = vpop.permute.xlu1 %706  ;;  %v847_v39 = vmul.f32 %v846_v17, %v9838_v35  ;;  %v1165_v53 = vmul.f32 %v1164_v18, %v9804_v9  ;;  %v9917_v18 = vmul.f32 0.5, %v9812_v25 }
  0xa9   : > { %v1014_v47 = vmul.f32 3.8918573e-05, %v9852_v49  ;;  %v9870_v0 = vadd.f32 %v715_v56, %v647_v51  ;;  %v9874_v13 = vadd.f32 %v707_v8, %v645_v21  ;;  %v924_v59 = vadd.f32 0.00028619796, %v923_v27 }
  0xaa   : > { %v1179_v44 = vadd.f32 0.112945676, %v1178_v48  ;;  %v848_v57 = vadd.f32 0.05243302, %v847_v39  ;;  %v1003_v51 = vmul.f32 2.1237322e-06, %v9852_v49 }
  0xab   : > { %v1015_v10 = vadd.f32 0.001143296, %v1014_v47  ;;  %v9880_v36 = vmul.f32 0.70710677, %v9870_v0  ;;  %v9885_v28 = vmul.f32 0.70710677, %v9874_v13 }
  0xac   : > { %v1180_v22 = vmul.f32 %v1179_v44, %v9804_v9  ;;  %v854_v47 = vmul.f32 3.8918573e-05, %v9838_v35  ;;  %v1166_v7 = vadd.f32 0.0036580483, %v1165_v53  ;;  %v849_v29 = vmul.f32 %v848_v57, %v9838_v35 }
  0xad   : > { %v1016_v20 = vmul.f32 %v1015_v10, %v9852_v49  ;;  %v1041_v56 = vmul.f32 %v9880_v36, %v9880_v36  ;;  %v961_v44 = vmul.f32 %v9885_v28, %v9885_v28  ;;  %v925_v10 = vmul.f32 %v924_v59, %v9872_v11 }
  0xae   : > { %v1181_v4 = vadd.f32 0.4994258, %v1180_v22  ;;  %v855_v17 = vadd.f32 0.001143296, %v854_v47  ;;  %v1004_v39 = vadd.f32 0.00028619796, %v1003_v51 }
  0xaf   : > { %v1017_v48 = vadd.f32 0.014752088, %v1016_v20  ;;  %v9902_v22 = vmin.f32 %v1041_v56, 16.0  ;;  %v9907_v21 = vmin.f32 %v961_v44, 16.0  ;;  %v9914_v20 = vmul.f32 0.5, %v9806_v23 }
  0xb0   : > { %v9877_v30 = vpop.permute.xlu0 %606  ;;  %v1182_v31 = vmul.f32 %v1181_v4, %v9804_v9  ;;  %v9904_v8 = vpop.permute.xlu1 %618  ;;  %v809_v4 = vmul.f32 %v808_v3, %v9842_v38  ;;  %v926_v53 = vadd.f32 0.0036580483, %v925_v10  ;;  %v540_v23 = vmul.f32 %v9788_v52, %v9746_v40 }
  0xb1   : > { %v1018_v6 = vmul.f32 %v1017_v48, %v9852_v49  ;;  %v1054_v48 = vmul.f32 3.8918573e-05, %v9902_v22  ;;  %v1043_v56 = vmul.f32 2.1237322e-06, %v9902_v22  ;;  %v974_v25 = vmul.f32 3.8918573e-05, %v9907_v21 }
  0xb2   : > { %v9898_v50 = vadd.f32 1.0, %v1182_v31  ;;  %v1167_v31 = vmul.f32 %v1166_v7, %v9804_v9  ;;  %v850_v57 = vadd.f32 0.18741608, %v849_v29  ;;  %v890_v59 = vadd.f32 0.18741608, %v889_v24 }
  0xb3   : > { %v1019_v27 = vadd.f32 0.112945676, %v1018_v6  ;;  %v810_v44 = vadd.f32 0.18741608, %v809_v4  ;;  %v856_v12 = vmul.f32 %v855_v17, %v9838_v35  ;;  %v1005_v60 = vmul.f32 %v1004_v39, %v9852_v49 }
  0xb4   : > { %9241 = vrcp.f32 %v9898_v50  ;;  %v9936_v3 = vmul.f32 %v9788_v52, %v9751_v63  ;;  %v536_v40 = vmul.f32 %v9788_v52, %v9714_v41  ;;  %v1168_v6 = vadd.f32 0.05243302, %v1167_v31 }
  0xb5   : > { %v1020_v47 = vmul.f32 %v1019_v27, %v9852_v49  ;;  %v9943_v7 = vmul.f32 0.5, %v9847_v43  ;;  %v1055_v10 = vadd.f32 0.001143296, %v1054_v48  ;;  %v537_v17 = vmul.f32 %v9788_v52, %v9727_v46 }
  0xb6   : > { %v927_v29 = vmul.f32 %v926_v53, %v9872_v11  ;;  %v1044_v24 = vadd.f32 0.00028619796, %v1043_v56  ;;  %v975_v4 = vadd.f32 0.001143296, %v974_v25  ;;  %v539_v63 = vmul.f32 %v9788_v52, %v9739_v33 }
  0xb7   : > { %14227 = vst [vmem:[#allocation7_spill] sm:$0xff] %v9943_v7  ;;  %v851_v39 = vmul.f32 %v850_v57, %v9838_v35  ;;  %v891_v41 = vmul.f32 %v890_v59, %v9840_v37  ;;  %v811_v27 = vmul.f32 %v810_v44, %v9842_v38  ;;  %v857_v43 = vadd.f32 0.014752088, %v856_v12 }
  0xb8   : > { %v611_v14 = vpop.permute.xlu0 %610  ;;  %v719_v31 = vpop.permute.xlu1 %718  ;;  %v1006_v1 = vadd.f32 0.0036580483, %v1005_v60  ;;  %v1021_v46 = vadd.f32 0.4994258, %v1020_v47  ;;  %v648_v53 = vmul.f32 %v9877_v30, %v536_v40  ;;  %v1169_v25 = vmul.f32 %v1168_v6, %v9804_v9 }
  0xb9   : > { %v1056_v33 = vmul.f32 %v1055_v10, %v9902_v22  ;;  %v963_v57 = vmul.f32 2.1237322e-06, %v9907_v21  ;;  %v649_v15 = vmul.f32 %v611_v14, %v537_v17  ;;  %v928_v59 = vadd.f32 0.05243302, %v927_v29 }
  0xba   : > { %v9940_v51 = vpop.eup %9241  ;;  %v1045_v44 = vmul.f32 %v1044_v24, %v9902_v22  ;;  %v976_v12 = vmul.f32 %v975_v4, %v9907_v21  ;;  %v9961_v58 = vadd.f32 %v719_v31, %v648_v53  ;;  %v852_v7 = vadd.f32 1.1283791, %v851_v39  ;;  %v627_v53 = vpop.permute.xlu2 %626 }
  0xbb   : > { %v1185_v48 = vmul.f32 %v9940_v51, %v9898_v50  ;;  %v812_v60 = vadd.f32 1.1283791, %v811_v27  ;;  %v9964_v47 = vmul.f32 0.5, %v9824_v32  ;;  %v892_v40 = vadd.f32 1.1283791, %v891_v41 }
  0xbc   : > { %v1007_v10 = vmul.f32 %v1006_v1, %v9852_v49  ;;  %v1022_v14 = vmul.f32 %v1021_v46, %v9852_v49  ;;  %v1170_v17 = vadd.f32 0.18741608, %v1169_v25  ;;  %v1057_v29 = vadd.f32 0.014752088, %v1056_v33 }
  0xbd   : > { %v1186_v6 = vsub.f32 1.0, %v1185_v48  ;;  %v964_v24 = vadd.f32 0.00028619796, %v963_v57  ;;  %v858_v4 = vmul.f32 %v857_v43, %v9838_v35  ;;  %v929_v31 = vmul.f32 %v928_v59, %v9872_v11 }
  0xbe   : > { %v1046_v39 = vadd.f32 0.0036580483, %v1045_v44  ;;  %v977_v27 = vadd.f32 0.014752088, %v976_v12  ;;  %v9973_v32 = vmul.f32 0.70710677, %v9961_v58  ;;  %v9978_v41 = vmul.f32 %v623_v2, %v540_v23 }
  0xbf   : > { %v651_v1 = vmul.f32 %v9904_v8, %v539_v63  ;;  %v9985_v43 = vmul.f32 %v812_v60, %v9822_v26  ;;  %v1187_v46 = vmul.f32 %v9940_v51, %v1186_v6  ;;  %v9988_v25 = vadd.f32 1.0, %v1022_v14 }
  0xc0   : > { %v723_v56 = vpop.permute.xlu0 %722  ;;  %v9991_v33 = vmul.f32 %v892_v40, %v9819_v19  ;;  %v1058_v23 = vmul.f32 %v1057_v29, %v9902_v22  ;;  %v965_v8 = vmul.f32 %v964_v24, %v9907_v21  ;;  %v930_v2 = vadd.f32 0.18741608, %v929_v31 }
  0xc1   : > { %v9966_v30 = vadd.f32 %v723_v56, %v649_v15  ;;  %v9976_v15 = vmul.f32 %v852_v7, %v9816_v16  ;;  %v1008_v56 = vadd.f32 0.05243302, %v1007_v10  ;;  %v1171_v16 = vmul.f32 %v1170_v17, %v9804_v9 }
  0xc2   : > { %v1047_v7 = vmul.f32 %v1046_v39, %v9902_v22  ;;  %v978_v26 = vmul.f32 %v977_v27, %v9907_v21  ;;  %v1081_v63 = vmul.f32 %v9973_v32, %v9973_v32  ;;  %v1193_v57 = vand.u32 2147483647, %v9898_v50 }
  0xc3   : > { %v9982_v48 = vmul.f32 0.70710677, %v9966_v30  ;;  %v10002_v59 = vadd.f32 %v9893_v61, %v651_v1  ;;  %v859_v19 = vadd.f32 0.112945676, %v858_v4  ;;  %v1188_v44 = vadd.f32 %v9940_v51, %v1187_v46  ;;  %v739_v1 = vpop.permute.xlu2 %738 }
  0xc4   : > { %vm1190_vm5 = vweird.f32 %v9940_v51  ;;  %v1009_v12 = vmul.f32 %v1008_v56, %v9852_v49  ;;  %9243 = vrcp.f32 %v9988_v25  ;;  %v1195_v60 = vand.u32 2147483648, %v9898_v50 }
  0xc5   : > { %14228 = vst [vmem:[#allocation8_spill] sm:$0xff] %v10002_v59  ;;  %v1121_v9 = vmul.f32 %v9982_v48, %v9982_v48  ;;  %v10012_v40 = vmul.f32 0.5, %v9870_v0  ;;  %v1059_v6 = vadd.f32 0.112945676, %v1058_v23  ;;  %v966_v61 = vadd.f32 0.0036580483, %v965_v8 }
  0xc6   : > { %vm1189_vm6 = vweird.f32 %v9898_v50  ;;  %v1048_v10 = vadd.f32 0.05243302, %v1047_v7  ;;  %v979_v14 = vadd.f32 0.112945676, %v978_v26  ;;  %v10015_v17 = vmin.f32 %v1081_v63, 16.0 }
  0xc7   : > { %14229 = vst [vmem:[#allocation9_spill] sm:$0xff] %v10012_v40  ;;  %v1172_v29 = vadd.f32 1.1283791, %v1171_v16  ;;  %vm10017_vm7 = vmor %vm1189_vm6, %vm1190_vm5  ;;  %v10022_v4 = vmul.f32 0.70710677, %v10002_v59  ;;  %v10024_v31 = vmin.f32 %v1121_v9, 16.0  ;;  %v860_v0 = vmul.f32 %v859_v19, %v9838_v35 }
  0xc8   : > { %v1192_v50 = vsel %vm10017_vm7, %v9940_v51, %v1188_v44  ;;  %v1010_v39 = vadd.f32 0.18741608, %v1009_v12  ;;  %v653_v27 = vmul.f32 %v627_v53, %v9936_v3  ;;  %v894_v46 = vmul.f32 3.8918573e-05, %v9840_v37 }
  0xc9   : > { %14232 = vst [vmem:[#allocation10_spill] sm:$0xff] %v10022_v4  ;;  %v1196_v56 = vor.u32 1.1754944e-38, %v1195_v60  ;;  %v1060_v16 = vmul.f32 %v1059_v6, %v9902_v22  ;;  %v967_v23 = vmul.f32 %v966_v61, %v9907_v21  ;;  %v861_v8 = vadd.f32 0.4994258, %v860_v0 }
  0xca   : > { %v10034_v7 = vpop.eup %9243  ;;  %vm1194_vm8 = vcmp.eq.f32.partialorder %v1193_v57, 8.507059e+37  ;;  %v1049_v26 = vmul.f32 %v1048_v10, %v9902_v22  ;;  %v980_v63 = vmul.f32 %v979_v14, %v9907_v21  ;;  %v1094_v51 = vmul.f32 3.8918573e-05, %v10015_v17 }
  0xcb   : > { %v1197_v9 = vsel %vm1194_vm8, %v1196_v56, %v1192_v50  ;;  %v1201_v3 = vmul.f32 %v10022_v4, %v10022_v4  ;;  %v10041_v53 = vadd.f32 %v739_v1, %v653_v27  ;;  %v1134_v19 = vmul.f32 3.8918573e-05, %v10024_v31 }
  0xcc   : > { %v1173_v44 = vmul.f32 %v1172_v29, %v9796_v62  ;;  %v931_v12 = vmul.f32 %v930_v2, %v9872_v11  ;;  %v1011_v57 = vmul.f32 %v1010_v39, %v9852_v49  ;;  %v895_v60 = vadd.f32 0.001143296, %v894_v46 }
  0xcd   : > { %14233 = vst [vmem:[#allocation11_spill] sm:$0xff] %v10041_v53  ;;  %v1025_v6 = vmul.f32 %v10034_v7, %v9988_v25  ;;  %v1061_v61 = vadd.f32 0.4994258, %v1060_v16  ;;  %v968_v10 = vadd.f32 0.05243302, %v967_v23  ;;  %v862_v14 = vmul.f32 %v861_v8, %v9838_v35  ;;  %v631_v8 = vpop.permute.xlu1 %630 }
  0xce   : > { %v1198_v24 = vmul.f32 %v1197_v9, %v1173_v44  ;;  %v1050_v0 = vadd.f32 0.18741608, %v1049_v26  ;;  %v981_v50 = vadd.f32 0.4994258, %v980_v63  ;;  %v1095_v27 = vadd.f32 0.001143296, %v1094_v51 }
  0xcf   : > { %v10050_v1 = vmin.f32 %v1201_v3, 16.0  ;;  %v10053_v62 = vmul.f32 0.70710677, %v10041_v53  ;;  %v1135_v2 = vadd.f32 0.001143296, %v1134_v19  ;;  %v10055_v29 = vadd.f32 1.0, %v862_v14 }
  0xd0   : > { %v932_v49 = vadd.f32 1.1283791, %v931_v12  ;;  %v1012_v39 = vadd.f32 1.1283791, %v1011_v57  ;;  %v10058_v46 = vmul.f32 0.5, %v9874_v13  ;;  %v896_v56 = vmul.f32 %v895_v60, %v9840_v37 }
  0xd1   : > { %14234 = vst [vmem:[#allocation12_spill] sm:$0xff] %v10053_v62  ;;  %v1026_v35 = vsub.f32 1.0, %v1025_v6  ;;  %v1062_v16 = vmul.f32 %v1061_v61, %v9902_v22  ;;  %v969_v23 = vmul.f32 %v968_v10, %v9907_v21  ;;  %9245 = vrcp.f32 %v10055_v29 }
  0xd2   : > { %v1035_v26 = vand.u32 2147483648, %v9988_v25  ;;  %v1051_v63 = vmul.f32 %v1050_v0, %v9902_v22  ;;  %v982_v51 = vmul.f32 %v981_v50, %v9907_v21  ;;  %v1096_v9 = vmul.f32 %v1095_v27, %v10015_v17 }
  0xd3   : > { %v8550_v13 = vclamps-f32 %v1198_v24, 1.0  ;;  %v1203_v3 = vmul.f32 2.1237322e-06, %v10050_v1  ;;  %v1281_v19 = vmul.f32 %v10053_v62, %v10053_v62  ;;  %v1136_v44 = vmul.f32 %v1135_v2, %v10024_v31 }
  0xd4   : > { %v10073_v12 = vmul.f32 %v932_v49, %v9855_v55  ;;  %v10076_v57 = vmul.f32 %v1012_v39, %v9836_v34  ;;  %v1033_v22 = vand.u32 2147483647, %v9988_v25  ;;  %v897_v60 = vadd.f32 0.014752088, %v896_v56 }
  0xd5   : > { %v1027_v6 = vmul.f32 %v10034_v7, %v1026_v35  ;;  %v10080_v61 = vadd.f32 1.0, %v1062_v16  ;;  %v970_v10 = vadd.f32 0.18741608, %v969_v23  ;;  %v814_v14 = vmul.f32 3.8918573e-05, %v9842_v38 }
  0xd6   : > { %v10083_v24 = vor.u32 1.1754944e-38, %v1035_v26  ;;  %v1052_v0 = vadd.f32 1.1283791, %v1051_v63  ;;  %v10085_v50 = vadd.f32 1.0, %v982_v51  ;;  %v1097_v55 = vadd.f32 0.014752088, %v1096_v9 }
  0xd7   : > { %v9246_v27 = vpop.eup %9245  ;;  %v10087_v2 = vadd.f32 1.0, %v8550_v13  ;;  %v10089_v34 = vadd.f32 0.00028619796, %v1203_v3  ;;  %v10091_v49 = vmin.f32 %v1281_v19, 16.0  ;;  %v1137_v39 = vadd.f32 0.014752088, %v1136_v44 }
  0xd8   : > { %v1083_v56 = vmul.f32 2.1237322e-06, %v10015_v17  ;;  %v542_v35 = vmul.f32 %v9788_v52, %v9758_v5  ;;  %v865_v16 = vmul.f32 %v9246_v27, %v10055_v29  ;;  %v898_v23 = vmul.f32 %v897_v60, %v9840_v37 }
  0xd9   : > { %v10099_v26 = vadd.f32 %v10034_v7, %v1027_v6  ;;  %vm1030_vm9 = vweird.f32 %v10034_v7  ;;  %9247 = vrcp.f32 %v10080_v61  ;;  %v971_v63 = vmul.f32 %v970_v10, %v9907_v21  ;;  %v743_v21 = vpop.permute.xlu1 %742 }
  0xda   : > { %v815_v51 = vadd.f32 0.001143296, %v814_v14  ;;  %v10105_v9 = vmul.f32 %v1052_v0, %v9880_v36  ;;  %9249 = vrcp.f32 %v10085_v50  ;;  %v1098_v5 = vmul.f32 %v1097_v55, %v10015_v17 }
  0xdb   : > { %vm1029_vm10 = vweird.f32 %v9988_v25  ;;  %v1294_v3 = vmul.f32 3.8918573e-05, %v10091_v49  ;;  %v1138_v19 = vmul.f32 %v1137_v39, %v10024_v31  ;;  %v866_v44 = vsub.f32 1.0, %v865_v16 }
  0xdc   : > { %v875_v60 = vand.u32 2147483648, %v10055_v29  ;;  %v1084_v6 = vadd.f32 0.00028619796, %v1083_v56  ;;  %v1123_v36 = vmul.f32 2.1237322e-06, %v10024_v31  ;;  %v654_v10 = vmul.f32 %v631_v8, %v542_v35  ;;  %vm10145_vm1 = vmor %vm1029_vm10, %vm1030_vm9 }
  0xdd   : > { %v899_v14 = vadd.f32 0.112945676, %v898_v23  ;;  %v867_v0 = vmul.f32 %v9246_v27, %v866_v44  ;;  %vm870_vm11 = vweird.f32 %v9246_v27  ;;  %v873_v13 = vand.u32 2147483647, %v10055_v29 }
  0xde   : > { %v816_v55 = vmul.f32 %v815_v51, %v9842_v38  ;;  %v1099_v53 = vadd.f32 0.112945676, %v1098_v5  ;;  %v10117_v62 = vadd.f32 %v743_v21, %v654_v10  ;;  %v934_v16 = vmul.f32 3.8918573e-05, %v9872_v11 }
  0xdf   : > { %v900_v39 = vmul.f32 %v899_v14, %v9840_v37  ;;  %v10121_v59 = vpop.eup %9247  ;;  %v1139_v56 = vadd.f32 0.112945676, %v1138_v19  ;;  %v868_v4 = vadd.f32 %v9246_v27, %v867_v0  ;;  %vm869_vm12 = vweird.f32 %v10055_v29 }
  0xe0   : > { %v876_v8 = vor.u32 1.1754944e-38, %v875_v60  ;;  %v10124_v35 = vpop.eup %9249  ;;  %vm10126_vm13 = vcmp.eq.f32.partialorder %v1033_v22, 8.507059e+37  ;;  %v1085_v51 = vmul.f32 %v1084_v6, %v10015_v17  ;;  %vm871_vm14 = vmor %vm869_vm12, %vm870_vm11  ;;  %v817_v44 = vadd.f32 0.014752088, %v816_v55 }
  0xe1   : > { %v901_v5 = vadd.f32 0.4994258, %v900_v39  ;;  %v935_v21 = vadd.f32 0.001143296, %v934_v16  ;;  %v1295_v10 = vadd.f32 0.001143296, %v1294_v3  ;;  %v872_v19 = vsel %vm871_vm14, %v9246_v27, %v868_v4 }
  0xe2   : > { %v1124_v14 = vadd.f32 0.00028619796, %v1123_v36  ;;  %vm874_vm15 = vcmp.eq.f32.partialorder %v873_v13, 8.507059e+37  ;;  %v1075_v29 = vand.u32 2147483648, %v10080_v61  ;;  %v1100_v60 = vmul.f32 %v1099_v53, %v10015_v17 }
  0xe3   : > { %v877_v0 = vsel %vm874_vm15, %v876_v8, %v872_v19  ;;  %v10135_v22 = vmul.f32 0.70710677, %v10117_v62  ;;  %v1065_v6 = vmul.f32 %v10121_v59, %v10080_v61  ;;  %v972_v40 = vadd.f32 1.1283791, %v971_v63 }
  0xe4   : > { %v1140_v39 = vmul.f32 %v1139_v56, %v10024_v31  ;;  %v878_v55 = vmul.f32 %v877_v0, %v9976_v15  ;;  %v1086_v53 = vadd.f32 0.0036580483, %v1085_v51  ;;  %v902_v27 = vmul.f32 %v901_v5, %v9840_v37 }
  0xe5   : > { %v818_v13 = vmul.f32 %v817_v44, %v9842_v38  ;;  %v936_v3 = vmul.f32 %v935_v21, %v9872_v11  ;;  %v1032_v15 = vsel %vm10145_vm1, %v10034_v7, %v10099_v26  ;;  %v1296_v63 = vmul.f32 %v1295_v10, %v10091_v49 }
  0xe6   : > { %v1125_v25 = vmul.f32 %v1124_v14, %v10024_v31  ;;  %v8542_v36 = vclamps-f32 %v878_v55, 1.0  ;;  %v10160_v16 = vmul.f32 %v10089_v34, %v10050_v1  ;;  %v1101_v56 = vadd.f32 0.4994258, %v1100_v60 }
  0xe7   : > { %v1321_v37 = vmul.f32 %v10135_v22, %v10135_v22  ;;  %v10164_v8 = vadd.f32 1.0, %v902_v27  ;;  %v985_v51 = vmul.f32 %v10124_v35, %v10085_v50  ;;  %v1141_v5 = vadd.f32 0.4994258, %v1140_v39 }
  0xe8   : > { %v1442_v7 = vadd.f32 1.0, %v8542_v36  ;;  %v819_v26 = vadd.f32 0.112945676, %v818_v13  ;;  %v1066_v44 = vsub.f32 1.0, %v1065_v6  ;;  %v1087_v21 = vmul.f32 %v1086_v53, %v10015_v17 }
  0xe9   : > { %9251 = vrcp.f32 %v10164_v8  ;;  %v937_v10 = vadd.f32 0.014752088, %v936_v3  ;;  %v1037_v34 = vsel %vm10126_vm13, %v10083_v24, %v1032_v15  ;;  %v1297_v14 = vadd.f32 0.014752088, %v1296_v63 }
  0xea   : > { %v1126_v19 = vadd.f32 0.0036580483, %v1125_v25  ;;  %v1458_v60 = vmul.f32 %v1442_v7, %v9914_v20  ;;  %v10174_v0 = vor.u32 1.1754944e-38, %v1075_v29  ;;  %v10177_v39 = vmul.f32 %v972_v40, %v9885_v28 }
  0xeb   : > { %v1102_v6 = vmul.f32 %v1101_v56, %v10015_v17  ;;  %v10180_v55 = vmin.f32 %v1321_v37, 16.0  ;;  %v986_v4 = vsub.f32 1.0, %v985_v51  ;;  %v1142_v53 = vmul.f32 %v1141_v5, %v10024_v31 }
  0xec   : > { %v1474_v27 = vpack.c.bf16 %v1458_v60, %v1458_v60  ;;  %v820_v23 = vmul.f32 %v819_v26, %v9842_v38  ;;  %v10185_v24 = vmul.f32 %v1037_v34, %v10076_v57  ;;  %v1067_v20 = vmul.f32 %v10121_v59, %v1066_v44 }
  0xed   : > { %vm1069_vm2 = vweird.f32 %v10080_v61  ;;  %v1088_v29 = vadd.f32 0.05243302, %v1087_v21  ;;  %v938_v28 = vmul.f32 %v937_v10, %v9872_v11  ;;  %vm989_vm3 = vweird.f32 %v10085_v50 }
  0xee   : > { %v1298_v40 = vmul.f32 %v1297_v14, %v10091_v49  ;;  %v1127_v13 = vmul.f32 %v1126_v19, %v10024_v31  ;;  %v1506_v3 = vunpack.c.l.b16 %v1474_v27  ;;  %v821_v15 = vadd.f32 0.4994258, %v820_v23 }
  0xef   : > { %v9252_v63 = vpop.eup %9251  ;;  %vm1070_vm4 = vweird.f32 %v10121_v59  ;;  %v10194_v57 = vadd.f32 1.0, %v1102_v6  ;;  %v1334_v25 = vmul.f32 3.8918573e-05, %v10180_v55  ;;  %v939_v36 = vadd.f32 0.112945676, %v938_v28 }
  0xf0   : > { %v987_v56 = vmul.f32 %v10124_v35, %v986_v4  ;;  %v10198_v37 = vadd.f32 1.0, %v1142_v53  ;;  %v1522_v51 = vpack.c.b16 %v1506_v3, %v1506_v3  ;;  %v905_v5 = vmul.f32 %v9252_v63, %v10164_v8  ;;  %vm10225_vm8 = vmor %vm1069_vm2, %vm1070_vm4 }
  0xf1   : > { %vm990_vm5 = vweird.f32 %v10124_v35  ;;  %v1089_v7 = vmul.f32 %v1088_v29, %v10015_v17  ;;  %v822_v26 = vmul.f32 %v821_v15, %v9842_v38  ;;  %v940_v44 = vmul.f32 %v939_v36, %v9872_v11 }
  0xf2   : > { %v1068_v21 = vadd.f32 %v10121_v59, %v1067_v20  ;;  %v1299_v10 = vadd.f32 0.112945676, %v1298_v40  ;;  %v1128_v34 = vadd.f32 0.05243302, %v1127_v13  ;;  %1539 = vrot.lane.b32.xlu0 %v1522_v51, %s9389_s29  ;;  %v906_v14 = vsub.f32 1.0, %v905_v5  ;;  %vm10236_vm9 = vmor %vm989_vm3, %vm990_vm5 }
  0xf3   : > { %v14239_v19 = vand.u32 2147483647, %v10080_v61  ;;  %9253 = vrcp.f32 %v10194_v57  ;;  %v1335_v6 = vadd.f32 0.001143296, %v1334_v25  ;;  %v10214_v38 = vadd.f32 1.0, %v822_v26 }
  0xf4   : > { %v941_v4 = vadd.f32 0.4994258, %v940_v44  ;;  %v988_v53 = vadd.f32 %v10124_v35, %v987_v56  ;;  %9255 = vrcp.f32 %v10198_v37  ;;  %v907_v27 = vmul.f32 %v9252_v63, %v906_v14 }
  0xf5   : > { %vm10209_vm6 = vcmp.eq.f32.partialorder %v14239_v19, 8.507059e+37  ;;  %v915_v23 = vand.u32 2147483648, %v10164_v8  ;;  %v1090_v20 = vadd.f32 0.18741608, %v1089_v7  ;;  %vm910_vm7 = vweird.f32 %v9252_v63 }
  0xf6   : > { %v913_v29 = vand.u32 2147483647, %v10164_v8  ;;  %9257 = vrcp.f32 %v10214_v38  ;;  %v993_v40 = vand.u32 2147483647, %v10085_v50  ;;  %v995_v13 = vand.u32 2147483648, %v10085_v50 }
  0xf7   : > { %v1129_v3 = vmul.f32 %v1128_v34, %v10024_v31  ;;  %v908_v15 = vadd.f32 %v9252_v63, %v907_v27  ;;  %v1206_v61 = vadd.f32 0.0036580483, %v10160_v16  ;;  %v1336_v36 = vmul.f32 %v1335_v6, %v10180_v55 }
  0xf8   : > { %vm909_vm10 = vweird.f32 %v10164_v8  ;;  %v942_v56 = vmul.f32 %v941_v4, %v9872_v11  ;;  %v1072_v51 = vsel %vm10225_vm8, %v10121_v59, %v1068_v21  ;;  %v10248_v5 = vmul.f32 2.1237322e-06, %v10091_v49 }
  0xf9   : > { %v1300_v50 = vmul.f32 %v1299_v10, %v10091_v49  ;;  %vm911_vm11 = vmor %vm909_vm10, %vm910_vm7  ;;  %v916_v7 = vor.u32 1.1754944e-38, %v915_v23  ;;  %v10252_v26 = vpop.eup %9253  ;;  %v992_v16 = vsel %vm10236_vm9, %v10124_v35, %v988_v53  ;;  %v1091_v11 = vmul.f32 %v1090_v20, %v10015_v17 }
  0xfa   : > { %v912_v8 = vsel %vm911_vm11, %v9252_v63, %v908_v15  ;;  %vm914_vm12 = vcmp.eq.f32.partialorder %v913_v29, 8.507059e+37  ;;  %v10258_v44 = vpop.eup %9255  ;;  %vm994_vm13 = vcmp.eq.f32.partialorder %v993_v40, 8.507059e+37  ;;  %v996_v59 = vor.u32 1.1754944e-38, %v995_v13 }
  0xfb   : > { %v1130_v21 = vadd.f32 0.18741608, %v1129_v3  ;;  %v917_v34 = vsel %vm914_vm12, %v916_v7, %v912_v8  ;;  %v10261_v14 = vmul.f32 %v1206_v61, %v10050_v1  ;;  %v1337_v19 = vadd.f32 0.014752088, %v1336_v36 }
  0xfc   : > { %v9258_v10 = vpop.eup %9257  ;;  %v918_v6 = vmul.f32 %v917_v34, %v9991_v33  ;;  %v10264_v4 = vadd.f32 1.0, %v942_v56  ;;  %v10269_v17 = vsel %vm10209_vm6, %v10174_v0, %v1072_v51  ;;  %v10271_v35 = vsel %vm994_vm13, %v996_v59, %v992_v16  ;;  %v635_v51 = vpop.permute.xlu0 %634 }
  0xfd   : > { %v1105_v63 = vmul.f32 %v10252_v26, %v10194_v57  ;;  %v825_v53 = vmul.f32 %v9258_v10, %v10214_v38  ;;  %v10276_v27 = vadd.f32 0.4994258, %v1300_v50  ;;  %v1092_v23 = vadd.f32 1.1283791, %v1091_v11 }
  0xfe   : > { %v1145_v33 = vmul.f32 %v10258_v44, %v10198_v37  ;;  %v8543_v20 = vclamps-f32 %v918_v6, 1.0  ;;  %v1115_v29 = vand.u32 2147483648, %v10194_v57  ;;  %v1131_v60 = vmul.f32 %v1130_v21, %v10024_v31 }
  0xff   : > { %v826_v0 = vsub.f32 1.0, %v825_v53  ;;  %9259 = vrcp.f32 %v10264_v4  ;;  %v543_v28 = vmul.f32 %v9788_v52, %v9765_v54  ;;  %v1338_v40 = vmul.f32 %v1337_v19, %v10180_v55 }
 0x100   : > { %v1443_v13 = vadd.f32 1.0, %v8543_v20  ;;  %v835_v3 = vand.u32 2147483648, %v10214_v38  ;;  %v1106_v15 = vsub.f32 1.0, %v1105_v63  ;;  %vm830_vm14 = vweird.f32 %v9258_v10 }
 0x101   : > { %v827_v25 = vmul.f32 %v9258_v10, %v826_v0  ;;  %v833_v61 = vand.u32 2147483647, %v10214_v38  ;;  %v10289_v36 = vmul.f32 %v1092_v23, %v9973_v32  ;;  %v1113_v31 = vand.u32 2147483647, %v10194_v57  ;;  %v747_v23 = vpop.permute.xlu1 %746 }
 0x102   : > { %v1146_v56 = vsub.f32 1.0, %v1145_v33  ;;  %v1459_v50 = vmul.f32 %v1443_v13, %v9920_v42  ;;  %vm1109_vm15 = vweird.f32 %v10194_v57  ;;  %v1116_v54 = vor.u32 1.1754944e-38, %v1115_v29 }
 0x103   : > { %v10294_v7 = vadd.f32 1.1283791, %v1131_v60  ;;  %v828_v16 = vadd.f32 %v9258_v10, %v827_v25  ;;  %vm829_vm1 = vweird.f32 %v10214_v38  ;;  %v1153_v11 = vand.u32 2147483647, %v10198_v37 }
 0x104   : > { %v1339_v8 = vadd.f32 0.112945676, %v1338_v40  ;;  %v1475_v59 = vpack.c.bf16 %v1459_v50, %v1459_v50  ;;  %vm831_vm2 = vmor %vm829_vm1, %vm830_vm14  ;;  %v836_v32 = vor.u32 1.1754944e-38, %v835_v3  ;;  %v1107_v34 = vmul.f32 %v10252_v26, %v1106_v15 }
 0x105   : > { %v9260_v21 = vpop.eup %9259  ;;  %v655_v19 = vmul.f32 %v635_v51, %v543_v28  ;;  %v832_v42 = vsel %vm831_vm2, %v9258_v10, %v828_v16  ;;  %vm834_vm3 = vcmp.eq.f32.partialorder %v833_v61, 8.507059e+37  ;;  %v1147_v6 = vmul.f32 %v10258_v44, %v1146_v56 }
 0x106   : > { %v1507_v63 = vunpack.c.l.b16 %v1475_v59  ;;  %v837_v53 = vsel %vm834_vm3, %v836_v32, %v832_v42  ;;  %v1214_v38 = vmul.f32 3.8918573e-05, %v10050_v1  ;;  %vm1110_vm4 = vweird.f32 %v10252_v26 }
 0x107   : > { %vm10303_vm5 = vcmp.eq.f32.partialorder %v1113_v31, 8.507059e+37  ;;  %vm1149_vm6 = vweird.f32 %v10198_v37  ;;  %v1155_v20 = vand.u32 2147483648, %v10198_v37  ;;  %v838_v10 = vmul.f32 %v837_v53, %v9985_v43  ;;  %vm10329_vm9 = vmor %vm1109_vm15, %vm1110_vm4 }
 0x108   : > { %vm10310_vm7 = vcmp.eq.f32.partialorder %v1153_v11, 8.507059e+37  ;;  %v1340_v60 = vmul.f32 %v1339_v8, %v10180_v55  ;;  %v1523_v0 = vpack.c.b16 %v1507_v63, %v1507_v63  ;;  %v945_v28 = vmul.f32 %v9260_v21, %v10264_v4 }
 0x109   : > { %v1108_v40 = vadd.f32 %v10252_v26, %v1107_v34  ;;  %v8541_v13 = vclamps-f32 %v838_v10, 1.0  ;;  %v10317_v3 = vadd.f32 %v747_v23, %v655_v19  ;;  %v8546_v15 = vclamps-f32 %v10185_v24, 1.0  ;;  %v14254_v24 = vld [vmem:[#allocation7_spill] sm:$0xff] }
 0x10a   : > { %v1148_v25 = vadd.f32 %v10258_v44, %v1147_v6  ;;  %vm1150_vm8 = vweird.f32 %v10258_v44  ;;  %1541 = vrot.lane.b32.xlu1 %v1523_v0, %s9389_s29  ;;  %v946_v43 = vsub.f32 1.0, %v945_v28  ;;  %v1215_v61 = vadd.f32 0.001143296, %v1214_v38 }
 0x10b   : > { %v1156_v31 = vor.u32 1.1754944e-38, %v1155_v20  ;;  %v1323_v56 = vmul.f32 2.1237322e-06, %v10180_v55  ;;  %v1441_v51 = vadd.f32 1.0, %v8541_v13  ;;  %v955_v50 = vand.u32 2147483648, %v10264_v4  ;;  %vm10339_vm11 = vmor %vm1149_vm6, %vm1150_vm8  ;;  %v735_v13 = vpop.permute.xlu0 %734 }
 0x10c   : > { %v1341_v16 = vadd.f32 0.4994258, %v1340_v60  ;;  %v947_v11 = vmul.f32 %v9260_v21, %v946_v43  ;;  %vm950_vm10 = vweird.f32 %v9260_v21  ;;  %v953_v8 = vand.u32 2147483647, %v10264_v4 }
 0x10d   : > { %v1112_v59 = vsel %vm10329_vm9, %v10252_v26, %v1108_v40  ;;  %v1457_v57 = vmul.f32 %v1441_v51, %v9917_v18  ;;  %v10345_v34 = vmul.f32 0.70710677, %v10317_v3  ;;  %v1446_v19 = vadd.f32 1.0, %v8546_v15 }
 0x10e   : > { %v1152_v42 = vsel %vm10339_vm11, %v10258_v44, %v1148_v25  ;;  %v948_v6 = vadd.f32 %v9260_v21, %v947_v11  ;;  %vm949_vm12 = vweird.f32 %v10264_v4  ;;  %v1216_v26 = vmul.f32 %v1215_v61, %v10050_v1 }
 0x10f   : > { %v1324_v37 = vadd.f32 0.00028619796, %v1323_v56  ;;  %v1473_v63 = vpack.c.bf16 %v1457_v57, %v1457_v57  ;;  %vm951_vm13 = vmor %vm949_vm12, %vm950_vm10  ;;  %v956_v53 = vor.u32 1.1754944e-38, %v955_v50  ;;  %v1462_v23 = vmul.f32 %v1446_v19, %v9964_v47 }
 0x110   : > { %v1117_v18 = vsel %vm10303_vm5, %v1116_v54, %v1112_v59  ;;  %v1342_v38 = vmul.f32 %v1341_v16, %v10180_v55  ;;  %v952_v20 = vsel %vm951_vm13, %v9260_v21, %v948_v6  ;;  %vm954_vm14 = vcmp.eq.f32.partialorder %v953_v8, 8.507059e+37 }
 0x111   : > { %v1157_v44 = vsel %vm10310_vm7, %v1156_v31, %v1152_v42  ;;  %v1505_v10 = vunpack.c.l.b16 %v1473_v63  ;;  %v1361_v4 = vmul.f32 %v10345_v34, %v10345_v34  ;;  %v957_v60 = vsel %vm954_vm14, %v956_v53, %v952_v20 }
 0x112   : > { %v1133_v0 = vmul.f32 %v10294_v7, %v9982_v48  ;;  %v958_v47 = vmul.f32 %v957_v60, %v10073_v12  ;;  %v1478_v28 = vpack.c.bf16 %v1462_v23, %v1462_v23  ;;  %v1217_v33 = vadd.f32 0.014752088, %v1216_v26 }
 0x113   : > { %v998_v54 = vmul.f32 %v10271_v35, %v10177_v39  ;;  %v1118_v21 = vmul.f32 %v1117_v18, %v10289_v36  ;;  %v1325_v29 = vmul.f32 %v1324_v37, %v10180_v55  ;;  %v1521_v40 = vpack.c.b16 %v1505_v10, %v1505_v10 }
 0x114   : > { %v1158_v15 = vmul.f32 %v1157_v44, %v1133_v0  ;;  %v10367_v25 = vadd.f32 1.0, %v1342_v38  ;;  %v8544_v43 = vclamps-f32 %v958_v47, 1.0  ;;  %v1510_v61 = vunpack.c.l.b16 %v1478_v28 }
 0x115   : > { %v1466_v48 = vmul.f32 %v10087_v2, %v9923_v45  ;;  %v1078_v12 = vmul.f32 %v10269_v17, %v10105_v9  ;;  %v1302_v39 = vmul.f32 %v10276_v27, %v10091_v49  ;;  %1537 = vrot.lane.b32.xlu2 %v1521_v40, %s9389_s29  ;;  %v10376_v35 = vmin.f32 %v1361_v4, 16.0 }
 0x116   : > { %v10379_v36 = vadd.f32 %v735_v13, %v9978_v41  ;;  %v1444_v7 = vadd.f32 1.0, %v8544_v43  ;;  %v1526_v31 = vpack.c.b16 %v1510_v61, %v1510_v61  ;;  %v1218_v56 = vmul.f32 %v1217_v33, %v10050_v1 }
 0x117   : > { %v1284_v51 = vadd.f32 0.00028619796, %v10248_v5  ;;  %v776_v45 = vmul.f32 0.5, %v9961_v58  ;;  %v8548_v2 = vclamps-f32 %v1118_v21, 1.0  ;;  %v8545_v9 = vclamps-f32 %v998_v54, 1.0 }
 0x118   : > { %v1208_v17 = vadd.f32 0.05243302, %v10261_v14  ;;  %v8549_v27 = vclamps-f32 %v1158_v15, 1.0  ;;  %v1326_v50 = vadd.f32 0.0036580483, %v1325_v29  ;;  %9261 = vrcp.f32 %v10367_v25  ;;  %1547 = vrot.lane.b32.xlu0 %v1526_v31, %s9389_s29 }
 0x119   : > { %v1374_v41 = vmul.f32 3.8918573e-05, %v10376_v35  ;;  %v1460_v16 = vmul.f32 %v1444_v7, %v14254_v24  ;;  %v1445_v11 = vadd.f32 1.0, %v8545_v9  ;;  %v8547_v8 = vclamps-f32 %v1078_v12, 1.0 }
 0x11a   : > { %v10389_v59 = vadd.f32 1.0, %v1302_v39  ;;  %v777_v58 = vmul.f32 0.5, %v9966_v30  ;;  %v10393_v5 = vmul.f32 0.70710677, %v10379_v36  ;;  %v1219_v14 = vadd.f32 0.112945676, %v1218_v56 }
 0x11b   : > { %v1448_v32 = vadd.f32 1.0, %v8548_v2  ;;  %v1476_v57 = vpack.c.bf16 %v1460_v16, %v1460_v16  ;;  %v1461_v19 = vmul.f32 %v1445_v11, %v10058_v46  ;;  %v1447_v42 = vadd.f32 1.0, %v8547_v8  ;;  %v14255_v30 = vld [vmem:[#allocation9_spill] sm:$0xff] }
 0x11c   : > { %v1285_v6 = vmul.f32 %v1284_v51, %v10091_v49  ;;  %v1449_v26 = vadd.f32 1.0, %v8549_v27  ;;  %v1327_v37 = vmul.f32 %v1326_v50, %v10180_v55  ;;  %v1220_v63 = vmul.f32 %v1219_v14, %v10050_v1 }
 0x11d   : > { %v1375_v53 = vadd.f32 0.001143296, %v1374_v41  ;;  %v1508_v23 = vunpack.c.l.b16 %v1476_v57  ;;  %v1477_v18 = vpack.c.bf16 %v1461_v19, %v1461_v19  ;;  %v1463_v38 = vmul.f32 %v1447_v42, %v14255_v30 }
 0x11e   : > { %v10400_v20 = vpop.eup %9261  ;;  %v1209_v44 = vmul.f32 %v1208_v17, %v10050_v1  ;;  %9263 = vrcp.f32 %v10389_v59  ;;  %v1241_v46 = vmul.f32 %v10393_v5, %v10393_v5  ;;  %v1221_v10 = vadd.f32 0.4994258, %v1220_v63 }
 0x11f   : > { %v1464_v4 = vmul.f32 %v1448_v32, %v776_v45  ;;  %v1524_v60 = vpack.c.b16 %v1508_v23, %v1508_v23  ;;  %v1482_v0 = vpack.c.bf16 %v1466_v48, %v1466_v48  ;;  %v1509_v47 = vunpack.c.l.b16 %v1477_v18 }
 0x120   : > { %v1286_v28 = vadd.f32 0.0036580483, %v1285_v6  ;;  %v1328_v33 = vadd.f32 0.05243302, %v1327_v37  ;;  %v1479_v54 = vpack.c.bf16 %v1463_v38, %v1463_v38  ;;  %v1222_v21 = vmul.f32 %v1221_v10, %v10050_v1 }
 0x121   : > { %v1465_v29 = vmul.f32 %v1449_v26, %v777_v58  ;;  %v1345_v40 = vmul.f32 %v10400_v20, %v10367_v25  ;;  %v1376_v13 = vmul.f32 %v1375_v53, %v10376_v35  ;;  %1543 = vrot.lane.b32.xlu1 %v1524_v60, %s9389_s29  ;;  %v1525_v15 = vpack.c.b16 %v1509_v47, %v1509_v47  ;;  %v14256_v60 = vld [vmem:[#allocation10_spill] sm:$0xff] }
 0x122   : > { %v10411_v43 = vmin.f32 %v1241_v46, 16.0  ;;  %v1511_v61 = vunpack.c.l.b16 %v1479_v54  ;;  %v10413_v12 = vadd.f32 1.0, %v1222_v21  ;;  %v1210_v48 = vadd.f32 0.18741608, %v1209_v44 }
 0x123   : > { %v1514_v39 = vunpack.c.l.b16 %v1482_v0  ;;  %1545 = vrot.lane.b32.xlu0 %v1525_v15, %s9389_s29  ;;  %v1480_v7 = vpack.c.bf16 %v1464_v4, %v1464_v4  ;;  %v1287_v56 = vmul.f32 %v1286_v28, %v10091_v49  ;;  %v1329_v51 = vmul.f32 %v1328_v33, %v10180_v55 }
 0x124   : > { %v10416_v31 = vpop.eup %9263  ;;  %v1527_v45 = vpack.c.b16 %v1511_v61, %v1511_v61  ;;  %9265 = vrcp.f32 %v10413_v12  ;;  %v1346_v2 = vsub.f32 1.0, %v1345_v40  ;;  %v1377_v9 = vadd.f32 0.014752088, %v1376_v13 }
 0x125   : > { %v1481_v17 = vpack.c.bf16 %v1465_v29, %v1465_v29  ;;  %v1254_v27 = vmul.f32 3.8918573e-05, %v10411_v43  ;;  %v1512_v50 = vunpack.c.l.b16 %v1480_v7  ;;  %v1211_v41 = vmul.f32 %v1210_v48, %v10050_v1 }
 0x126   : > { %1549 = vrot.lane.b32.xlu2 %v1527_v45, %s9389_s29  ;;  %v1530_v24 = vpack.c.b16 %v1514_v39, %v1514_v39  ;;  %v1288_v16 = vadd.f32 0.05243302, %v1287_v56  ;;  %v1305_v11 = vmul.f32 %v10416_v31, %v10389_v59  ;;  %v1330_v8 = vadd.f32 0.18741608, %v1329_v51 }
 0x127   : > { %v1347_v58 = vmul.f32 %v10400_v20, %v1346_v2  ;;  %v1378_v14 = vmul.f32 %v1377_v9, %v10376_v35  ;;  %v1513_v32 = vunpack.c.l.b16 %v1481_v17  ;;  %v1255_v19 = vadd.f32 0.001143296, %v1254_v27  ;;  %v14259_v27 = vld [vmem:[#allocation8_spill] sm:$0xff] }
 0x128   : > { %v1528_v42 = vpack.c.b16 %v1512_v50, %v1512_v50  ;;  %v1212_v6 = vadd.f32 1.1283791, %v1211_v41  ;;  %v1289_v1 = vmul.f32 %v1288_v16, %v10091_v49  ;;  %v1306_v37 = vsub.f32 1.0, %v1305_v11 }
 0x129   : > { %1555 = vrot.lane.b32.xlu1 %v1530_v24, %s9389_s29  ;;  %v1331_v63 = vmul.f32 %v1330_v8, %v10180_v55  ;;  %vm1350_vm15 = vweird.f32 %v10400_v20  ;;  %v1348_v53 = vadd.f32 %v10400_v20, %v1347_v58  ;;  %v1379_v23 = vadd.f32 0.112945676, %v1378_v14 }
 0x12a   : > { %v9266_v57 = vpop.eup %9265  ;;  %v1529_v30 = vpack.c.b16 %v1513_v32, %v1513_v32  ;;  %vm1349_vm1 = vweird.f32 %v10367_v25  ;;  %v1355_v38 = vand.u32 2147483648, %v10367_v25  ;;  %v1256_v44 = vmul.f32 %v1255_v19, %v10411_v43 }
 0x12b   : > { %v1225_v26 = vmul.f32 %v9266_v57, %v10413_v12  ;;  %v1235_v46 = vand.u32 2147483648, %v10413_v12  ;;  %v1353_v10 = vand.u32 2147483647, %v10367_v25  ;;  %vm1230_vm2 = vweird.f32 %v9266_v57  ;;  %vm10444_vm3 = vmor %vm1349_vm1, %vm1350_vm15 }
 0x12c   : > { %v1233_v4 = vand.u32 2147483647, %v10413_v12  ;;  %v1213_v0 = vmul.f32 %v1212_v6, %v14256_v60  ;;  %v1332_v47 = vadd.f32 1.1283791, %v1331_v63  ;;  %v1352_v33 = vsel %vm10444_vm3, %v10400_v20, %v1348_v53 }
 0x12d   : > { %v1226_v18 = vsub.f32 1.0, %v1225_v26  ;;  %v1380_v54 = vmul.f32 %v1379_v23, %v10376_v35  ;;  %vm1229_vm4 = vweird.f32 %v10413_v12  ;;  %v1290_v21 = vadd.f32 0.18741608, %v1289_v1  ;;  %v14260_v1 = vld [vmem:[#allocation12_spill] sm:$0xff] }
 0x12e   : > { %1551 = vrot.lane.b32.xlu2 %v1528_v42, %s9389_s29  ;;  %v1356_v29 = vor.u32 1.1754944e-38, %v1355_v38  ;;  %v1257_v40 = vadd.f32 0.014752088, %v1256_v44  ;;  %vm1231_vm5 = vmor %vm1229_vm4, %vm1230_vm2  ;;  %v1236_v13 = vor.u32 1.1754944e-38, %v1235_v46  ;;  %v1307_v15 = vmul.f32 %v10416_v31, %v1306_v37 }
 0x12f   : > { %v1227_v55 = vmul.f32 %v9266_v57, %v1226_v18  ;;  %vm1354_vm6 = vcmp.eq.f32.partialorder %v1353_v10, 8.507059e+37  ;;  %vm1234_vm7 = vcmp.eq.f32.partialorder %v1233_v4, 8.507059e+37  ;;  %v1333_v20 = vmul.f32 %v1332_v47, %v10135_v22 }
 0x130   : > { %v1357_v48 = vsel %vm1354_vm6, %v1356_v29, %v1352_v33  ;;  %v1381_v7 = vadd.f32 0.4994258, %v1380_v54  ;;  %v1291_v12 = vmul.f32 %v1290_v21, %v10091_v49  ;;  %v1258_v51 = vmul.f32 %v1257_v40, %v10411_v43 }
 0x131   : > { %v1228_v25 = vadd.f32 %v9266_v57, %v1227_v55  ;;  %1553 = vrot.lane.b32.xlu1 %v1529_v30, %s9389_s29  ;;  %v1363_v45 = vmul.f32 2.1237322e-06, %v10376_v35  ;;  %v1308_v2 = vadd.f32 %v10416_v31, %v1307_v15  ;;  %vm1310_vm8 = vweird.f32 %v10416_v31 }
 0x132   : > { %v1358_v9 = vmul.f32 %v1357_v48, %v1333_v20  ;;  %v779_v50 = vmul.f32 0.5, %v14259_v27  ;;  %v1315_v41 = vand.u32 2147483648, %v10389_v59  ;;  %vm1309_vm9 = vweird.f32 %v10389_v59 }
 0x133   : > { %v1232_v61 = vsel %vm1231_vm5, %v9266_v57, %v1228_v25  ;;  %v1313_v22 = vand.u32 2147483647, %v10389_v59  ;;  %v1382_v49 = vmul.f32 %v1381_v7, %v10376_v35  ;;  %vm1311_vm10 = vmor %vm1309_vm9, %vm1310_vm8  ;;  %v1259_v16 = vadd.f32 0.112945676, %v1258_v51  ;;  %v14261_v25 = vld [vmem:[#allocation11_spill] sm:$0xff] }
 0x134   : > { %v1237_v39 = vsel %vm1234_vm7, %v1236_v13, %v1232_v61  ;;  %v1364_v11 = vadd.f32 0.00028619796, %v1363_v45  ;;  %v1292_v8 = vadd.f32 1.1283791, %v1291_v12  ;;  %v1312_v58 = vsel %vm1311_vm10, %v10416_v31, %v1308_v2 }
 0x135   : > { %v1238_v56 = vmul.f32 %v1237_v39, %v1213_v0  ;;  %v8554_v14 = vclamps-f32 %v1358_v9, 1.0  ;;  %v1316_v57 = vor.u32 1.1754944e-38, %v1315_v41  ;;  %vm1314_vm11 = vcmp.eq.f32.partialorder %v1313_v22, 8.507059e+37 }
 0x136   : > { %v1383_v19 = vadd.f32 1.0, %v1382_v49  ;;  %v1260_v26 = vmul.f32 %v1259_v16, %v10411_v43  ;;  %v1365_v59 = vmul.f32 %v1364_v11, %v10376_v35  ;;  %v1293_v37 = vmul.f32 %v1292_v8, %v14260_v1 }
 0x137   : > { %v8551_v17 = vclamps-f32 %v1238_v56, 1.0  ;;  %v1317_v6 = vsel %vm1314_vm11, %v1316_v57, %v1312_v58  ;;  %v1454_v63 = vadd.f32 1.0, %v8554_v14  ;;  %v782_v18 = vmul.f32 0.5, %v10117_v62 }
 0x138   : > { %v1318_v23 = vmul.f32 %v1317_v6, %v1293_v37  ;;  %9267 = vrcp.f32 %v1383_v19  ;;  %v1261_v30 = vadd.f32 0.4994258, %v1260_v26  ;;  %v1366_v38 = vadd.f32 0.0036580483, %v1365_v59 }
 0x139   : > { %v1451_v24 = vadd.f32 1.0, %v8551_v17  ;;  %v1470_v44 = vmul.f32 %v1454_v63, %v782_v18  ;;  %v1243_v46 = vmul.f32 2.1237322e-06, %v10411_v43  ;;  %v781_v21 = vmul.f32 0.5, %v14261_v25 }
 0x13a   : > { %v8553_v10 = vclamps-f32 %v1318_v23, 1.0  ;;  %v1262_v55 = vmul.f32 %v1261_v30, %v10411_v43  ;;  %v1367_v4 = vmul.f32 %v1366_v38, %v10376_v35  ;;  %v14262_v40 = vmov 0  }
 0x13b   : > { %v1467_v32 = vmul.f32 %v1451_v24, %v779_v50  ;;  %v1244_v0 = vadd.f32 0.00028619796, %v1243_v46  ;;  %v1486_v47 = vpack.c.bf16 %v1470_v44, %v1470_v44  ;;  %v1395_v41 = vand.u32 2147483648, %v1383_v19 }
 0x13c   : > { %v1453_v28 = vadd.f32 1.0, %v8553_v10  ;;  %v1263_v33 = vadd.f32 1.0, %v1262_v55  ;;  %v1368_v62 = vadd.f32 0.05243302, %v1367_v4  ;;  %vm1389_vm13 = vweird.f32 %v1383_v19 }
 0x13d   : > { %v1483_v42 = vpack.c.bf16 %v1467_v32, %v1467_v32  ;;  %v1245_v29 = vmul.f32 %v1244_v0, %v10411_v43  ;;  %v1518_v13 = vunpack.c.l.b16 %v1486_v47  ;;  %v1393_v22 = vand.u32 2147483647, %v1383_v19 }
 0x13e   : > { %v9268_v60 = vpop.eup %9267  ;;  %v1469_v15 = vmul.f32 %v1453_v28, %v781_v21  ;;  %9269 = vrcp.f32 %v1263_v33  ;;  %v1369_v61 = vmul.f32 %v1368_v62, %v10376_v35  ;;  %v1396_v58 = vor.u32 1.1754944e-38, %v1395_v41 }
 0x13f   : > { %v1515_v53 = vunpack.c.l.b16 %v1483_v42  ;;  %v1385_v54 = vmul.f32 %v9268_v60, %v1383_v19  ;;  %v1246_v39 = vadd.f32 0.0036580483, %v1245_v29  ;;  %v1534_v20 = vpack.c.b16 %v1518_v13, %v1518_v13 }
 0x140   : > { %v1485_v7 = vpack.c.bf16 %v1469_v15, %v1469_v15  ;;  %v1370_v56 = vadd.f32 0.18741608, %v1369_v61  ;;  %vm1390_vm12 = vweird.f32 %v9268_v60  ;;  %vm1394_vm15 = vcmp.eq.f32.partialorder %v1393_v22, 8.507059e+37 }
 0x141   : > { %v1531_v31 = vpack.c.b16 %v1515_v53, %v1515_v53  ;;  %v1386_v48 = vsub.f32 1.0, %v1385_v54  ;;  %v1247_v51 = vmul.f32 %v1246_v39, %v10411_v43  ;;  %vm1391_vm14 = vmor %vm1389_vm13, %vm1390_vm12  ;;  %v1275_v26 = vand.u32 2147483648, %v1263_v33 }
 0x142   : > { %v1517_v2 = vunpack.c.l.b16 %v1485_v7  ;;  %v1371_v9 = vmul.f32 %v1370_v56, %v10376_v35  ;;  %vm1269_vm2 = vweird.f32 %v1263_v33  ;;  %v1273_v1 = vand.u32 2147483647, %v1263_v33 }
 0x143   : > { %1557 = vrot.lane.b32.xlu0 %v1531_v31, %s9389_s29  ;;  %v1387_v12 = vmul.f32 %v9268_v60, %v1386_v48  ;;  %v1248_v27 = vadd.f32 0.05243302, %v1247_v51  ;;  %vm1569_vm3 = vcmask 7168   ;;  %vm1603_vm5 = vcmask 138240  }
 0x144   : > { %v9270_v45 = vpop.eup %9269  ;;  %v1533_v49 = vpack.c.b16 %v1517_v2, %v1517_v2  ;;  %v1372_v24 = vadd.f32 1.1283791, %v1371_v9  ;;  %v1276_v18 = vor.u32 1.1754944e-38, %v1275_v26  ;;  %vm1274_vm6 = vcmp.eq.f32.partialorder %v1273_v1, 8.507059e+37 }
 0x145   : > { %v1388_v17 = vadd.f32 %v9268_v60, %v1387_v12  ;;  %v1265_v50 = vmul.f32 %v9270_v45, %v1263_v33  ;;  %v1249_v11 = vmul.f32 %v1248_v27, %v10411_v43  ;;  %vm1270_vm1 = vweird.f32 %v9270_v45 }
 0x146   : > { %v1373_v35 = vmul.f32 %v1372_v24, %v10345_v34  ;;  %vm1271_vm4 = vmor %vm1269_vm2, %vm1270_vm1  ;;  %v783_v30 = vmul.f32 0.5, %v10317_v3  ;;  %v780_v33 = vmul.f32 0.5, %v10379_v36  ;;  %vm1660_vm7 = vcmask 1041408  }
 0x147   : > { %v1392_v16 = vsel %vm1391_vm14, %v9268_v60, %v1388_v17  ;;  %v1266_v8 = vsub.f32 1.0, %v1265_v50  ;;  %v1250_v32 = vadd.f32 0.18741608, %v1249_v11  ;;  %vm1656_vm8 = vcmask 31744  }
 0x148   : > { %v1397_v14 = vsel %vm1394_vm15, %v1396_v58, %v1392_v16 }
 0x149   : > { %v1267_v57 = vmul.f32 %v9270_v45, %v1266_v8  ;;  %v1398_v42 = vmul.f32 %v1397_v14, %v1373_v35  ;;  %v1251_v6 = vmul.f32 %v1250_v32, %v10411_v43 }
 0x14b   : > { %1654 = vrot.lane.b32.xlu0 %v14262_v40, %s9390_s14  ;;  %v1268_v19 = vadd.f32 %v9270_v45, %v1267_v57  ;;  %v8555_v59 = vclamps-f32 %v1398_v42, 1.0  ;;  %v1252_v53 = vadd.f32 1.1283791, %v1251_v6 }
 0x14d   : > { %v1272_v23 = vsel %vm1271_vm4, %v9270_v45, %v1268_v19  ;;  %v1455_v31 = vadd.f32 1.0, %v8555_v59  ;;  %v1253_v38 = vmul.f32 %v1252_v53, %v10393_v5 }
 0x14e   : > { %v1277_v43 = vsel %vm1274_vm6, %v1276_v18, %v1272_v23 }
 0x14f   : > { %v1471_v44 = vmul.f32 %v1455_v31, %v783_v30  ;;  %v1278_v46 = vmul.f32 %v1277_v43, %v1253_v38  ;;  %v9203_v31 = vld [vmem:[%s14164_s6 + $0xf] ss:$0 sm:$0xff]  ;;  %v8559_v43 = vld [vmem:[%s14159_s1 + $0x24] sm:$0x3]  ;;  %v8557_v30 = vld [vmem:[%s14159_s1 + $0x20] sm:$0x3] }
 0x150   : > { %v9204_v38 = vld [vmem:[%s14163_s5 + $0xf] ss:$0 sm:$0xff] }
 0x151   : > { %v1487_v4 = vpack.c.bf16 %v1471_v44, %v1471_v44  ;;  %v8552_v60 = vclamps-f32 %v1278_v46, 1.0  ;;  %v8558_v44 = vld [vmem:[%s14159_s1 + $0x22] sm:$0x3] }
 0x153   : > { %1563 = vrot.lane.b32.xlu0 %v1534_v20, %s9389_s29  ;;  %v1519_v47 = vunpack.c.l.b16 %v1487_v4  ;;  %v1452_v28 = vadd.f32 1.0, %v8552_v60 }
 0x155   : > { %v1535_v3 = vpack.c.b16 %v1519_v47, %v1519_v47  ;;  %v1468_v62 = vmul.f32 %v1452_v28, %v780_v33 }
 0x157   : > { %v1484_v25 = vpack.c.bf16 %v1468_v62, %v1468_v62 }
 0x159   : > { %v1516_v15 = vunpack.c.l.b16 %v1484_v25 }
 0x15b   : > { %1561 = vrot.lane.b32.xlu0 %v1533_v49, %s9389_s29  ;;  %v1532_v61 = vpack.c.b16 %v1516_v15, %v1516_v15  ;;  %v8563_v15 = vld [vmem:[%s14159_s1 + $0x2c] sm:$0x3] }
 0x164   : > { %v1540_v37 = vpop.permute.xlu0 %1539 }
 0x165   : > { %v1574_v63 = vsel %vm1569_vm3, 0, %v1540_v37 }
 0x166   : > { %v10489_v34 = vsel %vm1603_vm5, %v1574_v63, 0 }
 0x167   : > { %1700 = vrot.lane.b32.xlu2 %v10489_v34, %s9390_s14 }
 0x16f   : > { %v1538_v10 = vpop.permute.xlu2 %1537 }
 0x170   : > { %v1572_v55 = vsel %vm1569_vm3, 0, %v1538_v10 }
 0x171   : > { %v10497_v0 = vsel %vm1603_vm5, %v1572_v55, 0 }
 0x172   : > { %1678 = vrot.lane.b32.xlu2 %v10497_v0, %s9390_s14 }
 0x17a   : > { %1565 = vrot.lane.b32.xlu2 %v1535_v3, %s9389_s29 }
 0x17c   : > { %v1542_v5 = vpop.permute.xlu1 %1541 }
 0x17d   : > { %v1576_v54 = vsel %vm1569_vm3, 0, %v1542_v5 }
 0x17e   : > { %v10505_v21 = vsel %vm1603_vm5, %v1576_v54, 0 }
 0x17f   : > { %1722 = vrot.lane.b32.xlu1 %v10505_v21, %s9390_s14 }
 0x180   : > { %v1550_v29 = vpop.permute.xlu2 %1549 }
 0x181   : > { %v1584_v13 = vsel %vm1569_vm3, 0, %v1550_v29 }
 0x182   : > { %v10511_v36 = vsel %vm1603_vm5, %v1584_v13, 0 }
 0x183   : > { %1810 = vrot.lane.b32.xlu0 %v10511_v36, %s9390_s14 }
 0x187   : > { %1559 = vrot.lane.b32.xlu1 %v1532_v61, %s9389_s29 }
 0x188   : > { %v1552_v48 = vpop.permute.xlu2 %1551 }
 0x189   : > { %v1586_v39 = vsel %vm1569_vm3, 0, %v1552_v48 }
 0x18a   : > { %v1548_v20 = vpop.permute.xlu0 %1547  ;;  %v10518_v7 = vsel %vm1603_vm5, %v1586_v39, 0 }
 0x18b   : > { %v1582_v56 = vsel %vm1569_vm3, 0, %v1548_v20  ;;  %1832 = vrot.lane.b32.xlu0 %v10518_v7, %s9390_s14  ;;  %v8560_v20 = vld [vmem:[%s14159_s1 + $0x26] sm:$0x3] }
 0x18c   : > { %v10524_v12 = vsel %vm1603_vm5, %v1582_v56, 0 }
 0x18f   : > { %1788 = vrot.lane.b32.xlu1 %v10524_v12, %s9390_s14 }
 0x193   : > { %v1544_v51 = vpop.permute.xlu1 %1543 }
 0x194   : > { %v1578_v45 = vsel %vm1569_vm3, 0, %v1544_v51  ;;  %v8562_v51 = vld [vmem:[%s14159_s1 + $0x2a] sm:$0x3] }
 0x195   : > { %v10530_v2 = vsel %vm1603_vm5, %v1578_v45, 0  ;;  %v1546_v9 = vpop.permute.xlu0 %1545  ;;  %v8567_v45 = vld [vmem:[%s14159_s1 + $0x34] sm:$0x3] }
 0x196   : > { %1744 = vrot.lane.b32.xlu2 %v10530_v2, %s9390_s14  ;;  %v1580_v17 = vsel %vm1569_vm3, 0, %v1546_v9  ;;  %v8564_v9 = vld [vmem:[%s14159_s1 + $0x2e] sm:$0x3] }
 0x197   : > { %v10536_v27 = vsel %vm1603_vm5, %v1580_v17, 0  ;;  %v8566_v17 = vld [vmem:[%s14159_s1 + $0x32] sm:$0x3] }
 0x198   : > { %1766 = vrot.lane.b32.xlu1 %v10536_v27, %s9390_s14 }
 0x19b   : > { %v1556_v50 = vpop.permute.xlu1 %1555 }
 0x19c   : > { %v1590_v41 = vsel %vm1569_vm3, 0, %v1556_v50 }
 0x19d   : > { %v10542_v22 = vsel %vm1603_vm5, %v1590_v41, 0 }
 0x19e   : > { %1876 = vrot.lane.b32.xlu2 %v10542_v22, %s9390_s14 }
 0x1a3   : > { %v1554_v49 = vpop.permute.xlu1 %1553 }
 0x1a4   : > { %v1588_v24 = vsel %vm1569_vm3, 0, %v1554_v49  ;;  %v8568_v49 = vld [vmem:[%s14159_s1 + $0x36] sm:$0x3] }
 0x1a5   : > { %v10548_v16 = vsel %vm1603_vm5, %v1588_v24, 0 }
 0x1a6   : > { %1854 = vrot.lane.b32.xlu2 %v10548_v16, %s9390_s14 }
 0x1b5   : > { %v1558_v11 = vpop.permute.xlu0 %1557 }
 0x1b6   : > { %v1592_v8 = vsel %vm1569_vm3, 0, %v1558_v11 }
 0x1b7   : > { %v10554_v58 = vsel %vm1603_vm5, %v1592_v8, 0  ;;  %v10714_v8 = vsel %vm1660_vm7, %v10505_v21, 0 }
 0x1b8   : > { %1898 = vrot.lane.b32.xlu1 %v10554_v58, %s9390_s14 }
 0x1bd   : > { %v1655_v14 = vpop.permute.xlu0 %1654 }
 0x1be   : > { %v10559_v35 = vsel %vm1660_vm7, %v1655_v14, 0 }
 0x1bf   : > { %14263 = vst [vmem:[#allocation7_spill] sm:$0xff] %v10559_v35  ;;  %1671 = vmatpush.bf16.msra.mxu0 %v10559_v35  ;;  %v8618_v35 = vld [vmem:[%s14159_s1 + $0x5a] sm:$0x3] }
 0x1c1   : > { %v1701_v32 = vpop.permute.xlu2 %1700 }
 0x1c2   : > { %v10563_v57 = vsel %vm1660_vm7, %v1701_v32, 0  ;;  %8573 = vmatmul.msk.bf16.vlgmr.msra.gmra.mxu0 %vm1656_vm8, %v8557_v30  ;;  %v14274_v30 = vld [vmem:[#allocation6_spill] sm:$0xff] }
 0x1c3   : > { %14264 = vst [vmem:[#allocation9_spill] sm:$0xff] %v10563_v57  ;;  %1715 = vmatpush.bf16.msra.mxu2 %v10563_v57 }
 0x1c5   : > { %v1564_v42 = vpop.permute.xlu0 %1563 }
 0x1c6   : > { %v1598_v6 = vsel %vm1569_vm3, 0, %v1564_v42  ;;  %8575 = vmatmul.msk.bf16.vlgmr.msra.gmra.mxu2 %vm1656_vm8, %v8559_v43  ;;  %v8561_v42 = vld [vmem:[%s14159_s1 + $0x28] sm:$0x3] }
 0x1c7   : > { %v10568_v19 = vsel %vm1603_vm5, %v1598_v6, 0  ;;  %v10726_v6 = vsel %vm1660_vm7, %v10489_v34, 0 }
 0x1c8   : > { %1964 = vrot.lane.b32.xlu0 %v10568_v19, %s9390_s14  ;;  %14270 = vst [vmem:[#allocation14_spill] sm:$0xff] %v10726_v6 }
 0x1cc   : > { %v1679_v26 = vpop.permute.xlu2 %1678 }
 0x1cd   : > { %v1562_v59 = vpop.permute.xlu0 %1561  ;;  %v10573_v1 = vsel %vm1660_vm7, %v1679_v26, 0  ;;  %v8572_v26 = vld [vmem:[%s14159_s1 + $0x3e] sm:$0x3] }
 0x1ce   : > { %v1596_v37 = vsel %vm1569_vm3, 0, %v1562_v59  ;;  %1693 = vmatpush.bf16.msra.mxu1 %v10573_v1  ;;  %v10739_v59 = vsel %vm1660_vm7, %v10524_v12, 0 }
 0x1cf   : > { %v10578_v63 = vsel %vm1603_vm5, %v1596_v37, 0  ;;  %14271 = vst [vmem:[#allocation15_spill] sm:$0xff] %v10739_v59 }
 0x1d0   : > { %1942 = vrot.lane.b32.xlu0 %v10578_v63, %s9390_s14 }
 0x1d1   : > { %8574 = vmatmul.msk.bf16.vlgmr.msra.gmra.mxu1 %vm1656_vm8, %v8558_v44 }
 0x1d4   : > { %v1566_v53 = vpop.permute.xlu2 %1565 }
 0x1d5   : > { %v1600_v23 = vsel %vm1569_vm3, 0, %v1566_v53 }
 0x1d6   : > { %v10584_v18 = vsel %vm1603_vm5, %v1600_v23, 0 }
 0x1d7   : > { %1986 = vrot.lane.b32.xlu2 %v10584_v18, %s9390_s14 }
 0x1d8   : > { %2375 = vrot.lane.b32.xlu0 %v10505_v21, %s9391_s17  ;;  %v8571_v21 = vld [vmem:[%s14159_s1 + $0x3c] sm:$0x3] }
 0x1df   : > { %2312 = vrot.lane.b32.xlu2 %v14262_v40, %s9391_s17 }
 0x1e0   : > { %750 = vperm.xlu0 %9170, %v9203_v31   ;;  %v10765_v31 = vsel %vm1660_vm7, %v10536_v27, 0 }
 0x1e1   : > { %14273 = vst [vmem:[#allocation17_spill] sm:$0xff] %v10765_v31 }
 0x1e7   : > { %638 = vperm.xlu2 %9172, %v9204_v38   ;;  %v544_v38 = vmul.f32 %v9788_v52, %v14274_v30  ;;  %v10784_v52 = vsel %vm1660_vm7, %v10554_v58, 0 }
 0x1e8   : > { %2459 = vrot.lane.b32.xlu0 %v10511_v36, %s9391_s17  ;;  %14276 = vst [vmem:[#allocation18_spill] sm:$0xff] %v10784_v52 }
 0x1ef   : > { %2396 = vrot.lane.b32.xlu2 %v10530_v2, %s9391_s17 }
 0x1f0   : > { %2480 = vrot.lane.b32.xlu0 %v10518_v7, %s9391_s17  ;;  %v1745_v46 = vpop.permute.xlu2 %1744 }
 0x1f1   : > { %v10617_v10 = vsel %vm1660_vm7, %v1745_v46, 0  ;;  %v1723_v55 = vpop.permute.xlu1 %1722  ;;  %v1623_v46 = vld [vmem:[%s14159_s1 + $0x6] sm:$0x3] }
 0x1f2   : > { %1759 = vmatpush.bf16.msrb.mxu0 %v10617_v10  ;;  %v10621_v4 = vsel %vm1660_vm7, %v1723_v55, 0 }
 0x1f3   : > { %14265 = vst [vmem:[#allocation10_spill] sm:$0xff] %v10621_v4  ;;  %1737 = vmatpush.bf16.msra.mxu3 %v10621_v4 }
 0x1f5   : > { %v1811_v60 = vpop.permute.xlu0 %1810  ;;  %8577 = vmatmul.msk.bf16.vlgmr.msrb.gmra.mxu0 %vm1656_vm8, %v8561_v42 }
 0x1f6   : > { %v10625_v47 = vsel %vm1660_vm7, %v1811_v60, 0  ;;  %8576 = vmatmul.msk.bf16.vlgmr.msra.gmra.mxu3 %vm1656_vm8, %v8560_v20  ;;  %v8565_v60 = vld [vmem:[%s14159_s1 + $0x30] sm:$0x3]  ;;  %v1627_v20 = vld [vmem:[%s14159_s1 + $0xe] sm:$0x3] }
 0x1f7   : > { %14266 = vst [vmem:[#allocation8_spill] sm:$0xff] %v10625_v47  ;;  %1825 = vmatpush.bf16.msrb.mxu3 %v10625_v47  ;;  %2522 = vrot.lane.b32.xlu2 %v10542_v22, %s9391_s17 }
 0x1f8   : > { %2606 = vrot.lane.b32.xlu0 %v10568_v19, %s9391_s17  ;;  %v1877_v54 = vpop.permute.xlu2 %1876 }
 0x1f9   : > { %v1560_v28 = vpop.permute.xlu1 %1559  ;;  %v10650_v13 = vsel %vm1660_vm7, %v1877_v54, 0 }
 0x1fa   : > { %v1594_v33 = vsel %vm1569_vm3, 0, %v1560_v28 }
 0x1fb   : > { %v10634_v3 = vsel %vm1603_vm5, %v1594_v33, 0  ;;  %v1621_v33 = vld [vmem:[%s14159_s1 + $0x2] sm:$0x3] }
 0x1fc   : > { %1920 = vrot.lane.b32.xlu1 %v10634_v3, %s9390_s14 }
 0x1fd   : > { %v1833_v62 = vpop.permute.xlu0 %1832 }
 0x1fe   : > { %v10639_v5 = vsel %vm1660_vm7, %v1833_v62, 0  ;;  %v10803_v62 = vsel %vm1660_vm7, %v10548_v16, 0 }
 0x1ff   : > { %14267 = vst [vmem:[#allocation12_spill] sm:$0xff] %v10639_v5  ;;  %1847 = vmatpush.bf16.msra.mxu0 %v10639_v5  ;;  %2501 = vrot.lane.b32.xlu2 %v10548_v16, %s9391_s17  ;;  %v10817_v16 = vsel %vm1660_vm7, %v10568_v19, 0  ;;  %v1625_v19 = vld [vmem:[%s14159_s1 + $0xa] sm:$0x3] }
 0x200   : > { %2585 = vrot.lane.b32.xlu0 %v10578_v63, %s9391_s17  ;;  %v1855_v61 = vpop.permute.xlu2 %1854  ;;  %14277 = vst [vmem:[#allocation19_spill] sm:$0xff] %v10817_v16 }
 0x201   : > { %v1789_v25 = vpop.permute.xlu1 %1788  ;;  %v10669_v56 = vsel %vm1660_vm7, %v1855_v61, 0 }
 0x202   : > { %v10647_v29 = vsel %vm1660_vm7, %v1789_v25, 0 }
 0x203   : > { %14268 = vst [vmem:[#allocation11_spill] sm:$0xff] %v10647_v29  ;;  %1803 = vmatpush.bf16.msrb.mxu2 %v10647_v29 }
 0x204   : > { %2354 = vrot.lane.b32.xlu1 %v10489_v34, %s9391_s17  ;;  %v10744_v34 = vsel %vm1660_vm7, %v10511_v36, 0  ;;  %v8570_v36 = vld [vmem:[%s14159_s1 + $0x3a] sm:$0x3] }
 0x205   : > { %14272 = vst [vmem:[#allocation16_spill] sm:$0xff] %v10744_v34  ;;  %8581 = vmatmul.msk.bf16.vlgmr.msra.gmra.mxu0 %vm1656_vm8, %v8565_v60 }
 0x206   : > { %8579 = vmatmul.msk.bf16.vlgmr.msrb.gmra.mxu2 %vm1656_vm8, %v8563_v15  ;;  %8580 = vmatmul.msk.bf16.vlgmr.msrb.gmra.mxu3 %vm1656_vm8, %v8564_v9 }
 0x207   : > { %1891 = vmatpush.bf16.msra.mxu2 %v10650_v13  ;;  %2627 = vrot.lane.b32.xlu2 %v10584_v18, %s9391_s17 }
 0x20a   : > { %v1767_v48 = vpop.permute.xlu1 %1766 }
 0x20b   : > { %v10663_v39 = vsel %vm1660_vm7, %v1767_v48, 0  ;;  %v1626_v48 = vld [vmem:[%s14159_s1 + $0xc] sm:$0x3] }
 0x20c   : > { %1781 = vmatpush.bf16.msrb.mxu1 %v10663_v39  ;;  %2333 = vrot.lane.b32.xlu1 %v10497_v0, %s9391_s17 }
 0x20f   : > { %8578 = vmatmul.msk.bf16.vlgmr.msrb.gmra.mxu1 %vm1656_vm8, %v8562_v51 }
 0x210   : > { %1869 = vmatpush.bf16.msra.mxu1 %v10669_v56 }
 0x214   : > { %2438 = vrot.lane.b32.xlu1 %v10524_v12, %s9391_s17  ;;  %v10756_v12 = vsel %vm1660_vm7, %v10497_v0, 0  ;;  %v1622_v0 = vld [vmem:[%s14159_s1 + $0x4] sm:$0x3] }
 0x216   : > { %8583 = vmatmul.msk.bf16.vlgmr.msra.gmra.mxu2 %vm1656_vm8, %v8567_v45 }
 0x21c   : > { %2417 = vrot.lane.b32.xlu1 %v10536_v27, %s9391_s17  ;;  %v10779_v27 = vsel %vm1660_vm7, %v10542_v22, 0 }
 0x21d   : > { %14275 = vst [vmem:[#allocation6_spill] sm:$0xff] %v10779_v27 }
 0x21f   : > { %8582 = vmatmul.msk.bf16.vlgmr.msra.gmra.mxu1 %vm1656_vm8, %v8566_v17  ;;  %v10822_v17 = vsel %vm1660_vm7, %v10584_v18, 0  ;;  %v10832_v18 = vsel %vm1660_vm7, %v10578_v63, 0 }
 0x220   : > { %14278 = vst [vmem:[#allocation20_spill] sm:$0xff] %v10822_v17 }
 0x224   : > { %2543 = vrot.lane.b32.xlu1 %v10554_v58, %s9391_s17 }
 0x22a   : > { %v1899_v50 = vpop.permute.xlu1 %1898 }
 0x22b   : > { %v10699_v41 = vsel %vm1660_vm7, %v1899_v50, 0 }
 0x22c   : > { %14269 = vst [vmem:[#allocation13_spill] sm:$0xff] %v10699_v41  ;;  %1913 = vmatpush.bf16.msra.mxu3 %v10699_v41  ;;  %2564 = vrot.lane.b32.xlu1 %v10634_v3, %s9391_s17 }
 0x22f   : > { %8584 = vmatmul.msk.bf16.vlgmr.msra.gmra.mxu3 %vm1656_vm8, %v8568_v49 }
 0x231   : > { %v1987_v24 = vpop.permute.xlu2 %1986 }
 0x232   : > { %v10709_v11 = vsel %vm1660_vm7, %v1987_v24, 0 }
 0x233   : > { %2001 = vmatpush.bf16.msrb.mxu3 %v10709_v11 }
 0x237   : > { %2073 = vmatpush.bf16.msra.mxu3 %v10714_v8 }
 0x239   : > { %v10748_v53 = vpop.permute.xlu2 %2312 }
 0x23a   : > { %v1965_v14 = vpop.permute.xlu0 %1964 }
 0x23b   : > { %v10718_v32 = vsel %vm1660_vm7, %v1965_v14, 0 }
 0x23c   : > { %1979 = vmatpush.bf16.msrb.mxu2 %v10718_v32 }
 0x23f   : > { %8587 = vmatmul.msk.bf16.vlgmr.msrb.gmra.mxu2 %vm1656_vm8, %v8571_v21  ;;  %8588 = vmatmul.msk.bf16.vlgmr.msrb.gmra.mxu3 %vm1656_vm8, %v8572_v26 }
 0x240   : > { %2055 = vmatpush.bf16.msra.mxu2 %v10726_v6  ;;  %2145 = vmatpush.bf16.msrb.mxu3 %v10744_v34 }
 0x241   : > { %v639_v44 = vpop.permute.xlu2 %638 }
 0x242   : > { %v1943_v37 = vpop.permute.xlu0 %1942  ;;  %v656_v55 = vmul.f32 %v639_v44, %v544_v38  ;;  %v1630_v38 = vld [vmem:[%s14159_s1 + $0x14] sm:$0x3] }
 0x243   : > { %v10751_v23 = vsel %vm1660_vm7, %v1943_v37, 0 }
 0x244   : > { %2127 = vmatpush.bf16.msrb.mxu2 %v10739_v59  ;;  %1957 = vmatpush.bf16.msrb.mxu1 %v10751_v23 }
 0x247   : > { %8586 = vmatmul.msk.bf16.vlgmr.msrb.gmra.mxu1 %vm1656_vm8, %v8570_v36 }
 0x248   : > { %2037 = vmatpush.bf16.msra.mxu1 %v10756_v12 }
 0x24a   : > { %v2376_v43 = vpop.permute.xlu0 %2375 }
 0x24b   : > { %v10842_v63 = vsel %vm1660_vm7, %v2376_v43, 0 }
 0x24c   : > { %2109 = vmatpush.bf16.msrb.mxu1 %v10765_v31 }
 0x24f   : > { %8591 = vmatmul.msk.bf16.vlgmr.msra.gmra.mxu2 %vm1656_vm8, %v1622_v0  ;;  %8592 = vmatmul.msk.bf16.vlgmr.msra.gmra.mxu3 %vm1656_vm8, %v1623_v46  ;;  %v1631_v0 = vld [vmem:[%s14159_s1 + $0x16] sm:$0x3] }
 0x250   : > { %2199 = vmatpush.bf16.msra.mxu2 %v10779_v27  ;;  %2217 = vmatpush.bf16.msra.mxu3 %v10784_v52 }
 0x252   : > { %v751_v28 = vpop.permute.xlu0 %750 }
 0x253   : > { %v10792_v22 = vadd.f32 %v751_v28, %v656_v55  ;;  %v10849_v28 = vpop.f32.mrf.mxu2 }
 0x255   : > { %v10798_v58 = vmul.f32 0.70710677, %v10792_v22 }
 0x257   : > { %8590 = vmatmul.msk.bf16.vlgmr.msra.gmra.mxu1 %vm1656_vm8, %v1621_v33  ;;  %v1401_v54 = vmul.f32 %v10798_v58, %v10798_v58  ;;  %v10851_v33 = vpop.f32.mrf.mxu1 }
 0x258   : > { %2181 = vmatpush.bf16.msra.mxu1 %v10803_v62 }
 0x259   : > { %v1402_v25 = vmin.f32 %v1401_v54, 16.0  ;;  %v8569_v54 = vld [vmem:[%s14159_s1 + $0x38] sm:$0x3] }
 0x25b   : > { %v1403_v15 = vmul.f32 2.1237322e-06, %v1402_v25  ;;  %v1414_v61 = vmul.f32 3.8918573e-05, %v1402_v25 }
 0x25d   : > { %v1404_v51 = vadd.f32 0.00028619796, %v1403_v15  ;;  %v1415_v45 = vadd.f32 0.001143296, %v1414_v61  ;;  %v10862_v15 = vsel %vm1660_vm7, %v10530_v2, 0 }
 0x25e   : > { %v1629_v61 = vld [vmem:[%s14159_s1 + $0x12] sm:$0x3] }
 0x25f   : > { %8595 = vmatmul.msk.bf16.vlgmr.msrb.gmra.mxu2 %vm1656_vm8, %v1626_v48  ;;  %v1405_v9 = vmul.f32 %v1404_v51, %v1402_v25  ;;  %8596 = vmatmul.msk.bf16.vlgmr.msrb.gmra.mxu3 %vm1656_vm8, %v1627_v20  ;;  %v1416_v50 = vmul.f32 %v1415_v45, %v1402_v25 }
 0x260   : > { %2271 = vmatpush.bf16.msrb.mxu2 %v10817_v16  ;;  %2289 = vmatpush.bf16.msrb.mxu3 %v10822_v17 }
 0x261   : > { %v1417_v49 = vadd.f32 0.014752088, %v1416_v50  ;;  %v1406_v24 = vadd.f32 0.0036580483, %v1405_v9  ;;  %v1719_v50 = vpop.f32.mrf.mxu2 }
 0x263   : > { %v1418_v14 = vmul.f32 %v1417_v49, %v1402_v25  ;;  %v1407_v21 = vmul.f32 %v1406_v24, %v1402_v25  ;;  %v1697_v49 = vpop.f32.mrf.mxu1 }
 0x265   : > { %v1419_v42 = vadd.f32 0.112945676, %v1418_v14  ;;  %v1408_v36 = vadd.f32 0.05243302, %v1407_v21  ;;  %v2460_v21 = vpop.permute.xlu0 %2459 }
 0x267   : > { %8594 = vmatmul.msk.bf16.vlgmr.msrb.gmra.mxu1 %vm1656_vm8, %v1625_v19  ;;  %v1420_v26 = vmul.f32 %v1419_v42, %v1402_v25  ;;  %v1409_v46 = vmul.f32 %v1408_v36, %v1402_v25 }
 0x268   : > { %2253 = vmatpush.bf16.msrb.mxu1 %v10832_v18 }
 0x269   : > { %v1421_v37 = vadd.f32 0.4994258, %v1420_v26  ;;  %v1410_v43 = vadd.f32 0.18741608, %v1409_v46  ;;  %v1635_v26 = vld [vmem:[%s14159_s1 + $0x1e] sm:$0x3] }
 0x26b   : > { %v1422_v30 = vmul.f32 %v1421_v37, %v1402_v25  ;;  %v1411_v20 = vmul.f32 %v1410_v43, %v1402_v25  ;;  %v1634_v25 = vld [vmem:[%s14159_s1 + $0x1c] sm:$0x3] }
 0x26d   : > { %v1423_v44 = vadd.f32 1.0, %v1422_v30  ;;  %v1412_v14 = vadd.f32 1.1283791, %v1411_v20  ;;  %v784_v20 = vmul.f32 0.5, %v10792_v22 }
 0x26e   : > { %v1921_v55 = vpop.permute.xlu1 %1920 }
 0x26f   : > { %8599 = vmatmul.msk.bf16.vlgmr.msra.gmra.mxu2 %vm1656_vm8, %v1630_v38  ;;  %v10846_v60 = vsel %vm1660_vm7, %v1921_v55, 0  ;;  %8600 = vmatmul.msk.bf16.vlgmr.msra.gmra.mxu3 %vm1656_vm8, %v1631_v0  ;;  %9271 = vrcp.f32 %v1423_v44  ;;  %v1435_v24 = vand.u32 2147483648, %v1423_v44  ;;  %v1433_v42 = vand.u32 2147483647, %v1423_v44  ;;  %v10880_v38 = vpop.permute.xlu2 %2396 }
 0x270   : > { %1935 = vmatpush.bf16.msrb.mxu0 %v10846_v60  ;;  %2390 = vmatpush.bf16.msra.mxu3 %v10842_v63  ;;  %vm1429_vm10 = vweird.f32 %v1423_v44  ;;  %v1413_v30 = vmul.f32 %v1412_v14, %v10798_v58  ;;  %v10883_v55 = vsel %vm1660_vm7, %v2460_v21, 0  ;;  %v1620_v58 = vld [vmem:[%s14159_s1] sm:$0x3] }
 0x271   : > { %v1436_v36 = vor.u32 1.1754944e-38, %v1435_v24  ;;  %vm1434_vm12 = vcmp.eq.f32.partialorder %v1433_v42, 8.507059e+37 }
 0x273   : > { %8585 = vmatmul.msk.bf16.vlgmr.msrb.gmra.mxu0 %vm1656_vm8, %v8569_v54 }
 0x274   : > { %2019 = vmatpush.bf16.msra.mxu0 %v14262_v40 }
 0x275   : > { %v9272_v48 = vpop.eup %9271 }
 0x276   : > { %v2355_v51 = vpop.permute.xlu1 %2354  ;;  %v1425_v45 = vmul.f32 %v9272_v48, %v1423_v44  ;;  %vm1430_vm9 = vweird.f32 %v9272_v48 }
 0x277   : > { %8598 = vmatmul.msk.bf16.vlgmr.msra.gmra.mxu1 %vm1656_vm8, %v1629_v61  ;;  %v10870_v9 = vsel %vm1660_vm7, %v2355_v51, 0  ;;  %vm1431_vm11 = vmor %vm1429_vm10, %vm1430_vm9  ;;  %v1633_v51 = vld [vmem:[%s14159_s1 + $0x1a] sm:$0x3]  ;;  %v2523_v24 = vpop.permute.xlu2 %2522 }
 0x278   : > { %2091 = vmatpush.bf16.msrb.mxu0 %v10862_v15  ;;  %2369 = vmatpush.bf16.msra.mxu2 %v10870_v9  ;;  %v1426_v2 = vsub.f32 1.0, %v1425_v45 }
 0x27a   : > { %v1427_v19 = vmul.f32 %v9272_v48, %v1426_v2 }
 0x27c   : > { %v1428_v37 = vadd.f32 %v9272_v48, %v1427_v19  ;;  %v8607_v19 = vld [vmem:[%s14159_s1 + $0x44] sm:$0x3] }
 0x27e   : > { %v2334_v0 = vpop.permute.xlu1 %2333  ;;  %v1432_v46 = vsel %vm1431_vm11, %v9272_v48, %v1428_v37  ;;  %v10898_v48 = vsel %vm1660_vm7, %v10518_v7, 0  ;;  %v10922_v37 = vsel %vm1660_vm7, %v2523_v24, 0 }
 0x27f   : > { %8603 = vmatmul.msk.bf16.vlgmr.msrb.gmra.mxu2 %vm1656_vm8, %v1634_v25  ;;  %v10887_v54 = vsel %vm1660_vm7, %v2334_v0, 0  ;;  %8604 = vmatmul.msk.bf16.vlgmr.msrb.gmra.mxu3 %vm1656_vm8, %v1635_v26  ;;  %v1437_v44 = vsel %vm1434_vm12, %v1436_v36, %v1432_v46  ;;  %v8608_v25 = vld [vmem:[%s14159_s1 + $0x46] sm:$0x3]  ;;  %v1624_v0 = vld [vmem:[%s14159_s1 + $0x8] sm:$0x3]  ;;  %v10936_v46 = vpop.f32.mrf.mxu3 }
 0x280   : > { %2348 = vmatpush.bf16.msra.mxu1 %v10887_v54  ;;  %2474 = vmatpush.bf16.msrb.mxu3 %v10883_v55  ;;  %v1438_v43 = vmul.f32 %v1437_v44, %v1413_v30  ;;  %v10929_v30 = vpop.permute.xlu0 %2480 }
 0x282   : > { %v8556_v61 = vclamps-f32 %v1438_v43, 1.0  ;;  %v10941_v43 = vsel %vm1660_vm7, %v10634_v3, 0 }
 0x283   : > { %8589 = vmatmul.msk.bf16.vlgmr.msra.gmra.mxu0 %vm1656_vm8, %v1620_v58  ;;  %v2502_v58 = vpop.permute.xlu2 %2501  ;;  %14279 = vst [vmem:[#allocation21_spill] sm:$0xff] %v10941_v43 }
 0x284   : > { %2163 = vmatpush.bf16.msra.mxu0 %v10898_v48  ;;  %v1456_v45 = vadd.f32 1.0, %v8556_v61  ;;  %v412_v61 = vld [vmem:[%s14160_s2] sm:$0xf] }
 0x286   : > { %v2439_v50 = vpop.permute.xlu1 %2438  ;;  %v1472_v49 = vmul.f32 %v1456_v45, %v784_v20  ;;  %v8606_v20 = vld [vmem:[%s14159_s1 + $0x42] sm:$0x3] }
 0x287   : > { %8602 = vmatmul.msk.bf16.vlgmr.msrb.gmra.mxu1 %vm1656_vm8, %v1633_v51  ;;  %v10907_v2 = vsel %vm1660_vm7, %v2439_v50, 0  ;;  %v10951_v50 = vsel %vm1660_vm7, %v2502_v58, 0  ;;  %v1628_v58 = vld [vmem:[%s14159_s1 + $0x10] sm:$0x3] }
 0x288   : > { %2453 = vmatpush.bf16.msrb.mxu2 %v10907_v2  ;;  %v1488_v7 = vpack.c.bf16 %v1472_v49, %v1472_v49  ;;  %v1741_v49 = vpop.f32.mrf.mxu3 }
 0x289   : > { %v10910_v14 = vpop.f32.mrf.mxu2 }
 0x28a   : > { %v1520_v22 = vunpack.c.l.b16 %v1488_v7  ;;  %v2607_v7 = vpop.permute.xlu0 %2606 }
 0x28c   : > { %v1536_v42 = vpack.c.b16 %v1520_v22, %v1520_v22  ;;  %v10915_v21 = vpop.f32.mrf.mxu1  ;;  %v9205_v22 = vld [vmem:[%s14166_s8 + $0x1] ss:$0 sm:$0xff] }
 0x28e   : > { %1567 = vrot.lane.b32.xlu1 %v1536_v42, %s9389_s29  ;;  %v2418_v26 = vpop.permute.xlu1 %2417  ;;  %v8611_v42 = vld [vmem:[%s14159_s1 + $0x4c] sm:$0x3] }
 0x28f   : > { %8623 = vmatmul.msk.bf16.vlgmr.msra.gmra.mxu2 %vm1656_vm8, %v8607_v19  ;;  %v10926_v36 = vsel %vm1660_vm7, %v2418_v26, 0  ;;  %8624 = vmatmul.msk.bf16.vlgmr.msra.gmra.mxu3 %vm1656_vm8, %v8608_v25  ;;  %v2628_v19 = vpop.permute.xlu2 %2627  ;;  %v8612_v26 = vld [vmem:[%s14159_s1 + $0x4e] sm:$0x3] }
 0x290   : > { %2537 = vmatpush.bf16.msra.mxu2 %v10922_v37  ;;  %2432 = vmatpush.bf16.msrb.mxu1 %v10926_v36 }
 0x291   : > { %v1807_v44 = vpop.f32.mrf.mxu2 }
 0x292   : > { %v10976_v44 = vsel %vm1660_vm7, %v2628_v19, 0  ;;  %v2586_v49 = vpop.permute.xlu0 %2585 }
 0x293   : > { %8593 = vmatmul.msk.bf16.vlgmr.msrb.gmra.mxu0 %vm1656_vm8, %v1624_v0  ;;  %v10973_v0 = vsel %vm1660_vm7, %v2607_v7, 0  ;;  %v8610_v7 = vld [vmem:[%s14159_s1 + $0x4a] sm:$0x3]  ;;  %v11000_v19 = vsel %vm1660_vm7, %v2586_v49, 0  ;;  %v9208_v49 = vld [vmem:[%s14165_s7 + $0x4] ss:$0 sm:$0xff] }
 0x294   : > { %2235 = vmatpush.bf16.msrb.mxu0 %v10941_v43  ;;  %v1785_v51 = vpop.f32.mrf.mxu1  ;;  %14281 = vst [vmem:[#allocation23_spill] sm:$0xff] %v11000_v19 }
 0x295   : > { %v9206_v51 = vld [vmem:[%s14166_s8] ss:$0 sm:$0xff] }
 0x296   : > { %4413 = vperm.xlu1 %9171, %v412_v61   ;;  %v2544_v45 = vpop.permute.xlu1 %2543  ;;  %v10985_v61 = vpop.f32.mrf.mxu3 }
 0x297   : > { %8622 = vmatmul.msk.bf16.vlgmr.msra.gmra.mxu1 %vm1656_vm8, %v8606_v20  ;;  %v10955_v3 = vsel %vm1660_vm7, %v2544_v45, 0  ;;  %v10992_v45 = vsel %vm1660_vm7, %v10748_v53, 0 }
 0x298   : > { %2516 = vmatpush.bf16.msra.mxu1 %v10951_v50  ;;  %2558 = vmatpush.bf16.msra.mxu3 %v10955_v3  ;;  %14280 = vst [vmem:[#allocation22_spill] sm:$0xff] %v10992_v45 }
 0x299   : > { %v10959_v24 = vpop.f32.mrf.mxu2 }
 0x29c   : > { %v10967_v25 = vpop.f32.mrf.mxu1 }
 0x29e   : > { %4704 = vperm.xlu1 %9171, %v9205_v22   ;;  %v1829_v53 = vpop.f32.mrf.mxu3 }
 0x29f   : > { %8627 = vmatmul.msk.bf16.vlgmr.msrb.gmra.mxu2 %vm1656_vm8, %v8611_v42  ;;  %8628 = vmatmul.msk.bf16.vlgmr.msrb.gmra.mxu3 %vm1656_vm8, %v8612_v26  ;;  %v9207_v42 = vld [vmem:[%s14166_s8 + $0x5] ss:$0 sm:$0xff]  ;;  %v11007_v26 = vpop.f32.mrf.mxu0  ;;  %v11029_v53 = vsel %vm1660_vm7, %v10880_v38, 0 }
 0x2a0   : > { %2621 = vmatpush.bf16.msrb.mxu2 %v10973_v0  ;;  %2642 = vmatpush.bf16.msrb.mxu3 %v10976_v44 }
 0x2a1   : > { %v1895_v20 = vpop.f32.mrf.mxu2 }
 0x2a2   : > { %v8616_v20 = vld [vmem:[%s14159_s1 + $0x56] sm:$0x3] }
 0x2a3   : > { %8597 = vmatmul.msk.bf16.vlgmr.msra.gmra.mxu0 %vm1656_vm8, %v1628_v58  ;;  %v8615_v58 = vld [vmem:[%s14159_s1 + $0x54] sm:$0x3] }
 0x2a4   : > { %2327 = vmatpush.bf16.msra.mxu0 %v10992_v45  ;;  %v1873_v22 = vpop.f32.mrf.mxu1 }
 0x2a6   : > { %4700 = vperm.xlu1 %9171, %v9206_v51   ;;  %v1632_v51 = vld [vmem:[%s14159_s1 + $0x18] sm:$0x3] }
 0x2a7   : > { %8626 = vmatmul.msk.bf16.vlgmr.msrb.gmra.mxu1 %vm1656_vm8, %v8610_v7  ;;  %v1675_v22 = vpop.f32.mrf.mxu0 }
 0x2a8   : > { %2600 = vmatpush.bf16.msrb.mxu1 %v11000_v19  ;;  %v8620_v22 = vld [vmem:[%s14159_s1 + $0x5e] sm:$0x3]  ;;  %v8640_v19 = vld [vmem:[%s14159_s1 + $0x66] sm:$0x3] }
 0x2ae   : > { %4720 = vperm.xlu1 %9171, %v9207_v42   ;;  %v8614_v42 = vld [vmem:[%s14159_s1 + $0x52] sm:$0x3] }
 0x2af   : > { %8631 = vmatmul.msk.bf16.vlgmr.msra.gmra.mxu2 %vm1656_vm8, %v8615_v58  ;;  %8632 = vmatmul.msk.bf16.vlgmr.msra.gmra.mxu3 %vm1656_vm8, %v8616_v20  ;;  %v9209_v58 = vld [vmem:[%s14165_s7 + $0x9] ss:$0 sm:$0xff]  ;;  %v11041_v38 = vpop.f32.mrf.mxu0 }
 0x2b0   : > { %2723 = vmatpush.bf16.msra.mxu2 %v10714_v8  ;;  %2739 = vmatpush.bf16.msra.mxu3 %v10862_v15 }
 0x2b2   : > { %v11025_v7 = vpop.f32.mrf.mxu3 }
 0x2b3   : > { %8601 = vmatmul.msk.bf16.vlgmr.msrb.gmra.mxu0 %vm1656_vm8, %v1632_v51  ;;  %v8619_v51 = vld [vmem:[%s14159_s1 + $0x5c] sm:$0x3] }
 0x2b4   : > { %2411 = vmatpush.bf16.msrb.mxu0 %v11029_v53 }
 0x2b6   : > { %4604 = vperm.xlu1 %9171, %v9208_v49   ;;  %v8605_v49 = vld [vmem:[%s14159_s1 + $0x40] sm:$0x3] }
 0x2b7   : > { %8630 = vmatmul.msk.bf16.vlgmr.msra.gmra.mxu1 %vm1656_vm8, %v8614_v42 }
 0x2b8   : > { %2707 = vmatpush.bf16.msra.mxu1 %v10726_v6  ;;  %v8639_v6 = vld [vmem:[%s14159_s1 + $0x64] sm:$0x3] }
 0x2ba   : > { %v1917_v20 = vpop.f32.mrf.mxu3 }
 0x2bb   : > { %v9210_v20 = vld [vmem:[%s14166_s8 + $0xa] ss:$0 sm:$0xff] }
 0x2be   : > { %4624 = vperm.xlu1 %9171, %v9209_v58   ;;  %v11065_v58 = vsel %vm1660_vm7, %v10929_v30, 0  ;;  %v9211_v30 = vld [vmem:[%s14166_s8 + $0x7] ss:$0 sm:$0xff] }
 0x2bf   : > { %8635 = vmatmul.msk.bf16.vlgmr.msrb.gmra.mxu2 %vm1656_vm8, %v8619_v51  ;;  %8636 = vmatmul.msk.bf16.vlgmr.msrb.gmra.mxu3 %vm1656_vm8, %v8620_v22  ;;  %v1763_v51 = vpop.f32.mrf.mxu0 }
 0x2c0   : > { %2787 = vmatpush.bf16.msrb.mxu2 %v10744_v34  ;;  %2803 = vmatpush.bf16.msrb.mxu3 %v10898_v48  ;;  %v8643_v34 = vld [vmem:[%s14159_s1 + $0x6c] sm:$0x3] }
 0x2c2   : > { %v11056_v42 = vpop.f32.mrf.mxu2  ;;  %v11061_v45 = vpop.f32.mrf.mxu3 }
 0x2c3   : > { %8621 = vmatmul.msk.bf16.vlgmr.msra.gmra.mxu0 %vm1656_vm8, %v8605_v49 }
 0x2c4   : > { %v11068_v22 = vpop.f32.mrf.mxu1  ;;  %2495 = vmatpush.bf16.msra.mxu0 %v11065_v58 }
 0x2c6   : > { %4740 = vperm.xlu1 %9171, %v9210_v20  }
 0x2c7   : > { %8634 = vmatmul.msk.bf16.vlgmr.msrb.gmra.mxu1 %vm1656_vm8, %v8618_v35  ;;  %v11085_v20 = vpop.f32.mrf.mxu0  ;;  %v8609_v35 = vld [vmem:[%s14159_s1 + $0x48] sm:$0x3] }
 0x2c8   : > { %2771 = vmatpush.bf16.msrb.mxu1 %v10739_v59 }
 0x2ca   : > { %v1983_v40 = vpop.f32.mrf.mxu2  ;;  %v2005_v49 = vpop.f32.mrf.mxu3 }
 0x2cb   : > { %v2565_v40 = vpop.permute.xlu1 %2564 }
 0x2cc   : > { %v1961_v51 = vpop.f32.mrf.mxu1 }
 0x2ce   : > { %4728 = vperm.xlu1 %9171, %v9211_v30   ;;  %v9212_v30 = vld [vmem:[%s14165_s7 + $0xe] ss:$0 sm:$0xff] }
 0x2cf   : > { %8655 = vmatmul.msk.bf16.vlgmr.msra.gmra.mxu2 %vm1656_vm8, %v8639_v6  ;;  %8656 = vmatmul.msk.bf16.vlgmr.msra.gmra.mxu3 %vm1656_vm8, %v8640_v19  ;;  %v11100_v6 = vsel %vm1660_vm7, %v2565_v40, 0 }
 0x2d0   : > { %2851 = vmatpush.bf16.msra.mxu2 %v10784_v52  ;;  %2867 = vmatpush.bf16.msra.mxu3 %v10941_v43  ;;  %v8638_v52 = vld [vmem:[%s14159_s1 + $0x62] sm:$0x3]  ;;  %v1851_v43 = vpop.f32.mrf.mxu0 }
 0x2d2   : > { %v11094_v49 = vpop.f32.mrf.mxu2  ;;  %v2075_v51 = vpop.f32.mrf.mxu3 }
 0x2d3   : > { %8625 = vmatmul.msk.bf16.vlgmr.msrb.gmra.mxu0 %vm1656_vm8, %v8609_v35  ;;  %v11104_v19 = vadd.f32 %v2075_v51, %v10936_v46  ;;  %v9213_v46 = vld [vmem:[%s14165_s7 + $0xb] ss:$0 sm:$0xff] }
 0x2d4   : > { %v11106_v59 = vpop.f32.mrf.mxu1  ;;  %2579 = vmatpush.bf16.msrb.mxu0 %v11100_v6 }
 0x2d6   : > { %4644 = vperm.xlu1 %9171, %v9212_v30   ;;  %v8644_v30 = vld [vmem:[%s14159_s1 + $0x6e] sm:$0x3] }
 0x2d7   : > { %8654 = vmatmul.msk.bf16.vlgmr.msra.gmra.mxu1 %vm1656_vm8, %v8638_v52  ;;  %v8613_v52 = vld [vmem:[%s14159_s1 + $0x50] sm:$0x3] }
 0x2d8   : > { %2835 = vmatpush.bf16.msra.mxu1 %v10779_v27 }
 0x2da   : > { %v2059_v40 = vpop.f32.mrf.mxu2  ;;  %v2077_v35 = vpop.f32.mrf.mxu3 }
 0x2db   : > { %v9214_v40 = vld [vmem:[%s14166_s8 + $0xc] ss:$0 sm:$0xff] }
 0x2dc   : > { %v2041_v51 = vpop.f32.mrf.mxu1 }
 0x2dd   : > { %v8642_v51 = vld [vmem:[%s14159_s1 + $0x6a] sm:$0x3] }
 0x2de   : > { %4632 = vperm.xlu1 %9171, %v9213_v46  }
 0x2df   : > { %8659 = vmatmul.msk.bf16.vlgmr.msrb.gmra.mxu2 %vm1656_vm8, %v8643_v34  ;;  %8660 = vmatmul.msk.bf16.vlgmr.msrb.gmra.mxu3 %vm1656_vm8, %v8644_v30 }
 0x2e0   : > { %2915 = vmatpush.bf16.msrb.mxu2 %v10822_v17 }
 0x2e2   : > { %v11129_v43 = vpop.f32.mrf.mxu2  ;;  %v2147_v35 = vpop.f32.mrf.mxu3 }
 0x2e3   : > { %8629 = vmatmul.msk.bf16.vlgmr.msra.gmra.mxu0 %vm1656_vm8, %v8613_v52  ;;  %v11136_v46 = vadd.f32 %v2147_v35, %v10985_v61  ;;  %v8647_v61 = vld [vmem:[%s14159_s1 + $0x74] sm:$0x3]  ;;  %v8648_v52 = vld [vmem:[%s14159_s1 + $0x76] sm:$0x3] }
 0x2e4   : > { %v11138_v34 = vpop.f32.mrf.mxu1  ;;  %2691 = vmatpush.bf16.msra.mxu0 %v10756_v12 }
 0x2e6   : > { %4748 = vperm.xlu1 %9171, %v9214_v40  }
 0x2e7   : > { %8658 = vmatmul.msk.bf16.vlgmr.msrb.gmra.mxu1 %vm1656_vm8, %v8642_v51 }
 0x2e8   : > { %2899 = vmatpush.bf16.msrb.mxu1 %v10817_v16 }
 0x2ea   : > { %v2131_v30 = vpop.f32.mrf.mxu2  ;;  %v2149_v27 = vpop.f32.mrf.mxu3 }
 0x2eb   : > { %v8617_v27 = vld [vmem:[%s14159_s1 + $0x58] sm:$0x3]  ;;  %v8646_v30 = vld [vmem:[%s14159_s1 + $0x72] sm:$0x3] }
 0x2ec   : > { %v2113_v17 = vpop.f32.mrf.mxu1 }
 0x2ef   : > { %8663 = vmatmul.msk.bf16.vlgmr.msra.gmra.mxu2 %vm1656_vm8, %v8647_v61  ;;  %8664 = vmatmul.msk.bf16.vlgmr.msra.gmra.mxu3 %vm1656_vm8, %v8648_v52 }
 0x2f0   : > { %3014 = vmatpush.bf16.msra.mxu2 %v10621_v4  ;;  %v11155_v12 = vpop.f32.mrf.mxu0 }
 0x2f2   : > { %v11160_v17 = vpop.f32.mrf.mxu2  ;;  %v2219_v40 = vpop.f32.mrf.mxu3 }
 0x2f3   : > { %8633 = vmatmul.msk.bf16.vlgmr.msrb.gmra.mxu0 %vm1656_vm8, %v8617_v27  ;;  %v11164_v35 = vadd.f32 %v2219_v40, %v11025_v7  ;;  %v8651_v7 = vld [vmem:[%s14159_s1 + $0x7c] sm:$0x3] }
 0x2f4   : > { %v11166_v51 = vpop.f32.mrf.mxu1  ;;  %2755 = vmatpush.bf16.msrb.mxu0 %v10765_v31 }
 0x2f7   : > { %8662 = vmatmul.msk.bf16.vlgmr.msra.gmra.mxu1 %vm1656_vm8, %v8646_v30  ;;  %v8637_v30 = vld [vmem:[%s14159_s1 + $0x60] sm:$0x3] }
 0x2f8   : > { %2998 = vmatpush.bf16.msra.mxu1 %v10563_v57  ;;  %v1939_v61 = vpop.f32.mrf.mxu0 }
 0x2fa   : > { %v2203_v52 = vpop.f32.mrf.mxu2  ;;  %v2221_v16 = vpop.f32.mrf.mxu3 }
 0x2fc   : > { %v2185_v4 = vpop.f32.mrf.mxu1 }
 0x2ff   : > { %8667 = vmatmul.msk.bf16.vlgmr.msrb.gmra.mxu2 %vm1656_vm8, %v8651_v7 }
 0x300   : > { %3078 = vmatpush.bf16.msrb.mxu2 %v10625_v47  ;;  %v1568_v27 = vpop.permute.xlu1 %1567  ;;  %v11179_v40 = vpop.f32.mrf.mxu0  ;;  %v8650_v47 = vld [vmem:[%s14159_s1 + $0x7a] sm:$0x3] }
 0x301   : > { %v1602_v31 = vsel %vm1569_vm3, 0, %v1568_v27 }
 0x302   : > { %v2273_v61 = vpop.f32.mrf.mxu2  ;;  %v1619_v4 = vsel %vm1603_vm5, %v1602_v31, 0  ;;  %v2291_v16 = vpop.f32.mrf.mxu3  ;;  %v8652_v31 = vld [vmem:[%s14159_s1 + $0x7e] sm:$0x3] }
 0x303   : > { %v11187_v52 = vadd.f32 %v2273_v61, %v11056_v42  ;;  %3507 = vrot.lane.b32.xlu0 %v1619_v4, %s9391_s17  ;;  %3213 = vrot.lane.b32.xlu2 %v1619_v4, %s9390_s14  ;;  %v11192_v7 = vsel %vm1660_vm7, %v1619_v4, 0  ;;  %v11195_v27 = vadd.f32 %v2291_v16, %v11061_v45  ;;  %v9215_v45 = vld [vmem:[%s14165_s7 + $0x2] ss:$0 sm:$0xff]  ;;  %v8671_v4 = vld [vmem:[%s14159_s1 + $0x84] sm:$0x3] }
 0x304   : > { %v2255_v57 = vpop.f32.mrf.mxu1  ;;  %2933 = vmatpush.bf16.msrb.mxu3 %v11192_v7  ;;  %8653 = vmatmul.msk.bf16.vlgmr.msra.gmra.mxu0 %vm1656_vm8, %v8637_v30  ;;  %v9216_v30 = vld [vmem:[%s14165_s7 + $0x1] ss:$0 sm:$0xff]  ;;  %v9217_v16 = vld [vmem:[%s14165_s7] ss:$0 sm:$0xff] }
 0x305   : > { %v11206_v42 = vadd.f32 %v2255_v57, %v11068_v22  ;;  %2819 = vmatpush.bf16.msra.mxu0 %v10803_v62 }
 0x307   : > { %8666 = vmatmul.msk.bf16.vlgmr.msrb.gmra.mxu1 %vm1656_vm8, %v8650_v47  ;;  %8668 = vmatmul.msk.bf16.vlgmr.msrb.gmra.mxu3 %vm1656_vm8, %v8652_v31  ;;  %v9218_v31 = vld [vmem:[%s14166_s8 + $0x2] ss:$0 sm:$0xff] }
 0x308   : > { %3030 = vmatpush.bf16.msra.mxu3 %v10617_v10  ;;  %3062 = vmatpush.bf16.msrb.mxu1 %v10647_v29  ;;  %v2023_v57 = vpop.f32.mrf.mxu0 }
 0x30a   : > { %v2275_v22 = vpop.f32.mrf.mxu2  ;;  %v2293_v61 = vpop.f32.mrf.mxu3 }
 0x30b   : > { %4596 = vperm.xlu0 %9170, %v9215_v45   ;;  %4592 = vperm.xlu2 %9172, %v9216_v30   ;;  %v2058_v45 = vadd.f32 %v11094_v49, %v10849_v28  ;;  %v8641_v30 = vld [vmem:[%s14159_s1 + $0x68] sm:$0x3]  ;;  %v8670_v28 = vld [vmem:[%s14159_s1 + $0x82] sm:$0x3]  ;;  %v8672_v49 = vld [vmem:[%s14159_s1 + $0x86] sm:$0x3] }
 0x30c   : > { %3094 = vmatpush.bf16.msrb.mxu3 %v10639_v5  ;;  %v2257_v47 = vpop.f32.mrf.mxu1 }
 0x30d   : > { %v2040_v47 = vadd.f32 %v11106_v59, %v10851_v33  ;;  %v9219_v59 = vld [vmem:[%s14165_s7 + $0x6] ss:$0 sm:$0xff]  ;;  %v9220_v33 = vld [vmem:[%s14165_s7 + $0x5] ss:$0 sm:$0xff] }
 0x30f   : > { %8687 = vmatmul.msk.bf16.vlgmr.msra.gmra.mxu2 %vm1656_vm8, %v8671_v4 }
 0x310   : > { %3142 = vmatpush.bf16.msra.mxu2 %v10699_v41  ;;  %v11231_v57 = vpop.f32.mrf.mxu0 }
 0x312   : > { %v2371_v22 = vpop.f32.mrf.mxu2  ;;  %v2392_v61 = vpop.f32.mrf.mxu3 }
 0x313   : > { %v11240_v4 = vadd.f32 %v2371_v22, %v2058_v45  ;;  %4588 = vperm.xlu0 %9170, %v9217_v16   ;;  %4708 = vperm.xlu2 %9172, %v9218_v31   ;;  %v11243_v29 = vadd.f32 %v2392_v61, %v11104_v19  ;;  %v8675_v45 = vld [vmem:[%s14159_s1 + $0x8c] sm:$0x3]  ;;  %v9222_v22 = vld [vmem:[%s14166_s8 + $0x6] ss:$0 sm:$0xff] }
 0x314   : > { %v2350_v41 = vpop.f32.mrf.mxu1  ;;  %8657 = vmatmul.msk.bf16.vlgmr.msrb.gmra.mxu0 %vm1656_vm8, %v8641_v30  ;;  %v9221_v30 = vld [vmem:[%s14165_s7 + $0x3] ss:$0 sm:$0xff] }
 0x315   : > { %v11252_v5 = vadd.f32 %v2350_v41, %v2040_v47  ;;  %2883 = vmatpush.bf16.msrb.mxu0 %v10832_v18  ;;  %v2130_v47 = vadd.f32 %v11129_v43, %v10910_v14  ;;  %v8674_v14 = vld [vmem:[%s14159_s1 + $0x8a] sm:$0x3]  ;;  %v8676_v43 = vld [vmem:[%s14159_s1 + $0x8e] sm:$0x3] }
 0x317   : > { %8686 = vmatmul.msk.bf16.vlgmr.msra.gmra.mxu1 %vm1656_vm8, %v8670_v28  ;;  %8688 = vmatmul.msk.bf16.vlgmr.msra.gmra.mxu3 %vm1656_vm8, %v8672_v49  ;;  %v8645_v28 = vld [vmem:[%s14159_s1 + $0x70] sm:$0x3] }
 0x318   : > { %3126 = vmatpush.bf16.msra.mxu1 %v10650_v13  ;;  %3158 = vmatpush.bf16.msra.mxu3 %v10846_v60  ;;  %v2095_v41 = vpop.f32.mrf.mxu0 }
 0x31a   : > { %v2373_v19 = vpop.f32.mrf.mxu2  ;;  %v2394_v16 = vpop.f32.mrf.mxu3 }
 0x31b   : > { %4612 = vperm.xlu0 %9170, %v9219_v59   ;;  %4608 = vperm.xlu2 %9172, %v9220_v33   ;;  %v2112_v33 = vadd.f32 %v11138_v34, %v10915_v21  ;;  %v9223_v21 = vld [vmem:[%s14166_s8 + $0x4] ss:$0 sm:$0xff] }
 0x31c   : > { %v2352_v31 = vpop.f32.mrf.mxu1 }
 0x31f   : > { %8691 = vmatmul.msk.bf16.vlgmr.msrb.gmra.mxu2 %vm1656_vm8, %v8675_v45 }
 0x320   : > { %3206 = vmatpush.bf16.msrb.mxu2 %v10709_v11  ;;  %v11276_v61 = vpop.f32.mrf.mxu0 }
 0x322   : > { %v2455_v49 = vpop.f32.mrf.mxu2  ;;  %v2476_v59 = vpop.f32.mrf.mxu3 }
 0x323   : > { %v11285_v41 = vadd.f32 %v2455_v49, %v2130_v47  ;;  %4600 = vperm.xlu0 %9170, %v9221_v30   ;;  %4724 = vperm.xlu2 %9172, %v9222_v22   ;;  %v11288_v19 = vadd.f32 %v2476_v59, %v11136_v46  ;;  %v9224_v46 = vld [vmem:[%s14166_s8 + $0x3] ss:$0 sm:$0xff]  ;;  %v8679_v22 = vld [vmem:[%s14159_s1 + $0x94] sm:$0x3]  ;;  %v9225_v47 = vld [vmem:[%s14166_s8 + $0x9] ss:$0 sm:$0xff]  ;;  %v2202_v59 = vadd.f32 %v11160_v17, %v10959_v24 }
 0x324   : > { %v2434_v16 = vpop.f32.mrf.mxu1  ;;  %8661 = vmatmul.msk.bf16.vlgmr.msra.gmra.mxu0 %vm1656_vm8, %v8645_v28  ;;  %v9226_v28 = vld [vmem:[%s14165_s7 + $0xa] ss:$0 sm:$0xff]  ;;  %v8680_v17 = vld [vmem:[%s14159_s1 + $0x96] sm:$0x3] }
 0x325   : > { %v11297_v31 = vadd.f32 %v2434_v16, %v2112_v33  ;;  %2982 = vmatpush.bf16.msra.mxu0 %v10573_v1  ;;  %v8649_v16 = vld [vmem:[%s14159_s1 + $0x78] sm:$0x3] }
 0x327   : > { %8690 = vmatmul.msk.bf16.vlgmr.msrb.gmra.mxu1 %vm1656_vm8, %v8674_v14  ;;  %8692 = vmatmul.msk.bf16.vlgmr.msrb.gmra.mxu3 %vm1656_vm8, %v8676_v43 }
 0x328   : > { %3190 = vmatpush.bf16.msrb.mxu1 %v10718_v32  ;;  %v2167_v34 = vpop.f32.mrf.mxu0 }
 0x32a   : > { %v2457_v45 = vpop.f32.mrf.mxu2  ;;  %v2478_v30 = vpop.f32.mrf.mxu3 }
 0x32b   : > { %4716 = vperm.xlu0 %9170, %v9223_v21   ;;  %4712 = vperm.xlu2 %9172, %v9224_v46   ;;  %v2184_v21 = vadd.f32 %v11166_v51, %v10967_v25  ;;  %v9227_v25 = vld [vmem:[%s14165_s7 + $0x8] ss:$0 sm:$0xff] }
 0x32c   : > { %v2436_v1 = vpop.f32.mrf.mxu1 }
 0x32f   : > { %8695 = vmatmul.msk.bf16.vlgmr.msra.gmra.mxu2 %vm1656_vm8, %v8679_v22 }
 0x330   : > { %3309 = vmatpush.bf16.msra.mxu2 %v10842_v63  ;;  %v2237_v49 = vpop.f32.mrf.mxu0 }
 0x331   : > { %v11323_v33 = vadd.f32 %v2237_v49, %v11155_v12  ;;  %v8678_v12 = vld [vmem:[%s14159_s1 + $0x92] sm:$0x3]  ;;  %v9229_v49 = vld [vmem:[%s14165_s7 + $0xd] ss:$0 sm:$0xff] }
 0x332   : > { %v2539_v14 = vpop.f32.mrf.mxu2  ;;  %v2560_v43 = vpop.f32.mrf.mxu3 }
 0x333   : > { %v11330_v46 = vadd.f32 %v2539_v14, %v2202_v59  ;;  %4736 = vperm.xlu0 %9170, %v9225_v47   ;;  %4628 = vperm.xlu2 %9172, %v9226_v28   ;;  %v11333_v34 = vadd.f32 %v2560_v43, %v11164_v35  ;;  %v9228_v35 = vld [vmem:[%s14165_s7 + $0x7] ss:$0 sm:$0xff]  ;;  %v8683_v47 = vld [vmem:[%s14159_s1 + $0x9c] sm:$0x3]  ;;  %v2022_v28 = vadd.f32 %v11179_v40, %v11007_v26  ;;  %v9230_v59 = vld [vmem:[%s14166_s8 + $0x8] ss:$0 sm:$0xff] }
 0x334   : > { %v2518_v24 = vpop.f32.mrf.mxu1  ;;  %8665 = vmatmul.msk.bf16.vlgmr.msrb.gmra.mxu0 %vm1656_vm8, %v8649_v16  ;;  %v8669_v43 = vld [vmem:[%s14159_s1 + $0x80] sm:$0x3] }
 0x335   : > { %v11342_v45 = vadd.f32 %v2518_v24, %v2184_v21  ;;  %3046 = vmatpush.bf16.msrb.mxu0 %v10663_v39 }
 0x337   : > { %8694 = vmatmul.msk.bf16.vlgmr.msra.gmra.mxu1 %vm1656_vm8, %v8678_v12  ;;  %8696 = vmatmul.msk.bf16.vlgmr.msra.gmra.mxu3 %vm1656_vm8, %v8680_v17  ;;  %v8682_v17 = vld [vmem:[%s14159_s1 + $0x9a] sm:$0x3] }
 0x338   : > { %3293 = vmatpush.bf16.msra.mxu1 %v10870_v9  ;;  %v2239_v51 = vpop.f32.mrf.mxu0 }
 0x33a   : > { %v2541_v30 = vpop.f32.mrf.mxu2  ;;  %v2562_v1 = vpop.f32.mrf.mxu3 }
 0x33b   : > { %4620 = vperm.xlu0 %9170, %v9227_v25   ;;  %4616 = vperm.xlu2 %9172, %v9228_v35   ;;  %v8703_v1 = vld [vmem:[%s14159_s1 + $0xa4] sm:$0x3] }
 0x33c   : > { %v2520_v22 = vpop.f32.mrf.mxu1 }
 0x33d   : > { %v2094_v22 = vadd.f32 %v11231_v57, %v11041_v38 }
 0x33f   : > { %8699 = vmatmul.msk.bf16.vlgmr.msrb.gmra.mxu2 %vm1656_vm8, %v8683_v47  ;;  %v9233_v47 = vld [vmem:[%s14166_s8 + $0xb] ss:$0 sm:$0xff] }
 0x340   : > { %3373 = vmatpush.bf16.msrb.mxu2 %v10883_v55  ;;  %v2329_v16 = vpop.f32.mrf.mxu0 }
 0x341   : > { %v11367_v14 = vadd.f32 %v2329_v16, %v2022_v28  ;;  %v9234_v28 = vld [vmem:[%s14165_s7 + $0xc] ss:$0 sm:$0xff]  ;;  %v8673_v16 = vld [vmem:[%s14159_s1 + $0x88] sm:$0x3] }
 0x342   : > { %v2623_v26 = vpop.f32.mrf.mxu2  ;;  %v2644_v40 = vpop.f32.mrf.mxu3 }
 0x343   : > { %v11373_v21 = vadd.f32 %v2623_v26, %v11187_v52  ;;  %4640 = vperm.xlu0 %9170, %v9229_v49   ;;  %4732 = vperm.xlu2 %9172, %v9230_v59   ;;  %v11376_v24 = vadd.f32 %v2644_v40, %v11195_v27  ;;  %v9231_v52 = vld [vmem:[%s14166_s8 + $0xe] ss:$0 sm:$0xff]  ;;  %v9232_v27 = vld [vmem:[%s14166_s8 + $0xd] ss:$0 sm:$0xff] }
 0x344   : > { %v2602_v12 = vpop.f32.mrf.mxu1  ;;  %8685 = vmatmul.msk.bf16.vlgmr.msra.gmra.mxu0 %vm1656_vm8, %v8669_v43 }
 0x345   : > { %v11383_v25 = vadd.f32 %v2602_v12, %v11206_v42  ;;  %3110 = vmatpush.bf16.msra.mxu0 %v10669_v56  ;;  %v8702_v12 = vld [vmem:[%s14159_s1 + $0xa2] sm:$0x3] }
 0x347   : > { %8698 = vmatmul.msk.bf16.vlgmr.msrb.gmra.mxu1 %vm1656_vm8, %v8682_v17 }
 0x348   : > { %3357 = vmatpush.bf16.msrb.mxu1 %v10907_v2  ;;  %v2331_v35 = vpop.f32.mrf.mxu0 }
 0x349   : > { %v8707_v35 = vld [vmem:[%s14159_s1 + $0xac] sm:$0x3] }
 0x34a   : > { %v2625_v51 = vpop.f32.mrf.mxu2  ;;  %v2646_v30 = vpop.f32.mrf.mxu3 }
 0x34b   : > { %4756 = vperm.xlu0 %9170, %v9231_v52   ;;  %4752 = vperm.xlu2 %9172, %v9232_v27  }
 0x34c   : > { %v2604_v42 = vpop.f32.mrf.mxu1 }
 0x34d   : > { %v8684_v42 = vld [vmem:[%s14159_s1 + $0x9e] sm:$0x3] }
 0x34f   : > { %8719 = vmatmul.msk.bf16.vlgmr.msra.gmra.mxu2 %vm1656_vm8, %v8703_v1 }
 0x350   : > { %3437 = vmatpush.bf16.msra.mxu2 %v10955_v3  ;;  %v2413_v49 = vpop.f32.mrf.mxu0 }
 0x351   : > { %v11407_v59 = vadd.f32 %v2413_v49, %v2094_v22 }
 0x352   : > { %v2725_v38 = vpop.f32.mrf.mxu2  ;;  %v2741_v57 = vpop.f32.mrf.mxu3 }
 0x353   : > { %v11413_v43 = vadd.f32 %v2725_v38, %v11240_v4  ;;  %4744 = vperm.xlu0 %9170, %v9233_v47   ;;  %4636 = vperm.xlu2 %9172, %v9234_v28   ;;  %v11416_v26 = vadd.f32 %v2741_v57, %v11243_v29  ;;  %v8677_v47 = vld [vmem:[%s14159_s1 + $0x90] sm:$0x3]  ;;  %v8706_v38 = vld [vmem:[%s14159_s1 + $0xaa] sm:$0x3] }
 0x354   : > { %v2709_v40 = vpop.f32.mrf.mxu1  ;;  %8689 = vmatmul.msk.bf16.vlgmr.msrb.gmra.mxu0 %vm1656_vm8, %v8673_v16 }
 0x355   : > { %v11423_v17 = vadd.f32 %v2709_v40, %v11252_v5  ;;  %3174 = vmatpush.bf16.msrb.mxu0 %v10751_v23  ;;  %v2166_v5 = vadd.f32 %v11276_v61, %v11085_v20 }
 0x357   : > { %8718 = vmatmul.msk.bf16.vlgmr.msra.gmra.mxu1 %vm1656_vm8, %v8702_v12 }
 0x358   : > { %3421 = vmatpush.bf16.msra.mxu1 %v10922_v37  ;;  %v2415_v4 = vpop.f32.mrf.mxu0 }
 0x359   : > { %v8711_v4 = vld [vmem:[%s14159_s1 + $0xb4] sm:$0x3] }
 0x35a   : > { %v2727_v52 = vpop.f32.mrf.mxu2  ;;  %v2743_v29 = vpop.f32.mrf.mxu3 }
 0x35b   : > { %v8681_v29 = vld [vmem:[%s14159_s1 + $0x98] sm:$0x3] }
 0x35c   : > { %v2711_v27 = vpop.f32.mrf.mxu1 }
 0x35d   : > { %v3214_v51 = vpop.permute.xlu2 %3213 }
 0x35e   : > { %v11432_v30 = vsel %vm1660_vm7, %v3214_v51, 0 }
 0x35f   : > { %8723 = vmatmul.msk.bf16.vlgmr.msrb.gmra.mxu2 %vm1656_vm8, %v8707_v35  ;;  %3228 = vmatpush.bf16.msrb.mxu3 %v11432_v30 }
 0x360   : > { %3501 = vmatpush.bf16.msrb.mxu2 %v10976_v44  ;;  %v2497_v1 = vpop.f32.mrf.mxu0 }
 0x361   : > { %v11443_v22 = vadd.f32 %v2497_v1, %v2166_v5 }
 0x362   : > { %v2789_v20 = vpop.f32.mrf.mxu2  ;;  %8700 = vmatmul.msk.bf16.vlgmr.msrb.gmra.mxu3 %vm1656_vm8, %v8684_v42  ;;  %v2805_v61 = vpop.f32.mrf.mxu3 }
 0x363   : > { %3325 = vmatpush.bf16.msra.mxu3 %v11029_v53  ;;  %v11450_v28 = vadd.f32 %v2789_v20, %v11285_v41  ;;  %v11454_v49 = vadd.f32 %v2805_v61, %v11288_v19  ;;  %v8715_v20 = vld [vmem:[%s14159_s1 + $0xbc] sm:$0x3] }
 0x364   : > { %v2773_v16 = vpop.f32.mrf.mxu1  ;;  %8693 = vmatmul.msk.bf16.vlgmr.msra.gmra.mxu0 %vm1656_vm8, %v8677_v47 }
 0x365   : > { %v11461_v57 = vadd.f32 %v2773_v16, %v11297_v31  ;;  %3277 = vmatpush.bf16.msra.mxu0 %v10887_v54  ;;  %v8704_v31 = vld [vmem:[%s14159_s1 + $0xa6] sm:$0x3] }
 0x367   : > { %3389 = vmatpush.bf16.msrb.mxu3 %v11065_v58  ;;  %8722 = vmatmul.msk.bf16.vlgmr.msrb.gmra.mxu1 %vm1656_vm8, %v8706_v38 }
 0x368   : > { %3485 = vmatpush.bf16.msrb.mxu1 %v10973_v0  ;;  %v2499_v41 = vpop.f32.mrf.mxu0 }
 0x36a   : > { %v2791_v40 = vpop.f32.mrf.mxu2  ;;  %v2807_v19 = vpop.f32.mrf.mxu3 }
 0x36c   : > { %v2775_v12 = vpop.f32.mrf.mxu1 }
 0x36d   : > { %v8714_v12 = vld [vmem:[%s14159_s1 + $0xba] sm:$0x3] }
 0x36f   : > { %8727 = vmatmul.msk.bf16.vlgmr.msra.gmra.mxu2 %vm1656_vm8, %v8711_v4 }
 0x370   : > { %3603 = vmatpush.bf16.msra.mxu2 %v10862_v15  ;;  %v2581_v54 = vpop.f32.mrf.mxu0 }
 0x371   : > { %v11475_v52 = vadd.f32 %v2581_v54, %v11323_v33  ;;  %v8710_v33 = vld [vmem:[%s14159_s1 + $0xb2] sm:$0x3] }
 0x372   : > { %v2853_v27 = vpop.f32.mrf.mxu2  ;;  %8720 = vmatmul.msk.bf16.vlgmr.msra.gmra.mxu3 %vm1656_vm8, %v8704_v31  ;;  %v2869_v35 = vpop.f32.mrf.mxu3 }
 0x373   : > { %v11482_v51 = vadd.f32 %v2853_v27, %v11330_v46  ;;  %3453 = vmatpush.bf16.msra.mxu3 %v11100_v6  ;;  %v11486_v5 = vadd.f32 %v2869_v35, %v11333_v34  ;;  %v8735_v35 = vld [vmem:[%s14159_s1 + $0xc4] sm:$0x3] }
 0x374   : > { %v2837_v15 = vpop.f32.mrf.mxu1  ;;  %8697 = vmatmul.msk.bf16.vlgmr.msrb.gmra.mxu0 %vm1656_vm8, %v8681_v29 }
 0x375   : > { %v11493_v42 = vadd.f32 %v2837_v15, %v11342_v45  ;;  %3341 = vmatpush.bf16.msrb.mxu0 %v10926_v36  ;;  %v3508_v61 = vpop.permute.xlu0 %3507  ;;  %v8708_v45 = vld [vmem:[%s14159_s1 + $0xae] sm:$0x3]  ;;  %v14283_v15 = vld [vmem:[#allocation21_spill] sm:$0xff] }
 0x376   : > { %v11510_v41 = vsel %vm1660_vm7, %v3508_v61, 0 }
 0x377   : > { %8726 = vmatmul.msk.bf16.vlgmr.msra.gmra.mxu1 %vm1656_vm8, %v8710_v33 }
 0x378   : > { %3587 = vmatpush.bf16.msra.mxu1 %v10714_v8  ;;  %v2583_v46 = vpop.f32.mrf.mxu0  ;;  %v8701_v8 = vld [vmem:[%s14159_s1 + $0xa0] sm:$0x3] }
 0x379   : > { %v8705_v46 = vld [vmem:[%s14159_s1 + $0xa8] sm:$0x3] }
 0x37a   : > { %v2855_v1 = vpop.f32.mrf.mxu2  ;;  %v2871_v34 = vpop.f32.mrf.mxu3 }
 0x37c   : > { %v2839_v47 = vpop.f32.mrf.mxu1 }
 0x37f   : > { %8731 = vmatmul.msk.bf16.vlgmr.msrb.gmra.mxu2 %vm1656_vm8, %v8715_v20  ;;  %v14284_v20 = vld [vmem:[#allocation17_spill] sm:$0xff] }
 0x380   : > { %3667 = vmatpush.bf16.msrb.mxu2 %v10898_v48 }
 0x381   : > { %v2693_v16 = vpop.f32.mrf.mxu0 }
 0x382   : > { %v2917_v38 = vpop.f32.mrf.mxu2  ;;  %v11513_v40 = vadd.f32 %v2693_v16, %v11367_v14  ;;  %8724 = vmatmul.msk.bf16.vlgmr.msrb.gmra.mxu3 %vm1656_vm8, %v8708_v45  ;;  %v14282_v14 = vld [vmem:[#allocation16_spill] sm:$0xff]  ;;  %v8734_v45 = vld [vmem:[%s14159_s1 + $0xc2] sm:$0x3] }
 0x383   : > { %v11517_v19 = vadd.f32 %v2917_v38, %v11373_v21  ;;  %3522 = vmatpush.bf16.msrb.mxu3 %v11510_v41 }
 0x384   : > { %v2901_v48 = vpop.f32.mrf.mxu1  ;;  %8717 = vmatmul.msk.bf16.vlgmr.msra.gmra.mxu0 %vm1656_vm8, %v8701_v8  ;;  %v14286_v8 = vld [vmem:[#allocation18_spill] sm:$0xff] }
 0x385   : > { %v11525_v4 = vadd.f32 %v2901_v48, %v11383_v25  ;;  %3405 = vmatpush.bf16.msra.mxu0 %v10951_v50  ;;  %v8712_v25 = vld [vmem:[%s14159_s1 + $0xb6] sm:$0x3] }
 0x387   : > { %8730 = vmatmul.msk.bf16.vlgmr.msrb.gmra.mxu1 %vm1656_vm8, %v8714_v12 }
 0x388   : > { %3651 = vmatpush.bf16.msrb.mxu1 %v14282_v14 }
 0x389   : > { %v2695_v21 = vpop.f32.mrf.mxu0 }
 0x38a   : > { %v2919_v31 = vpop.f32.mrf.mxu2  ;;  %v2935_v54 = vpop.f32.mrf.mxu3  ;;  %v8739_v21 = vld [vmem:[%s14159_s1 + $0xcc] sm:$0x3] }
 0x38b   : > { %v11531_v29 = vadd.f32 %v2935_v54, %v11376_v24  ;;  %v8709_v54 = vld [vmem:[%s14159_s1 + $0xb0] sm:$0x3] }
 0x38c   : > { %v2903_v27 = vpop.f32.mrf.mxu1 }
 0x38f   : > { %8751 = vmatmul.msk.bf16.vlgmr.msra.gmra.mxu2 %vm1656_vm8, %v8735_v35 }
 0x390   : > { %3731 = vmatpush.bf16.msra.mxu2 %v14283_v15 }
 0x391   : > { %v2757_v33 = vpop.f32.mrf.mxu0 }
 0x392   : > { %v3016_v24 = vpop.f32.mrf.mxu2  ;;  %v11545_v1 = vadd.f32 %v2757_v33, %v11407_v59  ;;  %v2937_v34 = vpop.f32.mrf.mxu3  ;;  %8728 = vmatmul.msk.bf16.vlgmr.msra.gmra.mxu3 %vm1656_vm8, %v8712_v25  ;;  %v14285_v59 = vld [vmem:[#allocation23_spill] sm:$0xff] }
 0x393   : > { %v11549_v47 = vadd.f32 %v3016_v24, %v11413_v43  ;;  %3619 = vmatpush.bf16.msra.mxu3 %v14284_v20 }
 0x394   : > { %v3000_v61 = vpop.f32.mrf.mxu1  ;;  %8721 = vmatmul.msk.bf16.vlgmr.msrb.gmra.mxu0 %vm1656_vm8, %v8705_v46  ;;  %v14288_v46 = vld [vmem:[#allocation20_spill] sm:$0xff] }
 0x395   : > { %v11557_v16 = vadd.f32 %v3000_v61, %v11423_v17  ;;  %3469 = vmatpush.bf16.msrb.mxu0 %v14285_v59  ;;  %v8716_v17 = vld [vmem:[%s14159_s1 + $0xbe] sm:$0x3]  ;;  %v8743_v61 = vld [vmem:[%s14159_s1 + $0xd4] sm:$0x3] }
 0x397   : > { %8750 = vmatmul.msk.bf16.vlgmr.msra.gmra.mxu1 %vm1656_vm8, %v8734_v45 }
 0x398   : > { %3715 = vmatpush.bf16.msra.mxu1 %v14286_v8  ;;  %v8713_v8 = vld [vmem:[%s14159_s1 + $0xb8] sm:$0x3] }
 0x399   : > { %v2759_v43 = vpop.f32.mrf.mxu0 }
 0x39a   : > { %v3018_v38 = vpop.f32.mrf.mxu2  ;;  %v3032_v48 = vpop.f32.mrf.mxu3 }
 0x39b   : > { %v11563_v12 = vadd.f32 %v3032_v48, %v11416_v26 }
 0x39c   : > { %v3002_v14 = vpop.f32.mrf.mxu1 }
 0x39f   : > { %8755 = vmatmul.msk.bf16.vlgmr.msrb.gmra.mxu2 %vm1656_vm8, %v8739_v21 }
 0x3a0   : > { %3795 = vmatpush.bf16.msrb.mxu2 %v11192_v7  ;;  %v8738_v7 = vld [vmem:[%s14159_s1 + $0xca] sm:$0x3] }
 0x3a1   : > { %v2821_v31 = vpop.f32.mrf.mxu0 }
 0x3a2   : > { %v3080_v26 = vpop.f32.mrf.mxu2  ;;  %v11577_v27 = vadd.f32 %v2821_v31, %v11443_v22  ;;  %v3034_v35 = vpop.f32.mrf.mxu3  ;;  %8732 = vmatmul.msk.bf16.vlgmr.msrb.gmra.mxu3 %vm1656_vm8, %v8716_v17  ;;  %v14287_v22 = vld [vmem:[#allocation14_spill] sm:$0xff] }
 0x3a3   : > { %v11581_v25 = vadd.f32 %v3080_v26, %v11450_v28  ;;  %3683 = vmatpush.bf16.msrb.mxu3 %v10803_v62  ;;  %v14290_v17 = vld [vmem:[#allocation10_spill] sm:$0xff]  ;;  %v8747_v35 = vld [vmem:[%s14159_s1 + $0xdc] sm:$0x3] }
 0x3a4   : > { %v3064_v15 = vpop.f32.mrf.mxu1  ;;  %8725 = vmatmul.msk.bf16.vlgmr.msra.gmra.mxu0 %vm1656_vm8, %v8709_v54 }
 0x3a5   : > { %v11589_v33 = vadd.f32 %v3064_v15, %v11461_v57  ;;  %3571 = vmatpush.bf16.msra.mxu0 %v14287_v22  ;;  %v8736_v57 = vld [vmem:[%s14159_s1 + $0xc6] sm:$0x3]  ;;  %v14291_v15 = vld [vmem:[#allocation12_spill] sm:$0xff]  ;;  %v8733_v22 = vld [vmem:[%s14159_s1 + $0xc0] sm:$0x3] }
 0x3a7   : > { %8754 = vmatmul.msk.bf16.vlgmr.msrb.gmra.mxu1 %vm1656_vm8, %v8738_v7 }
 0x3a8   : > { %3779 = vmatpush.bf16.msrb.mxu1 %v14288_v46 }
 0x3a9   : > { %v2823_v28 = vpop.f32.mrf.mxu0 }
 0x3aa   : > { %v3082_v24 = vpop.f32.mrf.mxu2  ;;  %v3096_v34 = vpop.f32.mrf.mxu3 }
 0x3ab   : > { %v11595_v62 = vadd.f32 %v3096_v34, %v11454_v49  ;;  %v14292_v34 = vmov 0  }
 0x3ac   : > { %v3066_v20 = vpop.f32.mrf.mxu1 }
 0x3af   : > { %8759 = vmatmul.msk.bf16.vlgmr.msra.gmra.mxu2 %vm1656_vm8, %v8743_v61  ;;  %v8746_v61 = vld [vmem:[%s14159_s1 + $0xda] sm:$0x3] }
 0x3b0   : > { %3892 = vmatpush.bf16.msra.mxu2 %v10617_v10  ;;  %v8742_v10 = vld [vmem:[%s14159_s1 + $0xd2] sm:$0x3] }
 0x3b1   : > { %v2885_v45 = vpop.f32.mrf.mxu0 }
 0x3b2   : > { %v3144_v49 = vpop.f32.mrf.mxu2  ;;  %v11609_v43 = vadd.f32 %v2885_v45, %v11475_v52  ;;  %v3098_v38 = vpop.f32.mrf.mxu3  ;;  %8752 = vmatmul.msk.bf16.vlgmr.msra.gmra.mxu3 %vm1656_vm8, %v8736_v57  ;;  %v14289_v52 = vld [vmem:[#allocation15_spill] sm:$0xff]  ;;  %v14294_v45 = vld [vmem:[#allocation8_spill] sm:$0xff] }
 0x3b3   : > { %v11613_v48 = vadd.f32 %v3144_v49, %v11482_v51  ;;  %3747 = vmatpush.bf16.msra.mxu3 %v10832_v18  ;;  %v8767_v38 = vld [vmem:[%s14159_s1 + $0xe4] sm:$0x3] }
 0x3b4   : > { %v3128_v14 = vpop.f32.mrf.mxu1  ;;  %8729 = vmatmul.msk.bf16.vlgmr.msrb.gmra.mxu0 %vm1656_vm8, %v8713_v8 }
 0x3b5   : > { %v11621_v21 = vadd.f32 %v3128_v14, %v11493_v42  ;;  %3635 = vmatpush.bf16.msrb.mxu0 %v14289_v52  ;;  %v8740_v42 = vld [vmem:[%s14159_s1 + $0xce] sm:$0x3] }
 0x3b7   : > { %8758 = vmatmul.msk.bf16.vlgmr.msra.gmra.mxu1 %vm1656_vm8, %v8742_v10  ;;  %v8737_v10 = vld [vmem:[%s14159_s1 + $0xc8] sm:$0x3] }
 0x3b8   : > { %3876 = vmatpush.bf16.msra.mxu1 %v14290_v17 }
 0x3b9   : > { %v2887_v51 = vpop.f32.mrf.mxu0 }
 0x3ba   : > { %v3146_v31 = vpop.f32.mrf.mxu2  ;;  %v3160_v54 = vpop.f32.mrf.mxu3 }
 0x3bb   : > { %v11627_v18 = vadd.f32 %v3160_v54, %v11486_v5 }
 0x3bc   : > { %v3130_v26 = vpop.f32.mrf.mxu1 }
 0x3bd   : > { %v14295_v26 = vld [vmem:[#allocation19_spill] sm:$0xff] }
 0x3bf   : > { %8763 = vmatmul.msk.bf16.vlgmr.msrb.gmra.mxu2 %vm1656_vm8, %v8747_v35 }
 0x3c0   : > { %3956 = vmatpush.bf16.msrb.mxu2 %v14291_v15 }
 0x3c1   : > { %v2984_v7 = vpop.f32.mrf.mxu0 }
 0x3c2   : > { %v3208_v5 = vpop.f32.mrf.mxu2  ;;  %v11641_v46 = vadd.f32 %v2984_v7, %v11513_v40  ;;  %8756 = vmatmul.msk.bf16.vlgmr.msrb.gmra.mxu3 %vm1656_vm8, %v8740_v42  ;;  %v3162_v28 = vpop.f32.mrf.mxu3  ;;  %v14293_v40 = vld [vmem:[#allocation6_spill] sm:$0xff]  ;;  %v8741_v7 = vld [vmem:[%s14159_s1 + $0xd0] sm:$0x3] }
 0x3c3   : > { %v11645_v24 = vadd.f32 %v3208_v5, %v11517_v19  ;;  %3811 = vmatpush.bf16.msrb.mxu3 %v14292_v34 }
 0x3c4   : > { %v3192_v20 = vpop.f32.mrf.mxu1  ;;  %8749 = vmatmul.msk.bf16.vlgmr.msra.gmra.mxu0 %vm1656_vm8, %v8733_v22 }
 0x3c5   : > { %v11653_v57 = vadd.f32 %v3192_v20, %v11525_v4  ;;  %3699 = vmatpush.bf16.msra.mxu0 %v14293_v40  ;;  %v8744_v4 = vld [vmem:[%s14159_s1 + $0xd6] sm:$0x3] }
 0x3c7   : > { %8762 = vmatmul.msk.bf16.vlgmr.msrb.gmra.mxu1 %vm1656_vm8, %v8746_v61 }
 0x3c8   : > { %3940 = vmatpush.bf16.msrb.mxu1 %v14294_v45 }
 0x3c9   : > { %v2986_v19 = vpop.f32.mrf.mxu0 }
 0x3ca   : > { %v3210_v8 = vpop.f32.mrf.mxu2 }
 0x3cb   : > { %v8775_v8 = vld [vmem:[%s14159_s1 + $0xf4] sm:$0x3] }
 0x3cc   : > { %v3194_v49 = vpop.f32.mrf.mxu1 }
 0x3cf   : > { %8783 = vmatmul.msk.bf16.vlgmr.msra.gmra.mxu2 %vm1656_vm8, %v8767_v38 }
 0x3d0   : > { %4020 = vmatpush.bf16.msra.mxu2 %v10846_v60  ;;  %v8766_v60 = vld [vmem:[%s14159_s1 + $0xe2] sm:$0x3] }
 0x3d1   : > { %v3048_v14 = vpop.f32.mrf.mxu0 }
 0x3d2   : > { %v3311_v52 = vpop.f32.mrf.mxu2  ;;  %v11670_v17 = vadd.f32 %v3048_v14, %v11545_v1  ;;  %8760 = vmatmul.msk.bf16.vlgmr.msra.gmra.mxu3 %vm1656_vm8, %v8744_v4  ;;  %v14296_v1 = vld [vmem:[#allocation13_spill] sm:$0xff] }
 0x3d3   : > { %v11674_v51 = vadd.f32 %v3311_v52, %v11549_v47  ;;  %3908 = vmatpush.bf16.msra.mxu3 %v10663_v39  ;;  %v8771_v39 = vld [vmem:[%s14159_s1 + $0xec] sm:$0x3] }
 0x3d4   : > { %v3295_v31 = vpop.f32.mrf.mxu1  ;;  %8753 = vmatmul.msk.bf16.vlgmr.msrb.gmra.mxu0 %vm1656_vm8, %v8737_v10 }
 0x3d5   : > { %v11682_v54 = vadd.f32 %v3295_v31, %v11557_v16  ;;  %3763 = vmatpush.bf16.msrb.mxu0 %v14295_v26  ;;  %v8748_v16 = vld [vmem:[%s14159_s1 + $0xde] sm:$0x3] }
 0x3d7   : > { %8782 = vmatmul.msk.bf16.vlgmr.msra.gmra.mxu1 %vm1656_vm8, %v8766_v60 }
 0x3d8   : > { %4004 = vmatpush.bf16.msra.mxu1 %v14296_v1  ;;  %v8779_v1 = vld [vmem:[%s14159_s1 + $0xfc] sm:$0x3] }
 0x3d9   : > { %v3050_v47 = vpop.f32.mrf.mxu0 }
 0x3da   : > { %v3313_v35 = vpop.f32.mrf.mxu2 }
 0x3dc   : > { %v3297_v42 = vpop.f32.mrf.mxu1 }
 0x3df   : > { %8787 = vmatmul.msk.bf16.vlgmr.msrb.gmra.mxu2 %vm1656_vm8, %v8771_v39 }
 0x3e0   : > { %4084 = vmatpush.bf16.msrb.mxu2 %v11432_v30  ;;  %v8770_v30 = vld [vmem:[%s14159_s1 + $0xea] sm:$0x3] }
 0x3e1   : > { %v3112_v15 = vpop.f32.mrf.mxu0 }
 0x3e2   : > { %v3375_v22 = vpop.f32.mrf.mxu2  ;;  %v11699_v5 = vadd.f32 %v3112_v15, %v11577_v27  ;;  %8764 = vmatmul.msk.bf16.vlgmr.msrb.gmra.mxu3 %vm1656_vm8, %v8748_v16  ;;  %v14297_v27 = vld [vmem:[#allocation9_spill] sm:$0xff]  ;;  %v14299_v16 = vld [vmem:[#allocation7_spill] sm:$0xff] }
 0x3e3   : > { %v11703_v28 = vadd.f32 %v3375_v22, %v11581_v25  ;;  %3972 = vmatpush.bf16.msrb.mxu3 %v10669_v56 }
 0x3e4   : > { %v3359_v20 = vpop.f32.mrf.mxu1  ;;  %8757 = vmatmul.msk.bf16.vlgmr.msra.gmra.mxu0 %vm1656_vm8, %v8741_v7 }
 0x3e5   : > { %v11711_v61 = vadd.f32 %v3359_v20, %v11589_v33  ;;  %v3230_v40 = vpop.f32.mrf.mxu3  ;;  %3860 = vmatpush.bf16.msra.mxu0 %v14297_v27  ;;  %v8768_v33 = vld [vmem:[%s14159_s1 + $0xe6] sm:$0x3] }
 0x3e6   : > { %v11715_v45 = vadd.f32 %v3230_v40, %v11531_v29  ;;  %v8799_v40 = vld [vmem:[%s14159_s1 + $0x104] sm:$0x3] }
 0x3e7   : > { %8786 = vmatmul.msk.bf16.vlgmr.msrb.gmra.mxu1 %vm1656_vm8, %v8770_v30 }
 0x3e8   : > { %4068 = vmatpush.bf16.msrb.mxu1 %v10709_v11  ;;  %v8745_v11 = vld [vmem:[%s14159_s1 + $0xd8] sm:$0x3] }
 0x3e9   : > { %v3114_v56 = vpop.f32.mrf.mxu0 }
 0x3ea   : > { %v3377_v25 = vpop.f32.mrf.mxu2 }
 0x3ec   : > { %v3361_v19 = vpop.f32.mrf.mxu1 }
 0x3ed   : > { %v3232_v49 = vpop.f32.mrf.mxu3 }
 0x3ef   : > { %8791 = vmatmul.msk.bf16.vlgmr.msra.gmra.mxu2 %vm1656_vm8, %v8775_v8 }
 0x3f0   : > { %4181 = vmatpush.bf16.msra.mxu2 %v11029_v53  ;;  %v8774_v53 = vld [vmem:[%s14159_s1 + $0xf2] sm:$0x3] }
 0x3f1   : > { %v3176_v29 = vpop.f32.mrf.mxu0 }
 0x3f2   : > { %v3439_v38 = vpop.f32.mrf.mxu2  ;;  %v11731_v4 = vadd.f32 %v3176_v29, %v11609_v43  ;;  %8784 = vmatmul.msk.bf16.vlgmr.msra.gmra.mxu3 %vm1656_vm8, %v8768_v33  ;;  %v14298_v43 = vld [vmem:[#allocation11_spill] sm:$0xff]  ;;  %v8803_v29 = vld [vmem:[%s14159_s1 + $0x10c] sm:$0x3] }
 0x3f3   : > { %v11735_v14 = vadd.f32 %v3439_v38, %v11613_v48  ;;  %4036 = vmatpush.bf16.msra.mxu3 %v10751_v23 }
 0x3f4   : > { %v3423_v10 = vpop.f32.mrf.mxu1  ;;  %8761 = vmatmul.msk.bf16.vlgmr.msrb.gmra.mxu0 %vm1656_vm8, %v8745_v11 }
 0x3f5   : > { %v11743_v52 = vadd.f32 %v3423_v10, %v11621_v21  ;;  %v3327_v31 = vpop.f32.mrf.mxu3  ;;  %3924 = vmatpush.bf16.msrb.mxu0 %v14298_v43  ;;  %v8772_v21 = vld [vmem:[%s14159_s1 + $0xee] sm:$0x3] }
 0x3f6   : > { %v11747_v60 = vadd.f32 %v3327_v31, %v11563_v12 }
 0x3f7   : > { %8790 = vmatmul.msk.bf16.vlgmr.msra.gmra.mxu1 %vm1656_vm8, %v8774_v53 }
 0x3f8   : > { %4165 = vmatpush.bf16.msra.mxu1 %v10842_v63  ;;  %v8765_v63 = vld [vmem:[%s14159_s1 + $0xe0] sm:$0x3] }
 0x3f9   : > { %v3178_v23 = vpop.f32.mrf.mxu0 }
 0x3fa   : > { %v3441_v48 = vpop.f32.mrf.mxu2 }
 0x3fb   : > { %v8807_v48 = vld [vmem:[%s14159_s1 + $0x114] sm:$0x3] }
 0x3fc   : > { %v3425_v26 = vpop.f32.mrf.mxu1 }
 0x3fd   : > { %v3329_v47 = vpop.f32.mrf.mxu3 }
 0x3ff   : > { %8795 = vmatmul.msk.bf16.vlgmr.msrb.gmra.mxu2 %vm1656_vm8, %v8779_v1 }
 0x400   : > { %4245 = vmatpush.bf16.msrb.mxu2 %v11065_v58  ;;  %v8778_v58 = vld [vmem:[%s14159_s1 + $0xfa] sm:$0x3] }
 0x401   : > { %v3279_v12 = vpop.f32.mrf.mxu0 }
 0x402   : > { %v3503_v35 = vpop.f32.mrf.mxu2  ;;  %v11763_v42 = vadd.f32 %v3279_v12, %v11641_v46  ;;  %8788 = vmatmul.msk.bf16.vlgmr.msrb.gmra.mxu3 %vm1656_vm8, %v8772_v21  ;;  %v8806_v12 = vld [vmem:[%s14159_s1 + $0x112] sm:$0x3] }
 0x403   : > { %v11767_v39 = vadd.f32 %v3503_v35, %v11645_v24  ;;  %4100 = vmatpush.bf16.msrb.mxu3 %v14299_v16 }
 0x404   : > { %v3487_v15 = vpop.f32.mrf.mxu1  ;;  %8781 = vmatmul.msk.bf16.vlgmr.msra.gmra.mxu0 %vm1656_vm8, %v8765_v63 }
 0x405   : > { %v11775_v7 = vadd.f32 %v3487_v15, %v11653_v57  ;;  %v3391_v22 = vpop.f32.mrf.mxu3  ;;  %3988 = vmatpush.bf16.msra.mxu0 %v10650_v13  ;;  %v8776_v13 = vld [vmem:[%s14159_s1 + $0xf6] sm:$0x3] }
 0x406   : > { %v11779_v46 = vadd.f32 %v3391_v22, %v11595_v62 }
 0x407   : > { %8794 = vmatmul.msk.bf16.vlgmr.msrb.gmra.mxu1 %vm1656_vm8, %v8778_v58  ;;  %v8811_v58 = vld [vmem:[%s14159_s1 + $0x11c] sm:$0x3] }
 0x408   : > { %4229 = vmatpush.bf16.msrb.mxu1 %v10883_v55  ;;  %v8769_v55 = vld [vmem:[%s14159_s1 + $0xe8] sm:$0x3] }
 0x409   : > { %v3281_v24 = vpop.f32.mrf.mxu0 }
 0x40a   : > { %v3505_v20 = vpop.f32.mrf.mxu2 }
 0x40c   : > { %v3489_v30 = vpop.f32.mrf.mxu1 }
 0x40d   : > { %v3393_v27 = vpop.f32.mrf.mxu3 }
 0x40f   : > { %8815 = vmatmul.msk.bf16.vlgmr.msra.gmra.mxu2 %vm1656_vm8, %v8799_v40  ;;  %v14300_v40 = vld [vmem:[#allocation22_spill] sm:$0xff] }
 0x410   : > { %4309 = vmatpush.bf16.msra.mxu2 %v11100_v6  ;;  %v8798_v6 = vld [vmem:[%s14159_s1 + $0x102] sm:$0x3] }
 0x411   : > { %v3343_v62 = vpop.f32.mrf.mxu0 }
 0x412   : > { %v3605_v57 = vpop.f32.mrf.mxu2  ;;  %v11795_v56 = vadd.f32 %v3343_v62, %v11670_v17  ;;  %8792 = vmatmul.msk.bf16.vlgmr.msra.gmra.mxu3 %vm1656_vm8, %v8776_v13  ;;  %v8810_v13 = vld [vmem:[%s14159_s1 + $0x11a] sm:$0x3] }
 0x413   : > { %v11799_v25 = vadd.f32 %v3605_v57, %v11674_v51  ;;  %4197 = vmatpush.bf16.msra.mxu3 %v10926_v36 }
 0x414   : > { %v3589_v19 = vpop.f32.mrf.mxu1  ;;  %8785 = vmatmul.msk.bf16.vlgmr.msrb.gmra.mxu0 %vm1656_vm8, %v8769_v55 }
 0x415   : > { %v11807_v8 = vadd.f32 %v3589_v19, %v11682_v54  ;;  %v3455_v49 = vpop.f32.mrf.mxu3  ;;  %4052 = vmatpush.bf16.msrb.mxu0 %v10718_v32  ;;  %v8780_v32 = vld [vmem:[%s14159_s1 + $0xfe] sm:$0x3] }
 0x416   : > { %v11811_v17 = vadd.f32 %v3455_v49, %v11627_v18  ;;  %v8808_v49 = vld [vmem:[%s14159_s1 + $0x116] sm:$0x3] }
 0x417   : > { %8814 = vmatmul.msk.bf16.vlgmr.msra.gmra.mxu1 %vm1656_vm8, %v8798_v6 }
 0x418   : > { %4293 = vmatpush.bf16.msra.mxu1 %v10955_v3  ;;  %v8773_v3 = vld [vmem:[%s14159_s1 + $0xf0] sm:$0x3] }
 0x419   : > { %v3345_v36 = vpop.f32.mrf.mxu0 }
 0x41a   : > { %v3607_v51 = vpop.f32.mrf.mxu2 }
 0x41c   : > { %v3591_v33 = vpop.f32.mrf.mxu1 }
 0x41d   : > { %v3457_v11 = vpop.f32.mrf.mxu3 }
 0x41f   : > { %8819 = vmatmul.msk.bf16.vlgmr.msrb.gmra.mxu2 %vm1656_vm8, %v8803_v29 }
 0x420   : > { %4373 = vmatpush.bf16.msrb.mxu2 %v11510_v41  ;;  %v8802_v41 = vld [vmem:[%s14159_s1 + $0x10a] sm:$0x3] }
 0x421   : > { %v3407_v18 = vpop.f32.mrf.mxu0 }
 0x422   : > { %v3669_v54 = vpop.f32.mrf.mxu2  ;;  %v11827_v38 = vadd.f32 %v3407_v18, %v11699_v5  ;;  %8796 = vmatmul.msk.bf16.vlgmr.msrb.gmra.mxu3 %vm1656_vm8, %v8780_v32 }
 0x423   : > { %v11831_v10 = vadd.f32 %v3669_v54, %v11703_v28  ;;  %4261 = vmatpush.bf16.msrb.mxu3 %v10951_v50 }
 0x424   : > { %v3653_v53 = vpop.f32.mrf.mxu1  ;;  %8789 = vmatmul.msk.bf16.vlgmr.msra.gmra.mxu0 %vm1656_vm8, %v8773_v3 }
 0x425   : > { %v11839_v31 = vadd.f32 %v3653_v53, %v11711_v61  ;;  %v3524_v43 = vpop.f32.mrf.mxu3  ;;  %4149 = vmatpush.bf16.msra.mxu0 %v10870_v9  ;;  %v8800_v9 = vld [vmem:[%s14159_s1 + $0x106] sm:$0x3] }
 0x426   : > { %v11843_v5 = vadd.f32 %v3524_v43, %v11715_v45  ;;  %v8777_v45 = vld [vmem:[%s14159_s1 + $0xf8] sm:$0x3] }
 0x427   : > { %8818 = vmatmul.msk.bf16.vlgmr.msrb.gmra.mxu1 %vm1656_vm8, %v8802_v41 }
 0x428   : > { %4357 = vmatpush.bf16.msrb.mxu1 %v10976_v44 }
 0x429   : > { %v3409_v50 = vpop.f32.mrf.mxu0 }
 0x42a   : > { %v3671_v28 = vpop.f32.mrf.mxu2 }
 0x42c   : > { %v3655_v23 = vpop.f32.mrf.mxu1 }
 0x42d   : > { %v3526_v26 = vpop.f32.mrf.mxu3 }
 0x42f   : > { %8823 = vmatmul.msk.bf16.vlgmr.msra.gmra.mxu2 %vm1656_vm8, %v8807_v48 }
 0x431   : > { %v3471_v61 = vpop.f32.mrf.mxu0 }
 0x432   : > { %v3733_v44 = vpop.f32.mrf.mxu2  ;;  %v11858_v1 = vadd.f32 %v3471_v61, %v11731_v4  ;;  %8816 = vmatmul.msk.bf16.vlgmr.msra.gmra.mxu3 %vm1656_vm8, %v8800_v9 }
 0x433   : > { %v11862_v47 = vadd.f32 %v3733_v44, %v11735_v14  ;;  %4325 = vmatpush.bf16.msra.mxu3 %v14285_v59 }
 0x434   : > { %v3717_v21 = vpop.f32.mrf.mxu1  ;;  %8793 = vmatmul.msk.bf16.vlgmr.msrb.gmra.mxu0 %vm1656_vm8, %v8777_v45 }
 0x435   : > { %v11870_v63 = vadd.f32 %v3717_v21, %v11743_v52  ;;  %v3621_v35 = vpop.f32.mrf.mxu3  ;;  %4213 = vmatpush.bf16.msrb.mxu0 %v10907_v2  ;;  %v8804_v52 = vld [vmem:[%s14159_s1 + $0x10e] sm:$0x3] }
 0x436   : > { %v11874_v4 = vadd.f32 %v3621_v35, %v11747_v60  ;;  %v8797_v60 = vld [vmem:[%s14159_s1 + $0x100] sm:$0x3] }
 0x437   : > { %8822 = vmatmul.msk.bf16.vlgmr.msra.gmra.mxu1 %vm1656_vm8, %v8806_v12 }
 0x439   : > { %v3473_v14 = vpop.f32.mrf.mxu0 }
 0x43a   : > { %v3735_v59 = vpop.f32.mrf.mxu2 }
 0x43c   : > { %v3719_v15 = vpop.f32.mrf.mxu1 }
 0x43d   : > { %v3623_v22 = vpop.f32.mrf.mxu3 }
 0x43f   : > { %8827 = vmatmul.msk.bf16.vlgmr.msrb.gmra.mxu2 %vm1656_vm8, %v8811_v58 }
 0x441   : > { %v3573_v2 = vpop.f32.mrf.mxu0 }
 0x442   : > { %v3797_v24 = vpop.f32.mrf.mxu2  ;;  %v11888_v20 = vadd.f32 %v3573_v2, %v11763_v42  ;;  %8820 = vmatmul.msk.bf16.vlgmr.msrb.gmra.mxu3 %vm1656_vm8, %v8804_v52 }
 0x443   : > { %v11892_v30 = vadd.f32 %v3797_v24, %v11767_v39  ;;  %4389 = vmatpush.bf16.msrb.mxu3 %v14300_v40 }
 0x444   : > { %v3781_v27 = vpop.f32.mrf.mxu1  ;;  %8813 = vmatmul.msk.bf16.vlgmr.msra.gmra.mxu0 %vm1656_vm8, %v8797_v60 }
 0x445   : > { %v3830_v62 = vadd.f32 %v3781_v27, %v11775_v7  ;;  %v3685_v55 = vpop.f32.mrf.mxu3  ;;  %4277 = vmatpush.bf16.msra.mxu0 %v10922_v37  ;;  %v8801_v7 = vld [vmem:[%s14159_s1 + $0x108] sm:$0x3] }
 0x446   : > { %v3824_v42 = vadd.f32 %v3685_v55, %v11779_v46 }
 0x447   : > { %8826 = vmatmul.msk.bf16.vlgmr.msrb.gmra.mxu1 %vm1656_vm8, %v8810_v13 }
 0x449   : > { %v3575_v39 = vpop.f32.mrf.mxu0 }
 0x44a   : > { %v3799_v57 = vpop.f32.mrf.mxu2 }
 0x44c   : > { %v3783_v19 = vpop.f32.mrf.mxu1 }
 0x44d   : > { %v3687_v6 = vpop.f32.mrf.mxu3 }
 0x451   : > { %v3637_v36 = vpop.f32.mrf.mxu0 }
 0x452   : > { %v3894_v51 = vpop.f32.mrf.mxu2  ;;  %v3821_v37 = vadd.f32 %v3637_v36, %v11795_v56  ;;  %8824 = vmatmul.msk.bf16.vlgmr.msra.gmra.mxu3 %vm1656_vm8, %v8808_v49  ;;  %v8812_v56 = vld [vmem:[%s14159_s1 + $0x11e] sm:$0x3] }
 0x453   : > { %v4108_v46 = vadd.f32 %v3894_v51, %v11799_v25  ;;  %v8805_v25 = vld [vmem:[%s14159_s1 + $0x110] sm:$0x3] }
 0x454   : > { %v3878_v33 = vpop.f32.mrf.mxu1  ;;  %8817 = vmatmul.msk.bf16.vlgmr.msrb.gmra.mxu0 %vm1656_vm8, %v8801_v7 }
 0x455   : > { %v4107_v29 = vadd.f32 %v3878_v33, %v11807_v8  ;;  %v3749_v11 = vpop.f32.mrf.mxu3  ;;  %4341 = vmatpush.bf16.msrb.mxu0 %v10973_v0 }
 0x456   : > { %v3828_v32 = vadd.f32 %v3749_v11, %v11811_v17 }
 0x459   : > { %v3639_v18 = vpop.f32.mrf.mxu0 }
 0x45a   : > { %v3896_v3 = vpop.f32.mrf.mxu2 }
 0x45c   : > { %v3880_v54 = vpop.f32.mrf.mxu1 }
 0x45d   : > { %v3751_v53 = vpop.f32.mrf.mxu3 }
 0x461   : > { %v3701_v41 = vpop.f32.mrf.mxu0 }
 0x462   : > { %v3958_v43 = vpop.f32.mrf.mxu2  ;;  %v3825_v8 = vadd.f32 %v3701_v41, %v11827_v38  ;;  %8828 = vmatmul.msk.bf16.vlgmr.msrb.gmra.mxu3 %vm1656_vm8, %v8812_v56  ;;  %v8809_v38 = vld [vmem:[%s14159_s1 + $0x118] sm:$0x3] }
 0x463   : > { %v4112_v0 = vadd.f32 %v3958_v43, %v11831_v10 }
 0x464   : > { %v3942_v17 = vpop.f32.mrf.mxu1  ;;  %8821 = vmatmul.msk.bf16.vlgmr.msra.gmra.mxu0 %vm1656_vm8, %v8805_v25 }
 0x465   : > { %v4111_v50 = vadd.f32 %v3942_v17, %v11839_v31  ;;  %v3813_v28 = vpop.f32.mrf.mxu3  ;;  %5670 = vmatpush.bf16.msra.mxu0 %v14299_v16 }
 0x466   : > { %v3832_v23 = vadd.f32 %v3813_v28, %v11843_v5 }
 0x469   : > { %v3703_v48 = vpop.f32.mrf.mxu0 }
 0x46a   : > { %v3960_v26 = vpop.f32.mrf.mxu2 }
 0x46c   : > { %v3944_v9 = vpop.f32.mrf.mxu1 }
 0x46d   : > { %v3815_v61 = vpop.f32.mrf.mxu3 }
 0x471   : > { %v3765_v45 = vpop.f32.mrf.mxu0 }
 0x472   : > { %v4022_v10 = vpop.f32.mrf.mxu2  ;;  %v3829_v44 = vadd.f32 %v3765_v45, %v11858_v1 }
 0x473   : > { %v11934_v21 = vadd.f32 %v4022_v10, %v11862_v47 }
 0x474   : > { %v4006_v31 = vpop.f32.mrf.mxu1  ;;  %8825 = vmatmul.msk.bf16.vlgmr.msrb.gmra.mxu0 %vm1656_vm8, %v8809_v38 }
 0x475   : > { %v11938_v5 = vadd.f32 %v4006_v31, %v11870_v63  ;;  %v3910_v12 = vpop.f32.mrf.mxu3 }
 0x476   : > { %v4109_v35 = vadd.f32 %v3910_v12, %v11874_v4 }
 0x479   : > { %v3767_v14 = vpop.f32.mrf.mxu0 }
 0x47a   : > { %v4024_v59 = vpop.f32.mrf.mxu2 }
 0x47c   : > { %v4008_v15 = vpop.f32.mrf.mxu1 }
 0x47d   : > { %v3912_v58 = vpop.f32.mrf.mxu3 }
 0x481   : > { %v3862_v22 = vpop.f32.mrf.mxu0 }
 0x482   : > { %v4086_v52 = vpop.f32.mrf.mxu2  ;;  %v4106_v1 = vadd.f32 %v3862_v22, %v11888_v20 }
 0x483   : > { %v11943_v47 = vadd.f32 %v4086_v52, %v11892_v30 }
 0x484   : > { %v4070_v2 = vpop.f32.mrf.mxu1 }
 0x485   : > { %v11945_v60 = vadd.f32 %v4070_v2, %v3830_v62  ;;  %v3974_v24 = vpop.f32.mrf.mxu3 }
 0x486   : > { %v11947_v63 = vadd.f32 %v3974_v24, %v3824_v42 }
 0x489   : > { %v3864_v27 = vpop.f32.mrf.mxu0 }
 0x48a   : > { %v4088_v13 = vpop.f32.mrf.mxu2 }
 0x48c   : > { %v4072_v4 = vpop.f32.mrf.mxu1 }
 0x48d   : > { %v3976_v55 = vpop.f32.mrf.mxu3 }
 0x491   : > { %v3926_v39 = vpop.f32.mrf.mxu0 }
 0x492   : > { %v4183_v57 = vpop.f32.mrf.mxu2  ;;  %v4110_v19 = vadd.f32 %v3926_v39, %v3821_v37 }
 0x493   : > { %v4397_v6 = vadd.f32 %v4183_v57, %v4108_v46 }
 0x494   : > { %v4167_v49 = vpop.f32.mrf.mxu1 }
 0x495   : > { %v4396_v36 = vadd.f32 %v4167_v49, %v4107_v29  ;;  %v4038_v20 = vpop.f32.mrf.mxu3 }
 0x496   : > { %v11949_v7 = vadd.f32 %v4038_v20, %v3828_v32 }
 0x499   : > { %v3928_v30 = vpop.f32.mrf.mxu0 }
 0x49a   : > { %v4185_v51 = vpop.f32.mrf.mxu2 }
 0x49c   : > { %v4169_v62 = vpop.f32.mrf.mxu1 }
 0x49d   : > { %v4040_v33 = vpop.f32.mrf.mxu3 }
 0x4a1   : > { %v3990_v11 = vpop.f32.mrf.mxu0 }
 0x4a2   : > { %v4247_v42 = vpop.f32.mrf.mxu2  ;;  %v4114_v18 = vadd.f32 %v3990_v11, %v3825_v8 }
 0x4a3   : > { %v4401_v3 = vadd.f32 %v4247_v42, %v4112_v0  ;;  %v11955_v0 = vpop.permute.xlu1 %4413 }
 0x4a4   : > { %v4231_v54 = vpop.f32.mrf.mxu1  ;;  %v11961_v31 = vadd.f32 %v11955_v0, %v4397_v6 }
 0x4a5   : > { %v4400_v53 = vadd.f32 %v4231_v54, %v4111_v50  ;;  %v4102_v56 = vpop.f32.mrf.mxu3  ;;  %v4422_v20 = vadd.f32 %v11955_v0, %v4401_v3 }
 0x4a6   : > { %v11951_v41 = vadd.f32 %v4102_v56, %v3832_v23  ;;  %v11958_v23 = vadd.f32 %v11955_v0, %v4396_v36 }
 0x4a7   : > { %v4421_v57 = vadd.f32 %v11955_v0, %v4400_v53 }
 0x4a8   : > { %v4433_v59 = vsel %vm414_vm0, %v11958_v23, 0.0 }
 0x4a9   : > { %v3992_v37 = vpop.f32.mrf.mxu0  ;;  %v4441_v62 = vsel %vm414_vm0, %v4421_v57, 0.0 }
 0x4aa   : > { %v4249_v46 = vpop.f32.mrf.mxu2 }
 0x4ac   : > { %v4233_v25 = vpop.f32.mrf.mxu1 }
 0x4ad   : > { %v4104_v29 = vpop.f32.mrf.mxu3 }
 0x4b1   : > { %v4054_v43 = vpop.f32.mrf.mxu0 }
 0x4b2   : > { %v4311_v32 = vpop.f32.mrf.mxu2  ;;  %v11953_v17 = vadd.f32 %v4054_v43, %v3829_v44 }
 0x4b3   : > { %v4405_v3 = vadd.f32 %v4311_v32, %v11934_v21 }
 0x4b4   : > { %v4295_v28 = vpop.f32.mrf.mxu1 }
 0x4b5   : > { %v4199_v48 = vpop.f32.mrf.mxu3  ;;  %v4404_v37 = vadd.f32 %v4295_v28, %v11938_v5 }
 0x4b6   : > { %v4398_v38 = vadd.f32 %v4199_v48, %v4109_v35  ;;  %v4435_v35 = vsel %vm414_vm0, %v11961_v31, 0.0 }
 0x4b7   : > { %v4425_v29 = vadd.f32 %v11955_v0, %v4404_v37 }
 0x4b8   : > { %v11969_v15 = vadd.f32 %v11955_v0, %v4398_v38 }
 0x4b9   : > { %v4056_v26 = vpop.f32.mrf.mxu0 }
 0x4ba   : > { %v4313_v9 = vpop.f32.mrf.mxu2  ;;  %v4437_v2 = vsel %vm414_vm0, %v11969_v15, 0.0 }
 0x4bb   : > { %v4426_v9 = vadd.f32 %v11955_v0, %v4405_v3 }
 0x4bc   : > { %v4297_v61 = vpop.f32.mrf.mxu1 }
 0x4bd   : > { %v4201_v8 = vpop.f32.mrf.mxu3  ;;  %v4451_v21 = vsel %vm414_vm0, %v4426_v9, 0.0 }
 0x4c1   : > { %v4151_v50 = vpop.f32.mrf.mxu0 }
 0x4c2   : > { %v4375_v45 = vpop.f32.mrf.mxu2  ;;  %v4395_v10 = vadd.f32 %v4151_v50, %v4106_v1  ;;  %v4449_v50 = vsel %vm414_vm0, %v4425_v29, 0.0 }
 0x4c4   : > { %v4359_v44 = vpop.f32.mrf.mxu1  ;;  %v11964_v12 = vadd.f32 %v11955_v0, %v4395_v10 }
 0x4c5   : > { %v4263_v14 = vpop.f32.mrf.mxu3 }
 0x4c6   : > { %v4432_v58 = vsel %vm414_vm0, %v11964_v12, 0.0  ;;  %v4402_v6 = vadd.f32 %v4263_v14, %v11947_v63  ;;  %v4408_v14 = vadd.f32 %v4359_v44, %v11945_v60 }
 0x4c7   : > { %v4434_v22 = vadd.f32 %v4433_v59, %v4432_v58  ;;  %v4409_v58 = vadd.f32 %v4375_v45, %v11943_v47 }
 0x4c8   : > { %v4423_v33 = vadd.f32 %v11955_v0, %v4402_v6 }
 0x4c9   : > { %v4436_v52 = vadd.f32 %v4435_v35, %v4434_v22  ;;  %v4153_v1 = vpop.f32.mrf.mxu0  ;;  %v4429_v35 = vadd.f32 %v11955_v0, %v4408_v14 }
 0x4ca   : > { %v4377_v24 = vpop.f32.mrf.mxu2  ;;  %v4445_v53 = vsel %vm414_vm0, %v4423_v33, 0.0 }
 0x4cb   : > { %v4438_v27 = vadd.f32 %v4437_v2, %v4436_v52  ;;  %v4430_v2 = vadd.f32 %v11955_v0, %v4409_v58 }
 0x4cc   : > { %v4361_v13 = vpop.f32.mrf.mxu1 }
 0x4cd   : > { %v4265_v4 = vpop.f32.mrf.mxu3  ;;  %v4457_v13 = vsel %vm414_vm0, %v4429_v35, 0.0  ;;  %v4459_v47 = vsel %vm414_vm0, %v4430_v2, 0.0 }
 0x4d1   : > { %v4215_v55 = vpop.f32.mrf.mxu0 }
 0x4d2   : > { %v4399_v39 = vadd.f32 %v4215_v55, %v4110_v19  ;;  %v4443_v19 = vsel %vm414_vm0, %v4422_v20, 0.0 }
 0x4d4   : > { %v4420_v49 = vadd.f32 %v11955_v0, %v4399_v39 }
 0x4d5   : > { %v4327_v36 = vpop.f32.mrf.mxu3 }
 0x4d6   : > { %v4439_v30 = vsel %vm414_vm0, %v4420_v49, 0.0  ;;  %v4406_v43 = vadd.f32 %v4327_v36, %v11949_v7 }
 0x4d7   : > { %v4440_v51 = vadd.f32 %v4439_v30, %v4438_v27 }
 0x4d8   : > { %v4427_v5 = vadd.f32 %v11955_v0, %v4406_v43 }
 0x4d9   : > { %v4442_v11 = vadd.f32 %v4441_v62, %v4440_v51  ;;  %v4217_v42 = vpop.f32.mrf.mxu0 }
 0x4da   : > { %v4453_v32 = vsel %vm414_vm0, %v4427_v5, 0.0 }
 0x4db   : > { %v4444_v54 = vadd.f32 %v4443_v19, %v4442_v11 }
 0x4dd   : > { %v4329_v63 = vpop.f32.mrf.mxu3  ;;  %v4446_v56 = vadd.f32 %v4445_v53, %v4444_v54 }
 0x4e1   : > { %v4279_v46 = vpop.f32.mrf.mxu0 }
 0x4e2   : > { %v4403_v25 = vadd.f32 %v4279_v46, %v4114_v18 }
 0x4e4   : > { %v4424_v48 = vadd.f32 %v11955_v0, %v4403_v25 }
 0x4e5   : > { %v4391_v26 = vpop.f32.mrf.mxu3 }
 0x4e6   : > { %v4447_v61 = vsel %vm414_vm0, %v4424_v48, 0.0  ;;  %v4410_v52 = vadd.f32 %v4391_v26, %v11951_v41  ;;  %v14301_v41 = vld [vmem:[#allocation5_spill] sm:$0xff] }
 0x4e7   : > { %v4448_v8 = vadd.f32 %v4447_v61, %v4446_v56 }
 0x4e8   : > { %v4431_v60 = vadd.f32 %v11955_v0, %v4410_v52 }
 0x4e9   : > { %v4450_v28 = vadd.f32 %v4449_v50, %v4448_v8  ;;  %v4281_v38 = vpop.f32.mrf.mxu0 }
 0x4ea   : > { %v4461_v45 = vsel %vm414_vm0, %v4431_v60, 0.0 }
 0x4eb   : > { %v4452_v18 = vadd.f32 %v4451_v21, %v4450_v28 }
 0x4ed   : > { %v4454_v7 = vadd.f32 %v4453_v32, %v4452_v18  ;;  %v4393_v10 = vpop.f32.mrf.mxu3 }
 0x4f1   : > { %v4343_v59 = vpop.f32.mrf.mxu0 }
 0x4f2   : > { %v4407_v22 = vadd.f32 %v4343_v59, %v11953_v17 }
 0x4f4   : > { %v4428_v1 = vadd.f32 %v11955_v0, %v4407_v22 }
 0x4f6   : > { %v4455_v24 = vsel %vm414_vm0, %v4428_v1, 0.0 }
 0x4f7   : > { %v4456_v27 = vadd.f32 %v4455_v24, %v4454_v7 }
 0x4f9   : > { %v4458_v44 = vadd.f32 %v4457_v13, %v4456_v27  ;;  %v4345_v4 = vpop.f32.mrf.mxu0 }
 0x4fb   : > { %v4460_v17 = vadd.f32 %v4459_v47, %v4458_v44 }
 0x4fd   : > { %v4462_v55 = vadd.f32 %v4461_v45, %v4460_v17 }
 0x4ff   : > { %v4463_v39 = vmul.f32 %v4462_v55, %v14301_v41 }
 0x501   : > { %v12011_v6 = vsub.f32 %v11964_v12, %v4463_v39  ;;  %v12014_v36 = vsub.f32 %v11958_v23, %v4463_v39  ;;  %v12017_v30 = vsub.f32 %v11961_v31, %v4463_v39  ;;  %v12020_v0 = vsub.f32 %v11969_v15, %v4463_v39 }
 0x502   : > { %v12022_v51 = vsub.f32 %v4420_v49, %v4463_v39  ;;  %v12024_v62 = vsub.f32 %v4421_v57, %v4463_v39  ;;  %v12026_v11 = vsub.f32 %v4422_v20, %v4463_v39  ;;  %v12028_v42 = vsub.f32 %v4423_v33, %v4463_v39 }
 0x503   : > { %v12030_v19 = vsub.f32 %v4424_v48, %v4463_v39  ;;  %v12032_v12 = vsub.f32 %v4425_v29, %v4463_v39  ;;  %v12034_v23 = vsub.f32 %v4426_v9, %v4463_v39  ;;  %v12036_v54 = vsub.f32 %v4427_v5, %v4463_v39 }
 0x504   : > { %v12038_v31 = vsub.f32 %v4428_v1, %v4463_v39  ;;  %v12040_v15 = vsub.f32 %v4429_v35, %v4463_v39  ;;  %v12042_v49 = vsub.f32 %v4430_v2, %v4463_v39  ;;  %v12044_v57 = vsub.f32 %v4431_v60, %v4463_v39 }
 0x505   : > { %v4480_v20 = vmul.f32 %v12011_v6, %v12011_v6  ;;  %v4481_v33 = vmul.f32 %v12014_v36, %v12014_v36  ;;  %v4482_v53 = vmul.f32 %v12017_v30, %v12017_v30  ;;  %v4483_v63 = vmul.f32 %v12020_v0, %v12020_v0 }
 0x506   : > { %v4484_v3 = vmul.f32 %v12022_v51, %v12022_v51  ;;  %v4485_v43 = vmul.f32 %v12024_v62, %v12024_v62  ;;  %v4486_v9 = vmul.f32 %v12026_v11, %v12026_v11  ;;  %v4487_v50 = vmul.f32 %v12028_v42, %v12028_v42 }
 0x507   : > { %v4496_v56 = vsel %vm414_vm0, %v4480_v20, 0.0  ;;  %v4497_v37 = vsel %vm414_vm0, %v4481_v33, 0.0  ;;  %v4499_v25 = vsel %vm414_vm0, %v4482_v53, 0.0  ;;  %v4501_v48 = vsel %vm414_vm0, %v4483_v63, 0.0  ;;  %v4593_v53 = vpop.permute.xlu2 %4592 }
 0x508   : > { %v4498_v46 = vadd.f32 %v4497_v37, %v4496_v56  ;;  %v4503_v61 = vsel %vm414_vm0, %v4484_v3, 0.0  ;;  %v4505_v5 = vsel %vm414_vm0, %v4485_v43, 0.0  ;;  %v4488_v38 = vmul.f32 %v12030_v19, %v12030_v19  ;;  %v4705_v3 = vpop.permute.xlu1 %4704 }
 0x509   : > { %v4507_v21 = vsel %vm414_vm0, %v4486_v9, 0.0  ;;  %v4489_v32 = vmul.f32 %v12032_v12, %v12032_v12  ;;  %v4509_v7 = vsel %vm414_vm0, %v4487_v50, 0.0  ;;  %v4490_v14 = vmul.f32 %v12034_v23, %v12034_v23 }
 0x50a   : > { %v4500_v29 = vadd.f32 %v4499_v25, %v4498_v46  ;;  %v4511_v59 = vsel %vm414_vm0, %v4488_v38, 0.0  ;;  %v4491_v22 = vmul.f32 %v12036_v54, %v12036_v54  ;;  %v4492_v1 = vmul.f32 %v12038_v31, %v12038_v31  ;;  %v4597_v46 = vpop.permute.xlu0 %4596 }
 0x50b   : > { %v4513_v35 = vsel %vm414_vm0, %v4489_v32, 0.0  ;;  %v4515_v2 = vsel %vm414_vm0, %v4490_v14, 0.0  ;;  %v4493_v27 = vmul.f32 %v12040_v15, %v12040_v15  ;;  %v4494_v44 = vmul.f32 %v12042_v49, %v12042_v49 }
 0x50c   : > { %v4502_v26 = vadd.f32 %v4501_v48, %v4500_v29  ;;  %v4517_v13 = vsel %vm414_vm0, %v4491_v22, 0.0  ;;  %v4519_v4 = vsel %vm414_vm0, %v4492_v1, 0.0  ;;  %v4495_v17 = vmul.f32 %v12044_v57, %v12044_v57 }
 0x50d   : > { %v4521_v45 = vsel %vm414_vm0, %v4493_v27, 0.0  ;;  %v4523_v39 = vsel %vm414_vm0, %v4494_v44, 0.0 }
 0x50e   : > { %v4504_v8 = vadd.f32 %v4503_v61, %v4502_v26  ;;  %v4525_v33 = vsel %vm414_vm0, %v4495_v17, 0.0 }
 0x50f   : > { %v4709_v25 = vpop.permute.xlu2 %4708 }
 0x510   : > { %v4506_v28 = vadd.f32 %v4505_v5, %v4504_v8  ;;  %v4701_v61 = vpop.permute.xlu1 %4700 }
 0x512   : > { %v4508_v18 = vadd.f32 %v4507_v21, %v4506_v28  ;;  %v4589_v26 = vpop.permute.xlu0 %4588 }
 0x514   : > { %v4510_v10 = vadd.f32 %v4509_v7, %v4508_v18 }
 0x516   : > { %v4512_v58 = vadd.f32 %v4511_v59, %v4510_v10 }
 0x517   : > { %v4609_v50 = vpop.permute.xlu2 %4608 }
 0x518   : > { %v4514_v52 = vadd.f32 %v4513_v35, %v4512_v58  ;;  %v4721_v35 = vpop.permute.xlu1 %4720 }
 0x51a   : > { %v4516_v24 = vadd.f32 %v4515_v2, %v4514_v52  ;;  %v4613_v7 = vpop.permute.xlu0 %4612 }
 0x51c   : > { %v4518_v60 = vadd.f32 %v4517_v13, %v4516_v24 }
 0x51e   : > { %v4520_v47 = vadd.f32 %v4519_v4, %v4518_v60 }
 0x51f   : > { %v4725_v1 = vpop.permute.xlu2 %4724 }
 0x520   : > { %v4522_v55 = vadd.f32 %v4521_v45, %v4520_v47 }
 0x522   : > { %v4524_v20 = vadd.f32 %v4523_v39, %v4522_v55 }
 0x524   : > { %v4526_v63 = vadd.f32 %v4525_v33, %v4524_v20 }
 0x526   : > { %v4527_v56 = vmul.f32 %v4526_v63, %v14301_v41 }
 0x528   : > { %v4528_v37 = vadd.f32 1e-05, %v4527_v56  ;;  %v4601_v56 = vpop.permute.xlu0 %4600 }
 0x52a   : > { %9273 = vrsqrt.f32 %v4528_v37  ;;  %vm4535_vm14 = vweird.f32 %v4528_v37 }
 0x530   : > { %v9274_v29 = vpop.eup %9273 }
 0x531   : > { %v4530_v43 = vmul.f32 %v9274_v29, %v4528_v37  ;;  %vm4536_vm13 = vweird.f32 %v9274_v29 }
 0x532   : > { %vm4537_vm15 = vmor %vm4535_vm14, %vm4536_vm13 }
 0x533   : > { %v4531_v48 = vmul.f32 %v9274_v29, %v4530_v43 }
 0x535   : > { %v4532_v9 = vmul.f32 0.5, %v4531_v48 }
 0x537   : > { %v4533_v8 = vsub.f32 1.5, %v4532_v9 }
 0x539   : > { %v4534_v5 = vmul.f32 %v9274_v29, %v4533_v8 }
 0x53b   : > { %v12095_v28 = vsel %vm4537_vm15, %v9274_v29, %v4534_v5 }
 0x53c   : > { %v4539_v41 = vmul.f32 %v12095_v28, %v12011_v6  ;;  %v4540_v38 = vmul.f32 %v12095_v28, %v12014_v36  ;;  %v4541_v21 = vmul.f32 %v12095_v28, %v12017_v30  ;;  %v4544_v18 = vmul.f32 %v12095_v28, %v12024_v62 }
 0x53d   : > { %v4545_v32 = vmul.f32 %v12095_v28, %v12026_v11  ;;  %v4542_v45 = vmul.f32 %v12095_v28, %v12020_v0 }
 0x53e   : > { %v4651_v10 = vmul.f32 %v4589_v26, %v4539_v41  ;;  %v4652_v14 = vmul.f32 %v4593_v53, %v4540_v38  ;;  %v4653_v59 = vmul.f32 %v4597_v46, %v4541_v21  ;;  %v4656_v58 = vmul.f32 %v4609_v50, %v4544_v18  ;;  %v4713_v41 = vpop.permute.xlu2 %4712 }
 0x53f   : > { %v4657_v22 = vmul.f32 %v4613_v7, %v4545_v32  ;;  %v4654_v43 = vmul.f32 %v4601_v56, %v4542_v45 }
 0x540   : > { %v12107_v6 = vadd.f32 %v4701_v61, %v4651_v10  ;;  %v12109_v52 = vadd.f32 %v4705_v3, %v4652_v14  ;;  %v12111_v36 = vadd.f32 %v4709_v25, %v4653_v59  ;;  %v12113_v30 = vadd.f32 %v4721_v35, %v4656_v58 }
 0x541   : > { %v12127_v27 = vadd.f32 %v4725_v1, %v4657_v22  ;;  %v12164_v59 = vadd.f32 %v4713_v41, %v4654_v43  ;;  %v4543_v1 = vmul.f32 %v12095_v28, %v12022_v51 }
 0x542   : > { %v12116_v62 = vmul.f32 0.70710677, %v12107_v6  ;;  %v12119_v11 = vmul.f32 0.70710677, %v12109_v52  ;;  %v12122_v2 = vmul.f32 0.70710677, %v12111_v36 }
 0x543   : > { %v12125_v24 = vmul.f32 0.70710677, %v12113_v30  ;;  %v12148_v20 = vmul.f32 0.70710677, %v12127_v27 }
 0x544   : > { %v4811_v13 = vmul.f32 %v12116_v62, %v12116_v62  ;;  %v4851_v60 = vmul.f32 %v12119_v11, %v12119_v11  ;;  %v4891_v44 = vmul.f32 %v12122_v2, %v12122_v2 }
 0x545   : > { %v5011_v4 = vmul.f32 %v12125_v24, %v12125_v24 }
 0x546   : > { %v12137_v47 = vmin.f32 %v4811_v13, 16.0  ;;  %v12139_v17 = vmin.f32 %v4851_v60, 16.0  ;;  %v12143_v55 = vmin.f32 %v4891_v44, 16.0 }
 0x547   : > { %v12145_v39 = vmin.f32 %v5011_v4, 16.0 }
 0x548   : > { %v4813_v33 = vmul.f32 2.1237322e-06, %v12137_v47  ;;  %v4824_v53 = vmul.f32 3.8918573e-05, %v12137_v47  ;;  %v4853_v63 = vmul.f32 2.1237322e-06, %v12139_v17 }
 0x549   : > { %v4864_v37 = vmul.f32 3.8918573e-05, %v12139_v17  ;;  %v4893_v46 = vmul.f32 2.1237322e-06, %v12143_v55  ;;  %v4904_v0 = vmul.f32 3.8918573e-05, %v12143_v55 }
 0x54a   : > { %v4814_v3 = vadd.f32 0.00028619796, %v4813_v33  ;;  %v4825_v25 = vadd.f32 0.001143296, %v4824_v53  ;;  %v4854_v29 = vadd.f32 0.00028619796, %v4853_v63 }
 0x54b   : > { %v4865_v48 = vadd.f32 0.001143296, %v4864_v37  ;;  %v4894_v26 = vadd.f32 0.00028619796, %v4893_v46  ;;  %v4905_v9 = vadd.f32 0.001143296, %v4904_v0 }
 0x54c   : > { %v4815_v61 = vmul.f32 %v4814_v3, %v12137_v47  ;;  %v4826_v8 = vmul.f32 %v4825_v25, %v12137_v47  ;;  %v4855_v50 = vmul.f32 %v4854_v29, %v12139_v17  ;;  %v5013_v5 = vmul.f32 2.1237322e-06, %v12145_v39 }
 0x54d   : > { %v4866_v38 = vmul.f32 %v4865_v48, %v12139_v17  ;;  %v4895_v21 = vmul.f32 %v4894_v26, %v12143_v55  ;;  %v4906_v18 = vmul.f32 %v4905_v9, %v12143_v55  ;;  %v5024_v32 = vmul.f32 3.8918573e-05, %v12145_v39 }
 0x54e   : > { %v4816_v7 = vadd.f32 0.0036580483, %v4815_v61  ;;  %v4827_v10 = vadd.f32 0.014752088, %v4826_v8  ;;  %v4856_v14 = vadd.f32 0.0036580483, %v4855_v50 }
 0x54f   : > { %v4867_v58 = vadd.f32 0.014752088, %v4866_v38  ;;  %v4896_v22 = vadd.f32 0.0036580483, %v4895_v21  ;;  %v4907_v35 = vadd.f32 0.014752088, %v4906_v18 }
 0x550   : > { %v4817_v13 = vmul.f32 %v4816_v7, %v12137_v47  ;;  %v4828_v60 = vmul.f32 %v4827_v10, %v12137_v47  ;;  %v4857_v44 = vmul.f32 %v4856_v14, %v12139_v17  ;;  %v5014_v4 = vadd.f32 0.00028619796, %v5013_v5 }
 0x551   : > { %v4868_v45 = vmul.f32 %v4867_v58, %v12139_v17  ;;  %v4897_v33 = vmul.f32 %v4896_v22, %v12143_v55  ;;  %v4908_v53 = vmul.f32 %v4907_v35, %v12143_v55  ;;  %v5025_v63 = vadd.f32 0.001143296, %v5024_v32 }
 0x552   : > { %v4818_v56 = vadd.f32 0.05243302, %v4817_v13  ;;  %v4829_v37 = vadd.f32 0.112945676, %v4828_v60  ;;  %v4858_v46 = vadd.f32 0.05243302, %v4857_v44  ;;  %v5015_v0 = vmul.f32 %v5014_v4, %v12145_v39 }
 0x553   : > { %v4869_v51 = vadd.f32 0.112945676, %v4868_v45  ;;  %v4898_v3 = vadd.f32 0.05243302, %v4897_v33  ;;  %v4909_v25 = vadd.f32 0.112945676, %v4908_v53  ;;  %v5026_v29 = vmul.f32 %v5025_v63, %v12145_v39  ;;  %v4605_v33 = vpop.permute.xlu1 %4604 }
 0x554   : > { %v4819_v43 = vmul.f32 %v4818_v56, %v12137_v47  ;;  %v4830_v48 = vmul.f32 %v4829_v37, %v12137_v47  ;;  %v4859_v26 = vmul.f32 %v4858_v46, %v12139_v17  ;;  %v5016_v9 = vadd.f32 0.0036580483, %v5015_v0 }
 0x555   : > { %v4870_v61 = vmul.f32 %v4869_v51, %v12139_v17  ;;  %v4899_v8 = vmul.f32 %v4898_v3, %v12143_v55  ;;  %v4910_v50 = vmul.f32 %v4909_v25, %v12143_v55  ;;  %v5027_v5 = vadd.f32 0.014752088, %v5026_v29  ;;  %v4717_v25 = vpop.permute.xlu0 %4716 }
 0x556   : > { %v4820_v41 = vadd.f32 0.18741608, %v4819_v43  ;;  %v4831_v38 = vadd.f32 0.4994258, %v4830_v48  ;;  %v4860_v21 = vadd.f32 0.18741608, %v4859_v26  ;;  %v5017_v18 = vmul.f32 %v5016_v9, %v12145_v39 }
 0x557   : > { %v4871_v32 = vadd.f32 0.4994258, %v4870_v61  ;;  %v4900_v7 = vadd.f32 0.18741608, %v4899_v8  ;;  %v4911_v10 = vadd.f32 0.4994258, %v4910_v50  ;;  %v5028_v14 = vmul.f32 %v5027_v5, %v12145_v39 }
 0x558   : > { %v4821_v58 = vmul.f32 %v4820_v41, %v12137_v47  ;;  %v4832_v22 = vmul.f32 %v4831_v38, %v12137_v47  ;;  %v5018_v35 = vadd.f32 0.05243302, %v5017_v18  ;;  %v12187_v13 = vmul.f32 0.70710677, %v12164_v59 }
 0x559   : > { %v4861_v60 = vmul.f32 %v4860_v21, %v12139_v17  ;;  %v4872_v44 = vmul.f32 %v4871_v32, %v12139_v17  ;;  %v4912_v4 = vmul.f32 %v4911_v10, %v12143_v55  ;;  %v5029_v45 = vadd.f32 0.112945676, %v5028_v14 }
 0x55a   : > { %v12192_v53 = vadd.f32 1.0, %v4832_v22  ;;  %v4901_v63 = vmul.f32 %v4900_v7, %v12143_v55  ;;  %v4655_v47 = vmul.f32 %v4605_v33, %v4543_v1  ;;  %v4822_v46 = vadd.f32 1.1283791, %v4821_v58 }
 0x55b   : > { %v12195_v56 = vadd.f32 1.0, %v4872_v44  ;;  %v12197_v37 = vadd.f32 1.0, %v4912_v4  ;;  %v5019_v0 = vmul.f32 %v5018_v35, %v12145_v39  ;;  %v5051_v17 = vmul.f32 %v12148_v20, %v12148_v20 }
 0x55c   : > { %9275 = vrcp.f32 %v12192_v53  ;;  %v4862_v51 = vadd.f32 1.1283791, %v4861_v60  ;;  %v5030_v3 = vmul.f32 %v5029_v45, %v12145_v39  ;;  %v4931_v55 = vmul.f32 %v12187_v13, %v12187_v13 }
 0x55d   : > { %9277 = vrcp.f32 %v12195_v56  ;;  %v12208_v29 = vmul.f32 0.5, %v12107_v6  ;;  %v12211_v1 = vmul.f32 0.5, %v12109_v52  ;;  %v12214_v43 = vmul.f32 0.5, %v12111_v36 }
 0x55e   : > { %v4902_v48 = vadd.f32 1.1283791, %v4901_v63  ;;  %v4843_v26 = vand.u32 2147483647, %v12192_v53  ;;  %v4845_v9 = vand.u32 2147483648, %v12192_v53  ;;  %9279 = vrcp.f32 %v12197_v37 }
 0x55f   : > { %v12219_v61 = vadd.f32 %v4717_v25, %v4655_v47  ;;  %v12222_v8 = vmul.f32 %v4822_v46, %v12116_v62  ;;  %v4883_v6 = vand.u32 2147483647, %v12195_v56  ;;  %v4885_v52 = vand.u32 2147483648, %v12195_v56 }
 0x560   : > { %v5020_v50 = vadd.f32 0.18741608, %v5019_v0  ;;  %vm4839_vm1 = vweird.f32 %v12192_v53  ;;  %v12228_v36 = vmul.f32 %v4862_v51, %v12119_v11  ;;  %v5031_v5 = vadd.f32 0.4994258, %v5030_v3  ;;  %v4625_v51 = vpop.permute.xlu1 %4624 }
 0x561   : > { %v12230_v41 = vmin.f32 %v5051_v17, 16.0  ;;  %v12232_v38 = vmin.f32 %v4931_v55, 16.0  ;;  %vm4879_vm2 = vweird.f32 %v12195_v56  ;;  %v12236_v62 = vmul.f32 %v4902_v48, %v12122_v2 }
 0x562   : > { %v9276_v21 = vpop.eup %9275  ;;  %v4923_v18 = vand.u32 2147483647, %v12197_v37  ;;  %v4925_v32 = vand.u32 2147483648, %v12197_v37  ;;  %v5021_v7 = vmul.f32 %v5020_v50, %v12145_v39  ;;  %vm12242_vm4 = vcmp.eq.f32.partialorder %v4843_v26, 8.507059e+37 }
 0x563   : > { %v9278_v10 = vpop.eup %9277  ;;  %v4835_v11 = vmul.f32 %v9276_v21, %v12192_v53  ;;  %v4846_v58 = vor.u32 1.1754944e-38, %v4845_v9  ;;  %v5032_v22 = vmul.f32 %v5031_v5, %v12145_v39  ;;  %v5053_v35 = vmul.f32 2.1237322e-06, %v12230_v41 }
 0x564   : > { %v4875_v2 = vmul.f32 %v9278_v10, %v12195_v56  ;;  %vm12249_vm6 = vcmp.eq.f32.partialorder %v4883_v6, 8.507059e+37  ;;  %v4886_v44 = vor.u32 1.1754944e-38, %v4885_v52  ;;  %vm4919_vm9 = vweird.f32 %v12197_v37  ;;  %v9280_v33 = vpop.eup %9279 }
 0x565   : > { %v5022_v4 = vadd.f32 1.1283791, %v5021_v7  ;;  %v5064_v45 = vmul.f32 3.8918573e-05, %v12230_v41  ;;  %v4836_v63 = vsub.f32 1.0, %v4835_v11  ;;  %v12255_v47 = vadd.f32 1.0, %v5032_v22 }
 0x566   : > { %v5054_v46 = vadd.f32 0.00028619796, %v5053_v35  ;;  %v4933_v39 = vmul.f32 2.1237322e-06, %v12232_v38  ;;  %vm4840_vm10 = vweird.f32 %v9276_v21  ;;  %v4876_v0 = vsub.f32 1.0, %v4875_v2 }
 0x567   : > { %v4915_v17 = vmul.f32 %v9280_v33, %v12197_v37  ;;  %vm12259_vm11 = vcmp.eq.f32.partialorder %v4923_v18, 8.507059e+37  ;;  %v4926_v3 = vor.u32 1.1754944e-38, %v4925_v32  ;;  %v4837_v55 = vmul.f32 %v9276_v21, %v4836_v63  ;;  %vm4841_vm14 = vmor %vm4839_vm1, %vm4840_vm10 }
 0x568   : > { %vm4880_vm12 = vweird.f32 %v9278_v10  ;;  %vm4920_vm13 = vweird.f32 %v9280_v33  ;;  %9281 = vrcp.f32 %v12255_v47  ;;  %v4877_v25 = vmul.f32 %v9278_v10, %v4876_v0 }
 0x569   : > { %v4916_v48 = vsub.f32 1.0, %v4915_v17  ;;  %v12265_v26 = vmul.f32 %v5022_v4, %v12125_v24  ;;  %v5055_v9 = vmul.f32 %v5054_v46, %v12230_v41  ;;  %v4838_v6 = vadd.f32 %v9276_v21, %v4837_v55  ;;  %vm4881_vm15 = vmor %vm4879_vm2, %vm4880_vm12  ;;  %v12291_v17 = vpop.permute.xlu2 %4628 }
 0x56a   : > { %v5043_v52 = vand.u32 2147483647, %v12255_v47  ;;  %v5065_v50 = vadd.f32 0.001143296, %v5064_v45  ;;  %v4934_v5 = vadd.f32 0.00028619796, %v4933_v39  ;;  %v4878_v18 = vadd.f32 %v9278_v10, %v4877_v25  ;;  %vm4921_vm2 = vmor %vm4919_vm9, %vm4920_vm13 }
 0x56b   : > { %v4917_v32 = vmul.f32 %v9280_v33, %v4916_v48  ;;  %v5045_v7 = vand.u32 2147483648, %v12255_v47  ;;  %v5056_v11 = vadd.f32 0.0036580483, %v5055_v9  ;;  %v4842_v22 = vsel %vm4841_vm14, %v9276_v21, %v4838_v6 }
 0x56c   : > { %v5066_v24 = vmul.f32 %v5065_v50, %v12230_v41  ;;  %v4935_v35 = vmul.f32 %v4934_v5, %v12232_v38  ;;  %v4944_v2 = vmul.f32 3.8918573e-05, %v12232_v38  ;;  %v4847_v53 = vsel %vm12242_vm4, %v4846_v58, %v4842_v22 }
 0x56d   : > { %v4882_v4 = vsel %vm4881_vm15, %v9278_v10, %v4878_v18  ;;  %v4918_v45 = vadd.f32 %v9280_v33, %v4917_v32  ;;  %vm5039_vm1 = vweird.f32 %v12255_v47  ;;  %v5057_v63 = vmul.f32 %v5056_v11, %v12230_v41 }
 0x56e   : > { %v9282_v21 = vpop.eup %9281  ;;  %v4848_v46 = vmul.f32 %v4847_v53, %v12222_v8  ;;  %v4887_v56 = vsel %vm12249_vm6, %v4886_v44, %v4882_v4  ;;  %v5067_v39 = vadd.f32 0.014752088, %v5066_v24  ;;  %v4936_v0 = vadd.f32 0.0036580483, %v4935_v35 }
 0x56f   : > { %v4888_v14 = vmul.f32 %v4887_v56, %v12228_v36  ;;  %v4922_v10 = vsel %vm4921_vm2, %v9280_v33, %v4918_v45  ;;  %v5035_v58 = vmul.f32 %v9282_v21, %v12255_v47  ;;  %vm5040_vm4 = vweird.f32 %v9282_v21 }
 0x570   : > { %v8829_v55 = vclamps-f32 %v4848_v46, 1.0  ;;  %v4927_v8 = vsel %vm12259_vm11, %v4926_v3, %v4922_v10  ;;  %v5058_v60 = vadd.f32 0.05243302, %v5057_v63  ;;  %v5068_v44 = vmul.f32 %v5067_v39, %v12230_v41  ;;  %vm5041_vm6 = vmor %vm5039_vm1, %vm5040_vm4 }
 0x571   : > { %v8830_v25 = vclamps-f32 %v4888_v14, 1.0  ;;  %v4928_v37 = vmul.f32 %v4927_v8, %v12236_v62  ;;  %v5036_v48 = vsub.f32 1.0, %v5035_v58  ;;  %v4937_v9 = vmul.f32 %v4936_v0, %v12232_v38 }
 0x572   : > { %v5451_v36 = vadd.f32 1.0, %v8829_v55  ;;  %v5059_v33 = vmul.f32 %v5058_v60, %v12230_v41  ;;  %v5069_v6 = vadd.f32 0.112945676, %v5068_v44  ;;  %v4945_v50 = vadd.f32 0.001143296, %v4944_v2  ;;  %v4617_v44 = vpop.permute.xlu2 %4616 }
 0x573   : > { %v5452_v5 = vadd.f32 1.0, %v8830_v25  ;;  %v8831_v18 = vclamps-f32 %v4928_v37, 1.0  ;;  %v5037_v32 = vmul.f32 %v9282_v21, %v5036_v48  ;;  %v4938_v11 = vadd.f32 0.05243302, %v4937_v9 }
 0x574   : > { %v5467_v3 = vmul.f32 %v5451_v36, %v12208_v29  ;;  %v5046_v22 = vor.u32 1.1754944e-38, %v5045_v7  ;;  %v5070_v24 = vmul.f32 %v5069_v6, %v12230_v41  ;;  %v4946_v62 = vmul.f32 %v4945_v50, %v12232_v38  ;;  %v4741_v6 = vpop.permute.xlu1 %4740 }
 0x575   : > { %v5468_v35 = vmul.f32 %v5452_v5, %v12211_v1  ;;  %v5453_v53 = vadd.f32 1.0, %v8831_v18  ;;  %v5038_v4 = vadd.f32 %v9282_v21, %v5037_v32  ;;  %v5060_v45 = vadd.f32 0.18741608, %v5059_v33 }
 0x576   : > { %v5483_v63 = vpack.c.bf16 %v5467_v3, %v5467_v3  ;;  %v5071_v2 = vadd.f32 0.4994258, %v5070_v24  ;;  %v4939_v46 = vmul.f32 %v4938_v11, %v12232_v38  ;;  %v4947_v56 = vadd.f32 0.014752088, %v4946_v62 }
 0x577   : > { %v5484_v29 = vpack.c.bf16 %v5468_v35, %v5468_v35  ;;  %v5469_v7 = vmul.f32 %v5453_v53, %v12214_v43  ;;  %v5042_v39 = vsel %vm5041_vm6, %v9282_v21, %v5038_v4  ;;  %vm5044_vm9 = vcmp.eq.f32.partialorder %v5043_v52, 8.507059e+37  ;;  %v4737_v35 = vpop.permute.xlu0 %4736 }
 0x578   : > { %v5515_v1 = vunpack.c.l.b16 %v5483_v63  ;;  %v5047_v0 = vsel %vm5044_vm9, %v5046_v22, %v5042_v39  ;;  %v5072_v14 = vmul.f32 %v5071_v2, %v12230_v41  ;;  %v12312_v10 = vmul.f32 0.70710677, %v12219_v61 }
 0x579   : > { %v5516_v58 = vunpack.c.l.b16 %v5484_v29  ;;  %v5485_v55 = vpack.c.bf16 %v5469_v7, %v5469_v7  ;;  %v5048_v8 = vmul.f32 %v5047_v0, %v12265_v26  ;;  %v5061_v60 = vmul.f32 %v5060_v45, %v12230_v41 }
 0x57a   : > { %v5531_v25 = vpack.c.b16 %v5515_v1, %v5515_v1  ;;  %v12316_v43 = vadd.f32 1.0, %v5072_v14  ;;  %v4940_v21 = vadd.f32 0.18741608, %v4939_v46  ;;  %v4948_v47 = vmul.f32 %v4947_v56, %v12232_v38  ;;  %v12352_v7 = vpop.permute.xlu2 %4732 }
 0x57b   : > { %v5532_v52 = vpack.c.b16 %v5516_v58, %v5516_v58  ;;  %v5517_v37 = vunpack.c.l.b16 %v5485_v55  ;;  %v8834_v48 = vclamps-f32 %v5048_v8, 1.0  ;;  %v4784_v9 = vmul.f32 0.5, %v12113_v30 }
 0x57c   : > { %5547 = vrot.lane.b32.xlu1 %v5531_v25, %s9389_s29  ;;  %9283 = vrcp.f32 %v12316_v43  ;;  %v5062_v36 = vadd.f32 1.1283791, %v5061_v60  ;;  %v4949_v33 = vadd.f32 0.112945676, %v4948_v47  ;;  %v4941_v50 = vmul.f32 %v4940_v21, %v12232_v38 }
 0x57d   : > { %5549 = vrot.lane.b32.xlu2 %v5532_v52, %s9389_s29  ;;  %v5533_v26 = vpack.c.b16 %v5517_v37, %v5517_v37  ;;  %v5456_v41 = vadd.f32 1.0, %v8834_v48  ;;  %v4971_v5 = vmul.f32 %v12312_v10, %v12312_v10  ;;  %v4548_v18 = vmul.f32 %v12095_v28, %v12032_v12 }
 0x57e   : > { %v12330_v30 = vmul.f32 %v12095_v28, %v12038_v31  ;;  %v4950_v11 = vmul.f32 %v4949_v33, %v12232_v38  ;;  %v4549_v3 = vmul.f32 %v12095_v28, %v12034_v23  ;;  %v12337_v22 = vmul.f32 0.5, %v12127_v27 }
 0x57f   : > { %5551 = vrot.lane.b32.xlu0 %v5533_v26, %s9389_s29  ;;  %v5472_v32 = vmul.f32 %v5456_v41, %v4784_v9  ;;  %v12339_v24 = vmin.f32 %v4971_v5, 16.0  ;;  %v4660_v62 = vmul.f32 %v4625_v51, %v4548_v18  ;;  %v4546_v12 = vmul.f32 %v12095_v28, %v12028_v42 }
 0x580   : > { %v5063_v53 = vmul.f32 %v5062_v36, %v12148_v20  ;;  %v4951_v4 = vadd.f32 0.4994258, %v4950_v11  ;;  %v4661_v45 = vmul.f32 %v12291_v17, %v4549_v3  ;;  %v4942_v2 = vadd.f32 1.1283791, %v4941_v50 }
 0x581   : > { %v5488_v31 = vpack.c.bf16 %v5472_v32, %v5472_v32  ;;  %v4973_v23 = vmul.f32 2.1237322e-06, %v12339_v24  ;;  %v4984_v27 = vmul.f32 3.8918573e-05, %v12339_v24  ;;  %v12347_v46 = vadd.f32 %v4737_v35, %v4660_v62 }
 0x582   : > { %v9284_v63 = vpop.eup %9283  ;;  %v5083_v42 = vand.u32 2147483647, %v12316_v43  ;;  %v4952_v29 = vmul.f32 %v4951_v4, %v12232_v38  ;;  %v12354_v17 = vadd.f32 %v4741_v6, %v4661_v45  ;;  %v4658_v1 = vmul.f32 %v4617_v44, %v4546_v12  ;;  %v4729_v44 = vpop.permute.xlu1 %4728 }
 0x583   : > { %v5520_v56 = vunpack.c.l.b16 %v5488_v31  ;;  %v5075_v51 = vmul.f32 %v9284_v63, %v12316_v43  ;;  %v4974_v20 = vadd.f32 0.00028619796, %v4973_v23  ;;  %v4985_v39 = vadd.f32 0.001143296, %v4984_v27 }
 0x584   : > { %v12356_v58 = vadd.f32 1.0, %v4952_v29  ;;  %v12359_v55 = vmul.f32 0.70710677, %v12347_v46  ;;  %v5085_v8 = vand.u32 2147483648, %v12316_v43  ;;  %v12365_v25 = vmul.f32 0.70710677, %v12354_v17 }
 0x585   : > { %v5536_v0 = vpack.c.b16 %v5520_v56, %v5520_v56  ;;  %v5076_v14 = vsub.f32 1.0, %v5075_v51  ;;  %v4975_v60 = vmul.f32 %v4974_v20, %v12339_v24  ;;  %v4986_v38 = vmul.f32 %v4985_v39, %v12339_v24 }
 0x586   : > { %vm5079_vm10 = vweird.f32 %v12316_v43  ;;  %vm5080_vm11 = vweird.f32 %v9284_v63  ;;  %9285 = vrcp.f32 %v12356_v58  ;;  %v12371_v47 = vmul.f32 %v4942_v2, %v12187_v13 }
 0x587   : > { %5557 = vrot.lane.b32.xlu2 %v5536_v0, %s9389_s29  ;;  %v5077_v21 = vmul.f32 %v9284_v63, %v5076_v14  ;;  %v4976_v52 = vadd.f32 0.0036580483, %v4975_v60  ;;  %v4987_v37 = vadd.f32 0.014752088, %v4986_v38  ;;  %v5171_v48 = vmul.f32 %v12359_v55, %v12359_v55  ;;  %vm5081_vm13 = vmor %vm5079_vm10, %vm5080_vm11 }
 0x588   : > { %vm5084_vm12 = vcmp.eq.f32.partialorder %v5083_v42, 8.507059e+37  ;;  %v5211_v26 = vmul.f32 %v12365_v25, %v12365_v25  ;;  %v12377_v41 = vadd.f32 %v4729_v44, %v4658_v1  ;;  %v5086_v43 = vor.u32 1.1754944e-38, %v5085_v8 }
 0x589   : > { %v5078_v9 = vadd.f32 %v9284_v63, %v5077_v21  ;;  %v4977_v36 = vmul.f32 %v4976_v52, %v12339_v24  ;;  %v4988_v33 = vmul.f32 %v4987_v37, %v12339_v24  ;;  %v12381_v13 = vmin.f32 %v5171_v48, 16.0 }
 0x58a   : > { %v4963_v50 = vand.u32 2147483647, %v12356_v58  ;;  %v12384_v5 = vmin.f32 %v5211_v26, 16.0  ;;  %v4547_v18 = vmul.f32 %v12095_v28, %v12030_v19  ;;  %vm4959_vm14 = vweird.f32 %v12356_v58 }
 0x58b   : > { %v5082_v6 = vsel %vm5081_vm13, %v9284_v63, %v5078_v9  ;;  %v4978_v11 = vadd.f32 0.05243302, %v4977_v36  ;;  %v4989_v3 = vadd.f32 0.112945676, %v4988_v33  ;;  %v5173_v62 = vmul.f32 2.1237322e-06, %v12381_v13  ;;  %v12395_v63 = vpop.permute.xlu2 %4752 }
 0x58c   : > { %v5087_v32 = vsel %vm5084_vm12, %v5086_v43, %v5082_v6  ;;  %v9286_v12 = vpop.eup %9285  ;;  %v5184_v31 = vmul.f32 3.8918573e-05, %v12381_v13  ;;  %v5213_v4 = vmul.f32 2.1237322e-06, %v12384_v5  ;;  %v12393_v45 = vmul.f32 0.70710677, %v12377_v41  ;;  %v4621_v6 = vpop.permute.xlu0 %4620 }
 0x58d   : > { %v5088_v35 = vmul.f32 %v5087_v32, %v5063_v53  ;;  %v4955_v19 = vmul.f32 %v9286_v12, %v12356_v58  ;;  %v4979_v2 = vmul.f32 %v4978_v11, %v12339_v24  ;;  %v4990_v23 = vmul.f32 %v4989_v3, %v12339_v24  ;;  %v12416_v3 = vpop.permute.xlu1 %4644 }
 0x58e   : > { %v5224_v27 = vmul.f32 3.8918573e-05, %v12384_v5  ;;  %v4965_v53 = vand.u32 2147483648, %v12356_v58  ;;  %v5174_v51 = vadd.f32 0.00028619796, %v5173_v62  ;;  %vm4960_vm15 = vweird.f32 %v9286_v12 }
 0x58f   : > { %v8835_v56 = vclamps-f32 %v5088_v35, 1.0  ;;  %v5185_v42 = vadd.f32 0.001143296, %v5184_v31  ;;  %v4956_v29 = vsub.f32 1.0, %v4955_v19  ;;  %v4980_v20 = vadd.f32 0.18741608, %v4979_v2  ;;  %vm4961_vm1 = vmor %vm4959_vm14, %vm4960_vm15 }
 0x590   : > { %v4991_v39 = vadd.f32 0.4994258, %v4990_v23  ;;  %v5175_v0 = vmul.f32 %v5174_v51, %v12381_v13  ;;  %v5214_v8 = vadd.f32 0.00028619796, %v5213_v4  ;;  %v5225_v44 = vadd.f32 0.001143296, %v5224_v27 }
 0x591   : > { %v5457_v1 = vadd.f32 1.0, %v8835_v56  ;;  %v5186_v14 = vmul.f32 %v5185_v42, %v12381_v13  ;;  %v4957_v60 = vmul.f32 %v9286_v12, %v4956_v29  ;;  %v4981_v38 = vmul.f32 %v4980_v20, %v12339_v24 }
 0x592   : > { %v4992_v21 = vmul.f32 %v4991_v39, %v12339_v24  ;;  %v5176_v37 = vadd.f32 0.0036580483, %v5175_v0  ;;  %v5215_v9 = vmul.f32 %v5214_v8, %v12384_v5  ;;  %v4966_v43 = vor.u32 1.1754944e-38, %v4965_v53 }
 0x593   : > { %v5473_v52 = vmul.f32 %v5457_v1, %v12337_v22  ;;  %v5187_v48 = vadd.f32 0.014752088, %v5186_v14  ;;  %v4958_v26 = vadd.f32 %v9286_v12, %v4957_v60  ;;  %v5226_v33 = vmul.f32 %v5225_v44, %v12384_v5  ;;  %v4637_v58 = vpop.permute.xlu2 %4636 }
 0x594   : > { %v12408_v36 = vadd.f32 1.0, %v4992_v21  ;;  %v5177_v24 = vmul.f32 %v5176_v37, %v12381_v13  ;;  %v5216_v11 = vadd.f32 0.0036580483, %v5215_v9  ;;  %vm4964_vm2 = vcmp.eq.f32.partialorder %v4963_v50, 8.507059e+37 }
 0x595   : > { %v5489_v32 = vpack.c.bf16 %v5473_v52, %v5473_v52  ;;  %v5188_v22 = vmul.f32 %v5187_v48, %v12381_v13  ;;  %v4962_v62 = vsel %vm4961_vm1, %v9286_v12, %v4958_v26  ;;  %v4659_v35 = vmul.f32 %v4621_v6, %v4547_v18 }
 0x596   : > { %9287 = vrcp.f32 %v12408_v36  ;;  %v4967_v4 = vsel %vm4964_vm2, %v4966_v43, %v4962_v62  ;;  %v4982_v19 = vadd.f32 1.1283791, %v4981_v38  ;;  %v5091_v2 = vmul.f32 %v12393_v45, %v12393_v45 }
 0x597   : > { %v5521_v31 = vunpack.c.l.b16 %v5489_v32  ;;  %v4968_v23 = vmul.f32 %v4967_v4, %v12371_v47  ;;  %v5178_v27 = vadd.f32 0.05243302, %v5177_v24  ;;  %v5189_v56 = vadd.f32 0.112945676, %v5188_v22  ;;  %v12445_v32 = vpop.permute.xlu1 %4632 }
 0x598   : > { %v5217_v53 = vmul.f32 %v5216_v11, %v12384_v5  ;;  %v12424_v51 = vmul.f32 %v4637_v58, %v12330_v30  ;;  %v4782_v12 = vmul.f32 0.5, %v12164_v59  ;;  %v5227_v18 = vadd.f32 0.014752088, %v5226_v33 }
 0x599   : > { %v5537_v50 = vpack.c.b16 %v5521_v31, %v5521_v31  ;;  %v8832_v42 = vclamps-f32 %v4968_v23, 1.0  ;;  %v5179_v29 = vmul.f32 %v5178_v27, %v12381_v13  ;;  %v5190_v20 = vmul.f32 %v5189_v56, %v12381_v13 }
 0x59a   : > { %v5218_v39 = vadd.f32 0.05243302, %v5217_v53  ;;  %v4983_v47 = vmul.f32 %v4982_v19, %v12312_v10  ;;  %v5228_v1 = vmul.f32 %v5227_v18, %v12384_v5  ;;  %v12432_v0 = vmin.f32 %v5091_v2, 16.0 }
 0x59b   : > { %5559 = vrot.lane.b32.xlu0 %v5537_v50, %s9389_s29  ;;  %v12435_v30 = vadd.f32 %v12352_v7, %v4659_v35  ;;  %v5454_v59 = vadd.f32 1.0, %v8832_v42  ;;  %v5180_v8 = vadd.f32 0.18741608, %v5179_v29  ;;  %v5191_v60 = vadd.f32 0.4994258, %v5190_v20 }
 0x59c   : > { %v9288_v14 = vpop.eup %9287  ;;  %v5219_v38 = vmul.f32 %v5218_v39, %v12384_v5  ;;  %v5005_v44 = vand.u32 2147483648, %v12408_v36  ;;  %v5229_v52 = vadd.f32 0.112945676, %v5228_v1  ;;  %v5093_v10 = vmul.f32 2.1237322e-06, %v12432_v0 }
 0x59d   : > { %v4995_v21 = vmul.f32 %v9288_v14, %v12408_v36  ;;  %v5470_v37 = vmul.f32 %v5454_v59, %v4782_v12  ;;  %v5181_v48 = vmul.f32 %v5180_v8, %v12381_v13  ;;  %v5192_v9 = vmul.f32 %v5191_v60, %v12381_v13 }
 0x59e   : > { %v5220_v7 = vadd.f32 0.18741608, %v5219_v38  ;;  %v5230_v43 = vmul.f32 %v5229_v52, %v12384_v5  ;;  %v5094_v33 = vadd.f32 0.00028619796, %v5093_v10  ;;  %v5104_v6 = vmul.f32 3.8918573e-05, %v12432_v0 }
 0x59f   : > { %v4996_v26 = vsub.f32 1.0, %v4995_v21  ;;  %v5486_v24 = vpack.c.bf16 %v5470_v37, %v5470_v37  ;;  %vm5000_vm4 = vweird.f32 %v9288_v14  ;;  %v5003_v22 = vand.u32 2147483647, %v12408_v36 }
 0x5a0   : > { %v12448_v11 = vadd.f32 1.0, %v5192_v9  ;;  %v5231_v35 = vadd.f32 0.4994258, %v5230_v43  ;;  %v5095_v31 = vmul.f32 %v5094_v33, %v12432_v0  ;;  %v5105_v13 = vadd.f32 0.001143296, %v5104_v6  ;;  %v4641_v9 = vpop.permute.xlu0 %4640 }
 0x5a1   : > { %v4997_v62 = vmul.f32 %v9288_v14, %v4996_v26  ;;  %v5518_v4 = vunpack.c.l.b16 %v5486_v24  ;;  %vm4999_vm6 = vweird.f32 %v12408_v36  ;;  %v5006_v19 = vor.u32 1.1754944e-38, %v5005_v44 }
 0x5a2   : > { %9289 = vrcp.f32 %v12448_v11  ;;  %v5182_v58 = vadd.f32 1.1283791, %v5181_v48  ;;  %v5221_v23 = vmul.f32 %v5220_v7, %v12384_v5  ;;  %v12455_v27 = vmul.f32 0.70710677, %v12435_v30  ;;  %vm5001_vm9 = vmor %vm4999_vm6, %vm5000_vm4 }
 0x5a3   : > { %v4998_v2 = vadd.f32 %v9288_v14, %v4997_v62  ;;  %v5534_v56 = vpack.c.b16 %v5518_v4, %v5518_v4  ;;  %v5232_v53 = vmul.f32 %v5231_v35, %v12384_v5  ;;  %v5096_v50 = vadd.f32 0.0036580483, %v5095_v31 }
 0x5a4   : > { %v5106_v12 = vmul.f32 %v5105_v13, %v12432_v0  ;;  %vm5004_vm10 = vcmp.eq.f32.partialorder %v5003_v22, 8.507059e+37  ;;  %v5203_v36 = vand.u32 2147483647, %v12448_v11  ;;  %v5205_v42 = vand.u32 2147483648, %v12448_v11 }
 0x5a5   : > { %v5002_v18 = vsel %vm5001_vm9, %v9288_v14, %v4998_v2  ;;  %5553 = vrot.lane.b32.xlu1 %v5534_v56, %s9389_s29  ;;  %v12463_v20 = vadd.f32 1.0, %v5232_v53  ;;  %v5097_v39 = vmul.f32 %v5096_v50, %v12432_v0  ;;  %v4783_v59 = vmul.f32 0.5, %v12219_v61 }
 0x5a6   : > { %v5007_v29 = vsel %vm5004_vm10, %v5006_v19, %v5002_v18  ;;  %v5107_v1 = vadd.f32 0.014752088, %v5106_v12  ;;  %v5222_v8 = vadd.f32 1.1283791, %v5221_v23  ;;  %v5131_v14 = vmul.f32 %v12455_v27, %v12455_v27 }
 0x5a7   : > { %v5008_v5 = vmul.f32 %v5007_v29, %v4983_v47  ;;  %v12470_v38 = vmul.f32 0.5, %v12347_v46  ;;  %v5183_v21 = vmul.f32 %v5182_v58, %v12359_v55  ;;  %9291 = vrcp.f32 %v12463_v20  ;;  %v4749_v47 = vpop.permute.xlu1 %4748 }
 0x5a8   : > { %v9290_v60 = vpop.eup %9289  ;;  %v4552_v44 = vmul.f32 %v12095_v28, %v12040_v15  ;;  %vm5199_vm11 = vweird.f32 %v12448_v11  ;;  %v5098_v61 = vadd.f32 0.05243302, %v5097_v39  ;;  %vm12478_vm12 = vcmp.eq.f32.partialorder %v5203_v36, 8.507059e+37 }
 0x5a9   : > { %v8833_v52 = vclamps-f32 %v5008_v5, 1.0  ;;  %v5195_v10 = vmul.f32 %v9290_v60, %v12448_v11  ;;  %v5206_v46 = vor.u32 1.1754944e-38, %v5205_v42  ;;  %v5108_v48 = vmul.f32 %v5107_v1, %v12432_v0 }
 0x5aa   : > { %v12483_v55 = vmin.f32 %v5131_v14, 16.0  ;;  %v5223_v15 = vmul.f32 %v5222_v8, %v12365_v25  ;;  %v12487_v43 = vadd.f32 %v4749_v47, %v12424_v51  ;;  %v4664_v22 = vmul.f32 %v4641_v9, %v4552_v44 }
 0x5ab   : > { %v5455_v7 = vadd.f32 1.0, %v8833_v52  ;;  %v5196_v26 = vsub.f32 1.0, %v5195_v10  ;;  %v5109_v33 = vadd.f32 0.112945676, %v5108_v48  ;;  %vm5200_vm13 = vweird.f32 %v9290_v60 }
 0x5ac   : > { %v5133_v6 = vmul.f32 2.1237322e-06, %v12483_v55  ;;  %v5144_v24 = vmul.f32 3.8918573e-05, %v12483_v55  ;;  %v5099_v31 = vmul.f32 %v5098_v61, %v12432_v0  ;;  %v5243_v4 = vand.u32 2147483647, %v12463_v20  ;;  %vm5201_vm14 = vmor %vm5199_vm11, %vm5200_vm13 }
 0x5ad   : > { %v5471_v62 = vmul.f32 %v5455_v7, %v4783_v59  ;;  %v5197_v35 = vmul.f32 %v9290_v60, %v5196_v26  ;;  %v9292_v13 = vpop.eup %9291  ;;  %v5110_v19 = vmul.f32 %v5109_v33, %v12432_v0  ;;  %v5245_v56 = vand.u32 2147483648, %v12463_v20 }
 0x5ae   : > { %v5134_v25 = vadd.f32 0.00028619796, %v5133_v6  ;;  %v5145_v2 = vadd.f32 0.001143296, %v5144_v24  ;;  %v5235_v23 = vmul.f32 %v9292_v13, %v12463_v20  ;;  %v12501_v18 = vadd.f32 %v12395_v63, %v4664_v22 }
 0x5af   : > { %v5487_v51 = vpack.c.bf16 %v5471_v62, %v5471_v62  ;;  %v5198_v58 = vadd.f32 %v9290_v60, %v5197_v35  ;;  %v5111_v53 = vadd.f32 0.4994258, %v5110_v19  ;;  %v5100_v39 = vadd.f32 0.18741608, %v5099_v31 }
 0x5b0   : > { %v5135_v50 = vmul.f32 %v5134_v25, %v12483_v55  ;;  %v5146_v12 = vmul.f32 %v5145_v2, %v12483_v55  ;;  %v5236_v29 = vsub.f32 1.0, %v5235_v23  ;;  %vm5240_vm15 = vweird.f32 %v9292_v13 }
 0x5b1   : > { %v5519_v36 = vunpack.c.l.b16 %v5487_v51  ;;  %v5202_v42 = vsel %vm5201_vm14, %v9290_v60, %v5198_v58  ;;  %v5112_v59 = vmul.f32 %v5111_v53, %v12432_v0  ;;  %vm5239_vm1 = vweird.f32 %v12463_v20 }
 0x5b2   : > { %v5207_v1 = vsel %vm12478_vm12, %v5206_v46, %v5202_v42  ;;  %v5136_v11 = vadd.f32 0.0036580483, %v5135_v50  ;;  %v5237_v14 = vmul.f32 %v9292_v13, %v5236_v29  ;;  %v5147_v44 = vadd.f32 0.014752088, %v5146_v12  ;;  %vm5241_vm4 = vmor %vm5239_vm1, %vm5240_vm15 }
 0x5b3   : > { %v5535_v5 = vpack.c.b16 %v5519_v36, %v5519_v36  ;;  %v5208_v8 = vmul.f32 %v5207_v1, %v5183_v21  ;;  %v12507_v52 = vadd.f32 1.0, %v5112_v59  ;;  %v12511_v60 = vmul.f32 0.70710677, %v12501_v18 }
 0x5b4   : > { %v5137_v63 = vmul.f32 %v5136_v11, %v12483_v55  ;;  %v5238_v61 = vadd.f32 %v9292_v13, %v5237_v14  ;;  %vm5244_vm2 = vcmp.eq.f32.partialorder %v5243_v4, 8.507059e+37  ;;  %v5148_v47 = vmul.f32 %v5147_v44, %v12483_v55 }
 0x5b5   : > { %5555 = vrot.lane.b32.xlu2 %v5535_v5, %s9389_s29  ;;  %v8838_v10 = vclamps-f32 %v5208_v8, 1.0  ;;  %v5246_v21 = vor.u32 1.1754944e-38, %v5245_v56  ;;  %v5101_v37 = vmul.f32 %v5100_v39, %v12432_v0  ;;  %9293 = vrcp.f32 %v12507_v52 }
 0x5b6   : > { %v12519_v20 = vmul.f32 0.70710677, %v12487_v43  ;;  %v5242_v48 = vsel %vm5241_vm4, %v9292_v13, %v5238_v61  ;;  %v5138_v9 = vadd.f32 0.05243302, %v5137_v63  ;;  %v5149_v7 = vadd.f32 0.112945676, %v5148_v47  ;;  %v4757_v47 = vpop.permute.xlu0 %4756 }
 0x5b7   : > { %v5460_v46 = vadd.f32 1.0, %v8838_v10  ;;  %v4789_v26 = vmul.f32 0.5, %v12354_v17  ;;  %v5247_v33 = vsel %vm5244_vm2, %v5246_v21, %v5242_v48  ;;  %v5331_v6 = vmul.f32 %v12511_v60, %v12511_v60 }
 0x5b8   : > { %v4553_v24 = vmul.f32 %v12095_v28, %v12042_v49  ;;  %v5248_v22 = vmul.f32 %v5247_v33, %v5223_v15  ;;  %v5139_v62 = vmul.f32 %v5138_v9, %v12483_v55  ;;  %v5150_v35 = vmul.f32 %v5149_v7, %v12483_v55 }
 0x5b9   : > { %v5476_v0 = vmul.f32 %v5460_v46, %v12470_v38  ;;  %v5102_v31 = vadd.f32 1.1283791, %v5101_v37  ;;  %v5123_v13 = vand.u32 2147483647, %v12507_v52  ;;  %v12530_v4 = vmin.f32 %v5331_v6, 16.0 }
 0x5ba   : > { %v5291_v17 = vmul.f32 %v12519_v20, %v12519_v20  ;;  %v8839_v25 = vclamps-f32 %v5248_v22, 1.0  ;;  %v5140_v2 = vadd.f32 0.18741608, %v5139_v62  ;;  %v5151_v51 = vadd.f32 0.4994258, %v5150_v35 }
 0x5bb   : > { %v5492_v19 = vpack.c.bf16 %v5476_v0, %v5476_v0  ;;  %v9294_v49 = vpop.eup %9293  ;;  %v5125_v38 = vand.u32 2147483648, %v12507_v52  ;;  %v5333_v15 = vmul.f32 2.1237322e-06, %v12530_v4  ;;  %v5344_v58 = vmul.f32 3.8918573e-05, %v12530_v4 }
 0x5bc   : > { %v12537_v23 = vmin.f32 %v5291_v17, 16.0  ;;  %v5461_v53 = vadd.f32 1.0, %v8839_v25  ;;  %v5115_v50 = vmul.f32 %v9294_v49, %v12507_v52  ;;  %v4665_v12 = vmul.f32 %v12416_v3, %v4553_v24 }
 0x5bd   : > { %v5524_v56 = vunpack.c.l.b16 %v5492_v19  ;;  %vm5120_vm6 = vweird.f32 %v9294_v49  ;;  %v5152_v36 = vmul.f32 %v5151_v51, %v12483_v55  ;;  %v5334_v42 = vadd.f32 0.00028619796, %v5333_v15 }
 0x5be   : > { %v5345_v29 = vadd.f32 0.001143296, %v5344_v58  ;;  %v5477_v1 = vmul.f32 %v5461_v53, %v4789_v26  ;;  %v5116_v59 = vsub.f32 1.0, %v5115_v50  ;;  %v5293_v11 = vmul.f32 2.1237322e-06, %v12537_v23 }
 0x5bf   : > { %v5540_v39 = vpack.c.b16 %v5524_v56, %v5524_v56  ;;  %v5141_v5 = vmul.f32 %v5140_v2, %v12483_v55  ;;  %v12544_v8 = vadd.f32 1.0, %v5152_v36  ;;  %v5335_v14 = vmul.f32 %v5334_v42, %v12530_v4 }
 0x5c0   : > { %v5346_v44 = vmul.f32 %v5345_v29, %v12530_v4  ;;  %v5493_v3 = vpack.c.bf16 %v5477_v1, %v5477_v1  ;;  %v5117_v63 = vmul.f32 %v9294_v49, %v5116_v59  ;;  %v5294_v10 = vadd.f32 0.00028619796, %v5293_v11 }
 0x5c1   : > { %5565 = vrot.lane.b32.xlu0 %v5540_v39, %s9389_s29  ;;  %v5304_v61 = vmul.f32 3.8918573e-05, %v12537_v23  ;;  %v5103_v21 = vmul.f32 %v5102_v31, %v12393_v45  ;;  %vm5119_vm9 = vweird.f32 %v12507_v52  ;;  %v5126_v37 = vor.u32 1.1754944e-38, %v5125_v38 }
 0x5c2   : > { %9295 = vrcp.f32 %v12544_v8  ;;  %v5525_v55 = vunpack.c.l.b16 %v5493_v3  ;;  %v5118_v46 = vadd.f32 %v9294_v49, %v5117_v63  ;;  %v5336_v48 = vadd.f32 0.0036580483, %v5335_v14  ;;  %vm5121_vm10 = vmor %vm5119_vm9, %vm5120_vm6 }
 0x5c3   : > { %v12553_v9 = vadd.f32 %v4757_v47, %v4665_v12  ;;  %v5142_v7 = vadd.f32 1.1283791, %v5141_v5  ;;  %v5347_v26 = vadd.f32 0.014752088, %v5346_v44  ;;  %v5295_v33 = vmul.f32 %v5294_v10, %v12537_v23 }
 0x5c4   : > { %v5305_v6 = vadd.f32 0.001143296, %v5304_v61  ;;  %v5541_v24 = vpack.c.b16 %v5525_v55, %v5525_v55  ;;  %v5122_v0 = vsel %vm5121_vm10, %v9294_v49, %v5118_v46  ;;  %vm5124_vm11 = vcmp.eq.f32.partialorder %v5123_v13, 8.507059e+37 }
 0x5c5   : > { %v5337_v45 = vmul.f32 %v5336_v48, %v12530_v4  ;;  %v5127_v52 = vsel %vm5124_vm11, %v5126_v37, %v5122_v0  ;;  %v5348_v22 = vmul.f32 %v5347_v26, %v12530_v4  ;;  %v5296_v62 = vadd.f32 0.0036580483, %v5295_v33 }
 0x5c6   : > { %v5306_v35 = vmul.f32 %v5305_v6, %v12537_v23  ;;  %5567 = vrot.lane.b32.xlu1 %v5541_v24, %s9389_s29  ;;  %v4786_v31 = vmul.f32 0.5, %v12377_v41  ;;  %v5128_v17 = vmul.f32 %v5127_v52, %v5103_v21  ;;  %v12563_v19 = vmul.f32 0.70710677, %v12553_v9  ;;  %v4745_v21 = vpop.permute.xlu0 %4744 }
 0x5c7   : > { %v5143_v2 = vmul.f32 %v5142_v7, %v12455_v27  ;;  %v5349_v13 = vadd.f32 0.112945676, %v5348_v22  ;;  %v4550_v49 = vmul.f32 %v12095_v28, %v12036_v54  ;;  %vm5159_vm12 = vweird.f32 %v12544_v8 }
 0x5c8   : > { %v9296_v25 = vpop.eup %9295  ;;  %v5307_v51 = vadd.f32 0.014752088, %v5306_v35  ;;  %v8836_v38 = vclamps-f32 %v5128_v17, 1.0  ;;  %v5338_v58 = vadd.f32 0.05243302, %v5337_v45  ;;  %v5297_v56 = vmul.f32 %v5296_v62, %v12537_v23 }
 0x5c9   : > { %v5155_v15 = vmul.f32 %v9296_v25, %v12544_v8  ;;  %v5350_v41 = vmul.f32 %v5349_v13, %v12530_v4  ;;  %v5371_v27 = vmul.f32 %v12563_v19, %v12563_v19  ;;  %v5163_v36 = vand.u32 2147483647, %v12544_v8 }
 0x5ca   : > { %v5308_v53 = vmul.f32 %v5307_v51, %v12537_v23  ;;  %v5458_v50 = vadd.f32 1.0, %v8836_v38  ;;  %v5165_v54 = vand.u32 2147483648, %v12544_v8  ;;  %v4662_v1 = vmul.f32 %v12445_v32, %v4550_v49 }
 0x5cb   : > { %v5156_v12 = vsub.f32 1.0, %v5155_v15  ;;  %v5351_v42 = vadd.f32 0.4994258, %v5350_v41  ;;  %v12577_v39 = vmin.f32 %v5371_v27, 16.0  ;;  %vm5160_vm13 = vweird.f32 %v9296_v25 }
 0x5cc   : > { %v5309_v29 = vadd.f32 0.112945676, %v5308_v53  ;;  %v5474_v59 = vmul.f32 %v5458_v50, %v4786_v31  ;;  %v5339_v5 = vmul.f32 %v5338_v58, %v12530_v4  ;;  %v5298_v44 = vadd.f32 0.05243302, %v5297_v56  ;;  %vm5161_vm15 = vmor %vm5159_vm12, %vm5160_vm13 }
 0x5cd   : > { %v5157_v11 = vmul.f32 %v9296_v25, %v5156_v12  ;;  %v5352_v14 = vmul.f32 %v5351_v42, %v12530_v4  ;;  %v5373_v63 = vmul.f32 2.1237322e-06, %v12577_v39  ;;  %vm5164_vm14 = vcmp.eq.f32.partialorder %v5163_v36, 8.507059e+37 }
 0x5ce   : > { %v5310_v3 = vmul.f32 %v5309_v29, %v12537_v23  ;;  %v5490_v10 = vpack.c.bf16 %v5474_v59, %v5474_v59  ;;  %v5384_v47 = vmul.f32 3.8918573e-05, %v12577_v39  ;;  %v5166_v32 = vor.u32 1.1754944e-38, %v5165_v54 }
 0x5cf   : > { %v5158_v61 = vadd.f32 %v9296_v25, %v5157_v11  ;;  %v12587_v37 = vadd.f32 1.0, %v5352_v14  ;;  %v5374_v46 = vadd.f32 0.00028619796, %v5373_v63  ;;  %v12589_v33 = vadd.f32 %v4745_v21, %v4662_v1 }
 0x5d0   : > { %v5311_v55 = vadd.f32 0.4994258, %v5310_v3  ;;  %v5522_v48 = vunpack.c.l.b16 %v5490_v10  ;;  %v5385_v26 = vadd.f32 0.001143296, %v5384_v47  ;;  %v5340_v24 = vadd.f32 0.18741608, %v5339_v5 }
 0x5d1   : > { %v5162_v7 = vsel %vm5161_vm15, %v9296_v25, %v5158_v61  ;;  %9297 = vrcp.f32 %v12587_v37  ;;  %v5299_v0 = vmul.f32 %v5298_v44, %v12537_v23  ;;  %v5375_v22 = vmul.f32 %v5374_v46, %v12577_v39 }
 0x5d2   : > { %v5167_v6 = vsel %vm5164_vm14, %v5166_v32, %v5162_v7  ;;  %v5538_v45 = vpack.c.b16 %v5522_v48, %v5522_v48  ;;  %v5312_v8 = vmul.f32 %v5311_v55, %v12537_v23  ;;  %v5386_v62 = vmul.f32 %v5385_v26, %v12577_v39 }
 0x5d3   : > { %v5168_v52 = vmul.f32 %v5167_v6, %v5143_v2  ;;  %v12598_v31 = vmul.f32 0.70710677, %v12589_v33  ;;  %v5341_v17 = vmul.f32 %v5340_v24, %v12530_v4  ;;  %v5300_v25 = vadd.f32 0.18741608, %v5299_v0 }
 0x5d4   : > { %5561 = vrot.lane.b32.xlu2 %v5538_v45, %s9389_s29  ;;  %v12601_v13 = vadd.f32 1.0, %v5312_v8  ;;  %v5387_v51 = vadd.f32 0.014752088, %v5386_v62  ;;  %v4787_v2 = vmul.f32 0.5, %v12435_v30  ;;  %v5376_v15 = vadd.f32 0.0036580483, %v5375_v22 }
 0x5d5   : > { %v8837_v35 = vclamps-f32 %v5168_v52, 1.0  ;;  %v5251_v58 = vmul.f32 %v12598_v31, %v12598_v31  ;;  %v5342_v30 = vadd.f32 1.1283791, %v5341_v17  ;;  %v5301_v50 = vmul.f32 %v5300_v25, %v12537_v23 }
 0x5d6   : > { %9299 = vrcp.f32 %v12601_v13  ;;  %v5388_v12 = vmul.f32 %v5387_v51, %v12577_v39  ;;  %v5377_v42 = vmul.f32 %v5376_v15, %v12577_v39  ;;  %v5363_v1 = vand.u32 2147483647, %v12587_v37 }
 0x5d7   : > { %v5459_v49 = vadd.f32 1.0, %v8837_v35  ;;  %v5550_v38 = vpop.permute.xlu2 %5549  ;;  %v9298_v41 = vpop.eup %9297  ;;  %v12617_v29 = vmin.f32 %v5251_v58, 16.0  ;;  %v5365_v59 = vand.u32 2147483648, %v12587_v37  ;;  %vm5359_vm2 = vweird.f32 %v12587_v37 }
 0x5d8   : > { %v5582_v56 = vsel %vm1569_vm3, 0, %v5550_v38  ;;  %v5355_v27 = vmul.f32 %v9298_v41, %v12587_v37  ;;  %vm5360_vm1 = vweird.f32 %v9298_v41  ;;  %v5389_v11 = vadd.f32 0.112945676, %v5388_v12 }
 0x5d9   : > { %v5475_v53 = vmul.f32 %v5459_v49, %v4787_v2  ;;  %v12609_v4 = vsel %vm1603_vm5, %v5582_v56, 0  ;;  %v5253_v44 = vmul.f32 2.1237322e-06, %v12617_v29  ;;  %v5264_v23 = vmul.f32 3.8918573e-05, %v12617_v29  ;;  %vm5361_vm4 = vmor %vm5359_vm2, %vm5360_vm1 }
 0x5da   : > { %5699 = vrot.lane.b32.xlu1 %v12609_v4, %s9390_s14  ;;  %v5356_v54 = vsub.f32 1.0, %v5355_v27  ;;  %v5302_v63 = vadd.f32 1.1283791, %v5301_v50  ;;  %v5390_v10 = vmul.f32 %v5389_v11, %v12577_v39  ;;  %v5378_v32 = vadd.f32 0.05243302, %v5377_v42 }
 0x5db   : > { %v5491_v36 = vpack.c.bf16 %v5475_v53, %v5475_v53  ;;  %v5343_v55 = vmul.f32 %v5342_v30, %v12511_v60  ;;  %v5366_v46 = vor.u32 1.1754944e-38, %v5365_v59  ;;  %v5254_v7 = vadd.f32 0.00028619796, %v5253_v44 }
 0x5dc   : > { %v5357_v14 = vmul.f32 %v9298_v41, %v5356_v54  ;;  %v9300_v3 = vpop.eup %9299  ;;  %v5391_v48 = vadd.f32 0.4994258, %v5390_v10  ;;  %vm5364_vm6 = vcmp.eq.f32.partialorder %v5363_v1, 8.507059e+37  ;;  %v5265_v6 = vadd.f32 0.001143296, %v5264_v23 }
 0x5dd   : > { %v5523_v5 = vunpack.c.l.b16 %v5491_v36  ;;  %v5315_v21 = vmul.f32 %v9300_v3, %v12601_v13  ;;  %v5323_v0 = vand.u32 2147483647, %v12601_v13  ;;  %v5325_v45 = vand.u32 2147483648, %v12601_v13 }
 0x5de   : > { %v5358_v47 = vadd.f32 %v9298_v41, %v5357_v14  ;;  %v5392_v52 = vmul.f32 %v5391_v48, %v12577_v39  ;;  %vm5320_vm9 = vweird.f32 %v9300_v3  ;;  %v5379_v22 = vmul.f32 %v5378_v32, %v12577_v39 }
 0x5df   : > { %v5539_v61 = vpack.c.b16 %v5523_v5, %v5523_v5  ;;  %v5316_v37 = vsub.f32 1.0, %v5315_v21  ;;  %v5255_v35 = vmul.f32 %v5254_v7, %v12617_v29  ;;  %v5266_v17 = vmul.f32 %v5265_v6, %v12617_v29 }
 0x5e0   : > { %v5362_v26 = vsel %vm5361_vm4, %v9298_v41, %v5358_v47  ;;  %v12633_v62 = vadd.f32 1.0, %v5392_v52  ;;  %vm5319_vm10 = vweird.f32 %v12601_v13  ;;  %v4792_v2 = vmul.f32 0.5, %v12501_v18 }
 0x5e1   : > { %5563 = vrot.lane.b32.xlu0 %v5539_v61, %s9389_s29  ;;  %v5367_v24 = vsel %vm5364_vm6, %v5366_v46, %v5362_v26  ;;  %v5317_v60 = vmul.f32 %v9300_v3, %v5316_v37  ;;  %v5303_v49 = vmul.f32 %v5302_v63, %v12519_v20  ;;  %vm5321_vm11 = vmor %vm5319_vm10, %vm5320_vm9  ;;  %v5326_v38 = vor.u32 1.1754944e-38, %v5325_v45 }
 0x5e2   : > { %v5368_v8 = vmul.f32 %v5367_v24, %v5343_v55  ;;  %9301 = vrcp.f32 %v12633_v62  ;;  %vm5324_vm12 = vcmp.eq.f32.partialorder %v5323_v0, 8.507059e+37  ;;  %v5380_v41 = vadd.f32 0.18741608, %v5379_v22 }
 0x5e3   : > { %v5318_v51 = vadd.f32 %v9300_v3, %v5317_v60  ;;  %v5256_v53 = vadd.f32 0.0036580483, %v5255_v35  ;;  %v5267_v27 = vadd.f32 0.014752088, %v5266_v17  ;;  %v4791_v59 = vmul.f32 0.5, %v12487_v43 }
 0x5e4   : > { %v8842_v25 = vclamps-f32 %v5368_v8, 1.0  ;;  %v5381_v18 = vmul.f32 %v5380_v41, %v12577_v39  ;;  %v5405_v10 = vand.u32 2147483648, %v12633_v62  ;;  %v5403_v43 = vand.u32 2147483647, %v12633_v62 }
 0x5e5   : > { %v5322_v58 = vsel %vm5321_vm11, %v9300_v3, %v5318_v51  ;;  %v5268_v12 = vmul.f32 %v5267_v27, %v12617_v29  ;;  %v5257_v54 = vmul.f32 %v5256_v53, %v12617_v29  ;;  %vm5399_vm14 = vweird.f32 %v12633_v62 }
 0x5e6   : > { %v5464_v15 = vadd.f32 1.0, %v8842_v25  ;;  %v5327_v56 = vsel %vm5324_vm12, %v5326_v38, %v5322_v58  ;;  %v5382_v3 = vadd.f32 1.1283791, %v5381_v18  ;;  %v5406_v0 = vor.u32 1.1754944e-38, %v5405_v10 }
 0x5e7   : > { %v5328_v50 = vmul.f32 %v5327_v56, %v5303_v49  ;;  %v5269_v42 = vadd.f32 0.112945676, %v5268_v12  ;;  %v5258_v61 = vadd.f32 0.05243302, %v5257_v54  ;;  %vm5404_vm1 = vcmp.eq.f32.partialorder %v5403_v43, 8.507059e+37 }
 0x5e8   : > { %v5480_v30 = vmul.f32 %v5464_v15, %v4792_v2  ;;  %v9302_v20 = vpop.eup %9301  ;;  %v5383_v8 = vmul.f32 %v5382_v3, %v12563_v19  ;;  %v4793_v51 = vmul.f32 0.5, %v12553_v9  ;;  %v5558_v9 = vpop.permute.xlu2 %5557 }
 0x5e9   : > { %v8841_v36 = vclamps-f32 %v5328_v50, 1.0  ;;  %v5395_v5 = vmul.f32 %v9302_v20, %v12633_v62  ;;  %v5270_v14 = vmul.f32 %v5269_v42, %v12617_v29  ;;  %vm5400_vm13 = vweird.f32 %v9302_v20 }
 0x5ea   : > { %v5496_v13 = vpack.c.bf16 %v5480_v30, %v5480_v30  ;;  %vm5401_vm15 = vmor %vm5399_vm14, %vm5400_vm13  ;;  %v5259_v45 = vmul.f32 %v5258_v61, %v12617_v29  ;;  %v5590_v42 = vsel %vm1569_vm3, 0, %v5558_v9 }
 0x5eb   : > { %v5463_v11 = vadd.f32 1.0, %v8841_v36  ;;  %v5396_v63 = vsub.f32 1.0, %v5395_v5  ;;  %v5271_v39 = vadd.f32 0.4994258, %v5270_v14  ;;  %v12674_v5 = vsel %vm1603_vm5, %v5590_v42, 0 }
 0x5ec   : > { %v5528_v1 = vunpack.c.l.b16 %v5496_v13  ;;  %v5260_v17 = vadd.f32 0.18741608, %v5259_v45 }
 0x5ed   : > { %v5479_v23 = vmul.f32 %v5463_v11, %v4791_v59  ;;  %v5397_v55 = vmul.f32 %v9302_v20, %v5396_v63  ;;  %v5272_v7 = vmul.f32 %v5271_v39, %v12617_v29  ;;  %v4790_v59 = vmul.f32 0.5, %v12589_v33 }
 0x5ee   : > { %v5544_v44 = vpack.c.b16 %v5528_v1, %v5528_v1  ;;  %v5548_v21 = vpop.permute.xlu1 %5547  ;;  %v5261_v38 = vmul.f32 %v5260_v17, %v12617_v29 }
 0x5ef   : > { %v5495_v47 = vpack.c.bf16 %v5479_v23, %v5479_v23  ;;  %v5580_v46 = vsel %vm1569_vm3, 0, %v5548_v21  ;;  %v5398_v24 = vadd.f32 %v9302_v20, %v5397_v55  ;;  %v5273_v52 = vadd.f32 1.0, %v5272_v7 }
 0x5f0   : > { %5573 = vrot.lane.b32.xlu1 %v5544_v44, %s9389_s29  ;;  %v12655_v37 = vsel %vm1603_vm5, %v5580_v46, 0  ;;  %v5262_v56 = vadd.f32 1.1283791, %v5261_v38 }
 0x5f1   : > { %v5552_v32 = vpop.permute.xlu0 %5551  ;;  %v5527_v26 = vunpack.c.l.b16 %v5495_v47  ;;  %5677 = vrot.lane.b32.xlu0 %v12655_v37, %s9390_s14  ;;  %v5402_v60 = vsel %vm5401_vm15, %v9302_v20, %v5398_v24  ;;  %9303 = vrcp.f32 %v5273_v52  ;;  %v5285_v53 = vand.u32 2147483648, %v5273_v52 }
 0x5f2   : > { %v5584_v48 = vsel %vm1569_vm3, 0, %v5552_v32  ;;  %v5407_v22 = vsel %vm5404_vm1, %v5406_v0, %v5402_v60  ;;  %v5283_v50 = vand.u32 2147483647, %v5273_v52  ;;  %vm5279_vm4 = vweird.f32 %v5273_v52 }
 0x5f3   : > { %v12658_v6 = vsel %vm1603_vm5, %v5584_v48, 0  ;;  %v5543_v62 = vpack.c.b16 %v5527_v26, %v5527_v26  ;;  %v5408_v35 = vmul.f32 %v5407_v22, %v5383_v8  ;;  %v5286_v36 = vor.u32 1.1754944e-38, %v5285_v53 }
 0x5f4   : > { %5721 = vrot.lane.b32.xlu2 %v12658_v6, %s9390_s14  ;;  %v5263_v29 = vmul.f32 %v5262_v56, %v12598_v31  ;;  %vm5284_vm9 = vcmp.eq.f32.partialorder %v5283_v50, 8.507059e+37  ;;  %v9235_v50 = vld [vmem:[%s14165_s7 + $0xf] ss:$0 sm:$0xff] }
 0x5f5   : > { %v8843_v25 = vclamps-f32 %v5408_v35, 1.0 }
 0x5f7   : > { %v5465_v2 = vadd.f32 1.0, %v8843_v25  ;;  %v9304_v49 = vpop.eup %9303 }
 0x5f8   : > { %5571 = vrot.lane.b32.xlu1 %v5543_v62, %s9389_s29  ;;  %v5275_v58 = vmul.f32 %v9304_v49, %v5273_v52  ;;  %vm5280_vm2 = vweird.f32 %v9304_v49 }
 0x5f9   : > { %v5481_v15 = vmul.f32 %v5465_v2, %v4793_v51  ;;  %vm5281_vm6 = vmor %vm5279_vm4, %vm5280_vm2 }
 0x5fa   : > { %v5276_v19 = vsub.f32 1.0, %v5275_v58 }
 0x5fb   : > { %v5497_v41 = vpack.c.bf16 %v5481_v15, %v5481_v15 }
 0x5fc   : > { %v5277_v30 = vmul.f32 %v9304_v49, %v5276_v19 }
 0x5fd   : > { %v5529_v27 = vunpack.c.l.b16 %v5497_v41 }
 0x5fe   : > { %v5278_v13 = vadd.f32 %v9304_v49, %v5277_v30 }
 0x5ff   : > { %v5545_v12 = vpack.c.b16 %v5529_v27, %v5529_v27 }
 0x600   : > { %v5282_v18 = vsel %vm5281_vm6, %v9304_v49, %v5278_v13  ;;  %v8845_v13 = vld [vmem:[%s14161_s3 + $0x20] sm:$0x3] }
 0x601   : > { %5575 = vrot.lane.b32.xlu2 %v5545_v12, %s9389_s29  ;;  %v5287_v20 = vsel %vm5284_vm9, %v5286_v36, %v5282_v18  ;;  %8861 = vmatmul.msk.bf16.vlgmr.msra.gmra.mxu0 %vm1656_vm8, %v8845_v13  ;;  %v5634_v13 = vld [vmem:[%s14161_s3 + $0xe] sm:$0x3] }
 0x602   : > { %v5288_v54 = vmul.f32 %v5287_v20, %v5263_v29 }
 0x604   : > { %v8840_v1 = vclamps-f32 %v5288_v54, 1.0 }
 0x606   : > { %v5462_v11 = vadd.f32 1.0, %v8840_v1 }
 0x608   : > { %v5478_v14 = vmul.f32 %v5462_v11, %v4790_v59  ;;  %v8848_v11 = vld [vmem:[%s14161_s3 + $0x26] sm:$0x3] }
 0x609   : > { %5787 = vrot.lane.b32.xlu2 %v12674_v5, %s9390_s14 }
 0x60a   : > { %v5494_v23 = vpack.c.bf16 %v5478_v14, %v5478_v14 }
 0x60c   : > { %v5526_v3 = vunpack.c.l.b16 %v5494_v23  ;;  %v9236_v23 = vld [vmem:[%s14166_s8 + $0xf] ss:$0 sm:$0xff] }
 0x60d   : > { %v5560_v33 = vpop.permute.xlu0 %5559 }
 0x60e   : > { %v5542_v63 = vpack.c.b16 %v5526_v3, %v5526_v3  ;;  %v5592_v39 = vsel %vm1569_vm3, 0, %v5560_v33  ;;  %v8852_v33 = vld [vmem:[%s14161_s3 + $0x2e] sm:$0x3] }
 0x60f   : > { %v5556_v44 = vpop.permute.xlu2 %5555  ;;  %v12693_v32 = vsel %vm1603_vm5, %v5592_v39, 0  ;;  %v8849_v39 = vld [vmem:[%s14161_s3 + $0x28] sm:$0x3] }
 0x610   : > { %v5588_v31 = vsel %vm1569_vm3, 0, %v5556_v44  ;;  %5569 = vrot.lane.b32.xlu0 %v5542_v63, %s9389_s29  ;;  %v8847_v44 = vld [vmem:[%s14161_s3 + $0x24] sm:$0x3]  ;;  %v8846_v63 = vld [vmem:[%s14161_s3 + $0x22] sm:$0x3] }
 0x611   : > { %v12680_v10 = vsel %vm1603_vm5, %v5588_v31, 0 }
 0x612   : > { %5765 = vrot.lane.b32.xlu2 %v12680_v10, %s9390_s14 }
 0x617   : > { %v5554_v61 = vpop.permute.xlu1 %5553 }
 0x618   : > { %v5586_v47 = vsel %vm1569_vm3, 0, %v5554_v61  ;;  %5809 = vrot.lane.b32.xlu0 %v12693_v32, %s9390_s14  ;;  %v8851_v61 = vld [vmem:[%s14161_s3 + $0x2c] sm:$0x3] }
 0x619   : > { %v12688_v21 = vsel %vm1603_vm5, %v5586_v47, 0 }
 0x61a   : > { %5743 = vrot.lane.b32.xlu1 %v12688_v21, %s9390_s14 }
 0x62e   : > { %v5562_v55 = vpop.permute.xlu2 %5561 }
 0x62f   : > { %v5594_v43 = vsel %vm1569_vm3, 0, %v5562_v55 }
 0x630   : > { %v12699_v46 = vsel %vm1603_vm5, %v5594_v43, 0  ;;  %v8850_v43 = vld [vmem:[%s14161_s3 + $0x2a] sm:$0x3] }
 0x631   : > { %5831 = vrot.lane.b32.xlu2 %v12699_v46, %s9390_s14 }
 0x633   : > { %v5566_v48 = vpop.permute.xlu0 %5565 }
 0x634   : > { %v5598_v7 = vsel %vm1569_vm3, 0, %v5566_v48  ;;  %v8856_v48 = vld [vmem:[%s14161_s3 + $0x36] sm:$0x3] }
 0x635   : > { %v12705_v26 = vsel %vm1603_vm5, %v5598_v7, 0  ;;  %v8855_v7 = vld [vmem:[%s14161_s3 + $0x34] sm:$0x3] }
 0x636   : > { %5875 = vrot.lane.b32.xlu0 %v12705_v26, %s9390_s14 }
 0x638   : > { %v5568_v24 = vpop.permute.xlu1 %5567 }
 0x639   : > { %v5600_v0 = vsel %vm1569_vm3, 0, %v5568_v24 }
 0x63a   : > { %v12711_v45 = vsel %vm1603_vm5, %v5600_v0, 0 }
 0x63b   : > { %5897 = vrot.lane.b32.xlu1 %v12711_v45, %s9390_s14 }
 0x64c   : > { %v5700_v52 = vpop.permute.xlu1 %5699 }
 0x64d   : > { %v12716_v8 = vsel %vm1660_vm7, %v5700_v52, 0  ;;  %v12867_v52 = vsel %vm1660_vm7, %v12658_v6, 0 }
 0x64e   : > { %14310 = vst [vmem:[#allocation16_spill] sm:$0xff] %v12716_v8  ;;  %v5722_v60 = vpop.permute.xlu2 %5721  ;;  %5714 = vmatpush.bf16.msra.mxu2 %v12716_v8 }
 0x64f   : > { %v12720_v22 = vsel %vm1660_vm7, %v5722_v60, 0  ;;  %v8853_v60 = vld [vmem:[%s14161_s3 + $0x30] sm:$0x3] }
 0x650   : > { %14311 = vst [vmem:[#allocation21_spill] sm:$0xff] %v12720_v22  ;;  %5736 = vmatpush.bf16.msra.mxu3 %v12720_v22 }
 0x651   : > { %8863 = vmatmul.msk.bf16.vlgmr.msra.gmra.mxu2 %vm1656_vm8, %v8847_v44  ;;  %v8857_v44 = vld [vmem:[%s14161_s3 + $0x38] sm:$0x3] }
 0x653   : > { %v5564_v62 = vpop.permute.xlu0 %5563  ;;  %8864 = vmatmul.msk.bf16.vlgmr.msra.gmra.mxu3 %vm1656_vm8, %v8848_v11 }
 0x654   : > { %v5596_v35 = vsel %vm1569_vm3, 0, %v5564_v62 }
 0x655   : > { %v12725_v17 = vsel %vm1603_vm5, %v5596_v35, 0  ;;  %v8860_v35 = vld [vmem:[%s14161_s3 + $0x3e] sm:$0x3] }
 0x656   : > { %5853 = vrot.lane.b32.xlu0 %v12725_v17, %s9390_s14 }
 0x65b   : > { %v5576_v25 = vpop.permute.xlu2 %5575 }
 0x65c   : > { %v5608_v51 = vsel %vm1569_vm3, 0, %v5576_v25 }
 0x65d   : > { %v12731_v2 = vsel %vm1603_vm5, %v5608_v51, 0  ;;  %v12887_v51 = vsel %vm1660_vm7, %v12693_v32, 0 }
 0x65e   : > { %5985 = vrot.lane.b32.xlu2 %v12731_v2, %s9390_s14 }
 0x662   : > { %v5574_v49 = vpop.permute.xlu1 %5573 }
 0x663   : > { %v5606_v38 = vsel %vm1569_vm3, 0, %v5574_v49  ;;  %v5678_v58 = vpop.permute.xlu0 %5677  ;;  %v5788_v41 = vpop.permute.xlu2 %5787  ;;  %v5630_v49 = vld [vmem:[%s14161_s3 + $0x6] sm:$0x3] }
 0x664   : > { %v12737_v15 = vsel %vm1603_vm5, %v5606_v38, 0  ;;  %v12742_v19 = vsel %vm1660_vm7, %v5678_v58, 0  ;;  %v12745_v56 = vsel %vm1660_vm7, %v5788_v41, 0  ;;  %v12900_v41 = vsel %vm1660_vm7, %v12609_v4, 0 }
 0x665   : > { %5963 = vrot.lane.b32.xlu1 %v12737_v15, %s9390_s14  ;;  %5692 = vmatpush.bf16.msra.mxu1 %v12742_v19 }
 0x666   : > { %5802 = vmatpush.bf16.msrb.mxu2 %v12745_v56  ;;  %6346 = vrot.lane.b32.xlu2 %v12609_v4, %s9391_s17  ;;  %v12915_v4 = vsel %vm1660_vm7, %v12674_v5, 0 }
 0x668   : > { %8862 = vmatmul.msk.bf16.vlgmr.msra.gmra.mxu1 %vm1656_vm8, %v8846_v63 }
 0x669   : > { %8867 = vmatmul.msk.bf16.vlgmr.msrb.gmra.mxu2 %vm1656_vm8, %v8851_v61 }
 0x66a   : > { %v5572_v53 = vpop.permute.xlu1 %5571 }
 0x66b   : > { %v5604_v27 = vsel %vm1569_vm3, 0, %v5572_v53  ;;  %v12908_v53 = vsel %vm1660_vm7, %v12711_v45, 0 }
 0x66c   : > { %v12753_v30 = vsel %vm1603_vm5, %v5604_v27, 0  ;;  %v5766_v12 = vpop.permute.xlu2 %5765 }
 0x66d   : > { %5941 = vrot.lane.b32.xlu1 %v12753_v30, %s9390_s14  ;;  %v12764_v36 = vsel %vm1660_vm7, %v5766_v12, 0  ;;  %v8858_v12 = vld [vmem:[%s14161_s3 + $0x3a] sm:$0x3] }
 0x66e   : > { %5780 = vmatpush.bf16.msrb.mxu1 %v12764_v36  ;;  %4648 = vperm.xlu2 %9172, %v9235_v50  }
 0x675   : > { %6325 = vrot.lane.b32.xlu1 %v12655_v37, %s9391_s17 }
 0x676   : > { %6451 = vrot.lane.b32.xlu2 %v12693_v32, %s9391_s17  ;;  %v8859_v32 = vld [vmem:[%s14161_s3 + $0x3c] sm:$0x3] }
 0x678   : > { %8866 = vmatmul.msk.bf16.vlgmr.msrb.gmra.mxu1 %vm1656_vm8, %v8850_v43 }
 0x67d   : > { %6430 = vrot.lane.b32.xlu1 %v12674_v5, %s9391_s17  ;;  %v12933_v5 = vsel %vm1660_vm7, %v12680_v10, 0 }
 0x67e   : > { %6514 = vrot.lane.b32.xlu2 %v12705_v26, %s9391_s17 }
 0x682   : > { %v5570_v9 = vpop.permute.xlu0 %5569 }
 0x683   : > { %v5602_v29 = vsel %vm1569_vm3, 0, %v5570_v9  ;;  %v12945_v9 = vsel %vm1660_vm7, %v12731_v2, 0 }
 0x684   : > { %v12780_v18 = vsel %vm1603_vm5, %v5602_v29, 0  ;;  %14314 = vst [vmem:[#allocation18_spill] sm:$0xff] %v12945_v9  ;;  %v5628_v29 = vld [vmem:[%s14161_s3 + $0x2] sm:$0x3] }
 0x685   : > { %6409 = vrot.lane.b32.xlu1 %v12680_v10, %s9391_s17  ;;  %5919 = vrot.lane.b32.xlu0 %v12780_v18, %s9390_s14  ;;  %v12951_v10 = vsel %vm1660_vm7, %v12705_v26, 0  ;;  %v5633_v26 = vld [vmem:[%s14161_s3 + $0xc] sm:$0x3] }
 0x686   : > { %6493 = vrot.lane.b32.xlu2 %v12725_v17, %s9391_s17  ;;  %14315 = vst [vmem:[#allocation14_spill] sm:$0xff] %v12951_v10 }
 0x68a   : > { %v5810_v59 = vpop.permute.xlu0 %5809 }
 0x68b   : > { %v5832_v20 = vpop.permute.xlu2 %5831  ;;  %v12800_v14 = vsel %vm1660_vm7, %v5810_v59, 0 }
 0x68c   : > { %v5744_v54 = vpop.permute.xlu1 %5743  ;;  %v12787_v42 = vsel %vm1660_vm7, %v5832_v20, 0  ;;  %14313 = vst [vmem:[#allocation23_spill] sm:$0xff] %v12800_v14  ;;  %5824 = vmatpush.bf16.msrb.mxu3 %v12800_v14  ;;  %v5638_v20 = vld [vmem:[%s14161_s3 + $0x16] sm:$0x3] }
 0x68d   : > { %14312 = vst [vmem:[#allocation17_spill] sm:$0xff] %v12787_v42  ;;  %v12790_v1 = vsel %vm1660_vm7, %v5744_v54, 0  ;;  %6472 = vrot.lane.b32.xlu1 %v12699_v46, %s9391_s17  ;;  %6367 = vrot.lane.b32.xlu0 %v12658_v6, %s9391_s17  ;;  %v8854_v6 = vld [vmem:[%s14161_s3 + $0x32] sm:$0x3] }
 0x68e   : > { %5758 = vmatpush.bf16.msrb.mxu0 %v12790_v1  ;;  %6556 = vrot.lane.b32.xlu2 %v12780_v18, %s9391_s17 }
 0x68f   : > { %8868 = vmatmul.msk.bf16.vlgmr.msrb.gmra.mxu3 %vm1656_vm8, %v8852_v33  ;;  %v4554_v33 = vmul.f32 %v12095_v28, %v12044_v57 }
 0x691   : > { %8865 = vmatmul.msk.bf16.vlgmr.msrb.gmra.mxu0 %vm1656_vm8, %v8849_v39 }
 0x692   : > { %5846 = vmatpush.bf16.msra.mxu0 %v12787_v42 }
 0x695   : > { %6619 = vrot.lane.b32.xlu1 %v12731_v2, %s9391_s17  ;;  %4760 = vperm.xlu0 %9170, %v9236_v23   ;;  %v12960_v2 = vsel %vm1660_vm7, %v12725_v17, 0  ;;  %v12976_v17 = vsel %vm1660_vm7, %v12737_v15, 0  ;;  %v12987_v23 = vsel %vm1660_vm7, %v12688_v21, 0 }
 0x696   : > { %14316 = vst [vmem:[#allocation20_spill] sm:$0xff] %v12960_v2 }
 0x697   : > { %14317 = vst [vmem:[#allocation15_spill] sm:$0xff] %v12976_v17 }
 0x698   : > { %14318 = vst [vmem:[#allocation10_spill] sm:$0xff] %v12987_v23 }
 0x69d   : > { %6388 = vrot.lane.b32.xlu0 %v12688_v21, %s9391_s17 }
 0x6a1   : > { %8869 = vmatmul.msk.bf16.vlgmr.msra.gmra.mxu0 %vm1656_vm8, %v8853_v60 }
 0x6a5   : > { %6535 = vrot.lane.b32.xlu0 %v12711_v45, %s9391_s17  ;;  %v12924_v45 = vsel %vm1660_vm7, %v12655_v37, 0  ;;  %v5629_v37 = vld [vmem:[%s14161_s3 + $0x4] sm:$0x3] }
 0x6a8   : > { %v5876_v31 = vpop.permute.xlu0 %5875 }
 0x6a9   : > { %v12820_v3 = vsel %vm1660_vm7, %v5876_v31, 0 }
 0x6aa   : > { %5890 = vmatpush.bf16.msra.mxu2 %v12820_v3 }
 0x6ad   : > { %v5898_v47 = vpop.permute.xlu1 %5897  ;;  %6598 = vrot.lane.b32.xlu0 %v12737_v15, %s9391_s17  ;;  %8871 = vmatmul.msk.bf16.vlgmr.msra.gmra.mxu2 %vm1656_vm8, %v8855_v7 }
 0x6ae   : > { %v12842_v55 = vsel %vm1660_vm7, %v5898_v47, 0 }
 0x6af   : > { %5912 = vmatpush.bf16.msra.mxu3 %v12842_v55 }
 0x6b2   : > { %8872 = vmatmul.msk.bf16.vlgmr.msra.gmra.mxu3 %vm1656_vm8, %v8856_v48 }
 0x6b5   : > { %6577 = vrot.lane.b32.xlu0 %v12753_v30, %s9391_s17 }
 0x6b8   : > { %v5986_v24 = vpop.permute.xlu2 %5985 }
 0x6b9   : > { %v12862_v0 = vsel %vm1660_vm7, %v5986_v24, 0 }
 0x6ba   : > { %6000 = vmatpush.bf16.msrb.mxu3 %v12862_v0 }
 0x6be   : > { %6070 = vmatpush.bf16.msra.mxu3 %v12867_v52 }
 0x6c0   : > { %v6347_v11 = vpop.permute.xlu2 %6346 }
 0x6c2   : > { %8876 = vmatmul.msk.bf16.vlgmr.msrb.gmra.mxu3 %vm1656_vm8, %v8860_v35 }
 0x6c3   : > { %6142 = vmatpush.bf16.msrb.mxu3 %v12887_v51 }
 0x6c8   : > { %v5854_v62 = vpop.permute.xlu0 %5853  ;;  %v4649_v63 = vpop.permute.xlu2 %4648 }
 0x6c9   : > { %v12878_v25 = vsel %vm1660_vm7, %v5854_v62, 0  ;;  %v4666_v61 = vmul.f32 %v4649_v63, %v4554_v33 }
 0x6ca   : > { %5868 = vmatpush.bf16.msra.mxu1 %v12878_v25 }
 0x6cd   : > { %8870 = vmatmul.msk.bf16.vlgmr.msra.gmra.mxu1 %vm1656_vm8, %v8854_v6 }
 0x6d2   : > { %8880 = vmatmul.msk.bf16.vlgmr.msra.gmra.mxu3 %vm1656_vm8, %v5630_v49 }
 0x6d3   : > { %6214 = vmatpush.bf16.msra.mxu3 %v12908_v53 }
 0x6d7   : > { %v5964_v38 = vpop.permute.xlu1 %5963 }
 0x6d8   : > { %v12895_v58 = vsel %vm1660_vm7, %v5964_v38, 0 }
 0x6d9   : > { %5978 = vmatpush.bf16.msrb.mxu2 %v12895_v58 }
 0x6dc   : > { %8875 = vmatmul.msk.bf16.vlgmr.msrb.gmra.mxu2 %vm1656_vm8, %v8859_v32 }
 0x6dd   : > { %6052 = vmatpush.bf16.msra.mxu2 %v12900_v41 }
 0x6df   : > { %v5942_v27 = vpop.permute.xlu1 %5941 }
 0x6e0   : > { %v12919_v50 = vsel %vm1660_vm7, %v5942_v27, 0 }
 0x6e1   : > { %6124 = vmatpush.bf16.msrb.mxu2 %v12915_v4  ;;  %5956 = vmatpush.bf16.msrb.mxu1 %v12919_v50 }
 0x6e2   : > { %8884 = vmatmul.msk.bf16.vlgmr.msrb.gmra.mxu3 %vm1656_vm8, %v5634_v13 }
 0x6e3   : > { %6286 = vmatpush.bf16.msrb.mxu3 %v12945_v9 }
 0x6e4   : > { %8874 = vmatmul.msk.bf16.vlgmr.msrb.gmra.mxu1 %vm1656_vm8, %v8858_v12 }
 0x6e5   : > { %6034 = vmatpush.bf16.msra.mxu1 %v12924_v45 }
 0x6e7   : > { %v6326_v57 = vpop.permute.xlu1 %6325 }
 0x6e9   : > { %6106 = vmatpush.bf16.msrb.mxu1 %v12933_v5 }
 0x6ec   : > { %8879 = vmatmul.msk.bf16.vlgmr.msra.gmra.mxu2 %vm1656_vm8, %v5629_v37 }
 0x6ed   : > { %6196 = vmatpush.bf16.msra.mxu2 %v12951_v10 }
 0x6f2   : > { %8888 = vmatmul.msk.bf16.vlgmr.msra.gmra.mxu3 %vm1656_vm8, %v5638_v20  ;;  %v6452_v20 = vpop.permute.xlu2 %6451 }
 0x6f4   : > { %8878 = vmatmul.msk.bf16.vlgmr.msra.gmra.mxu1 %vm1656_vm8, %v5628_v29 }
 0x6f5   : > { %6178 = vmatpush.bf16.msra.mxu1 %v12960_v2 }
 0x6f7   : > { %v5920_v54 = vpop.permute.xlu0 %5919 }
 0x6f8   : > { %v12971_v59 = vsel %vm1660_vm7, %v5920_v54, 0  ;;  %v5632_v54 = vld [vmem:[%s14161_s3 + $0xa] sm:$0x3] }
 0x6f9   : > { %5934 = vmatpush.bf16.msrb.mxu0 %v12971_v59 }
 0x6fc   : > { %8883 = vmatmul.msk.bf16.vlgmr.msrb.gmra.mxu2 %vm1656_vm8, %v5633_v26  ;;  %8873 = vmatmul.msk.bf16.vlgmr.msrb.gmra.mxu0 %vm1656_vm8, %v8857_v44  ;;  %v5627_v26 = vld [vmem:[%s14161_s3] sm:$0x3]  ;;  %v5642_v44 = vld [vmem:[%s14161_s3 + $0x1e] sm:$0x3] }
 0x6fd   : > { %6268 = vmatpush.bf16.msrb.mxu2 %v12976_v17  ;;  %6016 = vmatpush.bf16.msra.mxu0 %v14292_v34 }
 0x6ff   : > { %v6368_v15 = vpop.permute.xlu0 %6367 }
 0x700   : > { %v12991_v31 = vsel %vm1660_vm7, %v6368_v15, 0  ;;  %v6431_v15 = vpop.permute.xlu1 %6430 }
 0x701   : > { %6088 = vmatpush.bf16.msrb.mxu0 %v12987_v23  ;;  %6382 = vmatpush.bf16.msra.mxu3 %v12991_v31 }
 0x702   : > { %8892 = vmatmul.msk.bf16.vlgmr.msrb.gmra.mxu3 %vm1656_vm8, %v5642_v44 }
 0x704   : > { %8882 = vmatmul.msk.bf16.vlgmr.msrb.gmra.mxu1 %vm1656_vm8, %v5632_v54  ;;  %v5636_v54 = vld [vmem:[%s14161_s3 + $0x12] sm:$0x3] }
 0x707   : > { %v4761_v39 = vpop.permute.xlu0 %4760 }
 0x708   : > { %v12996_v47 = vadd.f32 %v4761_v39, %v4666_v61  ;;  %v13016_v61 = vsel %vm1660_vm7, %v12699_v46, 0  ;;  %v13020_v39 = vsel %vm1660_vm7, %v12753_v30, 0  ;;  %v13033_v46 = vsel %vm1660_vm7, %v6452_v20, 0  ;;  %v13039_v30 = vpop.f32.mrf.mxu2 }
 0x709   : > { %14319 = vst [vmem:[#allocation12_spill] sm:$0xff] %v13016_v61  ;;  %6250 = vmatpush.bf16.msrb.mxu1 %v13020_v39  ;;  %6466 = vmatpush.bf16.msrb.mxu3 %v13033_v46 }
 0x70a   : > { %v12999_v43 = vmul.f32 0.70710677, %v12996_v47  ;;  %14320 = vst [vmem:[#allocation6_spill] sm:$0xff] %v13020_v39 }
 0x70c   : > { %v5411_v21 = vmul.f32 %v12999_v43, %v12999_v43  ;;  %8877 = vmatmul.msk.bf16.vlgmr.msra.gmra.mxu0 %vm1656_vm8, %v5627_v26  ;;  %v5631_v26 = vld [vmem:[%s14161_s3 + $0x8] sm:$0x3] }
 0x70d   : > { %6160 = vmatpush.bf16.msra.mxu0 %v13016_v61 }
 0x70e   : > { %v5412_v48 = vmin.f32 %v5411_v21, 16.0  ;;  %v13022_v21 = vpop.f32.mrf.mxu3 }
 0x710   : > { %v5413_v7 = vmul.f32 2.1237322e-06, %v5412_v48  ;;  %v5424_v24 = vmul.f32 3.8918573e-05, %v5412_v48 }
 0x712   : > { %v5414_v60 = vadd.f32 0.00028619796, %v5413_v7  ;;  %v5425_v62 = vadd.f32 0.001143296, %v5424_v24  ;;  %v5637_v7 = vld [vmem:[%s14161_s3 + $0x14] sm:$0x3] }
 0x713   : > { %v13030_v24 = vsel %vm1660_vm7, %v6347_v11, 0  ;;  %8887 = vmatmul.msk.bf16.vlgmr.msra.gmra.mxu2 %vm1656_vm8, %v5637_v7  ;;  %v5641_v7 = vld [vmem:[%s14161_s3 + $0x1c] sm:$0x3] }
 0x714   : > { %v5415_v35 = vmul.f32 %v5414_v60, %v5412_v48  ;;  %v5426_v6 = vmul.f32 %v5425_v62, %v5412_v48  ;;  %6361 = vmatpush.bf16.msra.mxu2 %v13030_v24  ;;  %v13041_v60 = vpop.f32.mrf.mxu1  ;;  %8886 = vmatmul.msk.bf16.vlgmr.msra.gmra.mxu1 %vm1656_vm8, %v5636_v54 }
 0x716   : > { %v5416_v49 = vadd.f32 0.0036580483, %v5415_v35  ;;  %v5427_v38 = vadd.f32 0.014752088, %v5426_v6  ;;  %v13043_v35 = vpop.permute.xlu0 %6388 }
 0x718   : > { %v5428_v28 = vmul.f32 %v5427_v38, %v5412_v48  ;;  %v5417_v32 = vmul.f32 %v5416_v49, %v5412_v48  ;;  %v5740_v49 = vpop.f32.mrf.mxu3 }
 0x71a   : > { %v5429_v27 = vadd.f32 0.112945676, %v5428_v28  ;;  %v5418_v13 = vadd.f32 0.05243302, %v5417_v32  ;;  %v6410_v28 = vpop.permute.xlu1 %6409 }
 0x71c   : > { %v5430_v12 = vmul.f32 %v5429_v27, %v5412_v48  ;;  %v5419_v63 = vmul.f32 %v5418_v13, %v5412_v48  ;;  %v5718_v27 = vpop.f32.mrf.mxu2  ;;  %8881 = vmatmul.msk.bf16.vlgmr.msrb.gmra.mxu0 %vm1656_vm8, %v5631_v26 }
 0x71e   : > { %v5431_v37 = vadd.f32 0.4994258, %v5430_v12  ;;  %v5420_v62 = vadd.f32 0.18741608, %v5419_v63  ;;  %v5696_v12 = vpop.f32.mrf.mxu1  ;;  %v6536_v44 = vpop.permute.xlu0 %6535  ;;  %v8896_v63 = vld [vmem:[%s14161_s3 + $0x46] sm:$0x3] }
 0x71f   : > { %v13075_v12 = vsel %vm1660_vm7, %v6536_v44, 0  ;;  %8912 = vmatmul.msk.bf16.vlgmr.msra.gmra.mxu3 %vm1656_vm8, %v8896_v63 }
 0x720   : > { %v5432_v29 = vmul.f32 %v5431_v37, %v5412_v48  ;;  %v5421_v6 = vmul.f32 %v5420_v62, %v5412_v48  ;;  %v13058_v62 = vsel %vm1660_vm7, %v6326_v57, 0  ;;  %v13066_v49 = vpop.f32.mrf.mxu3  ;;  %v13072_v57 = vsel %vm1660_vm7, %v6431_v15, 0  ;;  %6550 = vmatpush.bf16.msra.mxu3 %v13075_v12 }
 0x721   : > { %6340 = vmatpush.bf16.msra.mxu1 %v13058_v62 }
 0x722   : > { %v5433_v33 = vadd.f32 1.0, %v5432_v29  ;;  %v5422_v13 = vadd.f32 1.1283791, %v5421_v6 }
 0x723   : > { %8891 = vmatmul.msk.bf16.vlgmr.msrb.gmra.mxu2 %vm1656_vm8, %v5641_v7 }
 0x724   : > { %9305 = vrcp.f32 %v5433_v33  ;;  %v5445_v37 = vand.u32 2147483648, %v5433_v33  ;;  %v5443_v20 = vand.u32 2147483647, %v5433_v33  ;;  %vm5439_vm11 = vweird.f32 %v5433_v33  ;;  %6445 = vmatpush.bf16.msrb.mxu2 %v13072_v57 }
 0x726   : > { %v5446_v6 = vor.u32 1.1754944e-38, %v5445_v37  ;;  %vm5444_vm13 = vcmp.eq.f32.partialorder %v5443_v20, 8.507059e+37  ;;  %v13087_v37 = vpop.permute.xlu1 %6472 }
 0x728   : > { %v5828_v26 = vpop.f32.mrf.mxu3 }
 0x72a   : > { %v9306_v11 = vpop.eup %9305 }
 0x72b   : > { %v5435_v38 = vmul.f32 %v9306_v11, %v5433_v33  ;;  %vm5440_vm10 = vweird.f32 %v9306_v11  ;;  %v13064_v33 = vsel %vm1660_vm7, %v12780_v18, 0 }
 0x72c   : > { %vm5441_vm12 = vmor %vm5439_vm11, %vm5440_vm10  ;;  %6232 = vmatpush.bf16.msrb.mxu0 %v13064_v33 }
 0x72d   : > { %v5436_v32 = vsub.f32 1.0, %v5435_v38  ;;  %v5423_v38 = vmul.f32 %v5422_v13, %v12999_v43  ;;  %v13081_v43 = vpop.f32.mrf.mxu2  ;;  %v13085_v13 = vpop.f32.mrf.mxu1 }
 0x72f   : > { %v5437_v29 = vmul.f32 %v9306_v11, %v5436_v32 }
 0x731   : > { %v5438_v48 = vadd.f32 %v9306_v11, %v5437_v29  ;;  %v4794_v29 = vmul.f32 0.5, %v12996_v47  ;;  %v8900_v47 = vld [vmem:[%s14161_s3 + $0x4e] sm:$0x3] }
 0x732   : > { %8916 = vmatmul.msk.bf16.vlgmr.msrb.gmra.mxu3 %vm1656_vm8, %v8900_v47  ;;  %v5639_v47 = vld [vmem:[%s14161_s3 + $0x18] sm:$0x3] }
 0x733   : > { %v5442_v32 = vsel %vm5441_vm12, %v9306_v11, %v5438_v48  ;;  %v13083_v11 = vpop.f32.mrf.mxu0 }
 0x734   : > { %v5447_v27 = vsel %vm5444_vm13, %v5446_v6, %v5442_v32  ;;  %v5640_v32 = vld [vmem:[%s14161_s3 + $0x1a] sm:$0x3] }
 0x735   : > { %v5448_v18 = vmul.f32 %v5447_v27, %v5423_v38  ;;  %v5806_v44 = vpop.f32.mrf.mxu2  ;;  %v5784_v7 = vpop.f32.mrf.mxu1  ;;  %v5635_v38 = vld [vmem:[%s14161_s3 + $0x10] sm:$0x3]  ;;  %8890 = vmatmul.msk.bf16.vlgmr.msrb.gmra.mxu1 %vm1656_vm8, %v5640_v32 }
 0x736   : > { %v6515_v27 = vpop.permute.xlu2 %6514  ;;  %8885 = vmatmul.msk.bf16.vlgmr.msra.gmra.mxu0 %vm1656_vm8, %v5635_v38  ;;  %v13107_v26 = vpop.f32.mrf.mxu3 }
 0x737   : > { %v8844_v15 = vclamps-f32 %v5448_v18, 1.0  ;;  %v6620_v18 = vpop.permute.xlu1 %6619  ;;  %6319 = vmatpush.bf16.msra.mxu0 %v14300_v40 }
 0x739   : > { %v5466_v20 = vadd.f32 1.0, %v8844_v15  ;;  %v8895_v15 = vld [vmem:[%s14161_s3 + $0x44] sm:$0x3] }
 0x73a   : > { %8911 = vmatmul.msk.bf16.vlgmr.msra.gmra.mxu2 %vm1656_vm8, %v8895_v15  ;;  %v8894_v15 = vld [vmem:[%s14161_s3 + $0x42] sm:$0x3] }
 0x73b   : > { %v5482_v54 = vmul.f32 %v5466_v20, %v4794_v29  ;;  %v5674_v63 = vpop.f32.mrf.mxu0  ;;  %v13103_v29 = vsel %vm1660_vm7, %v6410_v28, 0 }
 0x73c   : > { %6424 = vmatpush.bf16.msrb.mxu1 %v13103_v29 }
 0x73d   : > { %v5498_v48 = vpack.c.bf16 %v5482_v54, %v5482_v54  ;;  %v13112_v54 = vsel %vm1660_vm7, %v6515_v27, 0  ;;  %v13121_v28 = vpop.f32.mrf.mxu2 }
 0x73e   : > { %6529 = vmatpush.bf16.msra.mxu2 %v13112_v54  ;;  %v5916_v7 = vpop.f32.mrf.mxu3 }
 0x73f   : > { %v5530_v6 = vunpack.c.l.b16 %v5498_v48  ;;  %v13115_v48 = vsel %vm1660_vm7, %v6620_v18, 0  ;;  %v6494_v18 = vpop.permute.xlu2 %6493  ;;  %v8904_v7 = vld [vmem:[%s14161_s3 + $0x56] sm:$0x3] }
 0x740   : > { %6634 = vmatpush.bf16.msrb.mxu3 %v13115_v48 }
 0x741   : > { %v5546_v20 = vpack.c.b16 %v5530_v6, %v5530_v6  ;;  %v413_v6 = vld [vmem:[%s14162_s4] sm:$0xf] }
 0x742   : > { %8920 = vmatmul.msk.bf16.vlgmr.msra.gmra.mxu3 %vm1656_vm8, %v8904_v7  ;;  %v8898_v7 = vld [vmem:[%s14161_s3 + $0x4a] sm:$0x3] }
 0x743   : > { %v13123_v44 = vpop.f32.mrf.mxu0  ;;  %5577 = vrot.lane.b32.xlu1 %v5546_v20, %s9389_s29  ;;  %v6599_v20 = vpop.permute.xlu0 %6598 }
 0x744   : > { %v13157_v40 = vsel %vm1660_vm7, %v6599_v20, 0  ;;  %6731 = vmatpush.bf16.msra.mxu3 %v12987_v23  ;;  %v8893_v20 = vld [vmem:[%s14161_s3 + $0x40] sm:$0x3] }
 0x745   : > { %v5894_v38 = vpop.f32.mrf.mxu2  ;;  %8910 = vmatmul.msk.bf16.vlgmr.msra.gmra.mxu1 %vm1656_vm8, %v8894_v15  ;;  %14323 = vst [vmem:[#allocation13_spill] sm:$0xff] %v13157_v40 }
 0x746   : > { %v8899_v38 = vld [vmem:[%s14161_s3 + $0x4c] sm:$0x3]  ;;  %8889 = vmatmul.msk.bf16.vlgmr.msrb.gmra.mxu0 %vm1656_vm8, %v5639_v47 }
 0x74a   : > { %v13126_v63 = vpop.f32.mrf.mxu1  ;;  %8915 = vmatmul.msk.bf16.vlgmr.msrb.gmra.mxu2 %vm1656_vm8, %v8899_v38  ;;  %v8908_v38 = vld [vmem:[%s14161_s3 + $0x5e] sm:$0x3] }
 0x74b   : > { %v5762_v32 = vpop.f32.mrf.mxu0  ;;  %8405 = vperm.xlu1 %9171, %v413_v6   ;;  %v13144_v6 = vsel %vm1660_vm7, %v6494_v18, 0  ;;  %6613 = vmatpush.bf16.msrb.mxu2 %v13157_v40  ;;  %v6578_v34 = vpop.permute.xlu0 %6577 }
 0x74c   : > { %14321 = vst [vmem:[#allocation8_spill] sm:$0xff] %v13144_v6  ;;  %v13148_v32 = vsel %vm1660_vm7, %v13043_v35, 0  ;;  %6508 = vmatpush.bf16.msra.mxu1 %v13144_v6  ;;  %v13186_v23 = vsel %vm1660_vm7, %v6578_v34, 0 }
 0x74d   : > { %14322 = vst [vmem:[#allocation19_spill] sm:$0xff] %v13148_v32  ;;  %6403 = vmatpush.bf16.msrb.mxu0 %v13148_v32 }
 0x74e   : > { %14325 = vst [vmem:[#allocation11_spill] sm:$0xff] %v13186_v23 }
 0x752   : > { %v5872_v27 = vpop.f32.mrf.mxu1  ;;  %8924 = vmatmul.msk.bf16.vlgmr.msrb.gmra.mxu3 %vm1656_vm8, %v8908_v38 }
 0x753   : > { %v13152_v27 = vpop.f32.mrf.mxu3  ;;  %v13163_v35 = vpop.f32.mrf.mxu0  ;;  %6795 = vmatpush.bf16.msrb.mxu3 %v13016_v61 }
 0x755   : > { %8914 = vmatmul.msk.bf16.vlgmr.msrb.gmra.mxu1 %vm1656_vm8, %v8898_v7 }
 0x756   : > { %8909 = vmatmul.msk.bf16.vlgmr.msra.gmra.mxu0 %vm1656_vm8, %v8893_v20  ;;  %6592 = vmatpush.bf16.msrb.mxu1 %v13186_v23  ;;  %v6557_v23 = vpop.permute.xlu2 %6556 }
 0x757   : > { %v13217_v38 = vsel %vm1660_vm7, %v6557_v23, 0 }
 0x75b   : > { %v6004_v18 = vpop.f32.mrf.mxu3  ;;  %v5850_v16 = vpop.f32.mrf.mxu0 }
 0x75c   : > { %v8903_v18 = vld [vmem:[%s14161_s3 + $0x54] sm:$0x3]  ;;  %v13183_v16 = vsel %vm1660_vm7, %v13087_v37, 0 }
 0x75d   : > { %14324 = vst [vmem:[#allocation9_spill] sm:$0xff] %v13183_v16  ;;  %6487 = vmatpush.bf16.msra.mxu0 %v13183_v16  ;;  %8919 = vmatmul.msk.bf16.vlgmr.msra.gmra.mxu2 %vm1656_vm8, %v8903_v18 }
 0x75e   : > { %6715 = vmatpush.bf16.msra.mxu2 %v12867_v52 }
 0x75f   : > { %v13165_v47 = vpop.f32.mrf.mxu2 }
 0x761   : > { %v13167_v15 = vpop.f32.mrf.mxu1 }
 0x763   : > { %v6072_v40 = vpop.f32.mrf.mxu3 }
 0x764   : > { %v13193_v6 = vadd.f32 %v6072_v40, %v13022_v21  ;;  %v8897_v40 = vld [vmem:[%s14161_s3 + $0x48] sm:$0x3]  ;;  %v8902_v21 = vld [vmem:[%s14161_s3 + $0x52] sm:$0x3] }
 0x765   : > { %8918 = vmatmul.msk.bf16.vlgmr.msra.gmra.mxu1 %vm1656_vm8, %v8902_v21 }
 0x766   : > { %8913 = vmatmul.msk.bf16.vlgmr.msrb.gmra.mxu0 %vm1656_vm8, %v8897_v40  ;;  %6699 = vmatpush.bf16.msra.mxu1 %v12900_v41 }
 0x767   : > { %v5982_v32 = vpop.f32.mrf.mxu2  ;;  %6571 = vmatpush.bf16.msrb.mxu0 %v13217_v38 }
 0x768   : > { %v8928_v32 = vld [vmem:[%s14161_s3 + $0x66] sm:$0x3] }
 0x769   : > { %v5960_v34 = vpop.f32.mrf.mxu1  ;;  %8944 = vmatmul.msk.bf16.vlgmr.msra.gmra.mxu3 %vm1656_vm8, %v8928_v32  ;;  %v8906_v32 = vld [vmem:[%s14161_s3 + $0x5a] sm:$0x3] }
 0x76a   : > { %6859 = vmatpush.bf16.msra.mxu3 %v13064_v33 }
 0x76b   : > { %v6074_v37 = vpop.f32.mrf.mxu3 }
 0x76f   : > { %v6054_v20 = vpop.f32.mrf.mxu2 }
 0x770   : > { %v13200_v7 = vadd.f32 %v6054_v20, %v13039_v30  ;;  %v8907_v30 = vld [vmem:[%s14161_s3 + $0x5c] sm:$0x3] }
 0x771   : > { %v13202_v16 = vpop.f32.mrf.mxu1  ;;  %8923 = vmatmul.msk.bf16.vlgmr.msrb.gmra.mxu2 %vm1656_vm8, %v8907_v30  ;;  %v8932_v30 = vld [vmem:[%s14161_s3 + $0x6e] sm:$0x3] }
 0x772   : > { %6779 = vmatpush.bf16.msrb.mxu2 %v12887_v51 }
 0x773   : > { %v6144_v18 = vpop.f32.mrf.mxu3 }
 0x774   : > { %v13224_v34 = vadd.f32 %v6144_v18, %v13066_v49  ;;  %v8901_v49 = vld [vmem:[%s14161_s3 + $0x50] sm:$0x3]  ;;  %v8927_v18 = vld [vmem:[%s14161_s3 + $0x64] sm:$0x3] }
 0x775   : > { %8922 = vmatmul.msk.bf16.vlgmr.msrb.gmra.mxu1 %vm1656_vm8, %v8906_v32  ;;  %v8931_v32 = vld [vmem:[%s14161_s3 + $0x6c] sm:$0x3] }
 0x776   : > { %8917 = vmatmul.msk.bf16.vlgmr.msra.gmra.mxu0 %vm1656_vm8, %v8901_v49  ;;  %6763 = vmatpush.bf16.msrb.mxu1 %v12915_v4  ;;  %v8905_v49 = vld [vmem:[%s14161_s3 + $0x58] sm:$0x3] }
 0x777   : > { %v6056_v37 = vpop.f32.mrf.mxu2  ;;  %6683 = vmatpush.bf16.msra.mxu0 %v12924_v45  ;;  %v8926_v45 = vld [vmem:[%s14161_s3 + $0x62] sm:$0x3] }
 0x779   : > { %v6038_v23 = vpop.f32.mrf.mxu1  ;;  %v13230_v20 = vpop.f32.mrf.mxu0  ;;  %8948 = vmatmul.msk.bf16.vlgmr.msrb.gmra.mxu3 %vm1656_vm8, %v8932_v30 }
 0x77b   : > { %v6146_v40 = vpop.f32.mrf.mxu3 }
 0x77f   : > { %v6126_v21 = vpop.f32.mrf.mxu2 }
 0x780   : > { %v13233_v61 = vadd.f32 %v6126_v21, %v13081_v43 }
 0x781   : > { %v5938_v37 = vpop.f32.mrf.mxu0  ;;  %8943 = vmatmul.msk.bf16.vlgmr.msra.gmra.mxu2 %vm1656_vm8, %v8927_v18  ;;  %v13278_v18 = vpop.f32.mrf.mxu1 }
 0x782   : > { %6843 = vmatpush.bf16.msra.mxu2 %v12908_v53  ;;  %v8925_v37 = vld [vmem:[%s14161_s3 + $0x60] sm:$0x3] }
 0x783   : > { %v6216_v43 = vpop.f32.mrf.mxu3 }
 0x784   : > { %v13252_v23 = vadd.f32 %v6216_v43, %v13107_v26  ;;  %v8936_v26 = vld [vmem:[%s14161_s3 + $0x76] sm:$0x3]  ;;  %v8930_v43 = vld [vmem:[%s14161_s3 + $0x6a] sm:$0x3] }
 0x785   : > { %8942 = vmatmul.msk.bf16.vlgmr.msra.gmra.mxu1 %vm1656_vm8, %v8926_v45 }
 0x786   : > { %8921 = vmatmul.msk.bf16.vlgmr.msrb.gmra.mxu0 %vm1656_vm8, %v8905_v49  ;;  %6827 = vmatpush.bf16.msra.mxu1 %v12951_v10 }
 0x787   : > { %v6128_v40 = vpop.f32.mrf.mxu2  ;;  %6747 = vmatpush.bf16.msrb.mxu0 %v12933_v5 }
 0x788   : > { %v8935_v40 = vld [vmem:[%s14161_s3 + $0x74] sm:$0x3] }
 0x789   : > { %8952 = vmatmul.msk.bf16.vlgmr.msra.gmra.mxu3 %vm1656_vm8, %v8936_v26  ;;  %v13276_v30 = vpop.f32.mrf.mxu0  ;;  %v6110_v45 = vpop.f32.mrf.mxu1 }
 0x78b   : > { %v6218_v21 = vpop.f32.mrf.mxu3 }
 0x791   : > { %8947 = vmatmul.msk.bf16.vlgmr.msrb.gmra.mxu2 %vm1656_vm8, %v8931_v32  ;;  %v6020_v49 = vpop.f32.mrf.mxu0 }
 0x792   : > { %6907 = vmatpush.bf16.msrb.mxu2 %v12945_v9  ;;  %v8939_v49 = vld [vmem:[%s14161_s3 + $0x7c] sm:$0x3] }
 0x793   : > { %v13295_v21 = vpop.f32.mrf.mxu3 }
 0x795   : > { %8946 = vmatmul.msk.bf16.vlgmr.msrb.gmra.mxu1 %vm1656_vm8, %v8930_v43  ;;  %v8934_v43 = vld [vmem:[%s14161_s3 + $0x72] sm:$0x3] }
 0x796   : > { %8941 = vmatmul.msk.bf16.vlgmr.msra.gmra.mxu0 %vm1656_vm8, %v8925_v37  ;;  %6891 = vmatpush.bf16.msrb.mxu1 %v12976_v17  ;;  %v13297_v26 = vpop.f32.mrf.mxu2  ;;  %v8929_v37 = vld [vmem:[%s14161_s3 + $0x68] sm:$0x3] }
 0x797   : > { %6811 = vmatpush.bf16.msra.mxu0 %v12960_v2 }
 0x799   : > { %v13299_v9 = vpop.f32.mrf.mxu0 }
 0x79b   : > { %v6290_v32 = vpop.f32.mrf.mxu3 }
 0x7a1   : > { %8951 = vmatmul.msk.bf16.vlgmr.msra.gmra.mxu2 %vm1656_vm8, %v8935_v40  ;;  %v13307_v40 = vpop.f32.mrf.mxu1  ;;  %v6092_v32 = vpop.f32.mrf.mxu0 }
 0x7a2   : > { %7006 = vmatpush.bf16.msra.mxu2 %v12720_v22  ;;  %v6200_v22 = vpop.f32.mrf.mxu2  ;;  %v8938_v32 = vld [vmem:[%s14161_s3 + $0x7a] sm:$0x3] }
 0x7a3   : > { %v6384_v45 = vpop.f32.mrf.mxu3 }
 0x7a4   : > { %v13319_v22 = vadd.f32 %v6384_v45, %v13193_v6 }
 0x7a5   : > { %8950 = vmatmul.msk.bf16.vlgmr.msra.gmra.mxu1 %vm1656_vm8, %v8934_v43 }
 0x7a6   : > { %8945 = vmatmul.msk.bf16.vlgmr.msrb.gmra.mxu0 %vm1656_vm8, %v8929_v37  ;;  %6990 = vmatpush.bf16.msra.mxu1 %v12716_v8 }
 0x7a7   : > { %6875 = vmatpush.bf16.msrb.mxu0 %v13020_v39 }
 0x7a9   : > { %v6182_v17 = vpop.f32.mrf.mxu1 }
 0x7aa   : > { %v13321_v10 = vpop.f32.mrf.mxu2  ;;  %v8940_v17 = vld [vmem:[%s14161_s3 + $0x7e] sm:$0x3] }
 0x7ab   : > { %v6386_v6 = vpop.f32.mrf.mxu3 }
 0x7b1   : > { %8955 = vmatmul.msk.bf16.vlgmr.msrb.gmra.mxu2 %vm1656_vm8, %v8939_v49 }
 0x7b2   : > { %7070 = vmatpush.bf16.msrb.mxu2 %v12800_v14  ;;  %v8959_v14 = vld [vmem:[%s14161_s3 + $0x84] sm:$0x3] }
 0x7b3   : > { %v13335_v45 = vpop.f32.mrf.mxu0 }
 0x7b5   : > { %v5578_v2 = vpop.permute.xlu1 %5577  ;;  %8954 = vmatmul.msk.bf16.vlgmr.msrb.gmra.mxu1 %vm1656_vm8, %v8938_v32  ;;  %v6468_v6 = vpop.f32.mrf.mxu3 }
 0x7b6   : > { %v5610_v37 = vsel %vm1569_vm3, 0, %v5578_v2  ;;  %v8933_v2 = vld [vmem:[%s14161_s3 + $0x70] sm:$0x3]  ;;  %7054 = vmatpush.bf16.msrb.mxu1 %v12745_v56 }
 0x7b7   : > { %v5626_v43 = vsel %vm1603_vm5, %v5610_v37, 0  ;;  %v13343_v37 = vpop.f32.mrf.mxu1  ;;  %8949 = vmatmul.msk.bf16.vlgmr.msra.gmra.mxu0 %vm1656_vm8, %v8933_v2  ;;  %v6037_v2 = vadd.f32 %v13202_v16, %v13041_v60  ;;  %v8963_v60 = vld [vmem:[%s14161_s3 + $0x8c] sm:$0x3] }
 0x7b8   : > { %7499 = vrot.lane.b32.xlu0 %v5626_v43, %s9391_s17  ;;  %7205 = vrot.lane.b32.xlu2 %v5626_v43, %s9390_s14  ;;  %v13328_v49 = vsel %vm1660_vm7, %v5626_v43, 0  ;;  %v6272_v43 = vpop.f32.mrf.mxu2  ;;  %s8538_s17 = sshll.u32 %s323_s26, 6 }
 0x7b9   : > { %6925 = vmatpush.bf16.msrb.mxu3 %v13328_v49  ;;  %6974 = vmatpush.bf16.msra.mxu0 %v12742_v19  ;;  %v13357_v43 = vadd.f32 %v6468_v6, %v13224_v34  ;;  %v8960_v19 = vld [vmem:[%s14161_s3 + $0x86] sm:$0x3]  ;;  %v8937_v34 = vld [vmem:[%s14161_s3 + $0x78] sm:$0x3]  ;;  %s14031_s14 = scalar_lea.vmem [#allocation2], %s8538_s17 }
 0x7ba   : > { %s8469_s22 = sshll.u32 %s14031_s14, 4  ;;  %s8470_s22 = int_to_ptr.vmem [resolvable:$true] %s8469_s22 }
 0x7bc   : > { %8956 = vmatmul.msk.bf16.vlgmr.msrb.gmra.mxu3 %vm1656_vm8, %v8940_v17  ;;  %v6164_v17 = vpop.f32.mrf.mxu0 }
 0x7bd   : > { %7022 = vmatpush.bf16.msra.mxu3 %v12790_v1 }
 0x7bf   : > { %v6254_v8 = vpop.f32.mrf.mxu1 }
 0x7c0   : > { %v6363_v39 = vpop.f32.mrf.mxu2  ;;  %v8958_v8 = vld [vmem:[%s14161_s3 + $0x82] sm:$0x3] }
 0x7c1   : > { %7086 = vmatpush.bf16.msrb.mxu3 %v12787_v42  ;;  %8975 = vmatmul.msk.bf16.vlgmr.msra.gmra.mxu2 %vm1656_vm8, %v8959_v14  ;;  %v13360_v42 = vadd.f32 %v6363_v39, %v13200_v7  ;;  %v6470_v14 = vpop.f32.mrf.mxu3 }
 0x7c2   : > { %7134 = vmatpush.bf16.msra.mxu2 %v12842_v55 }
 0x7c4   : > { %v13367_v32 = vpop.f32.mrf.mxu0 }
 0x7c5   : > { %8974 = vmatmul.msk.bf16.vlgmr.msra.gmra.mxu1 %vm1656_vm8, %v8958_v8  ;;  %v6019_v8 = vadd.f32 %v13276_v30, %v13083_v11  ;;  %v6289_v30 = vadd.f32 %v13295_v21, %v13152_v27  ;;  %v6181_v27 = vadd.f32 %v13307_v40, %v13126_v63  ;;  %v6271_v63 = vadd.f32 %v13321_v10, %v13165_v47  ;;  %v8965_v10 = vld [vmem:[%s14161_s3 + $0x90] sm:$0x3]  ;;  %v8970_v47 = vld [vmem:[%s14161_s3 + $0x9a] sm:$0x3] }
 0x7c6   : > { %7118 = vmatpush.bf16.msra.mxu1 %v12820_v3 }
 0x7c7   : > { %v6342_v39 = vpop.f32.mrf.mxu1  ;;  %8953 = vmatmul.msk.bf16.vlgmr.msrb.gmra.mxu0 %vm1656_vm8, %v8937_v34  ;;  %v8964_v34 = vld [vmem:[%s14161_s3 + $0x8e] sm:$0x3] }
 0x7c8   : > { %v6365_v7 = vpop.f32.mrf.mxu2  ;;  %v13376_v6 = vadd.f32 %v6342_v39, %v6037_v2  ;;  %7038 = vmatpush.bf16.msrb.mxu0 %v12764_v36 }
 0x7c9   : > { %v6552_v16 = vpop.f32.mrf.mxu3  ;;  %v6109_v7 = vadd.f32 %v13278_v18, %v13085_v13  ;;  %v8967_v13 = vld [vmem:[%s14161_s3 + $0x94] sm:$0x3]  ;;  %v6199_v18 = vadd.f32 %v13297_v26, %v13121_v28  ;;  %v8961_v26 = vld [vmem:[%s14161_s3 + $0x88] sm:$0x3] }
 0x7cc   : > { %8976 = vmatmul.msk.bf16.vlgmr.msra.gmra.mxu3 %vm1656_vm8, %v8960_v19  ;;  %v6236_v17 = vpop.f32.mrf.mxu0  ;;  %v13389_v19 = vadd.f32 %v6552_v16, %v13252_v23  ;;  %v8957_v23 = vld [vmem:[%s14161_s3 + $0x80] sm:$0x3] }
 0x7cd   : > { %7150 = vmatpush.bf16.msra.mxu3 %v12971_v59 }
 0x7cf   : > { %v6344_v2 = vpop.f32.mrf.mxu1 }
 0x7d0   : > { %v6447_v14 = vpop.f32.mrf.mxu2 }
 0x7d1   : > { %8979 = vmatmul.msk.bf16.vlgmr.msrb.gmra.mxu2 %vm1656_vm8, %v8963_v60  ;;  %v13392_v39 = vadd.f32 %v6447_v14, %v13233_v61  ;;  %v6554_v60 = vpop.f32.mrf.mxu3  ;;  %v8962_v61 = vld [vmem:[%s14161_s3 + $0x8a] sm:$0x3] }
 0x7d2   : > { %7198 = vmatpush.bf16.msrb.mxu2 %v12862_v0 }
 0x7d4   : > { %v6321_v17 = vpop.f32.mrf.mxu0 }
 0x7d5   : > { %v13407_v16 = vadd.f32 %v6321_v17, %v6019_v8  ;;  %8978 = vmatmul.msk.bf16.vlgmr.msrb.gmra.mxu1 %vm1656_vm8, %v8962_v61  ;;  %v8968_v61 = vld [vmem:[%s14161_s3 + $0x96] sm:$0x3] }
 0x7d6   : > { %7182 = vmatpush.bf16.msrb.mxu1 %v12895_v58 }
 0x7d7   : > { %v6426_v2 = vpop.f32.mrf.mxu1  ;;  %8973 = vmatmul.msk.bf16.vlgmr.msra.gmra.mxu0 %vm1656_vm8, %v8957_v23 }
 0x7d8   : > { %v6449_v14 = vpop.f32.mrf.mxu2  ;;  %v13410_v11 = vadd.f32 %v6426_v2, %v6109_v7  ;;  %7102 = vmatpush.bf16.msra.mxu0 %v12878_v25  ;;  %v6091_v2 = vadd.f32 %v13299_v9, %v13123_v44  ;;  %v8971_v44 = vld [vmem:[%s14161_s3 + $0x9c] sm:$0x3] }
 0x7d9   : > { %v8966_v14 = vld [vmem:[%s14161_s3 + $0x92] sm:$0x3] }
 0x7dc   : > { %8980 = vmatmul.msk.bf16.vlgmr.msrb.gmra.mxu3 %vm1656_vm8, %v8964_v34  ;;  %v6636_v34 = vpop.f32.mrf.mxu3  ;;  %v6323_v8 = vpop.f32.mrf.mxu0 }
 0x7dd   : > { %v13425_v7 = vadd.f32 %v6636_v34, %v6289_v30 }
 0x7df   : > { %v6428_v60 = vpop.f32.mrf.mxu1 }
 0x7e0   : > { %v6531_v17 = vpop.f32.mrf.mxu2 }
 0x7e1   : > { %8983 = vmatmul.msk.bf16.vlgmr.msra.gmra.mxu2 %vm1656_vm8, %v8967_v13  ;;  %v13427_v23 = vadd.f32 %v6531_v17, %v6199_v18 }
 0x7e2   : > { %7301 = vmatpush.bf16.msra.mxu2 %v12991_v31 }
 0x7e4   : > { %v6638_v21 = vpop.f32.mrf.mxu3  ;;  %v6405_v28 = vpop.f32.mrf.mxu0 }
 0x7e5   : > { %v13442_v13 = vadd.f32 %v6405_v28, %v6091_v2  ;;  %8982 = vmatmul.msk.bf16.vlgmr.msra.gmra.mxu1 %vm1656_vm8, %v8966_v14  ;;  %v6163_v2 = vadd.f32 %v13335_v45, %v13163_v35  ;;  %v8991_v35 = vld [vmem:[%s14161_s3 + $0xa4] sm:$0x3] }
 0x7e6   : > { %7285 = vmatpush.bf16.msra.mxu1 %v13030_v24 }
 0x7e7   : > { %v6510_v30 = vpop.f32.mrf.mxu1  ;;  %8977 = vmatmul.msk.bf16.vlgmr.msrb.gmra.mxu0 %vm1656_vm8, %v8961_v26 }
 0x7e8   : > { %v6533_v18 = vpop.f32.mrf.mxu2  ;;  %v13445_v9 = vadd.f32 %v6510_v30, %v6181_v27  ;;  %7166 = vmatpush.bf16.msrb.mxu0 %v12919_v50  ;;  %v6253_v27 = vadd.f32 %v13343_v37, %v13167_v15 }
 0x7ec   : > { %8984 = vmatmul.msk.bf16.vlgmr.msra.gmra.mxu3 %vm1656_vm8, %v8968_v61  ;;  %v6733_v40 = vpop.f32.mrf.mxu3  ;;  %v6407_v34 = vpop.f32.mrf.mxu0 }
 0x7ed   : > { %v13459_v8 = vadd.f32 %v6733_v40, %v13319_v22  ;;  %v6235_v40 = vadd.f32 %v13367_v32, %v13230_v20  ;;  %v8995_v20 = vld [vmem:[%s14161_s3 + $0xac] sm:$0x3] }
 0x7ef   : > { %v6512_v60 = vpop.f32.mrf.mxu1 }
 0x7f0   : > { %v8969_v60 = vld [vmem:[%s14161_s3 + $0x98] sm:$0x3] }
 0x7f1   : > { %8987 = vmatmul.msk.bf16.vlgmr.msrb.gmra.mxu2 %vm1656_vm8, %v8971_v44 }
 0x7f2   : > { %7365 = vmatpush.bf16.msrb.mxu2 %v13033_v46 }
 0x7f4   : > { %v6615_v17 = vpop.f32.mrf.mxu2  ;;  %v6735_v21 = vpop.f32.mrf.mxu3 }
 0x7f5   : > { %v13461_v61 = vadd.f32 %v6615_v17, %v6271_v63  ;;  %v6489_v28 = vpop.f32.mrf.mxu0  ;;  %8986 = vmatmul.msk.bf16.vlgmr.msrb.gmra.mxu1 %vm1656_vm8, %v8970_v47  ;;  %v8990_v17 = vld [vmem:[%s14161_s3 + $0xa2] sm:$0x3] }
 0x7f6   : > { %v13473_v22 = vadd.f32 %v6489_v28, %v6163_v2  ;;  %7349 = vmatpush.bf16.msrb.mxu1 %v13072_v57 }
 0x7f7   : > { %v6594_v26 = vpop.f32.mrf.mxu1  ;;  %8981 = vmatmul.msk.bf16.vlgmr.msra.gmra.mxu0 %vm1656_vm8, %v8965_v10 }
 0x7f8   : > { %v13475_v30 = vadd.f32 %v6594_v26, %v6253_v27  ;;  %7269 = vmatpush.bf16.msra.mxu0 %v13058_v62 }
 0x7fc   : > { %v6617_v14 = vpop.f32.mrf.mxu2  ;;  %v6797_v15 = vpop.f32.mrf.mxu3 }
 0x7fd   : > { %v6491_v45 = vpop.f32.mrf.mxu0  ;;  %v13487_v37 = vadd.f32 %v6797_v15, %v13357_v43  ;;  %v8972_v14 = vld [vmem:[%s14161_s3 + $0x9e] sm:$0x3]  ;;  %v14326_v15 = vld [vmem:[#allocation19_spill] sm:$0xff] }
 0x7fe   : > { %v14327_v45 = vld [vmem:[#allocation9_spill] sm:$0xff] }
 0x7ff   : > { %v6596_v18 = vpop.f32.mrf.mxu1 }
 0x801   : > { %9007 = vmatmul.msk.bf16.vlgmr.msra.gmra.mxu2 %vm1656_vm8, %v8991_v35 }
 0x802   : > { %7429 = vmatpush.bf16.msra.mxu2 %v13075_v12 }
 0x804   : > { %v6717_v44 = vpop.f32.mrf.mxu2  ;;  %v6799_v62 = vpop.f32.mrf.mxu3 }
 0x805   : > { %v13490_v63 = vadd.f32 %v6717_v44, %v13360_v42  ;;  %v6573_v34 = vpop.f32.mrf.mxu0  ;;  %9006 = vmatmul.msk.bf16.vlgmr.msra.gmra.mxu1 %vm1656_vm8, %v8990_v17  ;;  %v8994_v44 = vld [vmem:[%s14161_s3 + $0xaa] sm:$0x3]  ;;  %v8999_v17 = vld [vmem:[%s14161_s3 + $0xb4] sm:$0x3] }
 0x806   : > { %v13500_v43 = vadd.f32 %v6573_v34, %v6235_v40  ;;  %7413 = vmatpush.bf16.msra.mxu1 %v13112_v54 }
 0x807   : > { %v6701_v2 = vpop.f32.mrf.mxu1  ;;  %8985 = vmatmul.msk.bf16.vlgmr.msrb.gmra.mxu0 %vm1656_vm8, %v8969_v60 }
 0x808   : > { %v13503_v42 = vadd.f32 %v6701_v2, %v13376_v6  ;;  %7333 = vmatpush.bf16.msrb.mxu0 %v13103_v29  ;;  %v14328_v2 = vld [vmem:[#allocation8_spill] sm:$0xff] }
 0x80c   : > { %v6719_v27 = vpop.f32.mrf.mxu2  ;;  %v6861_v21 = vpop.f32.mrf.mxu3 }
 0x80d   : > { %v6575_v6 = vpop.f32.mrf.mxu0  ;;  %v13518_v10 = vadd.f32 %v6861_v21, %v13389_v19  ;;  %v8989_v19 = vld [vmem:[%s14161_s3 + $0xa0] sm:$0x3]  ;;  %v8992_v21 = vld [vmem:[%s14161_s3 + $0xa6] sm:$0x3] }
 0x80e   : > { %v14329_v27 = vld [vmem:[#allocation13_spill] sm:$0xff] }
 0x80f   : > { %v6703_v47 = vpop.f32.mrf.mxu1 }
 0x811   : > { %9011 = vmatmul.msk.bf16.vlgmr.msrb.gmra.mxu2 %vm1656_vm8, %v8995_v20 }
 0x812   : > { %7493 = vmatpush.bf16.msrb.mxu2 %v13115_v48  ;;  %v7206_v32 = vpop.permute.xlu2 %7205 }
 0x813   : > { %v13515_v28 = vsel %vm1660_vm7, %v7206_v32, 0 }
 0x814   : > { %v6781_v26 = vpop.f32.mrf.mxu2  ;;  %7220 = vmatpush.bf16.msrb.mxu3 %v13515_v28  ;;  %v6863_v40 = vpop.f32.mrf.mxu3 }
 0x815   : > { %v13525_v35 = vadd.f32 %v6781_v26, %v13392_v39  ;;  %v6685_v18 = vpop.f32.mrf.mxu0  ;;  %9010 = vmatmul.msk.bf16.vlgmr.msrb.gmra.mxu1 %vm1656_vm8, %v8994_v44  ;;  %v8993_v26 = vld [vmem:[%s14161_s3 + $0xa8] sm:$0x3]  ;;  %v9003_v40 = vld [vmem:[%s14161_s3 + $0xbc] sm:$0x3] }
 0x816   : > { %v13537_v62 = vadd.f32 %v6685_v18, %v13407_v16  ;;  %7477 = vmatpush.bf16.msrb.mxu1 %v14329_v27  ;;  %v14330_v16 = vld [vmem:[#allocation10_spill] sm:$0xff] }
 0x817   : > { %8988 = vmatmul.msk.bf16.vlgmr.msrb.gmra.mxu3 %vm1656_vm8, %v8972_v14  ;;  %v6765_v39 = vpop.f32.mrf.mxu1  ;;  %9005 = vmatmul.msk.bf16.vlgmr.msra.gmra.mxu0 %vm1656_vm8, %v8989_v19  ;;  %v8998_v14 = vld [vmem:[%s14161_s3 + $0xb2] sm:$0x3] }
 0x818   : > { %7317 = vmatpush.bf16.msra.mxu3 %v14326_v15  ;;  %v13540_v60 = vadd.f32 %v6765_v39, %v13410_v11  ;;  %7397 = vmatpush.bf16.msra.mxu0 %v14328_v2  ;;  %v14331_v39 = vld [vmem:[#allocation11_spill] sm:$0xff] }
 0x81c   : > { %7381 = vmatpush.bf16.msrb.mxu3 %v14327_v45  ;;  %v6783_v34 = vpop.f32.mrf.mxu2 }
 0x81d   : > { %v6687_v20 = vpop.f32.mrf.mxu0 }
 0x81e   : > { %v8996_v20 = vld [vmem:[%s14161_s3 + $0xae] sm:$0x3] }
 0x81f   : > { %v6767_v32 = vpop.f32.mrf.mxu1 }
 0x821   : > { %9015 = vmatmul.msk.bf16.vlgmr.msra.gmra.mxu2 %vm1656_vm8, %v8999_v17 }
 0x822   : > { %7595 = vmatpush.bf16.msra.mxu2 %v14330_v16 }
 0x824   : > { %v6845_v11 = vpop.f32.mrf.mxu2 }
 0x825   : > { %v13555_v6 = vadd.f32 %v6845_v11, %v13427_v23  ;;  %v6749_v47 = vpop.f32.mrf.mxu0  ;;  %9014 = vmatmul.msk.bf16.vlgmr.msra.gmra.mxu1 %vm1656_vm8, %v8998_v14 }
 0x826   : > { %v13566_v18 = vadd.f32 %v6749_v47, %v13442_v13  ;;  %7579 = vmatpush.bf16.msra.mxu1 %v12867_v52  ;;  %v14332_v13 = vld [vmem:[#allocation12_spill] sm:$0xff] }
 0x827   : > { %9008 = vmatmul.msk.bf16.vlgmr.msra.gmra.mxu3 %vm1656_vm8, %v8992_v21  ;;  %v6829_v19 = vpop.f32.mrf.mxu1  ;;  %9009 = vmatmul.msk.bf16.vlgmr.msrb.gmra.mxu0 %vm1656_vm8, %v8993_v26  ;;  %v8997_v21 = vld [vmem:[%s14161_s3 + $0xb0] sm:$0x3]  ;;  %v9002_v47 = vld [vmem:[%s14161_s3 + $0xba] sm:$0x3] }
 0x828   : > { %7445 = vmatpush.bf16.msra.mxu3 %v13217_v38  ;;  %v13569_v23 = vadd.f32 %v6829_v19, %v13445_v9  ;;  %7461 = vmatpush.bf16.msrb.mxu0 %v14331_v39 }
 0x82a   : > { %v7500_v17 = vpop.permute.xlu0 %7499 }
 0x82b   : > { %v13587_v11 = vsel %vm1660_vm7, %v7500_v17, 0  ;;  %v9000_v17 = vld [vmem:[%s14161_s3 + $0xb6] sm:$0x3] }
 0x82c   : > { %v6847_v44 = vpop.f32.mrf.mxu2 }
 0x82d   : > { %v6751_v34 = vpop.f32.mrf.mxu0  ;;  %v9023_v44 = vld [vmem:[%s14161_s3 + $0xc4] sm:$0x3] }
 0x82f   : > { %v6831_v9 = vpop.f32.mrf.mxu1 }
 0x831   : > { %9019 = vmatmul.msk.bf16.vlgmr.msrb.gmra.mxu2 %vm1656_vm8, %v9003_v40 }
 0x832   : > { %7659 = vmatpush.bf16.msrb.mxu2 %v14332_v13 }
 0x834   : > { %v6909_v16 = vpop.f32.mrf.mxu2 }
 0x835   : > { %v13584_v32 = vadd.f32 %v6909_v16, %v13461_v61  ;;  %v6813_v52 = vpop.f32.mrf.mxu0  ;;  %9018 = vmatmul.msk.bf16.vlgmr.msrb.gmra.mxu1 %vm1656_vm8, %v9002_v47 }
 0x836   : > { %v13598_v26 = vadd.f32 %v6813_v52, %v13473_v22  ;;  %7643 = vmatpush.bf16.msrb.mxu1 %v12887_v51 }
 0x837   : > { %9012 = vmatmul.msk.bf16.vlgmr.msrb.gmra.mxu3 %vm1656_vm8, %v8996_v20  ;;  %v6893_v61 = vpop.f32.mrf.mxu1  ;;  %9013 = vmatmul.msk.bf16.vlgmr.msra.gmra.mxu0 %vm1656_vm8, %v8997_v21 }
 0x838   : > { %7514 = vmatpush.bf16.msrb.mxu3 %v13587_v11  ;;  %v13601_v19 = vadd.f32 %v6893_v61, %v13475_v30  ;;  %7563 = vmatpush.bf16.msra.mxu0 %v12900_v41 }
 0x83c   : > { %v6911_v14 = vpop.f32.mrf.mxu2 }
 0x83d   : > { %v6815_v30 = vpop.f32.mrf.mxu0  ;;  %v9004_v14 = vld [vmem:[%s14161_s3 + $0xbe] sm:$0x3] }
 0x83f   : > { %v6927_v40 = vpop.f32.mrf.mxu3  ;;  %v6895_v13 = vpop.f32.mrf.mxu1 }
 0x840   : > { %v13612_v22 = vadd.f32 %v6927_v40, %v13425_v7  ;;  %v9022_v7 = vld [vmem:[%s14161_s3 + $0xc2] sm:$0x3] }
 0x841   : > { %9039 = vmatmul.msk.bf16.vlgmr.msra.gmra.mxu2 %vm1656_vm8, %v9023_v44 }
 0x842   : > { %7723 = vmatpush.bf16.msra.mxu2 %v13064_v33  ;;  %v9001_v33 = vld [vmem:[%s14161_s3 + $0xb8] sm:$0x3] }
 0x844   : > { %v7008_v34 = vpop.f32.mrf.mxu2 }
 0x845   : > { %v13619_v9 = vadd.f32 %v7008_v34, %v13490_v63  ;;  %v6877_v51 = vpop.f32.mrf.mxu0  ;;  %9038 = vmatmul.msk.bf16.vlgmr.msra.gmra.mxu1 %vm1656_vm8, %v9022_v7 }
 0x846   : > { %v13630_v16 = vadd.f32 %v6877_v51, %v13500_v43  ;;  %7707 = vmatpush.bf16.msra.mxu1 %v12908_v53  ;;  %v14333_v53 = vld [vmem:[#allocation20_spill] sm:$0xff]  ;;  %v14335_v51 = vld [vmem:[#allocation18_spill] sm:$0xff] }
 0x847   : > { %v6929_v41 = vpop.f32.mrf.mxu3  ;;  %9016 = vmatmul.msk.bf16.vlgmr.msra.gmra.mxu3 %vm1656_vm8, %v9000_v17  ;;  %v6992_v20 = vpop.f32.mrf.mxu1  ;;  %9017 = vmatmul.msk.bf16.vlgmr.msrb.gmra.mxu0 %vm1656_vm8, %v9001_v33  ;;  %v9031_v17 = vld [vmem:[%s14161_s3 + $0xd4] sm:$0x3] }
 0x848   : > { %7611 = vmatpush.bf16.msra.mxu3 %v12933_v5  ;;  %v13633_v52 = vadd.f32 %v6992_v20, %v13503_v42  ;;  %v9027_v5 = vld [vmem:[%s14161_s3 + $0xcc] sm:$0x3]  ;;  %7627 = vmatpush.bf16.msrb.mxu0 %v12915_v4 }
 0x849   : > { %v14334_v41 = vld [vmem:[#allocation14_spill] sm:$0xff] }
 0x84c   : > { %v7010_v63 = vpop.f32.mrf.mxu2 }
 0x84d   : > { %v6879_v42 = vpop.f32.mrf.mxu0  ;;  %v9024_v63 = vld [vmem:[%s14161_s3 + $0xc6] sm:$0x3] }
 0x84e   : > { %v14336_v42 = vld [vmem:[#allocation6_spill] sm:$0xff] }
 0x84f   : > { %v7024_v21 = vpop.f32.mrf.mxu3  ;;  %v6994_v47 = vpop.f32.mrf.mxu1 }
 0x850   : > { %v13644_v43 = vadd.f32 %v7024_v21, %v13459_v8  ;;  %v9026_v8 = vld [vmem:[%s14161_s3 + $0xca] sm:$0x3] }
 0x851   : > { %9043 = vmatmul.msk.bf16.vlgmr.msrb.gmra.mxu2 %vm1656_vm8, %v9027_v5 }
 0x852   : > { %7787 = vmatpush.bf16.msrb.mxu2 %v13328_v49  ;;  %v9021_v49 = vld [vmem:[%s14161_s3 + $0xc0] sm:$0x3] }
 0x854   : > { %v7072_v61 = vpop.f32.mrf.mxu2 }
 0x855   : > { %v13651_v44 = vadd.f32 %v7072_v61, %v13525_v35  ;;  %v6976_v40 = vpop.f32.mrf.mxu0  ;;  %9042 = vmatmul.msk.bf16.vlgmr.msrb.gmra.mxu1 %vm1656_vm8, %v9026_v8 }
 0x856   : > { %v13662_v30 = vadd.f32 %v6976_v40, %v13537_v62  ;;  %7771 = vmatpush.bf16.msrb.mxu1 %v14335_v51  ;;  %v14337_v40 = vld [vmem:[#allocation15_spill] sm:$0xff] }
 0x857   : > { %v7026_v4 = vpop.f32.mrf.mxu3  ;;  %9020 = vmatmul.msk.bf16.vlgmr.msrb.gmra.mxu3 %vm1656_vm8, %v9004_v14  ;;  %v7056_v13 = vpop.f32.mrf.mxu1  ;;  %9037 = vmatmul.msk.bf16.vlgmr.msra.gmra.mxu0 %vm1656_vm8, %v9021_v49  ;;  %v14338_v49 = vld [vmem:[#allocation21_spill] sm:$0xff] }
 0x858   : > { %7675 = vmatpush.bf16.msrb.mxu3 %v14333_v53  ;;  %v13665_v34 = vadd.f32 %v7056_v13, %v13540_v60  ;;  %7691 = vmatpush.bf16.msra.mxu0 %v14334_v41  ;;  %v9035_v53 = vld [vmem:[%s14161_s3 + $0xdc] sm:$0x3]  ;;  %v9028_v41 = vld [vmem:[%s14161_s3 + $0xce] sm:$0x3] }
 0x85c   : > { %v7074_v35 = vpop.f32.mrf.mxu2 }
 0x85d   : > { %v6978_v60 = vpop.f32.mrf.mxu0 }
 0x85e   : > { %v14340_v60 = vmov 0  }
 0x85f   : > { %v7088_v33 = vpop.f32.mrf.mxu3  ;;  %v7058_v7 = vpop.f32.mrf.mxu1 }
 0x860   : > { %v13676_v62 = vadd.f32 %v7088_v33, %v13487_v37  ;;  %v9030_v37 = vld [vmem:[%s14161_s3 + $0xd2] sm:$0x3] }
 0x861   : > { %9047 = vmatmul.msk.bf16.vlgmr.msra.gmra.mxu2 %vm1656_vm8, %v9031_v17 }
 0x862   : > { %7884 = vmatpush.bf16.msra.mxu2 %v12790_v1  ;;  %v9025_v1 = vld [vmem:[%s14161_s3 + $0xc8] sm:$0x3] }
 0x864   : > { %v7136_v20 = vpop.f32.mrf.mxu2 }
 0x865   : > { %v13683_v5 = vadd.f32 %v7136_v20, %v13555_v6  ;;  %v7040_v47 = vpop.f32.mrf.mxu0  ;;  %9046 = vmatmul.msk.bf16.vlgmr.msra.gmra.mxu1 %vm1656_vm8, %v9030_v37  ;;  %v9034_v20 = vld [vmem:[%s14161_s3 + $0xda] sm:$0x3]  ;;  %v14342_v37 = vld [vmem:[#allocation23_spill] sm:$0xff] }
 0x866   : > { %v13694_v61 = vadd.f32 %v7040_v47, %v13566_v18  ;;  %7868 = vmatpush.bf16.msra.mxu1 %v14338_v49  ;;  %v9055_v47 = vld [vmem:[%s14161_s3 + $0xe4] sm:$0x3]  ;;  %v9033_v49 = vld [vmem:[%s14161_s3 + $0xd8] sm:$0x3] }
 0x867   : > { %v7090_v21 = vpop.f32.mrf.mxu3  ;;  %9040 = vmatmul.msk.bf16.vlgmr.msra.gmra.mxu3 %vm1656_vm8, %v9024_v63  ;;  %v7120_v14 = vpop.f32.mrf.mxu1  ;;  %9041 = vmatmul.msk.bf16.vlgmr.msrb.gmra.mxu0 %vm1656_vm8, %v9025_v1  ;;  %v14341_v1 = vld [vmem:[#allocation16_spill] sm:$0xff] }
 0x868   : > { %7739 = vmatpush.bf16.msra.mxu3 %v14336_v42  ;;  %v13697_v4 = vadd.f32 %v7120_v14, %v13569_v23  ;;  %7755 = vmatpush.bf16.msrb.mxu0 %v14337_v40  ;;  %v14339_v23 = vld [vmem:[#allocation17_spill] sm:$0xff] }
 0x86c   : > { %v7138_v6 = vpop.f32.mrf.mxu2 }
 0x86d   : > { %v7042_v13 = vpop.f32.mrf.mxu0  ;;  %v9032_v6 = vld [vmem:[%s14161_s3 + $0xd6] sm:$0x3] }
 0x86f   : > { %v7152_v8 = vpop.f32.mrf.mxu3  ;;  %v7122_v35 = vpop.f32.mrf.mxu1 }
 0x870   : > { %v13708_v18 = vadd.f32 %v7152_v8, %v13518_v10  ;;  %v9029_v10 = vld [vmem:[%s14161_s3 + $0xd0] sm:$0x3] }
 0x871   : > { %9051 = vmatmul.msk.bf16.vlgmr.msrb.gmra.mxu2 %vm1656_vm8, %v9035_v53 }
 0x872   : > { %7948 = vmatpush.bf16.msrb.mxu2 %v14339_v23 }
 0x874   : > { %v7200_v17 = vpop.f32.mrf.mxu2 }
 0x875   : > { %v13715_v51 = vadd.f32 %v7200_v17, %v13584_v32  ;;  %v7104_v7 = vpop.f32.mrf.mxu0  ;;  %9050 = vmatmul.msk.bf16.vlgmr.msrb.gmra.mxu1 %vm1656_vm8, %v9034_v20  ;;  %v9036_v17 = vld [vmem:[%s14161_s3 + $0xde] sm:$0x3]  ;;  %v9063_v20 = vld [vmem:[%s14161_s3 + $0xf4] sm:$0x3] }
 0x876   : > { %v13726_v63 = vadd.f32 %v7104_v7, %v13598_v26  ;;  %7932 = vmatpush.bf16.msrb.mxu1 %v14342_v37 }
 0x877   : > { %9044 = vmatmul.msk.bf16.vlgmr.msrb.gmra.mxu3 %vm1656_vm8, %v9028_v41  ;;  %v7154_v33 = vpop.f32.mrf.mxu3  ;;  %v7184_v21 = vpop.f32.mrf.mxu1  ;;  %9045 = vmatmul.msk.bf16.vlgmr.msra.gmra.mxu0 %vm1656_vm8, %v9029_v10 }
 0x878   : > { %7803 = vmatpush.bf16.msrb.mxu3 %v14340_v60  ;;  %v13729_v42 = vadd.f32 %v7184_v21, %v13601_v19  ;;  %7852 = vmatpush.bf16.msra.mxu0 %v14341_v1  ;;  %v9058_v33 = vld [vmem:[%s14161_s3 + $0xea] sm:$0x3]  ;;  %v9062_v1 = vld [vmem:[%s14161_s3 + $0xf2] sm:$0x3] }
 0x87c   : > { %v7202_v32 = vpop.f32.mrf.mxu2 }
 0x87d   : > { %v7106_v26 = vpop.f32.mrf.mxu0  ;;  %v9056_v32 = vld [vmem:[%s14161_s3 + $0xe6] sm:$0x3] }
 0x87f   : > { %v7186_v14 = vpop.f32.mrf.mxu1 }
 0x881   : > { %9071 = vmatmul.msk.bf16.vlgmr.msra.gmra.mxu2 %vm1656_vm8, %v9055_v47 }
 0x882   : > { %8012 = vmatpush.bf16.msra.mxu2 %v12971_v59  ;;  %v9054_v59 = vld [vmem:[%s14161_s3 + $0xe2] sm:$0x3] }
 0x884   : > { %v7303_v19 = vpop.f32.mrf.mxu2 }
 0x885   : > { %v13744_v53 = vadd.f32 %v7303_v19, %v13619_v9  ;;  %v7168_v40 = vpop.f32.mrf.mxu0  ;;  %9070 = vmatmul.msk.bf16.vlgmr.msra.gmra.mxu1 %vm1656_vm8, %v9054_v59  ;;  %v9067_v19 = vld [vmem:[%s14161_s3 + $0xfc] sm:$0x3] }
 0x886   : > { %v13755_v8 = vadd.f32 %v7168_v40, %v13630_v16  ;;  %7996 = vmatpush.bf16.msra.mxu1 %v12842_v55  ;;  %v9060_v40 = vld [vmem:[%s14161_s3 + $0xee] sm:$0x3] }
 0x887   : > { %9048 = vmatmul.msk.bf16.vlgmr.msra.gmra.mxu3 %vm1656_vm8, %v9032_v6  ;;  %v7287_v23 = vpop.f32.mrf.mxu1  ;;  %9049 = vmatmul.msk.bf16.vlgmr.msrb.gmra.mxu0 %vm1656_vm8, %v9033_v49 }
 0x888   : > { %7900 = vmatpush.bf16.msra.mxu3 %v12764_v36  ;;  %v13758_v9 = vadd.f32 %v7287_v23, %v13633_v52  ;;  %v9059_v36 = vld [vmem:[%s14161_s3 + $0xec] sm:$0x3]  ;;  %7916 = vmatpush.bf16.msrb.mxu0 %v12745_v56  ;;  %v9066_v23 = vld [vmem:[%s14161_s3 + $0xfa] sm:$0x3] }
 0x88c   : > { %v7305_v13 = vpop.f32.mrf.mxu2 }
 0x88d   : > { %v7170_v16 = vpop.f32.mrf.mxu0 }
 0x88f   : > { %v7289_v35 = vpop.f32.mrf.mxu1 }
 0x891   : > { %9075 = vmatmul.msk.bf16.vlgmr.msrb.gmra.mxu2 %vm1656_vm8, %v9059_v36 }
 0x892   : > { %8076 = vmatpush.bf16.msrb.mxu2 %v13515_v28  ;;  %v9053_v28 = vld [vmem:[%s14161_s3 + $0xe0] sm:$0x3] }
 0x894   : > { %v7367_v52 = vpop.f32.mrf.mxu2 }
 0x895   : > { %v13773_v41 = vadd.f32 %v7367_v52, %v13651_v44  ;;  %v7271_v55 = vpop.f32.mrf.mxu0  ;;  %9074 = vmatmul.msk.bf16.vlgmr.msrb.gmra.mxu1 %vm1656_vm8, %v9058_v33  ;;  %v9087_v52 = vld [vmem:[%s14161_s3 + $0x104] sm:$0x3] }
 0x896   : > { %v13787_v44 = vadd.f32 %v7271_v55, %v13662_v30  ;;  %8060 = vmatpush.bf16.msrb.mxu1 %v12862_v0 }
 0x897   : > { %9052 = vmatmul.msk.bf16.vlgmr.msrb.gmra.mxu3 %vm1656_vm8, %v9036_v17  ;;  %v7351_v7 = vpop.f32.mrf.mxu1  ;;  %9069 = vmatmul.msk.bf16.vlgmr.msra.gmra.mxu0 %vm1656_vm8, %v9053_v28  ;;  %v9086_v28 = vld [vmem:[%s14161_s3 + $0x102] sm:$0x3] }
 0x898   : > { %7964 = vmatpush.bf16.msrb.mxu3 %v12878_v25  ;;  %v13790_v25 = vadd.f32 %v7351_v7, %v13665_v34  ;;  %7980 = vmatpush.bf16.msra.mxu0 %v12820_v3 }
 0x89a   : > { %v7222_v56 = vpop.f32.mrf.mxu3 }
 0x89b   : > { %v13784_v60 = vadd.f32 %v7222_v56, %v13612_v22  ;;  %v9064_v56 = vld [vmem:[%s14161_s3 + $0xf6] sm:$0x3] }
 0x89c   : > { %v7369_v10 = vpop.f32.mrf.mxu2 }
 0x89d   : > { %v7273_v30 = vpop.f32.mrf.mxu0 }
 0x89e   : > { %v9068_v30 = vld [vmem:[%s14161_s3 + $0xfe] sm:$0x3] }
 0x89f   : > { %v7353_v34 = vpop.f32.mrf.mxu1 }
 0x8a1   : > { %9079 = vmatmul.msk.bf16.vlgmr.msra.gmra.mxu2 %vm1656_vm8, %v9063_v20  ;;  %v9091_v20 = vld [vmem:[%s14161_s3 + $0x10c] sm:$0x3] }
 0x8a2   : > { %8173 = vmatpush.bf16.msra.mxu2 %v14326_v15  ;;  %v7224_v22 = vpop.f32.mrf.mxu3  ;;  %v9057_v15 = vld [vmem:[%s14161_s3 + $0xe8] sm:$0x3] }
 0x8a4   : > { %v7431_v21 = vpop.f32.mrf.mxu2 }
 0x8a5   : > { %v13805_v47 = vadd.f32 %v7431_v21, %v13683_v5  ;;  %v7335_v0 = vpop.f32.mrf.mxu0  ;;  %9078 = vmatmul.msk.bf16.vlgmr.msra.gmra.mxu1 %vm1656_vm8, %v9062_v1  ;;  %v9090_v21 = vld [vmem:[%s14161_s3 + $0x10a] sm:$0x3] }
 0x8a6   : > { %v13819_v5 = vadd.f32 %v7335_v0, %v13694_v61  ;;  %8157 = vmatpush.bf16.msra.mxu1 %v12991_v31 }
 0x8a7   : > { %9072 = vmatmul.msk.bf16.vlgmr.msra.gmra.mxu3 %vm1656_vm8, %v9056_v32  ;;  %v7415_v26 = vpop.f32.mrf.mxu1  ;;  %9073 = vmatmul.msk.bf16.vlgmr.msrb.gmra.mxu0 %vm1656_vm8, %v9057_v15  ;;  %v9095_v15 = vld [vmem:[%s14161_s3 + $0x114] sm:$0x3] }
 0x8a8   : > { %8028 = vmatpush.bf16.msra.mxu3 %v12919_v50  ;;  %v13822_v50 = vadd.f32 %v7415_v26, %v13697_v4  ;;  %8044 = vmatpush.bf16.msrb.mxu0 %v12895_v58  ;;  %v14343_v58 = vld [vmem:[#allocation7_spill] sm:$0xff] }
 0x8aa   : > { %v7319_v3 = vpop.f32.mrf.mxu3 }
 0x8ab   : > { %v13816_v37 = vadd.f32 %v7319_v3, %v13644_v43 }
 0x8ac   : > { %v7433_v14 = vpop.f32.mrf.mxu2 }
 0x8ad   : > { %v7337_v61 = vpop.f32.mrf.mxu0 }
 0x8af   : > { %v7417_v4 = vpop.f32.mrf.mxu1 }
 0x8b1   : > { %9083 = vmatmul.msk.bf16.vlgmr.msrb.gmra.mxu2 %vm1656_vm8, %v9067_v19 }
 0x8b2   : > { %8237 = vmatpush.bf16.msrb.mxu2 %v14327_v45  ;;  %v7321_v43 = vpop.f32.mrf.mxu3  ;;  %v9061_v45 = vld [vmem:[%s14161_s3 + $0xf0] sm:$0x3] }
 0x8b3   : > { %v9094_v43 = vld [vmem:[%s14161_s3 + $0x112] sm:$0x3] }
 0x8b4   : > { %v7495_v6 = vpop.f32.mrf.mxu2 }
 0x8b5   : > { %v13837_v49 = vadd.f32 %v7495_v6, %v13715_v51  ;;  %v7399_v59 = vpop.f32.mrf.mxu0  ;;  %9082 = vmatmul.msk.bf16.vlgmr.msrb.gmra.mxu1 %vm1656_vm8, %v9066_v23 }
 0x8b6   : > { %v13851_v51 = vadd.f32 %v7399_v59, %v13726_v63  ;;  %8221 = vmatpush.bf16.msrb.mxu1 %v13033_v46 }
 0x8b7   : > { %9076 = vmatmul.msk.bf16.vlgmr.msrb.gmra.mxu3 %vm1656_vm8, %v9060_v40  ;;  %v7479_v36 = vpop.f32.mrf.mxu1  ;;  %9077 = vmatmul.msk.bf16.vlgmr.msra.gmra.mxu0 %vm1656_vm8, %v9061_v45  ;;  %v9099_v40 = vld [vmem:[%s14161_s3 + $0x11c] sm:$0x3]  ;;  %v14344_v45 = vld [vmem:[#allocation22_spill] sm:$0xff] }
 0x8b8   : > { %8092 = vmatpush.bf16.msrb.mxu3 %v14343_v58  ;;  %v13854_v35 = vadd.f32 %v7479_v36, %v13729_v42  ;;  %8141 = vmatpush.bf16.msra.mxu0 %v13030_v24 }
 0x8ba   : > { %v7383_v31 = vpop.f32.mrf.mxu3 }
 0x8bb   : > { %v13848_v13 = vadd.f32 %v7383_v31, %v13676_v62 }
 0x8bc   : > { %v7497_v16 = vpop.f32.mrf.mxu2 }
 0x8bd   : > { %v7401_v63 = vpop.f32.mrf.mxu0  ;;  %v9098_v16 = vld [vmem:[%s14161_s3 + $0x11a] sm:$0x3] }
 0x8bf   : > { %v7481_v42 = vpop.f32.mrf.mxu1 }
 0x8c1   : > { %9103 = vmatmul.msk.bf16.vlgmr.msra.gmra.mxu2 %vm1656_vm8, %v9087_v52 }
 0x8c2   : > { %8301 = vmatpush.bf16.msra.mxu2 %v13217_v38  ;;  %v7385_v62 = vpop.f32.mrf.mxu3  ;;  %v9065_v38 = vld [vmem:[%s14161_s3 + $0xf8] sm:$0x3] }
 0x8c4   : > { %v7597_v17 = vpop.f32.mrf.mxu2 }
 0x8c5   : > { %v13869_v55 = vadd.f32 %v7597_v17, %v13744_v53  ;;  %v7463_v46 = vpop.f32.mrf.mxu0  ;;  %9102 = vmatmul.msk.bf16.vlgmr.msra.gmra.mxu1 %vm1656_vm8, %v9086_v28 }
 0x8c6   : > { %v13883_v53 = vadd.f32 %v7463_v46, %v13755_v8  ;;  %8285 = vmatpush.bf16.msra.mxu1 %v13075_v12 }
 0x8c7   : > { %9080 = vmatmul.msk.bf16.vlgmr.msra.gmra.mxu3 %vm1656_vm8, %v9064_v56  ;;  %v7581_v7 = vpop.f32.mrf.mxu1  ;;  %9081 = vmatmul.msk.bf16.vlgmr.msrb.gmra.mxu0 %vm1656_vm8, %v9065_v38 }
 0x8c8   : > { %8189 = vmatpush.bf16.msra.mxu3 %v13103_v29  ;;  %v13886_v29 = vadd.f32 %v7581_v7, %v13758_v9  ;;  %8205 = vmatpush.bf16.msrb.mxu0 %v13072_v57 }
 0x8ca   : > { %v7447_v24 = vpop.f32.mrf.mxu3 }
 0x8cb   : > { %v13880_v33 = vadd.f32 %v7447_v24, %v13708_v18 }
 0x8cc   : > { %v7599_v10 = vpop.f32.mrf.mxu2 }
 0x8cd   : > { %v7465_v8 = vpop.f32.mrf.mxu0 }
 0x8cf   : > { %v7583_v9 = vpop.f32.mrf.mxu1 }
 0x8d1   : > { %9107 = vmatmul.msk.bf16.vlgmr.msrb.gmra.mxu2 %vm1656_vm8, %v9091_v20 }
 0x8d2   : > { %8365 = vmatpush.bf16.msrb.mxu2 %v13587_v11  ;;  %v7449_v18 = vpop.f32.mrf.mxu3  ;;  %v9085_v11 = vld [vmem:[%s14161_s3 + $0x100] sm:$0x3] }
 0x8d4   : > { %v7661_v22 = vpop.f32.mrf.mxu2 }
 0x8d5   : > { %v13901_v34 = vadd.f32 %v7661_v22, %v13773_v41  ;;  %v7565_v12 = vpop.f32.mrf.mxu0  ;;  %9106 = vmatmul.msk.bf16.vlgmr.msrb.gmra.mxu1 %vm1656_vm8, %v9090_v21 }
 0x8d6   : > { %v13915_v41 = vadd.f32 %v7565_v12, %v13787_v44  ;;  %8349 = vmatpush.bf16.msrb.mxu1 %v13115_v48  ;;  %v9089_v48 = vld [vmem:[%s14161_s3 + $0x108] sm:$0x3] }
 0x8d7   : > { %9084 = vmatmul.msk.bf16.vlgmr.msrb.gmra.mxu3 %vm1656_vm8, %v9068_v30  ;;  %v7645_v3 = vpop.f32.mrf.mxu1  ;;  %9101 = vmatmul.msk.bf16.vlgmr.msra.gmra.mxu0 %vm1656_vm8, %v9085_v11  ;;  %v9100_v30 = vld [vmem:[%s14161_s3 + $0x11e] sm:$0x3] }
 0x8d8   : > { %8253 = vmatpush.bf16.msrb.mxu3 %v14328_v2  ;;  %v13918_v2 = vadd.f32 %v7645_v3, %v13790_v25  ;;  %8269 = vmatpush.bf16.msra.mxu0 %v13112_v54  ;;  %v9088_v25 = vld [vmem:[%s14161_s3 + $0x106] sm:$0x3] }
 0x8da   : > { %v7516_v57 = vpop.f32.mrf.mxu3 }
 0x8db   : > { %v13912_v32 = vadd.f32 %v7516_v57, %v13784_v60 }
 0x8dc   : > { %v7663_v0 = vpop.f32.mrf.mxu2 }
 0x8dd   : > { %v7567_v44 = vpop.f32.mrf.mxu0 }
 0x8df   : > { %v7647_v1 = vpop.f32.mrf.mxu1 }
 0x8e1   : > { %9111 = vmatmul.msk.bf16.vlgmr.msra.gmra.mxu2 %vm1656_vm8, %v9095_v15 }
 0x8e2   : > { %v7518_v60 = vpop.f32.mrf.mxu3 }
 0x8e4   : > { %v7725_v26 = vpop.f32.mrf.mxu2 }
 0x8e5   : > { %v13932_v14 = vadd.f32 %v7725_v26, %v13805_v47  ;;  %v7629_v19 = vpop.f32.mrf.mxu0  ;;  %9110 = vmatmul.msk.bf16.vlgmr.msra.gmra.mxu1 %vm1656_vm8, %v9094_v43 }
 0x8e6   : > { %v13946_v47 = vadd.f32 %v7629_v19, %v13819_v5 }
 0x8e7   : > { %9104 = vmatmul.msk.bf16.vlgmr.msra.gmra.mxu3 %vm1656_vm8, %v9088_v25  ;;  %v7709_v4 = vpop.f32.mrf.mxu1  ;;  %9105 = vmatmul.msk.bf16.vlgmr.msrb.gmra.mxu0 %vm1656_vm8, %v9089_v48 }
 0x8e8   : > { %8317 = vmatpush.bf16.msra.mxu3 %v14331_v39  ;;  %v13949_v39 = vadd.f32 %v7709_v4, %v13822_v50  ;;  %8333 = vmatpush.bf16.msrb.mxu0 %v14329_v27  ;;  %v9092_v50 = vld [vmem:[%s14161_s3 + $0x10e] sm:$0x3]  ;;  %v9093_v27 = vld [vmem:[%s14161_s3 + $0x110] sm:$0x3] }
 0x8ea   : > { %v7613_v54 = vpop.f32.mrf.mxu3 }
 0x8eb   : > { %v13943_v61 = vadd.f32 %v7613_v54, %v13816_v37 }
 0x8ec   : > { %v7727_v6 = vpop.f32.mrf.mxu2 }
 0x8ed   : > { %v7631_v5 = vpop.f32.mrf.mxu0 }
 0x8ef   : > { %v7711_v58 = vpop.f32.mrf.mxu1 }
 0x8f1   : > { %9115 = vmatmul.msk.bf16.vlgmr.msrb.gmra.mxu2 %vm1656_vm8, %v9099_v40 }
 0x8f2   : > { %v7615_v37 = vpop.f32.mrf.mxu3 }
 0x8f4   : > { %v7789_v31 = vpop.f32.mrf.mxu2 }
 0x8f5   : > { %v13962_v59 = vadd.f32 %v7789_v31, %v13837_v49  ;;  %v7693_v36 = vpop.f32.mrf.mxu0  ;;  %9114 = vmatmul.msk.bf16.vlgmr.msrb.gmra.mxu1 %vm1656_vm8, %v9098_v16 }
 0x8f6   : > { %v13976_v49 = vadd.f32 %v7693_v36, %v13851_v51  ;;  %v9307_v36 = vld [vmem:[%s9527_s16 + $0x8] sm:$0xf] }
 0x8f7   : > { %9108 = vmatmul.msk.bf16.vlgmr.msrb.gmra.mxu3 %vm1656_vm8, %v9092_v50  ;;  %v7773_v62 = vpop.f32.mrf.mxu1  ;;  %9109 = vmatmul.msk.bf16.vlgmr.msra.gmra.mxu0 %vm1656_vm8, %v9093_v27 }
 0x8f8   : > { %8381 = vmatpush.bf16.msrb.mxu3 %v14344_v45  ;;  %v13979_v42 = vadd.f32 %v7773_v62, %v13854_v35  ;;  %v9097_v35 = vld [vmem:[%s14161_s3 + $0x118] sm:$0x3]  ;;  %v14024_v45 = vpop.permute.xlu1 %8405 }
 0x8fa   : > { %v7677_v23 = vpop.f32.mrf.mxu3 }
 0x8fb   : > { %v13973_v52 = vadd.f32 %v7677_v23, %v13848_v13  ;;  %v9096_v13 = vld [vmem:[%s14161_s3 + $0x116] sm:$0x3] }
 0x8fc   : > { %v7791_v63 = vpop.f32.mrf.mxu2 }
 0x8fd   : > { %v7695_v56 = vpop.f32.mrf.mxu0 }
 0x8ff   : > { %v7775_v24 = vpop.f32.mrf.mxu1 }
 0x902   : > { %v7679_v17 = vpop.f32.mrf.mxu3 }
 0x904   : > { %v7886_v46 = vpop.f32.mrf.mxu2 }
 0x905   : > { %v7757_v38 = vpop.f32.mrf.mxu0  ;;  %v8100_v37 = vadd.f32 %v7886_v46, %v13869_v55  ;;  %v9308_v46 = vld [vmem:[%s9527_s16 + $0x4] sm:$0xf] }
 0x906   : > { %v13994_v7 = vadd.f32 %v7757_v38, %v13883_v53 }
 0x907   : > { %9112 = vmatmul.msk.bf16.vlgmr.msra.gmra.mxu3 %vm1656_vm8, %v9096_v13  ;;  %v7870_v10 = vpop.f32.mrf.mxu1  ;;  %9113 = vmatmul.msk.bf16.vlgmr.msrb.gmra.mxu0 %vm1656_vm8, %v9097_v35 }
 0x908   : > { %v8099_v62 = vadd.f32 %v7870_v10, %v13886_v29 }
 0x90a   : > { %v7741_v51 = vpop.f32.mrf.mxu3 }
 0x90b   : > { %v13991_v28 = vadd.f32 %v7741_v51, %v13880_v33 }
 0x90c   : > { %v7888_v20 = vpop.f32.mrf.mxu2 }
 0x90d   : > { %v7759_v8 = vpop.f32.mrf.mxu0 }
 0x90e   : > { %v9309_v8 = vld [vmem:[%s9527_s16 + $0x18] sm:$0xf] }
 0x90f   : > { %v7872_v9 = vpop.f32.mrf.mxu1 }
 0x912   : > { %v7743_v18 = vpop.f32.mrf.mxu3 }
 0x914   : > { %v7950_v22 = vpop.f32.mrf.mxu2 }
 0x915   : > { %v7854_v33 = vpop.f32.mrf.mxu0  ;;  %v8104_v29 = vadd.f32 %v7950_v22, %v13901_v34 }
 0x917   : > { %9116 = vmatmul.msk.bf16.vlgmr.msrb.gmra.mxu3 %vm1656_vm8, %v9100_v30  ;;  %v7934_v53 = vpop.f32.mrf.mxu1  ;;  %v8098_v30 = vadd.f32 %v7854_v33, %v13915_v41  ;;  %v9311_v41 = vld [vmem:[%s9527_s16 + $0x14] sm:$0xf] }
 0x91a   : > { %v7805_v57 = vpop.f32.mrf.mxu3 }
 0x91b   : > { %v14002_v12 = vadd.f32 %v7805_v57, %v13912_v32 }
 0x91c   : > { %v7952_v11 = vpop.f32.mrf.mxu2 }
 0x91d   : > { %v7856_v3 = vpop.f32.mrf.mxu0  ;;  %v8103_v11 = vadd.f32 %v7934_v53, %v13918_v2 }
 0x91f   : > { %v7936_v0 = vpop.f32.mrf.mxu1 }
 0x922   : > { %v7807_v21 = vpop.f32.mrf.mxu3 }
 0x924   : > { %v14004_v15 = vpop.f32.mrf.mxu2 }
 0x925   : > { %v14008_v44 = vpop.f32.mrf.mxu0  ;;  %v8108_v53 = vadd.f32 %v14004_v15, %v13932_v14 }
 0x927   : > { %v14010_v1 = vpop.f32.mrf.mxu1 }
 0x928   : > { %v8107_v14 = vadd.f32 %v14010_v1, %v13949_v39  ;;  %v9314_v39 = vld [vmem:[%s9527_s16 + $0x10] sm:$0xf] }
 0x92a   : > { %v14006_v60 = vpop.f32.mrf.mxu3 }
 0x92c   : > { %v8016_v26 = vpop.f32.mrf.mxu2 }
 0x92d   : > { %v7920_v54 = vpop.f32.mrf.mxu0 }
 0x92e   : > { %v9310_v54 = vld [vmem:[%s9527_s16] sm:$0xf] }
 0x92f   : > { %v8000_v32 = vpop.f32.mrf.mxu1 }
 0x932   : > { %v7904_v25 = vpop.f32.mrf.mxu3 }
 0x934   : > { %v14012_v19 = vpop.f32.mrf.mxu2 }
 0x935   : > { %v14016_v43 = vpop.f32.mrf.mxu0 }
 0x937   : > { %v14018_v4 = vpop.f32.mrf.mxu1 }
 0x93a   : > { %v14014_v48 = vpop.f32.mrf.mxu3 }
 0x93c   : > { %v8080_v6 = vpop.f32.mrf.mxu2 }
 0x93d   : > { %v7984_v5 = vpop.f32.mrf.mxu0 }
 0x93f   : > { %v8064_v58 = vpop.f32.mrf.mxu1 }
 0x942   : > { %v7968_v40 = vpop.f32.mrf.mxu3 }
 0x944   : > { %v8175_v31 = vpop.f32.mrf.mxu2 }
 0x945   : > { %v8389_v50 = vadd.f32 %v8175_v31, %v8100_v37  ;;  %v14035_v55 = vpop.f32.mrf.mxu0  ;;  %v8101_v31 = vadd.f32 %v14006_v60, %v13943_v61 }
 0x947   : > { %v8410_v23 = vadd.f32 %v14024_v45, %v8389_v50  ;;  %v8159_v63 = vpop.f32.mrf.mxu1  ;;  %v9312_v50 = vld [vmem:[%s9527_s16 + $0x28] sm:$0xf] }
 0x948   : > { %v8388_v56 = vadd.f32 %v8159_v63, %v8099_v62 }
 0x949   : > { %v8426_v27 = vadd.f32 %v9307_v36, %v8410_v23  ;;  %v8102_v36 = vadd.f32 %v14008_v44, %v13946_v47 }
 0x94a   : > { %v14028_v16 = vpop.f32.mrf.mxu3  ;;  %v8409_v24 = vadd.f32 %v14024_v45, %v8388_v56 }
 0x94b   : > { %8442 = vst.msk [vmem:[%s14031_s14 + $0x8] sm:$0xf] %vm414_vm0, %v8426_v27 }
 0x94c   : > { %v8177_v17 = vpop.f32.mrf.mxu2  ;;  %v8425_v13 = vadd.f32 %v9308_v46, %v8409_v24  ;;  %v9313_v24 = vld [vmem:[%s9527_s16 + $0xc] sm:$0xf] }
 0x94d   : > { %v8048_v38 = vpop.f32.mrf.mxu0 }
 0x94e   : > { %8441 = vst.msk [vmem:[%s14031_s14 + $0x4] sm:$0xf] %vm414_vm0, %v8425_v13  ;;  %v9315_v13 = vld [vmem:[%s9527_s16 + $0x24] sm:$0xf]  ;;  %v8112_v38 = vadd.f32 %v14012_v19, %v13962_v59  ;;  %v8111_v59 = vadd.f32 %v14018_v4, %v13979_v42  ;;  %v9318_v42 = vld [vmem:[%s9527_s16 + $0x20] sm:$0xf] }
 0x94f   : > { %v8161_v35 = vpop.f32.mrf.mxu1 }
 0x952   : > { %v8032_v51 = vpop.f32.mrf.mxu3 }
 0x954   : > { %v8239_v10 = vpop.f32.mrf.mxu2 }
 0x955   : > { %v8393_v20 = vadd.f32 %v8239_v10, %v8104_v29  ;;  %v8143_v34 = vpop.f32.mrf.mxu0 }
 0x956   : > { %v8387_v22 = vadd.f32 %v8143_v34, %v8098_v30  ;;  %v9316_v30 = vld [vmem:[%s9527_s16 + $0x38] sm:$0xf]  ;;  %v8106_v34 = vadd.f32 %v14016_v43, %v13976_v49 }
 0x957   : > { %v8414_v18 = vadd.f32 %v14024_v45, %v8393_v20  ;;  %v8223_v21 = vpop.f32.mrf.mxu1 }
 0x958   : > { %v8392_v0 = vadd.f32 %v8223_v21, %v8103_v11  ;;  %v8408_v26 = vadd.f32 %v14024_v45, %v8387_v22 }
 0x959   : > { %v8430_v9 = vadd.f32 %v9309_v8, %v8414_v18 }
 0x95a   : > { %v14045_v57 = vpop.f32.mrf.mxu3  ;;  %v8413_v25 = vadd.f32 %v14024_v45, %v8392_v0  ;;  %v8424_v32 = vadd.f32 %v9310_v54, %v8408_v26 }
 0x95b   : > { %8446 = vst.msk [vmem:[%s14031_s14 + $0x18] sm:$0xf] %vm414_vm0, %v8430_v9  ;;  %v8105_v9 = vadd.f32 %v14014_v48, %v13973_v52 }
 0x95c   : > { %v8241_v3 = vpop.f32.mrf.mxu2  ;;  %v8429_v33 = vadd.f32 %v9311_v41, %v8413_v25  ;;  %8440 = vst.msk [vmem:[%s14031_s14] sm:$0xf] %vm414_vm0, %v8424_v32  ;;  %v9317_v25 = vld [vmem:[%s9527_s16 + $0x1c] sm:$0xf]  ;;  %v9319_v32 = vld [vmem:[%s9527_s16 + $0x34] sm:$0xf] }
 0x95d   : > { %v8145_v6 = vpop.f32.mrf.mxu0 }
 0x95e   : > { %8445 = vst.msk [vmem:[%s14031_s14 + $0x14] sm:$0xf] %vm414_vm0, %v8429_v33  ;;  %v8109_v6 = vadd.f32 %v14028_v16, %v13991_v28  ;;  %v8113_v16 = vadd.f32 %v14045_v57, %v14002_v12 }
 0x95f   : > { %v8225_v40 = vpop.f32.mrf.mxu1 }
 0x960   : > { %v8110_v40 = vadd.f32 %v14035_v55, %v13994_v7 }
 0x962   : > { %v8096_v2 = vpop.f32.mrf.mxu3 }
 0x964   : > { %v8303_v37 = vpop.f32.mrf.mxu2 }
 0x965   : > { %v8397_v5 = vadd.f32 %v8303_v37, %v8108_v53  ;;  %v8207_v15 = vpop.f32.mrf.mxu0 }
 0x966   : > { %v8391_v63 = vadd.f32 %v8207_v15, %v8102_v36  ;;  %v9320_v36 = vld [vmem:[%s9527_s16 + $0x2c] sm:$0xf] }
 0x967   : > { %v8418_v58 = vadd.f32 %v14024_v45, %v8397_v5  ;;  %v8287_v61 = vpop.f32.mrf.mxu1 }
 0x968   : > { %v8396_v17 = vadd.f32 %v8287_v61, %v8107_v14  ;;  %v8412_v47 = vadd.f32 %v14024_v45, %v8391_v63  ;;  %v9321_v14 = vld [vmem:[%s9527_s16 + $0x30] sm:$0xf]  ;;  %v9322_v61 = vld [vmem:[%s9527_s16 + $0x3c] sm:$0xf] }
 0x969   : > { %v8434_v23 = vadd.f32 %v9312_v50, %v8418_v58 }
 0x96a   : > { %v8191_v27 = vpop.f32.mrf.mxu3  ;;  %v8417_v44 = vadd.f32 %v14024_v45, %v8396_v17  ;;  %v8428_v1 = vadd.f32 %v9314_v39, %v8412_v47 }
 0x96b   : > { %8450 = vst.msk [vmem:[%s14031_s14 + $0x28] sm:$0xf] %vm414_vm0, %v8434_v23  ;;  %v8390_v62 = vadd.f32 %v8191_v27, %v8101_v31 }
 0x96c   : > { %v8305_v60 = vpop.f32.mrf.mxu2  ;;  %v8433_v51 = vadd.f32 %v9315_v13, %v8417_v44  ;;  %8444 = vst.msk [vmem:[%s14031_s14 + $0x10] sm:$0xf] %vm414_vm0, %v8428_v1 }
 0x96d   : > { %v8411_v56 = vadd.f32 %v14024_v45, %v8390_v62  ;;  %v8209_v35 = vpop.f32.mrf.mxu0 }
 0x96e   : > { %8449 = vst.msk [vmem:[%s14031_s14 + $0x24] sm:$0xf] %vm414_vm0, %v8433_v51 }
 0x96f   : > { %v8427_v46 = vadd.f32 %v9313_v24, %v8411_v56  ;;  %v8289_v10 = vpop.f32.mrf.mxu1 }
 0x971   : > { %8443 = vst.msk [vmem:[%s14031_s14 + $0xc] sm:$0xf] %vm414_vm0, %v8427_v46 }
 0x972   : > { %v8193_v29 = vpop.f32.mrf.mxu3 }
 0x974   : > { %v8367_v20 = vpop.f32.mrf.mxu2 }
 0x975   : > { %v8401_v18 = vadd.f32 %v8367_v20, %v8112_v38  ;;  %v8271_v19 = vpop.f32.mrf.mxu0 }
 0x976   : > { %v8395_v3 = vadd.f32 %v8271_v19, %v8106_v34 }
 0x977   : > { %v8422_v8 = vadd.f32 %v14024_v45, %v8401_v18  ;;  %v8351_v52 = vpop.f32.mrf.mxu1 }
 0x978   : > { %v8400_v0 = vadd.f32 %v8351_v52, %v8111_v59  ;;  %v8416_v49 = vadd.f32 %v14024_v45, %v8395_v3 }
 0x979   : > { %v8438_v11 = vadd.f32 %v9316_v30, %v8422_v8 }
 0x97a   : > { %v8255_v22 = vpop.f32.mrf.mxu3  ;;  %v8421_v43 = vadd.f32 %v14024_v45, %v8400_v0  ;;  %v8432_v4 = vadd.f32 %v9318_v42, %v8416_v49 }
 0x97b   : > { %8454 = vst.msk [vmem:[%s14031_s14 + $0x38] sm:$0xf] %vm414_vm0, %v8438_v11  ;;  %v8394_v21 = vadd.f32 %v8255_v22, %v8105_v9 }
 0x97c   : > { %v8369_v48 = vpop.f32.mrf.mxu2  ;;  %v8437_v41 = vadd.f32 %v9319_v32, %v8421_v43  ;;  %8448 = vst.msk [vmem:[%s14031_s14 + $0x20] sm:$0xf] %vm414_vm0, %v8432_v4 }
 0x97d   : > { %v8415_v26 = vadd.f32 %v14024_v45, %v8394_v21  ;;  %v8273_v2 = vpop.f32.mrf.mxu0 }
 0x97e   : > { %8453 = vst.msk [vmem:[%s14031_s14 + $0x34] sm:$0xf] %vm414_vm0, %v8437_v41 }
 0x97f   : > { %v8431_v54 = vadd.f32 %v9317_v25, %v8415_v26  ;;  %v8353_v53 = vpop.f32.mrf.mxu1 }
 0x981   : > { %8447 = vst.msk [vmem:[%s14031_s14 + $0x1c] sm:$0xf] %vm414_vm0, %v8431_v54 }
 0x982   : > { %v8257_v33 = vpop.f32.mrf.mxu3 }
 0x985   : > { %v8335_v5 = vpop.f32.mrf.mxu0 }
 0x986   : > { %v8399_v31 = vadd.f32 %v8335_v5, %v8110_v40 }
 0x988   : > { %v8420_v23 = vadd.f32 %v14024_v45, %v8399_v31 }
 0x98a   : > { %v8319_v37 = vpop.f32.mrf.mxu3  ;;  %v8436_v15 = vadd.f32 %v9321_v14, %v8420_v23 }
 0x98b   : > { %v8398_v58 = vadd.f32 %v8319_v37, %v8109_v6 }
 0x98c   : > { %8452 = vst.msk [vmem:[%s14031_s14 + $0x30] sm:$0xf] %vm414_vm0, %v8436_v15 }
 0x98d   : > { %v8419_v50 = vadd.f32 %v14024_v45, %v8398_v58  ;;  %v8337_v7 = vpop.f32.mrf.mxu0 }
 0x98f   : > { %v8435_v27 = vadd.f32 %v9320_v36, %v8419_v50 }
 0x991   : > { %8451 = vst.msk [vmem:[%s14031_s14 + $0x2c] sm:$0xf] %vm414_vm0, %v8435_v27 }
 0x992   : > { %v8321_v28 = vpop.f32.mrf.mxu3 }
 0x99a   : > { %v8383_v55 = vpop.f32.mrf.mxu3 }
 0x99b   : > { %v8402_v62 = vadd.f32 %v8383_v55, %v8113_v16 }
 0x99d   : > { %v8423_v63 = vadd.f32 %v14024_v45, %v8402_v62 }
 0x99f   : > { %v8439_v60 = vadd.f32 %v9322_v61, %v8423_v63 }
 0x9a1   : > { %8455 = vst.msk [vmem:[%s14031_s14 + $0x3c] sm:$0xf] %vm414_vm0, %v8439_v60 }
 0x9a2   : > { %v8385_v17 = vpop.f32.mrf.mxu3 }
 0x9a3   : > { %9350 = shalt.err (!%p9347_p3)
}
 0x9a4   : > { %s9392_s26 = smov 64   ;;  %s9393_s14 = smov 4  }
 0x9a5   : > { %9124 = dma.vmem_to_hbm [thread:$0]  (%p9482_p5), %s8470_s22, 1024, %s8472_s23, %s8457_s13, %s9392_s26, %s9392_s26, %s9393_s14  }
 0x9a6 PF: > { %p9130_p4 = scmp.ge.s32.totalorder %s9385_s12, 2  ;;  %s8486_s21 = sand.u32 1, %s9373_s30  }
 0x9a7   : > { %s8487_s17 = scalar_lea.sflag [#allocation3], %s8486_s21 }
 0x9a8   : > { %p9127_p7 = pnand %p9130_p4, %p9486_p6 }
 0x9aa   : > { %p9128_p8 = pneg %p9127_p7 }
 0x9ac   : > { %9368 = dma.done.wait (%p9128_p8), %s8487_s17, 1024  }
 0x9ad   : > { %9370 = vsyncadd (%p9128_p8), %s8487_s17, 4294966272  ;;  %p19_p9 = scmp.ge.s32.totalorder %s9469_s15, 4   ;;  %s14345_s30 = smov %s9377_s10 }
 0x9ae   : > { %s14346_s10 = smov %s9381_s11  ;;  %s14347_s11 = smov %s9480_s18 }
 0x9af   : > { %s14348_s12 = smov %s9469_s15  ;;  %21 = sbr.rel (!%p19_p9) target bundleno = 3 (0x3), region = 107 }
 0x9b4   :  { %8493 = vsyncpa [#allocation3], 1 }
 0x9b5   :  { %8495 = vsyncpa [#allocation3 + $0x1], 1 }

</bundles_post_ra>
